<compile_context>
chip_gen: v6e
topology: v6e:2x2x1
jax: 0.10.0
libtpu: 0.0.40
codegen_flags: <defaults>
</compile_context>

<pallas_src>
import functools
from typing import NamedTuple

import jax
import jax.numpy as jnp
from jax.experimental import pallas as pl
from jax.experimental.pallas import tpu as pltpu

LANE = 128


def _vmem_limit_bytes():
    # ~3/4 of physical VMEM: ~48 MiB on v7x (64 MiB), ~96 MiB on v5e/v6e (128 MiB).
    try:
        cap = int(pltpu.get_tpu_info().vmem_capacity_bytes)
    except Exception:
        cap = 64 * 1024 * 1024
    return max(32 * 1024 * 1024, min((cap * 3) // 4, 96 * 1024 * 1024))


_VMEM_LIMIT = _vmem_limit_bytes()

_CP_2D = pltpu.CompilerParams(
    dimension_semantics=("parallel", "parallel"), vmem_limit_bytes=_VMEM_LIMIT)
_CP_1D = pltpu.CompilerParams(
    dimension_semantics=("parallel",), vmem_limit_bytes=_VMEM_LIMIT)


class Dims(NamedTuple):
    gw: int
    inter: int
    outc: int
    cinp: int
    gwp: int
    interp: int
    outcp: int


# ----------------------------------------------------------------------------
# Kernel A: conv1 (1x1) + folded bn1 + relu          (x already bf16)
# ----------------------------------------------------------------------------
def _conv1_kernel(x_ref, w_ref, s_ref, h_ref, o_ref):
    acc = jnp.dot(x_ref[0], w_ref[...], preferred_element_type=jnp.float32)
    o_ref[0] = jnp.maximum(acc * s_ref[...] + h_ref[...], 0.0).astype(o_ref.dtype)


def conv1_bn_relu(x, w, scale, shift, *, tm):
    n, hw, cinp = x.shape
    gwp = w.shape[1]
    return pl.pallas_call(
        _conv1_kernel,
        out_shape=jax.ShapeDtypeStruct((n, hw, gwp), jnp.bfloat16),
        grid=(n, hw // tm),
        in_specs=[
            pl.BlockSpec((1, tm, cinp), lambda b, i: (b, i, 0)),
            pl.BlockSpec((cinp, gwp), lambda b, i: (0, 0)),
            pl.BlockSpec((1, gwp), lambda b, i: (0, 0)),
            pl.BlockSpec((1, gwp), lambda b, i: (0, 0)),
        ],
        out_specs=pl.BlockSpec((1, tm, gwp), lambda b, i: (b, i, 0)),
        compiler_params=_CP_2D,
    )(x, w, scale, shift)


# ----------------------------------------------------------------------------
# Kernel B (fused): conv2 3x3 + bn0 + relu + GAP + radix-1 attention
#                   + gate * conv3 1x1 + folded bn3 + residual + relu
# ----------------------------------------------------------------------------
def _splat_block_kernel(x1_ref, w2_ref, s0_ref, h0_ref,
                        wf1_ref, bf1_ref, s1_ref, h1_ref,
                        wf2_ref, bf2_ref,
                        w3_ref, s3_ref, h3_ref, res_ref,
                        o_ref,
                        pad_ref, slab_ref, ybf_ref, *, H, W):
    C = s0_ref.shape[1]                                   # gwp (128-lane padded)
    HW = H * W

    # --- 3x3 halo lives only in bf16 VMEM scratch (never touches HBM). -------
    # Re-zero only the border strips every grid step (interior is fully
    # overwritten; scratch is per-TensorCore, so do NOT gate on program_id).
    zrow = jnp.zeros((1, W + 2, C), jnp.bfloat16)
    zcol = jnp.zeros((H + 2, 1, C), jnp.bfloat16)
    pad_ref[0:1, :, :] = zrow
    pad_ref[H + 1:H + 2, :, :] = zrow
    pad_ref[:, 0:1, :] = zcol
    pad_ref[:, W + 1:W + 2, :] = zcol
    pad_ref[1:H + 1, 1:W + 1, :] = x1_ref[0]

    # --- im2col slab in VMEM: one K = 9*C MXU contraction (no 9x f32 adds). --
    for t in range(9):
        kh, kw = t // 3, t % 3
        win = pad_ref[kh:kh + H, kw:kw + W, :]            # (H, W, C) bf16
        slab_ref[:, t * C:(t + 1) * C] = win.reshape(HW, C)

    acc = jnp.dot(slab_ref[...], w2_ref[...], preferred_element_type=jnp.float32)
    y = jnp.maximum(acc * s0_ref[...] + h0_ref[...], 0.0)        # (HW, C) f32
    gap = jnp.mean(y, axis=0, keepdims=True)                     # (1, C) f32
    ybf_ref[...] = y.astype(jnp.bfloat16)

    # --- radix-1 split attention: sigmoid(fc2(relu(bn1a(fc1(GAP(y)))))). -----
    gap8 = jnp.broadcast_to(gap, (8, C)).astype(jnp.bfloat16)
    g = jnp.dot(gap8, wf1_ref[...], preferred_element_type=jnp.float32) + bf1_ref[...]
    g = jnp.maximum(g * s1_ref[...] + h1_ref[...], 0.0)
    a = jnp.dot(g.astype(jnp.bfloat16), wf2_ref[...],
                preferred_element_type=jnp.float32) + bf2_ref[...]
    # Padded lanes give sigmoid(0) = 0.5; this is harmless because y (bn0
    # scale/shift padded with 0) and the padded rows of w3 are exactly 0 there.
    att = jax.nn.sigmoid(a[0:1, :]).astype(jnp.bfloat16)         # (1, C)

    # --- gate * conv3 1x1 + folded bn3 + residual + relu. --------------------
    # TODO(synk): on v5e (no bf16 VALU) fold att into the w3 rows instead of
    # gating the (HW, C) operand elementwise.
    yg = ybf_ref[...] * att                                       # (HW, C) bf16
    o = jnp.dot(yg, w3_ref[...], preferred_element_type=jnp.float32)
    o = o * s3_ref[...] + h3_ref[...] + res_ref[0].astype(jnp.float32)
    o_ref[0] = jnp.maximum(o, 0.0).astype(o_ref.dtype)


def splat_conv_block(x1, w2, s0, h0, wf1, bf1, s1a, h1a, wf2, bf2,
                     w3, s3, h3, res):
    n, H, W, gwp = x1.shape
    interp = wf1.shape[1]
    outcp = w3.shape[1]
    hw = H * W
    # TODO(synk): for very large H*W, add an H-tile "parallel" grid axis with an
    # explicit halo + cross-tile GAP accumulator so both v7x TensorCores stay busy.
    return pl.pallas_call(
        functools.partial(_splat_block_kernel, H=H, W=W),
        out_shape=jax.ShapeDtypeStruct((n, hw, outcp), jnp.bfloat16),
        grid=(n,),
        in_specs=[
            pl.BlockSpec((1, H, W, gwp), lambda b: (b, 0, 0, 0)),
            pl.BlockSpec((9 * gwp, gwp), lambda b: (0, 0)),
            pl.BlockSpec((1, gwp), lambda b: (0, 0)),
            pl.BlockSpec((1, gwp), lambda b: (0, 0)),
            pl.BlockSpec((gwp, interp), lambda b: (0, 0)),
            pl.BlockSpec((1, interp), lambda b: (0, 0)),
            pl.BlockSpec((1, interp), lambda b: (0, 0)),
            pl.BlockSpec((1, interp), lambda b: (0, 0)),
            pl.BlockSpec((interp, gwp), lambda b: (0, 0)),
            pl.BlockSpec((1, gwp), lambda b: (0, 0)),
            pl.BlockSpec((gwp, outcp), lambda b: (0, 0)),
            pl.BlockSpec((1, outcp), lambda b: (0, 0)),
            pl.BlockSpec((1, outcp), lambda b: (0, 0)),
            pl.BlockSpec((1, hw, outcp), lambda b: (b, 0, 0)),
        ],
        out_specs=pl.BlockSpec((1, hw, outcp), lambda b: (b, 0, 0)),
        scratch_shapes=[
            pltpu.VMEM((H + 2, W + 2, gwp), jnp.bfloat16),   # halo pad
            pltpu.VMEM((hw, 9 * gwp), jnp.bfloat16),         # im2col slab
            pltpu.VMEM((hw, gwp), jnp.bfloat16),             # y (conv3 operand)
        ],
        compiler_params=_CP_1D,
    )(x1, w2, s0, h0, wf1, bf1, s1a, h1a, wf2, bf2, w3, s3, h3, res)


# ----------------------------------------------------------------------------
# Parameters (deterministic, synthetic), padded to 128 lanes, weights in bf16
# ----------------------------------------------------------------------------
def _round_up(x, m):
    return (x + m - 1) // m * m


def _pad_to(a, *target):
    return jnp.pad(a, tuple((0, t - s) for s, t in zip(a.shape, target)))


def _fold_bn(gamma, beta, mean, var, eps=1e-5):
    scale = gamma / jnp.sqrt(var + eps)
    shift = beta - mean * scale
    return scale, shift


def init_params(key, inplanes, planes, bottleneck_width=64, cardinality=1,
                radix=1, reduction_factor=4):
    gw = int(planes * (bottleneck_width / 64.0)) * cardinality   # group_width
    inter = max(gw * radix // reduction_factor, 32)              # SplAt inter_channels
    outc = planes * 4
    dims = Dims(gw, inter, outc,
                _round_up(inplanes, LANE), _round_up(gw, LANE),
                _round_up(inter, LANE), _round_up(outc, LANE))

    ks = jax.random.split(key, 11)

    def w_init(k, shape, fan_in):
        return jax.random.normal(k, shape, jnp.float32) * (1.0 / jnp.sqrt(fan_in))

    def bn_init(k, c, cp):
        k1, k2, k3, k4 = jax.random.split(k, 4)
        gamma = 1.0 + 0.1 * jax.random.normal(k1, (c,), jnp.float32)
        beta = 0.1 * jax.random.normal(k2, (c,), jnp.float32)
        mean = 0.1 * jax.random.normal(k3, (c,), jnp.float32)
        var = jax.random.uniform(k4, (c,), jnp.float32, minval=0.5, maxval=1.5)
        scale, shift = _fold_bn(gamma, beta, mean, var)
        # zero scale/shift in padded channels -> padded outputs stay exactly 0
        return (_pad_to(scale[None, :], 1, cp), _pad_to(shift[None, :], 1, cp))

    p = {}
    # conv1: torch (gw, inplanes, 1, 1) -> matmul weight (inplanes, gw)
    p["w1"] = _pad_to(w_init(ks[0], (inplanes, gw), inplanes),
                      dims.cinp, dims.gwp).astype(jnp.bfloat16)
    p["bn1"] = bn_init(ks[1], gw, dims.gwp)
    # SplAt conv2: torch (gw, gw, 3, 3) -> im2col weight (9*gwp, gwp)
    w2 = w_init(ks[2], (gw, gw, 3, 3), 9 * gw)                    # (cout, cin, kh, kw)
    w2 = jnp.transpose(w2, (2, 3, 1, 0)).reshape(9, gw, gw)       # (kh*3+kw, cin, cout)
    w2 = _pad_to(w2, 9, dims.gwp, dims.gwp)
    p["w2"] = w2.reshape(9 * dims.gwp, dims.gwp).astype(jnp.bfloat16)
    p["bn0"] = bn_init(ks[3], gw, dims.gwp)
    # SplAt attention: fc1 (inter, gw, 1, 1)+bias, bn1a, fc2 (gw, inter, 1, 1)+bias
    p["wfc1"] = _pad_to(w_init(ks[4], (gw, inter), gw),
                        dims.gwp, dims.interp).astype(jnp.bfloat16)
    p["bfc1"] = _pad_to(0.1 * jax.random.normal(ks[5], (1, inter), jnp.float32),
                        1, dims.interp)
    p["bn1a"] = bn_init(ks[6], inter, dims.interp)
    p["wfc2"] = _pad_to(w_init(ks[7], (inter, gw), inter),
                        dims.interp, dims.gwp).astype(jnp.bfloat16)
    p["bfc2"] = _pad_to(0.1 * jax.random.normal(ks[8], (1, gw), jnp.float32),
                        1, dims.gwp)
    # conv3: torch (4*planes, gw, 1, 1) -> (gw, 4*planes)
    p["w3"] = _pad_to(w_init(ks[9], (gw, outc), gw),
                      dims.gwp, dims.outcp).astype(jnp.bfloat16)
    p["bn3"] = bn_init(ks[10], outc, dims.outcp)
    return p, dims


# ----------------------------------------------------------------------------
# Forward wrapper (NCHW in / NCHW out to match the PyTorch module)
# ----------------------------------------------------------------------------
def _pick_tile(hw, cap=1024):
    # Prefer multiples of 256 (v6e/v7x MXU cadence), then 128 (v5e), then 8.
    cap = min(cap, hw)
    for quant in (256, 128, 8):
        best = 0
        for t in range(quant, cap + 1, quant):
            if hw % t == 0:
                best = t
        if best:
            return best
    # TODO(synk): pad hw up to a multiple of 8 instead of whole-image blocks.
    return hw


def bottleneck_forward(x_nchw, params, dims):
    n, cin, h, w = x_nchw.shape
    assert cin == dims.outc, "downsample is None -> requires inplanes == planes*4"
    assert dims.cinp == dims.outcp
    hw = h * w
    tm = _pick_tile(hw)

    # NCHW -> (N, H*W, C) channels-last rows in bf16, zero-padded to 128 lanes.
    # The same bf16 copy feeds kernel A and is reused as kernel B's residual.
    # TODO(synk): accept NHWC / pre-padded bf16 input to drop this glue pass.
    x_rows = jnp.transpose(x_nchw, (0, 2, 3, 1)).reshape(n, hw, cin)
    x_rows = jnp.pad(x_rows.astype(jnp.bfloat16),
                     ((0, 0), (0, 0), (0, dims.cinp - cin)))

    # (A) conv1 1x1 + bn1 + relu
    s1, h1 = params["bn1"]
    x1 = conv1_bn_relu(x_rows, params["w1"], s1, h1, tm=tm)       # (N, HW, gwp) bf16

    # (B) conv2 3x3 + bn0 + relu + GAP + attention + gate*conv3 + bn3 + res + relu
    s0, h0 = params["bn0"]
    s1a, h1a = params["bn1a"]
    s3, h3 = params["bn3"]
    out = splat_conv_block(x1.reshape(n, h, w, dims.gwp), params["w2"], s0, h0,
                           params["wfc1"], params["bfc1"], s1a, h1a,
                           params["wfc2"], params["bfc2"],
                           params["w3"], s3, h3, x_rows)          # (N, HW, outcp) bf16

    # Back to NCHW f32 to match the PyTorch module interface.
    out = out[:, :, :dims.outc].reshape(n, h, w, dims.outc)
    return jnp.transpose(out, (0, 3, 1, 2)).astype(jnp.float32)


# ----------------------------------------------------------------------------
# Pure-JAX reference (f32 math, same bf16-quantized weights / input)
# ----------------------------------------------------------------------------
def bottleneck_reference(x_nchw, params, dims):
    f32 = jnp.float32
    n, cin, h, w = x_nchw.shape
    gw, inter, outc = dims.gw, dims.inter, dims.outc
    x = jnp.transpose(x_nchw, (0, 2, 3, 1)).astype(jnp.bfloat16).astype(f32)
    w1 = params["w1"].astype(f32)[:cin, :gw]
    s1, h1 = (params["bn1"][0][0, :gw], params["bn1"][1][0, :gw])
    y = jnp.maximum(jnp.einsum("nhwc,cd->nhwd", x, w1) * s1 + h1, 0.0)
    w2 = params["w2"].astype(f32).reshape(9, dims.gwp, dims.gwp)[:, :gw, :gw]
    w2 = w2.reshape(3, 3, gw, gw)
    yp = jnp.pad(y, ((0, 0), (1, 1), (1, 1), (0, 0)))
    y2 = jnp.zeros_like(y)
    for kh in range(3):
        for kw in range(3):
            y2 = y2 + jnp.einsum("nhwc,cd->nhwd",
                                 yp[:, kh:kh + h, kw:kw + w, :], w2[kh, kw])
    s0, h0 = (params["bn0"][0][0, :gw], params["bn0"][1][0, :gw])
    y2 = jnp.maximum(y2 * s0 + h0, 0.0)
    gap = y2.mean(axis=(1, 2))
    wf1 = params["wfc1"].astype(f32)[:gw, :inter]
    bf1 = params["bfc1"][0, :inter]
    s1a, h1a = (params["bn1a"][0][0, :inter], params["bn1a"][1][0, :inter])
    wf2 = params["wfc2"].astype(f32)[:inter, :gw]
    bf2 = params["bfc2"][0, :gw]
    g = jnp.maximum((gap @ wf1 + bf1) * s1a + h1a, 0.0)
    att = jax.nn.sigmoid(g @ wf2 + bf2)
    yg = y2 * att[:, None, None, :]
    w3 = params["w3"].astype(f32)[:gw, :outc]
    s3, h3 = (params["bn3"][0][0, :outc], params["bn3"][1][0, :outc])
    o = jnp.maximum(jnp.einsum("nhwc,cd->nhwd", yg, w3) * s3 + h3 + x, 0.0)
    return jnp.transpose(o, (0, 3, 1, 2))


# ----------------------------------------------------------------------------
# Demo
# ----------------------------------------------------------------------------
if __name__ == "__main__":
    key = jax.random.PRNGKey(0)
    k_x, k_p = jax.random.split(key)

    planes = 8
    inplanes = planes * 4            # 32: required since downsample is None
    N, H, W = 2, 16, 16

    x = jax.random.normal(k_x, (N, inplanes, H, W), jnp.float32)
    params, dims = init_params(k_p, inplanes, planes)

    fwd = jax.jit(bottleneck_forward, static_argnames=("dims",))
    out = jax.block_until_ready(fwd(x, params, dims=dims))

    assert out.shape == (N, planes * 4, H, W)
    assert bool(jnp.all(out >= 0.0))                              # final ReLU
    ref = bottleneck_reference(x, params, dims)
    max_ref = float(jnp.max(jnp.abs(ref)))
    err = float(jnp.max(jnp.abs(out - ref)))
    assert err <= 4e-2 * max_ref + 1e-3, (
        f"mismatch vs reference: max abs err = {err}, max |ref| = {max_ref}")
    print("KERNEL_OK")
</pallas_src>

<mosaic_0001>
module attributes {stable_mosaic.version = 11 : i64} {
  func.func @_splat_block_kernel(%arg0: i32, %arg1: memref<1x16x16x128xbf16, #tpu.memory_space<vmem>>, %arg2: memref<1152x128xbf16, #tpu.memory_space<vmem>>, %arg3: memref<1x128xf32, #tpu.memory_space<vmem>>, %arg4: memref<1x128xf32, #tpu.memory_space<vmem>>, %arg5: memref<128x128xbf16, #tpu.memory_space<vmem>>, %arg6: memref<1x128xf32, #tpu.memory_space<vmem>>, %arg7: memref<1x128xf32, #tpu.memory_space<vmem>>, %arg8: memref<1x128xf32, #tpu.memory_space<vmem>>, %arg9: memref<128x128xbf16, #tpu.memory_space<vmem>>, %arg10: memref<1x128xf32, #tpu.memory_space<vmem>>, %arg11: memref<128x128xbf16, #tpu.memory_space<vmem>>, %arg12: memref<1x128xf32, #tpu.memory_space<vmem>>, %arg13: memref<1x128xf32, #tpu.memory_space<vmem>>, %arg14: memref<1x256x128xbf16, #tpu.memory_space<vmem>>, %arg15: memref<1x256x128xbf16, #tpu.memory_space<vmem>>, %arg16: memref<18x18x128xbf16, #tpu.memory_space<vmem>>, %arg17: memref<256x1152xbf16, #tpu.memory_space<vmem>>, %arg18: memref<256x128xbf16, #tpu.memory_space<vmem>>) attributes {dimension_semantics = [#tpu.dimension_semantics<parallel>], iteration_bounds = array<i64: 2>, scalar_prefetch = 0 : i64, scratch_operands = 3 : i64, tpu.core_type = #tpu.core_type<tc>, window_params = [{transform_indices = @transform_0, window_bounds = array<i64: 1, 16, 16, 128>}, {pipeline_mode = #tpu.pipeline_mode<synchronous>, transform_indices = @transform_1, window_bounds = array<i64: 1152, 128>}, {pipeline_mode = #tpu.pipeline_mode<synchronous>, transform_indices = @transform_2, window_bounds = array<i64: 1, 128>}, {pipeline_mode = #tpu.pipeline_mode<synchronous>, transform_indices = @transform_3, window_bounds = array<i64: 1, 128>}, {pipeline_mode = #tpu.pipeline_mode<synchronous>, transform_indices = @transform_4, window_bounds = array<i64: 128, 128>}, {pipeline_mode = #tpu.pipeline_mode<synchronous>, transform_indices = @transform_5, window_bounds = array<i64: 1, 128>}, {pipeline_mode = #tpu.pipeline_mode<synchronous>, transform_indices = @transform_6, window_bounds = array<i64: 1, 128>}, {pipeline_mode = #tpu.pipeline_mode<synchronous>, transform_indices = @transform_7, window_bounds = array<i64: 1, 128>}, {pipeline_mode = #tpu.pipeline_mode<synchronous>, transform_indices = @transform_8, window_bounds = array<i64: 128, 128>}, {pipeline_mode = #tpu.pipeline_mode<synchronous>, transform_indices = @transform_9, window_bounds = array<i64: 1, 128>}, {pipeline_mode = #tpu.pipeline_mode<synchronous>, transform_indices = @transform_10, window_bounds = array<i64: 128, 128>}, {pipeline_mode = #tpu.pipeline_mode<synchronous>, transform_indices = @transform_11, window_bounds = array<i64: 1, 128>}, {pipeline_mode = #tpu.pipeline_mode<synchronous>, transform_indices = @transform_12, window_bounds = array<i64: 1, 128>}, {transform_indices = @transform_13, window_bounds = array<i64: 1, 256, 128>}, {transform_indices = @transform_14, window_bounds = array<i64: 1, 256, 128>}]} {
    %cst = arith.constant 0.000000e+00 : bf16
    %0 = vector.broadcast %cst : bf16 to vector<1x18x128xbf16>
    %cst_0 = arith.constant 0.000000e+00 : bf16
    %1 = vector.broadcast %cst_0 : bf16 to vector<18x1x128xbf16>
    %c0 = arith.constant 0 : index
    %c0_1 = arith.constant 0 : index
    %c0_2 = arith.constant 0 : index
    %2 = vector.load %arg16[%c0, %c0_1, %c0_2] : memref<18x18x128xbf16, #tpu.memory_space<vmem>>, vector<1x18x128xbf16>
    tpu.vector_store %arg16[%c0, %c0_1, %c0_2], %0 {strides = array<i32>} : memref<18x18x128xbf16, #tpu.memory_space<vmem>>, vector<1x18x128xbf16>,
    %c17 = arith.constant 17 : index
    %c0_3 = arith.constant 0 : index
    %c0_4 = arith.constant 0 : index
    %3 = vector.load %arg16[%c17, %c0_3, %c0_4] : memref<18x18x128xbf16, #tpu.memory_space<vmem>>, vector<1x18x128xbf16>
    tpu.vector_store %arg16[%c17, %c0_3, %c0_4], %0 {strides = array<i32>} : memref<18x18x128xbf16, #tpu.memory_space<vmem>>, vector<1x18x128xbf16>,
    %c0_5 = arith.constant 0 : index
    %c0_6 = arith.constant 0 : index
    %c0_7 = arith.constant 0 : index
    %4 = vector.load %arg16[%c0_5, %c0_6, %c0_7] : memref<18x18x128xbf16, #tpu.memory_space<vmem>>, vector<18x1x128xbf16>
    tpu.vector_store %arg16[%c0_5, %c0_6, %c0_7], %1 {strides = array<i32>} : memref<18x18x128xbf16, #tpu.memory_space<vmem>>, vector<18x1x128xbf16>,
    %c0_8 = arith.constant 0 : index
    %c17_9 = arith.constant 17 : index
    %c0_10 = arith.constant 0 : index
    %5 = vector.load %arg16[%c0_8, %c17_9, %c0_10] : memref<18x18x128xbf16, #tpu.memory_space<vmem>>, vector<18x1x128xbf16>
    tpu.vector_store %arg16[%c0_8, %c17_9, %c0_10], %1 {strides = array<i32>} : memref<18x18x128xbf16, #tpu.memory_space<vmem>>, vector<18x1x128xbf16>,
    %c0_11 = arith.constant 0 : index
    %c0_12 = arith.constant 0 : index
    %c0_13 = arith.constant 0 : index
    %c0_14 = arith.constant 0 : index
    %6 = vector.load %arg1[%c0_11, %c0_12, %c0_13, %c0_14] : memref<1x16x16x128xbf16, #tpu.memory_space<vmem>>, vector<1x16x16x128xbf16>
    %7 = vector.shape_cast %6 : vector<1x16x16x128xbf16> to vector<16x16x128xbf16>
    %c1 = arith.constant 1 : index
    %c1_15 = arith.constant 1 : index
    %c0_16 = arith.constant 0 : index
    %8 = vector.load %arg16[%c1, %c1_15, %c0_16] : memref<18x18x128xbf16, #tpu.memory_space<vmem>>, vector<16x16x128xbf16>
    tpu.vector_store %arg16[%c1, %c1_15, %c0_16], %7 {strides = array<i32>} : memref<18x18x128xbf16, #tpu.memory_space<vmem>>, vector<16x16x128xbf16>,
    %c0_17 = arith.constant 0 : index
    %c0_18 = arith.constant 0 : index
    %c0_19 = arith.constant 0 : index
    %9 = vector.load %arg16[%c0_17, %c0_18, %c0_19] : memref<18x18x128xbf16, #tpu.memory_space<vmem>>, vector<16x16x128xbf16>
    %10 = vector.shape_cast %9 : vector<16x16x128xbf16> to vector<256x128xbf16>
    %c0_20 = arith.constant 0 : index
    %c0_21 = arith.constant 0 : index
    %11 = vector.load %arg17[%c0_20, %c0_21] : memref<256x1152xbf16, #tpu.memory_space<vmem>>, vector<256x128xbf16>
    tpu.vector_store %arg17[%c0_20, %c0_21], %10 {strides = array<i32>} : memref<256x1152xbf16, #tpu.memory_space<vmem>>, vector<256x128xbf16>,
    %c0_22 = arith.constant 0 : index
    %c1_23 = arith.constant 1 : index
    %c0_24 = arith.constant 0 : index
    %12 = vector.load %arg16[%c0_22, %c1_23, %c0_24] : memref<18x18x128xbf16, #tpu.memory_space<vmem>>, vector<16x16x128xbf16>
    %13 = vector.shape_cast %12 : vector<16x16x128xbf16> to vector<256x128xbf16>
    %c0_25 = arith.constant 0 : index
    %c128 = arith.constant 128 : index
    %14 = vector.load %arg17[%c0_25, %c128] : memref<256x1152xbf16, #tpu.memory_space<vmem>>, vector<256x128xbf16>
    tpu.vector_store %arg17[%c0_25, %c128], %13 {strides = array<i32>} : memref<256x1152xbf16, #tpu.memory_space<vmem>>, vector<256x128xbf16>,
    %c0_26 = arith.constant 0 : index
    %c2 = arith.constant 2 : index
    %c0_27 = arith.constant 0 : index
    %15 = vector.load %arg16[%c0_26, %c2, %c0_27] : memref<18x18x128xbf16, #tpu.memory_space<vmem>>, vector<16x16x128xbf16>
    %16 = vector.shape_cast %15 : vector<16x16x128xbf16> to vector<256x128xbf16>
    %c0_28 = arith.constant 0 : index
    %c256 = arith.constant 256 : index
    %17 = vector.load %arg17[%c0_28, %c256] : memref<256x1152xbf16, #tpu.memory_space<vmem>>, vector<256x128xbf16>
    tpu.vector_store %arg17[%c0_28, %c256], %16 {strides = array<i32>} : memref<256x1152xbf16, #tpu.memory_space<vmem>>, vector<256x128xbf16>,
    %c1_29 = arith.constant 1 : index
    %c0_30 = arith.constant 0 : index
    %c0_31 = arith.constant 0 : index
    %18 = vector.load %arg16[%c1_29, %c0_30, %c0_31] : memref<18x18x128xbf16, #tpu.memory_space<vmem>>, vector<16x16x128xbf16>
    %19 = vector.shape_cast %18 : vector<16x16x128xbf16> to vector<256x128xbf16>
    %c0_32 = arith.constant 0 : index
    %c384 = arith.constant 384 : index
    %20 = vector.load %arg17[%c0_32, %c384] : memref<256x1152xbf16, #tpu.memory_space<vmem>>, vector<256x128xbf16>
    tpu.vector_store %arg17[%c0_32, %c384], %19 {strides = array<i32>} : memref<256x1152xbf16, #tpu.memory_space<vmem>>, vector<256x128xbf16>,
    %c1_33 = arith.constant 1 : index
    %c1_34 = arith.constant 1 : index
    %c0_35 = arith.constant 0 : index
    %21 = vector.load %arg16[%c1_33, %c1_34, %c0_35] : memref<18x18x128xbf16, #tpu.memory_space<vmem>>, vector<16x16x128xbf16>
    %22 = vector.shape_cast %21 : vector<16x16x128xbf16> to vector<256x128xbf16>
    %c0_36 = arith.constant 0 : index
    %c512 = arith.constant 512 : index
    %23 = vector.load %arg17[%c0_36, %c512] : memref<256x1152xbf16, #tpu.memory_space<vmem>>, vector<256x128xbf16>
    tpu.vector_store %arg17[%c0_36, %c512], %22 {strides = array<i32>} : memref<256x1152xbf16, #tpu.memory_space<vmem>>, vector<256x128xbf16>,
    %c1_37 = arith.constant 1 : index
    %c2_38 = arith.constant 2 : index
    %c0_39 = arith.constant 0 : index
    %24 = vector.load %arg16[%c1_37, %c2_38, %c0_39] : memref<18x18x128xbf16, #tpu.memory_space<vmem>>, vector<16x16x128xbf16>
    %25 = vector.shape_cast %24 : vector<16x16x128xbf16> to vector<256x128xbf16>
    %c0_40 = arith.constant 0 : index
    %c640 = arith.constant 640 : index
    %26 = vector.load %arg17[%c0_40, %c640] : memref<256x1152xbf16, #tpu.memory_space<vmem>>, vector<256x128xbf16>
    tpu.vector_store %arg17[%c0_40, %c640], %25 {strides = array<i32>} : memref<256x1152xbf16, #tpu.memory_space<vmem>>, vector<256x128xbf16>,
    %c2_41 = arith.constant 2 : index
    %c0_42 = arith.constant 0 : index
    %c0_43 = arith.constant 0 : index
    %27 = vector.load %arg16[%c2_41, %c0_42, %c0_43] : memref<18x18x128xbf16, #tpu.memory_space<vmem>>, vector<16x16x128xbf16>
    %28 = vector.shape_cast %27 : vector<16x16x128xbf16> to vector<256x128xbf16>
    %c0_44 = arith.constant 0 : index
    %c768 = arith.constant 768 : index
    %29 = vector.load %arg17[%c0_44, %c768] : memref<256x1152xbf16, #tpu.memory_space<vmem>>, vector<256x128xbf16>
    tpu.vector_store %arg17[%c0_44, %c768], %28 {strides = array<i32>} : memref<256x1152xbf16, #tpu.memory_space<vmem>>, vector<256x128xbf16>,
    %c2_45 = arith.constant 2 : index
    %c1_46 = arith.constant 1 : index
    %c0_47 = arith.constant 0 : index
    %30 = vector.load %arg16[%c2_45, %c1_46, %c0_47] : memref<18x18x128xbf16, #tpu.memory_space<vmem>>, vector<16x16x128xbf16>
    %31 = vector.shape_cast %30 : vector<16x16x128xbf16> to vector<256x128xbf16>
    %c0_48 = arith.constant 0 : index
    %c896 = arith.constant 896 : index
    %32 = vector.load %arg17[%c0_48, %c896] : memref<256x1152xbf16, #tpu.memory_space<vmem>>, vector<256x128xbf16>
    tpu.vector_store %arg17[%c0_48, %c896], %31 {strides = array<i32>} : memref<256x1152xbf16, #tpu.memory_space<vmem>>, vector<256x128xbf16>,
    %c2_49 = arith.constant 2 : index
    %c2_50 = arith.constant 2 : index
    %c0_51 = arith.constant 0 : index
    %33 = vector.load %arg16[%c2_49, %c2_50, %c0_51] : memref<18x18x128xbf16, #tpu.memory_space<vmem>>, vector<16x16x128xbf16>
    %34 = vector.shape_cast %33 : vector<16x16x128xbf16> to vector<256x128xbf16>
    %c0_52 = arith.constant 0 : index
    %c1024 = arith.constant 1024 : index
    %35 = vector.load %arg17[%c0_52, %c1024] : memref<256x1152xbf16, #tpu.memory_space<vmem>>, vector<256x128xbf16>
    tpu.vector_store %arg17[%c0_52, %c1024], %34 {strides = array<i32>} : memref<256x1152xbf16, #tpu.memory_space<vmem>>, vector<256x128xbf16>,
    %c0_53 = arith.constant 0 : index
    %c0_54 = arith.constant 0 : index
    %36 = vector.load %arg17[%c0_53, %c0_54] : memref<256x1152xbf16, #tpu.memory_space<vmem>>, vector<256x1152xbf16>
    %c0_55 = arith.constant 0 : index
    %c0_56 = arith.constant 0 : index
    %37 = vector.load %arg2[%c0_55, %c0_56] : memref<1152x128xbf16, #tpu.memory_space<vmem>>, vector<1152x128xbf16>
    %cst_57 = arith.constant dense<0.000000e+00> : vector<256x128xf32>
    %38 = tpu.matmul %36, %37, %cst_57 {dimension_numbers = #tpu.dot_dimension_numbers<[1], [0], [0], [1], [0, 0, 1, 1], [], []>} : vector<256x1152xbf16>, vector<1152x128xbf16>, vector<256x128xf32> -> vector<256x128xf32>
    %c0_58 = arith.constant 0 : index
    %c0_59 = arith.constant 0 : index
    %39 = vector.load %arg3[%c0_58, %c0_59] : memref<1x128xf32, #tpu.memory_space<vmem>>, vector<1x128xf32>
    %40 = vector.broadcast %39 : vector<1x128xf32> to vector<256x128xf32>
    %41 = arith.mulf %38, %40 : vector<256x128xf32>
    %c0_60 = arith.constant 0 : index
    %c0_61 = arith.constant 0 : index
    %42 = vector.load %arg4[%c0_60, %c0_61] : memref<1x128xf32, #tpu.memory_space<vmem>>, vector<1x128xf32>
    %43 = vector.broadcast %42 : vector<1x128xf32> to vector<256x128xf32>
    %44 = arith.addf %41, %43 : vector<256x128xf32>
    %cst_62 = arith.constant 0.000000e+00 : f32
    %45 = vector.broadcast %cst_62 : f32 to vector<256x128xf32>
    %46 = arith.maximumf %44, %45 : vector<256x128xf32>
    %cst_63 = arith.constant dense<0.000000e+00> : vector<128xf32>
    %47 = vector.multi_reduction <add>, %46, %cst_63 [0] : vector<256x128xf32> to vector<128xf32>
    %48 = vector.shape_cast %47 : vector<128xf32> to vector<1x128xf32>
    %cst_64 = arith.constant 2.560000e+02 : f32
    %49 = vector.broadcast %cst_64 : f32 to vector<1x128xf32>
    %50 = arith.divf %48, %49 : vector<1x128xf32>
    %51 = arith.truncf %46 : vector<256x128xf32> to vector<256x128xbf16>
    %c0_65 = arith.constant 0 : index
    %c0_66 = arith.constant 0 : index
    %52 = vector.load %arg18[%c0_65, %c0_66] : memref<256x128xbf16, #tpu.memory_space<vmem>>, vector<256x128xbf16>
    tpu.vector_store %arg18[%c0_65, %c0_66], %51 {strides = array<i32>} : memref<256x128xbf16, #tpu.memory_space<vmem>>, vector<256x128xbf16>,
    %53 = vector.shape_cast %50 : vector<1x128xf32> to vector<1x128xf32>
    %54 = vector.broadcast %53 : vector<1x128xf32> to vector<8x128xf32>
    %55 = arith.truncf %54 : vector<8x128xf32> to vector<8x128xbf16>
    %c0_67 = arith.constant 0 : index
    %c0_68 = arith.constant 0 : index
    %56 = vector.load %arg5[%c0_67, %c0_68] : memref<128x128xbf16, #tpu.memory_space<vmem>>, vector<128x128xbf16>
    %cst_69 = arith.constant dense<0.000000e+00> : vector<8x128xf32>
    %57 = tpu.matmul %55, %56, %cst_69 {dimension_numbers = #tpu.dot_dimension_numbers<[1], [0], [0], [1], [0, 0, 1, 1], [], []>} : vector<8x128xbf16>, vector<128x128xbf16>, vector<8x128xf32> -> vector<8x128xf32>
    %c0_70 = arith.constant 0 : index
    %c0_71 = arith.constant 0 : index
    %58 = vector.load %arg6[%c0_70, %c0_71] : memref<1x128xf32, #tpu.memory_space<vmem>>, vector<1x128xf32>
    %59 = vector.broadcast %58 : vector<1x128xf32> to vector<8x128xf32>
    %60 = arith.addf %57, %59 : vector<8x128xf32>
    %c0_72 = arith.constant 0 : index
    %c0_73 = arith.constant 0 : index
    %61 = vector.load %arg7[%c0_72, %c0_73] : memref<1x128xf32, #tpu.memory_space<vmem>>, vector<1x128xf32>
    %62 = vector.broadcast %61 : vector<1x128xf32> to vector<8x128xf32>
    %63 = arith.mulf %60, %62 : vector<8x128xf32>
    %c0_74 = arith.constant 0 : index
    %c0_75 = arith.constant 0 : index
    %64 = vector.load %arg8[%c0_74, %c0_75] : memref<1x128xf32, #tpu.memory_space<vmem>>, vector<1x128xf32>
    %65 = vector.broadcast %64 : vector<1x128xf32> to vector<8x128xf32>
    %66 = arith.addf %63, %65 : vector<8x128xf32>
    %cst_76 = arith.constant 0.000000e+00 : f32
    %67 = vector.broadcast %cst_76 : f32 to vector<8x128xf32>
    %68 = arith.maximumf %66, %67 : vector<8x128xf32>
    %69 = arith.truncf %68 : vector<8x128xf32> to vector<8x128xbf16>
    %c0_77 = arith.constant 0 : index
    %c0_78 = arith.constant 0 : index
    %70 = vector.load %arg9[%c0_77, %c0_78] : memref<128x128xbf16, #tpu.memory_space<vmem>>, vector<128x128xbf16>
    %cst_79 = arith.constant dense<0.000000e+00> : vector<8x128xf32>
    %71 = tpu.matmul %69, %70, %cst_79 {dimension_numbers = #tpu.dot_dimension_numbers<[1], [0], [0], [1], [0, 0, 1, 1], [], []>} : vector<8x128xbf16>, vector<128x128xbf16>, vector<8x128xf32> -> vector<8x128xf32>
    %c0_80 = arith.constant 0 : index
    %c0_81 = arith.constant 0 : index
    %72 = vector.load %arg10[%c0_80, %c0_81] : memref<1x128xf32, #tpu.memory_space<vmem>>, vector<1x128xf32>
    %73 = vector.broadcast %72 : vector<1x128xf32> to vector<8x128xf32>
    %74 = arith.addf %71, %73 : vector<8x128xf32>
    %75 = vector.extract_strided_slice %74 {offsets = [0, 0], sizes = [1, 128], strides = [1, 1]} : vector<8x128xf32> to vector<1x128xf32>
    %76 = arith.negf %75 : vector<1x128xf32>
    %77 = math.exp %76 : vector<1x128xf32>
    %cst_82 = arith.constant 1.000000e+00 : f32
    %78 = vector.broadcast %cst_82 : f32 to vector<1x128xf32>
    %79 = arith.addf %78, %77 : vector<1x128xf32>
    %80 = arith.divf %78, %79 : vector<1x128xf32>
    %81 = arith.truncf %80 : vector<1x128xf32> to vector<1x128xbf16>
    %c0_83 = arith.constant 0 : index
    %c0_84 = arith.constant 0 : index
    %82 = vector.load %arg18[%c0_83, %c0_84] : memref<256x128xbf16, #tpu.memory_space<vmem>>, vector<256x128xbf16>
    %83 = vector.broadcast %81 : vector<1x128xbf16> to vector<256x128xbf16>
    %84 = arith.mulf %82, %83 : vector<256x128xbf16>
    %c0_85 = arith.constant 0 : index
    %c0_86 = arith.constant 0 : index
    %85 = vector.load %arg11[%c0_85, %c0_86] : memref<128x128xbf16, #tpu.memory_space<vmem>>, vector<128x128xbf16>
    %cst_87 = arith.constant dense<0.000000e+00> : vector<256x128xf32>
    %86 = tpu.matmul %84, %85, %cst_87 {dimension_numbers = #tpu.dot_dimension_numbers<[1], [0], [0], [1], [0, 0, 1, 1], [], []>} : vector<256x128xbf16>, vector<128x128xbf16>, vector<256x128xf32> -> vector<256x128xf32>
    %c0_88 = arith.constant 0 : index
    %c0_89 = arith.constant 0 : index
    %87 = vector.load %arg12[%c0_88, %c0_89] : memref<1x128xf32, #tpu.memory_space<vmem>>, vector<1x128xf32>
    %88 = vector.broadcast %87 : vector<1x128xf32> to vector<256x128xf32>
    %89 = arith.mulf %86, %88 : vector<256x128xf32>
    %c0_90 = arith.constant 0 : index
    %c0_91 = arith.constant 0 : index
    %90 = vector.load %arg13[%c0_90, %c0_91] : memref<1x128xf32, #tpu.memory_space<vmem>>, vector<1x128xf32>
    %91 = vector.broadcast %90 : vector<1x128xf32> to vector<256x128xf32>
    %92 = arith.addf %89, %91 : vector<256x128xf32>
    %c0_92 = arith.constant 0 : index
    %c0_93 = arith.constant 0 : index
    %c0_94 = arith.constant 0 : index
    %93 = vector.load %arg14[%c0_92, %c0_93, %c0_94] : memref<1x256x128xbf16, #tpu.memory_space<vmem>>, vector<1x256x128xbf16>
    %94 = vector.shape_cast %93 : vector<1x256x128xbf16> to vector<256x128xbf16>
    %95 = arith.extf %94 : vector<256x128xbf16> to vector<256x128xf32>
    %96 = arith.addf %92, %95 : vector<256x128xf32>
    %cst_95 = arith.constant 0.000000e+00 : f32
    %97 = vector.broadcast %cst_95 : f32 to vector<256x128xf32>
    %98 = arith.maximumf %96, %97 : vector<256x128xf32>
    %99 = arith.truncf %98 : vector<256x128xf32> to vector<256x128xbf16>
    %c0_96 = arith.constant 0 : index
    %c0_97 = arith.constant 0 : index
    %c0_98 = arith.constant 0 : index
    %100 = vector.load %arg15[%c0_96, %c0_97, %c0_98] : memref<1x256x128xbf16, #tpu.memory_space<vmem>>, vector<1x256x128xbf16>
    %101 = vector.shape_cast %100 : vector<1x256x128xbf16> to vector<256x128xbf16>
    %102 = vector.shape_cast %99 : vector<256x128xbf16> to vector<1x256x128xbf16>
    tpu.vector_store %arg15[%c0_96, %c0_97, %c0_98], %102 {strides = array<i32>} : memref<1x256x128xbf16, #tpu.memory_space<vmem>>, vector<1x256x128xbf16>,
    return
  }
  func.func @transform_0(%arg0: i32) -> (i32, i32, i32, i32) {
    %c0_i32 = arith.constant 0 : i32
    %c0_i32_0 = arith.constant 0 : i32
    %c0_i32_1 = arith.constant 0 : i32
    %c0_i32_2 = arith.constant 0 : i32
    return %arg0, %c0_i32, %c0_i32_0, %c0_i32_1 : i32, i32, i32, i32
  }
  func.func @transform_1(%arg0: i32) -> (i32, i32) {
    %c0_i32 = arith.constant 0 : i32
    %c0_i32_0 = arith.constant 0 : i32
    %c0_i32_1 = arith.constant 0 : i32
    return %c0_i32, %c0_i32_0 : i32, i32
  }
  func.func @transform_2(%arg0: i32) -> (i32, i32) {
    %c0_i32 = arith.constant 0 : i32
    %c0_i32_0 = arith.constant 0 : i32
    %c0_i32_1 = arith.constant 0 : i32
    return %c0_i32, %c0_i32_0 : i32, i32
  }
  func.func @transform_3(%arg0: i32) -> (i32, i32) {
    %c0_i32 = arith.constant 0 : i32
    %c0_i32_0 = arith.constant 0 : i32
    %c0_i32_1 = arith.constant 0 : i32
    return %c0_i32, %c0_i32_0 : i32, i32
  }
  func.func @transform_4(%arg0: i32) -> (i32, i32) {
    %c0_i32 = arith.constant 0 : i32
    %c0_i32_0 = arith.constant 0 : i32
    %c0_i32_1 = arith.constant 0 : i32
    return %c0_i32, %c0_i32_0 : i32, i32
  }
  func.func @transform_5(%arg0: i32) -> (i32, i32) {
    %c0_i32 = arith.constant 0 : i32
    %c0_i32_0 = arith.constant 0 : i32
    %c0_i32_1 = arith.constant 0 : i32
    return %c0_i32, %c0_i32_0 : i32, i32
  }
  func.func @transform_6(%arg0: i32) -> (i32, i32) {
    %c0_i32 = arith.constant 0 : i32
    %c0_i32_0 = arith.constant 0 : i32
    %c0_i32_1 = arith.constant 0 : i32
    return %c0_i32, %c0_i32_0 : i32, i32
  }
  func.func @transform_7(%arg0: i32) -> (i32, i32) {
    %c0_i32 = arith.constant 0 : i32
    %c0_i32_0 = arith.constant 0 : i32
    %c0_i32_1 = arith.constant 0 : i32
    return %c0_i32, %c0_i32_0 : i32, i32
  }
  func.func @transform_8(%arg0: i32) -> (i32, i32) {
    %c0_i32 = arith.constant 0 : i32
    %c0_i32_0 = arith.constant 0 : i32
    %c0_i32_1 = arith.constant 0 : i32
    return %c0_i32, %c0_i32_0 : i32, i32
  }
  func.func @transform_9(%arg0: i32) -> (i32, i32) {
    %c0_i32 = arith.constant 0 : i32
    %c0_i32_0 = arith.constant 0 : i32
    %c0_i32_1 = arith.constant 0 : i32
    return %c0_i32, %c0_i32_0 : i32, i32
  }
  func.func @transform_10(%arg0: i32) -> (i32, i32) {
    %c0_i32 = arith.constant 0 : i32
    %c0_i32_0 = arith.constant 0 : i32
    %c0_i32_1 = arith.constant 0 : i32
    return %c0_i32, %c0_i32_0 : i32, i32
  }
  func.func @transform_11(%arg0: i32) -> (i32, i32) {
    %c0_i32 = arith.constant 0 : i32
    %c0_i32_0 = arith.constant 0 : i32
    %c0_i32_1 = arith.constant 0 : i32
    return %c0_i32, %c0_i32_0 : i32, i32
  }
  func.func @transform_12(%arg0: i32) -> (i32, i32) {
    %c0_i32 = arith.constant 0 : i32
    %c0_i32_0 = arith.constant 0 : i32
    %c0_i32_1 = arith.constant 0 : i32
    return %c0_i32, %c0_i32_0 : i32, i32
  }
  func.func @transform_13(%arg0: i32) -> (i32, i32, i32) {
    %c0_i32 = arith.constant 0 : i32
    %c0_i32_0 = arith.constant 0 : i32
    %c0_i32_1 = arith.constant 0 : i32
    return %arg0, %c0_i32, %c0_i32_0 : i32, i32, i32
  }
  func.func @transform_14(%arg0: i32) -> (i32, i32, i32) {
    %c0_i32 = arith.constant 0 : i32
    %c0_i32_0 = arith.constant 0 : i32
    %c0_i32_1 = arith.constant 0 : i32
    return %arg0, %c0_i32, %c0_i32_0 : i32, i32, i32
  }
}

module attributes {stable_mosaic.version = 11 : i64} {
  func.func @_conv1_kernel(%arg0: i32, %arg1: i32, %arg2: memref<1x256x128xbf16, #tpu.memory_space<vmem>>, %arg3: memref<128x128xbf16, #tpu.memory_space<vmem>>, %arg4: memref<1x128xf32, #tpu.memory_space<vmem>>, %arg5: memref<1x128xf32, #tpu.memory_space<vmem>>, %arg6: memref<1x256x128xbf16, #tpu.memory_space<vmem>>) attributes {dimension_semantics = [#tpu.dimension_semantics<parallel>, #tpu.dimension_semantics<parallel>], iteration_bounds = array<i64: 2, 1>, scalar_prefetch = 0 : i64, scratch_operands = 0 : i64, tpu.core_type = #tpu.core_type<tc>, window_params = [{transform_indices = @transform_0, window_bounds = array<i64: 1, 256, 128>}, {pipeline_mode = #tpu.pipeline_mode<synchronous>, transform_indices = @transform_1, window_bounds = array<i64: 128, 128>}, {pipeline_mode = #tpu.pipeline_mode<synchronous>, transform_indices = @transform_2, window_bounds = array<i64: 1, 128>}, {pipeline_mode = #tpu.pipeline_mode<synchronous>, transform_indices = @transform_3, window_bounds = array<i64: 1, 128>}, {transform_indices = @transform_4, window_bounds = array<i64: 1, 256, 128>}]} {
    %c0 = arith.constant 0 : index
    %c0_0 = arith.constant 0 : index
    %c0_1 = arith.constant 0 : index
    %0 = vector.load %arg2[%c0, %c0_0, %c0_1] : memref<1x256x128xbf16, #tpu.memory_space<vmem>>, vector<1x256x128xbf16>
    %1 = vector.shape_cast %0 : vector<1x256x128xbf16> to vector<256x128xbf16>
    %c0_2 = arith.constant 0 : index
    %c0_3 = arith.constant 0 : index
    %2 = vector.load %arg3[%c0_2, %c0_3] : memref<128x128xbf16, #tpu.memory_space<vmem>>, vector<128x128xbf16>
    %cst = arith.constant dense<0.000000e+00> : vector<256x128xf32>
    %3 = tpu.matmul %1, %2, %cst {dimension_numbers = #tpu.dot_dimension_numbers<[1], [0], [0], [1], [0, 0, 1, 1], [], []>} : vector<256x128xbf16>, vector<128x128xbf16>, vector<256x128xf32> -> vector<256x128xf32>
    %c0_4 = arith.constant 0 : index
    %c0_5 = arith.constant 0 : index
    %4 = vector.load %arg4[%c0_4, %c0_5] : memref<1x128xf32, #tpu.memory_space<vmem>>, vector<1x128xf32>
    %5 = vector.broadcast %4 : vector<1x128xf32> to vector<256x128xf32>
    %6 = arith.mulf %3, %5 : vector<256x128xf32>
    %c0_6 = arith.constant 0 : index
    %c0_7 = arith.constant 0 : index
    %7 = vector.load %arg5[%c0_6, %c0_7] : memref<1x128xf32, #tpu.memory_space<vmem>>, vector<1x128xf32>
    %8 = vector.broadcast %7 : vector<1x128xf32> to vector<256x128xf32>
    %9 = arith.addf %6, %8 : vector<256x128xf32>
    %cst_8 = arith.constant 0.000000e+00 : f32
    %10 = vector.broadcast %cst_8 : f32 to vector<256x128xf32>
    %11 = arith.maximumf %9, %10 : vector<256x128xf32>
    %12 = arith.truncf %11 : vector<256x128xf32> to vector<256x128xbf16>
    %c0_9 = arith.constant 0 : index
    %c0_10 = arith.constant 0 : index
    %c0_11 = arith.constant 0 : index
    %13 = vector.load %arg6[%c0_9, %c0_10, %c0_11] : memref<1x256x128xbf16, #tpu.memory_space<vmem>>, vector<1x256x128xbf16>
    %14 = vector.shape_cast %13 : vector<1x256x128xbf16> to vector<256x128xbf16>
    %15 = vector.shape_cast %12 : vector<256x128xbf16> to vector<1x256x128xbf16>
    tpu.vector_store %arg6[%c0_9, %c0_10, %c0_11], %15 {strides = array<i32>} : memref<1x256x128xbf16, #tpu.memory_space<vmem>>, vector<1x256x128xbf16>,
    return
  }
  func.func @transform_0(%arg0: i32, %arg1: i32) -> (i32, i32, i32) {
    %c0_i32 = arith.constant 0 : i32
    %c0_i32_0 = arith.constant 0 : i32
    return %arg0, %arg1, %c0_i32 : i32, i32, i32
  }
  func.func @transform_1(%arg0: i32, %arg1: i32) -> (i32, i32) {
    %c0_i32 = arith.constant 0 : i32
    %c0_i32_0 = arith.constant 0 : i32
    %c0_i32_1 = arith.constant 0 : i32
    return %c0_i32, %c0_i32_0 : i32, i32
  }
  func.func @transform_2(%arg0: i32, %arg1: i32) -> (i32, i32) {
    %c0_i32 = arith.constant 0 : i32
    %c0_i32_0 = arith.constant 0 : i32
    %c0_i32_1 = arith.constant 0 : i32
    return %c0_i32, %c0_i32_0 : i32, i32
  }
  func.func @transform_3(%arg0: i32, %arg1: i32) -> (i32, i32) {
    %c0_i32 = arith.constant 0 : i32
    %c0_i32_0 = arith.constant 0 : i32
    %c0_i32_1 = arith.constant 0 : i32
    return %c0_i32, %c0_i32_0 : i32, i32
  }
  func.func @transform_4(%arg0: i32, %arg1: i32) -> (i32, i32, i32) {
    %c0_i32 = arith.constant 0 : i32
    %c0_i32_0 = arith.constant 0 : i32
    return %arg0, %arg1, %c0_i32 : i32, i32, i32
  }
}

</mosaic_0001>

<bundles_post_ra>
// kernel: bottleneck_forward.2
= control target key start
LH: loop header
LB: loop body
LE: loop exit
PB: predicated region body
PF: predicated region fallthrough
CT: control target
= control target key end

     0   :  { %s1331_s15 = smov 0   ;;  %s1333_s16 = smov 0   ;;  %s1505_s0 = inlined_call_operand.vmem [shape: bf16[2,256,128], index: 0, kind: input, shape index: {}]   ;;  %s1506_s1 = inlined_call_operand.vmem [shape: bf16[128,128], index: 1, kind: input, shape index: {}]   ;;  %s1507_s2 = inlined_call_operand.vmem [shape: f32[1,128], index: 2, kind: input, shape index: {}]   ;;  %s1508_s3 = inlined_call_operand.vmem [shape: f32[1,128], index: 3, kind: input, shape index: {}]   ;;  %s1509_s4 = inlined_call_operand.vmem [shape: bf16[2,256,128], index: 4, kind: output, shape index: {}]  }
   0x1   :  { %s1335_s17 = smov 0  }
   0x2 LB: > { %s26_s18 = sadd.s32 1, %s1300_s16  ;;  %p952_p0 = scmp.ge.s32.totalorder %s1304_s17, 1  ;;  %s1304_s17 = sphi %s1335_s17, %s14_s17   ;;  %s1300_s16 = sphi %s1333_s16, %s1511_s16   ;;  %s1296_s15 = sphi %s1331_s15, %s1510_s15  }
   0x3   : > { %p28_p1 = scmp.ge.s32.totalorder %s26_s18, 2  ;;  %p183_p2 = scmp.lt.s32.totalorder %s1304_s17, 3 }
   0x5   : > { %s1513_s18 = smov (%p28_p1, %s26_s18), 0  ;;  %p184_p3 = pnand %p952_p0, %p183_p2 }
   0x6   : > { %p218_p4 = scmp.lt.s32.totalorder (!%p184_p3), %s1296_s15, 1 }
   0x7   : > { %187 = sbr.rel (%p184_p3) target bundleno = 277 (0x115), region = 36 }
   0xc   : > { %v1258_v0 = vld [vmem:[%s1506_s1 + $0x38] sm:$0xff]   ;;  %v1259_v1 = vld [vmem:[%s1506_s1 + $0x30] sm:$0xff]   ;;  %s1515_s15 = smov (!%p218_p4, %s1296_s15), 1  ;;  %v1260_v2 = vld [vmem:[%s1506_s1 + $0x28] sm:$0xff]  }
   0xd   : > { %1170 = vmatprep.subr.bf16.mxu0 %v1258_v0  ;;  %1218 = vmatprep.subr.bf16.mxu1 %v1258_v0  ;;  %s1017_s25 = sshll.u32 %s1515_s15, 7  ;;  %v1261_v3 = vld [vmem:[%s1506_s1 + $0x20] sm:$0xff]   ;;  %v1262_v6 = vld [vmem:[%s1506_s1 + $0x18] sm:$0xff]   ;;  %v1263_v7 = vld [vmem:[%s1506_s1 + $0x10] sm:$0xff]  }
   0xe   : > { %1171 = vmatpush3.bf16.msra.mxu0 %v1258_v0  ;;  %1226 = vmatpush3.bf16.msra.mxu1 %v1258_v0  ;;  %s1366_s28 = scalar_lea.vmem %s1505_s0, %s1017_s25  ;;  %v1264_v8 = vld [vmem:[%s1506_s1 + $0x8] sm:$0xff]   ;;  %v1265_v9 = vld [vmem:[%s1506_s1] sm:$0xff]   ;;  %s1432_s23 = scalar_lea.vmem %s1509_s4, %s1017_s25 }
   0xf   : > { %1172 = vmatprep.subr.bf16.mxu0 %v1259_v1  ;;  %1219 = vmatprep.subr.bf16.mxu1 %v1259_v1  ;;  %v1266_v4 = vld [vmem:[%s1366_s28] sm:$0xff]   ;;  %v1268_v10 = vld [vmem:[%s1366_s28 + $0x8] sm:$0xff]   ;;  %v1270_v12 = vld [vmem:[%s1366_s28 + $0x10] sm:$0xff]  }
  0x10   : > { %v1267_v5 = vld [vmem:[%s1366_s28 + $0x40] sm:$0xff]   ;;  %1186 = vmatprep.mubr.bf16.mxu0 %v1266_v4  ;;  %v1269_v11 = vld [vmem:[%s1366_s28 + $0x48] sm:$0xff]   ;;  %v1271_v13 = vld [vmem:[%s1366_s28 + $0x50] sm:$0xff]  }
  0x11   : > { %1202 = vmatprep.mubr.bf16.mxu1 %v1267_v5  ;;  %v1272_v14 = vld [vmem:[%s1366_s28 + $0x18] sm:$0xff]   ;;  %v1274_v16 = vld [vmem:[%s1366_s28 + $0x20] sm:$0xff]   ;;  %v1276_v18 = vld [vmem:[%s1366_s28 + $0x28] sm:$0xff]  }
  0x12   : > { %1173 = vmatpush3.bf16.msra.mxu0 %v1259_v1  ;;  %1227 = vmatpush3.bf16.msra.mxu1 %v1259_v1  ;;  %v1273_v15 = vld [vmem:[%s1366_s28 + $0x58] sm:$0xff]   ;;  %v1275_v17 = vld [vmem:[%s1366_s28 + $0x60] sm:$0xff]   ;;  %v1277_v19 = vld [vmem:[%s1366_s28 + $0x68] sm:$0xff]  }
  0x13   : > { %1174 = vmatprep.subr.bf16.mxu0 %v1260_v2  ;;  %1220 = vmatprep.subr.bf16.mxu1 %v1260_v2  ;;  %v1278_v20 = vld [vmem:[%s1366_s28 + $0x30] sm:$0xff]   ;;  %v1280_v22 = vld [vmem:[%s1366_s28 + $0x38] sm:$0xff]   ;;  %v1402_v24 = vld [vmem:[%s1507_s2] ss:$0 sm:$0xff] }
  0x14   : > { %v1279_v21 = vld [vmem:[%s1366_s28 + $0x70] sm:$0xff]   ;;  %v1281_v23 = vld [vmem:[%s1366_s28 + $0x78] sm:$0xff]   ;;  %v1409_v29 = vld [vmem:[%s1508_s3] ss:$0 sm:$0xff] }
  0x16   : > { %1175 = vmatpush3.bf16.msra.mxu0 %v1260_v2  ;;  %1228 = vmatpush3.bf16.msra.mxu1 %v1260_v2 }
  0x17   : > { %1176 = vmatprep.subr.bf16.mxu0 %v1261_v3  ;;  %1221 = vmatprep.subr.bf16.mxu1 %v1261_v3 }
  0x1a   : > { %1177 = vmatpush3.bf16.msra.mxu0 %v1261_v3  ;;  %1229 = vmatpush3.bf16.msra.mxu1 %v1261_v3 }
  0x1b   : > { %1178 = vmatprep.subr.bf16.mxu0 %v1262_v6  ;;  %1222 = vmatprep.subr.bf16.mxu1 %v1262_v6 }
  0x1e   : > { %1179 = vmatpush3.bf16.msra.mxu0 %v1262_v6  ;;  %1230 = vmatpush3.bf16.msra.mxu1 %v1262_v6 }
  0x1f   : > { %1180 = vmatprep.subr.bf16.mxu0 %v1263_v7  ;;  %1223 = vmatprep.subr.bf16.mxu1 %v1263_v7 }
  0x22   : > { %1181 = vmatpush3.bf16.msra.mxu0 %v1263_v7  ;;  %1231 = vmatpush3.bf16.msra.mxu1 %v1263_v7 }
  0x23   : > { %1182 = vmatprep.subr.bf16.mxu0 %v1264_v8  ;;  %1224 = vmatprep.subr.bf16.mxu1 %v1264_v8 }
  0x26   : > { %1183 = vmatpush3.bf16.msra.mxu0 %v1264_v8  ;;  %1232 = vmatpush3.bf16.msra.mxu1 %v1264_v8 }
  0x27   : > { %1184 = vmatprep.subr.bf16.mxu0 %v1265_v9  ;;  %1225 = vmatprep.subr.bf16.mxu1 %v1265_v9 }
  0x2a   : > { %1185 = vmatpush3.bf16.msra.mxu0 %v1265_v9  ;;  %1233 = vmatpush3.bf16.msra.mxu1 %v1265_v9 }
  0x2d   : > { %1187 = vmatmul.mubr.bf16.vlgmr.msra.gmra.mxu0 %v1268_v10  ;;  %1203 = vmatmul.mubr.bf16.vlgmr.msra.gmra.mxu1 %v1269_v11 }
  0x2e   : > { %1190 = vmatprep.mubr.bf16.mxu0 %v1270_v12  ;;  %1206 = vmatprep.mubr.bf16.mxu1 %v1271_v13 }
  0x35   : > { %1191 = vmatmul.mubr.bf16.gmra.mxu0 %v1272_v14  ;;  %1207 = vmatmul.mubr.bf16.gmra.mxu1 %v1273_v15 }
  0x36   : > { %1194 = vmatprep.mubr.bf16.mxu0 %v1274_v16  ;;  %1210 = vmatprep.mubr.bf16.mxu1 %v1275_v17 }
  0x3d   : > { %1195 = vmatmul.mubr.bf16.gmra.mxu0 %v1276_v18  ;;  %1211 = vmatmul.mubr.bf16.gmra.mxu1 %v1277_v19 }
  0x3e   : > { %1198 = vmatprep.mubr.bf16.mxu0 %v1278_v20  ;;  %1214 = vmatprep.mubr.bf16.mxu1 %v1279_v21 }
  0x45   : > { %1199 = vmatmul.mubr.bf16.gmra.mxu0 %v1280_v22  ;;  %1215 = vmatmul.mubr.bf16.gmra.mxu1 %v1281_v23 }
  0xed   : > { %v1188_v25 = vpop.f32.mrf.mxu0  ;;  %v1204_v26 = vpop.f32.mrf.mxu1 }
  0xee   : > { %v600_v27 = vmul.f32 %v1188_v25, %v1402_v24  ;;  %v616_v28 = vmul.f32 %v1204_v26, %v1402_v24 }
  0xef   : > { %v464_v30 = vpop.f32.mrf.mxu0  ;;  %v528_v31 = vpop.f32.mrf.mxu1 }
  0xf0   : > { %v598_v32 = vmul.f32 %v1402_v24, %v464_v30  ;;  %v614_v33 = vmul.f32 %v1402_v24, %v528_v31  ;;  %v639_v36 = vadd.f32 %v1409_v29, %v600_v27  ;;  %v655_v37 = vadd.f32 %v1409_v29, %v616_v28 }
  0xf1   : > { %v1189_v34 = vpop.f32.mrf.mxu0  ;;  %v1205_v35 = vpop.f32.mrf.mxu1 }
  0xf2   : > { %v601_v38 = vmul.f32 %v1189_v34, %v1402_v24  ;;  %v617_v39 = vmul.f32 %v1205_v35, %v1402_v24  ;;  %v637_v42 = vadd.f32 %v1409_v29, %v598_v32  ;;  %v653_v43 = vadd.f32 %v1409_v29, %v614_v33 }
  0xf3   : > { %v467_v40 = vpop.f32.mrf.mxu0  ;;  %v531_v41 = vpop.f32.mrf.mxu1  ;;  %v671_v50 = vmax.f32 %v639_v36, 0.0  ;;  %v687_v51 = vmax.f32 %v655_v37, 0.0 }
  0xf4   : > { %v599_v44 = vmul.f32 %v1402_v24, %v467_v40  ;;  %v615_v45 = vmul.f32 %v1402_v24, %v531_v41  ;;  %v640_v46 = vadd.f32 %v1409_v29, %v601_v38  ;;  %v656_v47 = vadd.f32 %v1409_v29, %v617_v39 }
  0xf5   : > { %v1192_v48 = vpop.f32.mrf.mxu0  ;;  %v1208_v49 = vpop.f32.mrf.mxu1  ;;  %v669_v60 = vmax.f32 %v637_v42, 0.0  ;;  %v685_v61 = vmax.f32 %v653_v43, 0.0 }
  0xf6   : > { %v638_v52 = vadd.f32 %v1409_v29, %v599_v44  ;;  %v654_v53 = vadd.f32 %v1409_v29, %v615_v45  ;;  %v672_v54 = vmax.f32 %v640_v46, 0.0  ;;  %v688_v55 = vmax.f32 %v656_v47, 0.0 }
  0xf7   : > { %v604_v56 = vmul.f32 %v1192_v48, %v1402_v24  ;;  %v620_v57 = vmul.f32 %v1208_v49, %v1402_v24  ;;  %v480_v58 = vpop.f32.mrf.mxu0  ;;  %v544_v59 = vpop.f32.mrf.mxu1 }
  0xf8   : > { %v670_v62 = vmax.f32 %v638_v52, 0.0  ;;  %v686_v63 = vmax.f32 %v654_v53, 0.0  ;;  %v1059_v0 = vpack.c.bf16 %v672_v54, %v671_v50  ;;  %v1099_v1 = vpack.c.bf16 %v688_v55, %v687_v51 }
  0xf9   : > { %v602_v2 = vmul.f32 %v1402_v24, %v480_v58  ;;  %v618_v3 = vmul.f32 %v1402_v24, %v544_v59  ;;  %v1193_v4 = vpop.f32.mrf.mxu0  ;;  %v1209_v5 = vpop.f32.mrf.mxu1  ;;  %v643_v8 = vadd.f32 %v1409_v29, %v604_v56  ;;  %v659_v9 = vadd.f32 %v1409_v29, %v620_v57 }
  0xfa   : > { %v1054_v6 = vpack.c.bf16 %v670_v62, %v669_v60  ;;  %v1094_v7 = vpack.c.bf16 %v686_v63, %v685_v61  ;;  %1131 = vst [vmem:[%s1432_s23 + $0x8] sm:$0xff] %v1059_v0   ;;  %1139 = vst [vmem:[%s1432_s23 + $0x48] sm:$0xff] %v1099_v1   ;;  %v605_v10 = vmul.f32 %v1193_v4, %v1402_v24 }
  0xfb   : > { %v621_v11 = vmul.f32 %v1209_v5, %v1402_v24  ;;  %v483_v12 = vpop.f32.mrf.mxu0  ;;  %v547_v13 = vpop.f32.mrf.mxu1  ;;  %v641_v14 = vadd.f32 %v1409_v29, %v602_v2  ;;  %v657_v15 = vadd.f32 %v1409_v29, %v618_v3  ;;  %v675_v27 = vmax.f32 %v643_v8, 0.0 }
  0xfc   : > { %1055 = vst [vmem:[%s1432_s23] sm:$0xff] %v1054_v6   ;;  %1138 = vst [vmem:[%s1432_s23 + $0x40] sm:$0xff] %v1094_v7   ;;  %v603_v16 = vmul.f32 %v1402_v24, %v483_v12  ;;  %v619_v17 = vmul.f32 %v1402_v24, %v547_v13  ;;  %v644_v18 = vadd.f32 %v1409_v29, %v605_v10  ;;  %v691_v28 = vmax.f32 %v659_v9, 0.0 }
  0xfd   : > { %v660_v19 = vadd.f32 %v1409_v29, %v621_v11  ;;  %v1196_v20 = vpop.f32.mrf.mxu0  ;;  %v1212_v21 = vpop.f32.mrf.mxu1  ;;  %v673_v34 = vmax.f32 %v641_v14, 0.0  ;;  %v689_v35 = vmax.f32 %v657_v15, 0.0 }
  0xfe   : > { %v642_v22 = vadd.f32 %v1409_v29, %v603_v16  ;;  %v658_v23 = vadd.f32 %v1409_v29, %v619_v17  ;;  %v608_v25 = vmul.f32 %v1196_v20, %v1402_v24  ;;  %v624_v26 = vmul.f32 %v1212_v21, %v1402_v24 }
  0xff   : > { %v676_v30 = vmax.f32 %v644_v18, 0.0  ;;  %v692_v31 = vmax.f32 %v660_v19, 0.0  ;;  %v496_v32 = vpop.f32.mrf.mxu0  ;;  %v560_v33 = vpop.f32.mrf.mxu1 }
 0x100   : > { %v674_v36 = vmax.f32 %v642_v22, 0.0  ;;  %v690_v37 = vmax.f32 %v658_v23, 0.0  ;;  %v606_v40 = vmul.f32 %v1402_v24, %v496_v32  ;;  %v622_v41 = vmul.f32 %v1402_v24, %v560_v33 }
 0x101   : > { %v1069_v38 = vpack.c.bf16 %v676_v30, %v675_v27  ;;  %v1109_v39 = vpack.c.bf16 %v692_v31, %v691_v28  ;;  %v1197_v42 = vpop.f32.mrf.mxu0  ;;  %v1213_v43 = vpop.f32.mrf.mxu1  ;;  %v647_v46 = vadd.f32 %v1409_v29, %v608_v25  ;;  %v663_v47 = vadd.f32 %v1409_v29, %v624_v26 }
 0x102   : > { %v1064_v44 = vpack.c.bf16 %v674_v36, %v673_v34  ;;  %v1104_v45 = vpack.c.bf16 %v690_v37, %v689_v35  ;;  %v609_v48 = vmul.f32 %v1197_v42, %v1402_v24  ;;  %v625_v49 = vmul.f32 %v1213_v43, %v1402_v24 }
 0x103   : > { %1133 = vst [vmem:[%s1432_s23 + $0x18] sm:$0xff] %v1069_v38   ;;  %1141 = vst [vmem:[%s1432_s23 + $0x58] sm:$0xff] %v1109_v39   ;;  %v499_v50 = vpop.f32.mrf.mxu0  ;;  %v563_v51 = vpop.f32.mrf.mxu1  ;;  %v645_v52 = vadd.f32 %v1409_v29, %v606_v40  ;;  %v661_v53 = vadd.f32 %v1409_v29, %v622_v41  ;;  %v679_v60 = vmax.f32 %v647_v46, 0.0  ;;  %v695_v61 = vmax.f32 %v663_v47, 0.0 }
 0x104   : > { %1132 = vst [vmem:[%s1432_s23 + $0x10] sm:$0xff] %v1064_v44   ;;  %1140 = vst [vmem:[%s1432_s23 + $0x50] sm:$0xff] %v1104_v45   ;;  %v607_v54 = vmul.f32 %v1402_v24, %v499_v50  ;;  %v623_v55 = vmul.f32 %v1402_v24, %v563_v51  ;;  %v648_v56 = vadd.f32 %v1409_v29, %v609_v48 }
 0x105   : > { %v664_v57 = vadd.f32 %v1409_v29, %v625_v49  ;;  %v1200_v58 = vpop.f32.mrf.mxu0  ;;  %v1216_v59 = vpop.f32.mrf.mxu1  ;;  %v677_v6 = vmax.f32 %v645_v52, 0.0  ;;  %v693_v7 = vmax.f32 %v661_v53, 0.0 }
 0x106   : > { %v646_v62 = vadd.f32 %v1409_v29, %v607_v54  ;;  %v662_v63 = vadd.f32 %v1409_v29, %v623_v55  ;;  %v680_v0 = vmax.f32 %v648_v56, 0.0  ;;  %v612_v2 = vmul.f32 %v1200_v58, %v1402_v24 }
 0x107   : > { %v696_v1 = vmax.f32 %v664_v57, 0.0  ;;  %v628_v3 = vmul.f32 %v1216_v59, %v1402_v24  ;;  %v512_v4 = vpop.f32.mrf.mxu0  ;;  %v576_v5 = vpop.f32.mrf.mxu1 }
 0x108   : > { %v678_v8 = vmax.f32 %v646_v62, 0.0  ;;  %v694_v9 = vmax.f32 %v662_v63, 0.0  ;;  %v1079_v10 = vpack.c.bf16 %v680_v0, %v679_v60  ;;  %v610_v12 = vmul.f32 %v1402_v24, %v512_v4 }
 0x109   : > { %v1119_v11 = vpack.c.bf16 %v696_v1, %v695_v61  ;;  %v626_v13 = vmul.f32 %v1402_v24, %v576_v5  ;;  %v1201_v14 = vpop.f32.mrf.mxu0  ;;  %v1217_v15 = vpop.f32.mrf.mxu1  ;;  %v651_v18 = vadd.f32 %v1409_v29, %v612_v2  ;;  %v667_v19 = vadd.f32 %v1409_v29, %v628_v3 }
 0x10a   : > { %v1074_v16 = vpack.c.bf16 %v678_v8, %v677_v6  ;;  %v1114_v17 = vpack.c.bf16 %v694_v9, %v693_v7  ;;  %1135 = vst [vmem:[%s1432_s23 + $0x28] sm:$0xff] %v1079_v10   ;;  %v613_v20 = vmul.f32 %v1201_v14, %v1402_v24  ;;  %v629_v21 = vmul.f32 %v1217_v15, %v1402_v24 }
 0x10b   : > { %1143 = vst [vmem:[%s1432_s23 + $0x68] sm:$0xff] %v1119_v11   ;;  %v515_v22 = vpop.f32.mrf.mxu0  ;;  %v579_v23 = vpop.f32.mrf.mxu1  ;;  %v649_v25 = vadd.f32 %v1409_v29, %v610_v12  ;;  %v665_v26 = vadd.f32 %v1409_v29, %v626_v13  ;;  %v683_v34 = vmax.f32 %v651_v18, 0.0  ;;  %v699_v35 = vmax.f32 %v667_v19, 0.0 }
 0x10c   : > { %1134 = vst [vmem:[%s1432_s23 + $0x20] sm:$0xff] %v1074_v16   ;;  %1142 = vst [vmem:[%s1432_s23 + $0x60] sm:$0xff] %v1114_v17   ;;  %v611_v27 = vmul.f32 %v1402_v24, %v515_v22  ;;  %v627_v28 = vmul.f32 %v1402_v24, %v579_v23  ;;  %v652_v30 = vadd.f32 %v1409_v29, %v613_v20 }
 0x10d   : > { %v668_v31 = vadd.f32 %v1409_v29, %v629_v21  ;;  %v681_v38 = vmax.f32 %v649_v25, 0.0  ;;  %v697_v39 = vmax.f32 %v665_v26, 0.0 }
 0x10e   : > { %v650_v32 = vadd.f32 %v1409_v29, %v611_v27  ;;  %v666_v33 = vadd.f32 %v1409_v29, %v627_v28  ;;  %v684_v36 = vmax.f32 %v652_v30, 0.0 }
 0x10f   : > { %v700_v37 = vmax.f32 %v668_v31, 0.0 }
 0x110   : > { %v682_v40 = vmax.f32 %v650_v32, 0.0  ;;  %v698_v24 = vmax.f32 %v666_v33, 0.0  ;;  %v1089_v41 = vpack.c.bf16 %v684_v36, %v683_v34 }
 0x111   : > { %v1129_v42 = vpack.c.bf16 %v700_v37, %v699_v35 }
 0x112   : > { %v1084_v43 = vpack.c.bf16 %v682_v40, %v681_v38  ;;  %v1124_v44 = vpack.c.bf16 %v698_v24, %v697_v39  ;;  %1137 = vst [vmem:[%s1432_s23 + $0x38] sm:$0xff] %v1089_v41  }
 0x113   : > { %1145 = vst [vmem:[%s1432_s23 + $0x78] sm:$0xff] %v1129_v42  }
 0x114   : > { %1136 = vst [vmem:[%s1432_s23 + $0x30] sm:$0xff] %v1084_v43   ;;  %1144 = vst [vmem:[%s1432_s23 + $0x70] sm:$0xff] %v1124_v44  }
 0x115 PF: > { %s14_s17 = sadd.s32 1, %s1304_s17   ;;  %s1510_s15 = smov %s1300_s16 }
 0x116   : > { %p11_p5 = scmp.ge.s32.totalorder %s14_s17, 4   ;;  %s1511_s16 = smov %s1513_s18 }
 0x118   :  { %13 = sbr.rel (!%p11_p5) target bundleno = 2 (0x2), region = 66 }

// kernel: bottleneck_forward.3
= control target key start
LH: loop header
LB: loop body
LE: loop exit
PB: predicated region body
PF: predicated region fallthrough
CT: control target
= control target key end

     0   :  { %s9043_s29 = smov 0   ;;  %s10648_s0 = inlined_call_operand.vmem [shape: bf16[2,16,16,128], index: 0, kind: input, shape index: {}]   ;;  %s10649_s1 = inlined_call_operand.vmem [shape: bf16[1152,128], index: 1, kind: input, shape index: {}]   ;;  %s10650_s2 = inlined_call_operand.vmem [shape: f32[1,128], index: 2, kind: input, shape index: {}]   ;;  %s10651_s3 = inlined_call_operand.vmem [shape: f32[1,128], index: 3, kind: input, shape index: {}]   ;;  %s10652_s4 = inlined_call_operand.vmem [shape: bf16[128,128], index: 4, kind: input, shape index: {}]   ;;  %s10653_s5 = inlined_call_operand.vmem [shape: f32[1,128], index: 5, kind: input, shape index: {}]   ;;  %s10654_s6 = inlined_call_operand.vmem [shape: f32[1,128], index: 6, kind: input, shape index: {}]   ;;  %s10655_s7 = inlined_call_operand.vmem [shape: f32[1,128], index: 7, kind: input, shape index: {}]   ;;  %s10656_s8 = inlined_call_operand.vmem [shape: bf16[128,128], index: 8, kind: input, shape index: {}]   ;;  %s10657_s9 = inlined_call_operand.vmem [shape: f32[1,128], index: 9, kind: input, shape index: {}]   ;;  %s10658_s10 = inlined_call_operand.vmem [shape: bf16[128,128], index: 10, kind: input, shape index: {}]   ;;  %s10659_s11 = inlined_call_operand.vmem [shape: f32[1,128], index: 11, kind: input, shape index: {}]   ;;  %s10660_s12 = inlined_call_operand.vmem [shape: f32[1,128], index: 12, kind: input, shape index: {}]   ;;  %s10661_s13 = inlined_call_operand.vmem [shape: bf16[2,256,128], index: 13, kind: input, shape index: {}]   ;;  %s10662_s14 = inlined_call_operand.vmem [shape: bf16[2,256,128], index: 14, kind: output, shape index: {}]  }
   0x1 LB: > { %s7244_s30 = sadd.s32 4294967295, %s8963_s29   ;;  %p7248_p0 = scmp.ge.s32.totalorder %s8963_s29, 1  ;;  %s8963_s29 = sphi %s9043_s29, %s24_s29  }
   0x2   : > { %p422_p1 = scmp.lt.s32.totalorder %s8963_s29, 3 }
   0x4   : > { %p423_p2 = pnand %p7248_p0, %p422_p1 }
   0x6   : > { %426 = sbr.rel (%p423_p2) target bundleno = 1485 (0x5cd), region = 76 }
   0xb   : > { %v8648_v0 = vld [vmem:[%s10649_s1 + $0x78] sm:$0xff]   ;;  %v8965_v2 = vmov 0   ;;  %v8650_v3 = vld [vmem:[%s10649_s1 + $0x70] sm:$0xff]   ;;  %v8652_v5 = vld [vmem:[%s10649_s1 + $0x68] sm:$0xff]   ;;  %p473_p3 = scmp.lt.s32.totalorder %s7244_s30, 1  ;;  %vm496_vm0 = vcmask 1040384  }
   0xc   : > { %v8649_v1 = vld [vmem:[%s10649_s1 + $0x38] sm:$0xff]   ;;  %489 = vst [vmem:[#allocation2] sm:$0xf] %v8965_v2  ;;  %490 = vst [vmem:[#allocation2 + $0x4] sm:$0xf] %v8965_v2  ;;  %7971 = vmatprep.subr.bf16.mxu0 %v8648_v0  ;;  %8621 = vmatprep.subr.bf16.mxu1 %v8648_v0  ;;  %v8651_v4 = vld [vmem:[%s10649_s1 + $0x30] sm:$0xff]  }
   0xd   : > { %491 = vst [vmem:[#allocation2 + $0x8] sm:$0x1] %v8965_v2  ;;  %493 = vst [vmem:[#allocation2 + $0xcc] sm:$0xf] %v8965_v2  ;;  %7972 = vmatpush3.bf16.msra.mxu0 %v8649_v1  ;;  %8629 = vmatpush3.bf16.msra.mxu1 %v8649_v1  ;;  %v8653_v6 = vld [vmem:[%s10649_s1 + $0x28] sm:$0xff]   ;;  %v8654_v7 = vld [vmem:[%s10649_s1 + $0x60] sm:$0xff]  }
   0xe   : > { %494 = vst [vmem:[#allocation2 + $0xd0] sm:$0xf] %v8965_v2  ;;  %495 = vst [vmem:[#allocation2 + $0xd4] sm:$0x1] %v8965_v2  ;;  %7973 = vmatprep.subr.bf16.mxu0 %v8650_v3  ;;  %8622 = vmatprep.subr.bf16.mxu1 %v8650_v3  ;;  %s10712_s30 = smov (!%p473_p3, %s7244_s30), 1  ;;  %v8655_v8 = vld [vmem:[%s10649_s1 + $0x20] sm:$0xff]  }
   0xf   : > { %v8656_v9 = vld [vmem:[%s10649_s1 + $0x58] sm:$0xff]   ;;  %s9085_s21 = sshll.u32 %s10712_s30, 7  ;;  %v8658_v11 = vld [vmem:[%s10649_s1 + $0x50] sm:$0xff]   ;;  %vm497_vm1 = vsmask.f32 256  ;;  %vm964_vm7 = vcmask 1043456  }
  0x10   : > { %v8657_v10 = vld [vmem:[%s10649_s1 + $0x18] sm:$0xff]   ;;  %vm553_vm2 = vsmask.f32 7938  ;;  %vm9092_vm3 = vmand %vm496_vm0, %vm497_vm1  ;;  %s9100_s25 = scalar_lea.vmem %s10648_s0, %s9085_s21  ;;  %vm1190_vm5 = vsmask.f32 3328  ;;  %v8659_v19 = vld [vmem:[%s10649_s1 + $0x10] sm:$0xff]   ;;  %s10531_s24 = scalar_lea.vmem %s10661_s13, %s9085_s21 }
  0x11   : > { %7974 = vmatpush3.bf16.msra.mxu0 %v8651_v4  ;;  %8630 = vmatpush3.bf16.msra.mxu1 %v8651_v4  ;;  %vm9106_vm4 = vmand %vm496_vm0, %vm553_vm2  ;;  %vm1191_vm6 = vsmask.f32 7440  ;;  %v532_v23 = vld [vmem:[#allocation2 + $0x84] sm:$0x1]  ;;  %v8660_v24 = vld [vmem:[%s10649_s1 + $0x48] sm:$0xff]   ;;  %vm1737_vm12 = vcmask 1042432   ;;  %s10561_s18 = scalar_lea.vmem %s10662_s14, %s9085_s21 }
  0x12   : > { %7975 = vmatprep.subr.bf16.mxu0 %v8652_v5  ;;  %8623 = vmatprep.subr.bf16.mxu1 %v8652_v5  ;;  %v533_v25 = vsel %vm9092_vm3, 0, %v532_v23  ;;  %v588_v26 = vld [vmem:[#allocation2 + $0x8c] sm:$0x1]  ;;  %v629_v27 = vld [vmem:[%s9100_s25 + $0x50] sm:$0xf]  ;;  %v8662_v38 = vld [vmem:[%s10649_s1 + $0x40] sm:$0xff]  }
  0x13   : > { %v499_v12 = vld [vmem:[#allocation2] sm:$0x1]  ;;  %v1079_v15 = vld [vmem:[#allocation2 + $0x4] sm:$0xf]  ;;  %534 = vst [vmem:[#allocation2 + $0x84] sm:$0x1] %v533_v25  ;;  %vm9143_vm10 = vmand %vm964_vm7, %vm553_vm2 }
  0x14   : > { %v555_v14 = vld [vmem:[#allocation2 + $0x8] sm:$0x1]  ;;  %v500_v16 = vsel %vm9092_vm3, 0, %v499_v12  ;;  %1111 = vst [vmem:[#allocation3 + $0x24] sm:$0xf] %v1079_v15  ;;  %v589_v30 = vsel %vm9106_vm4, 0, %v588_v26  ;;  %vm9159_vm11 = vmor %vm1190_vm5, %vm1191_vm6 }
  0x15   : > { %7976 = vmatpush3.bf16.msra.mxu0 %v8653_v6  ;;  %8631 = vmatpush3.bf16.msra.mxu1 %v8653_v6  ;;  %v1143_v18 = vld [vmem:[#allocation2 + $0x4] sm:$0xf]  ;;  %501 = vst [vmem:[#allocation2] sm:$0x1] %v500_v16  ;;  %v556_v20 = vsel %vm9106_vm4, 0, %v555_v14  ;;  %v814_v32 = vshrl.u32 %v629_v27, 16 }
  0x16   : > { %7977 = vmatprep.subr.bf16.mxu0 %v8654_v7  ;;  %8624 = vmatprep.subr.bf16.mxu1 %v8654_v7  ;;  %v1203_v21 = vshll.u32 %v1143_v18, 16  ;;  %v1207_v22 = vshrl.u32 %v1143_v18, 16  ;;  %557 = vst [vmem:[#allocation2 + $0x8] sm:$0x1] %v556_v20  ;;  %v630_v31 = vld [vmem:[%s9100_s25 + $0x54] sm:$0xf] }
  0x17   : > { %590 = vst [vmem:[#allocation2 + $0x8c] sm:$0x1] %v589_v30  ;;  %vm641_vm8 = vsmask.f32 4368  ;;  %v817_v33 = vshll.u32 %v629_v27, 16  ;;  %v822_v34 = vshrl.u32 %v630_v31, 16 }
  0x18   : > { %v9121_v28 = vrot.slane %v1203_v21, 5  ;;  %v1209_v29 = vrot.slane %v1207_v22, 4  ;;  %v825_v35 = vshll.u32 %v630_v31, 16  ;;  %v8661_v36 = vld [vmem:[%s10649_s1 + $0x8] sm:$0xff]   ;;  %v816_v37 = vrot.slane %v814_v32, 7  ;;  %v8663_v41 = vld [vmem:[%s10649_s1] sm:$0xff]   ;;  %vm9137_vm9 = vmor %vm497_vm1, %vm641_vm8 }
  0x19   : > { %7978 = vmatpush3.bf16.msra.mxu0 %v8655_v8  ;;  %8632 = vmatpush3.bf16.msra.mxu1 %v8655_v8  ;;  %v824_v40 = vrot.slane %v822_v34, 7  ;;  %v502_v45 = vld [vmem:[#allocation2 + $0xc] sm:$0x1]  ;;  %v558_v46 = vld [vmem:[#allocation2 + $0x14] sm:$0x1]  ;;  %v8670_v56 = vld [vmem:[%s10649_s1 + $0xf8] sm:$0xff]  }
  0x1a   : > { %7979 = vmatprep.subr.bf16.mxu0 %v8656_v9  ;;  %8625 = vmatprep.subr.bf16.mxu1 %v8656_v9  ;;  %v1210_v39 = vor.u32 %v1209_v29, %v9121_v28  ;;  %v819_v43 = vor.u32 %v817_v33, %v816_v37  ;;  %v820_v44 = vrot.slane %v816_v37, 4  ;;  %v503_v52 = vsel %vm9092_vm3, 0, %v502_v45  ;;  %v1036_v61 = vld [vmem:[#allocation2 + $0x84] sm:$0xf]  ;;  %v609_v62 = vld [vmem:[%s9100_s25] sm:$0xf] }
  0x1b   : > { %v827_v49 = vor.u32 %v825_v35, %v824_v40  ;;  %v829_v50 = vrot.slane %v824_v40, 4  ;;  %504 = vst [vmem:[#allocation2 + $0xc] sm:$0x1] %v503_v52  ;;  %v559_v57 = vsel %vm9106_vm4, 0, %v558_v46  ;;  %v610_v4 = vld [vmem:[%s9100_s25 + $0x4] sm:$0xf] }
  0x1c   : > { %v1078_v47 = vld [vmem:[#allocation2] sm:$0xf]  ;;  %v1211_v58 = vrot.slane %v1210_v39, 4  ;;  %560 = vst [vmem:[#allocation2 + $0x14] sm:$0x1] %v559_v57  ;;  %v1037_v2 = vsel %vm9143_vm10, %v819_v43, %v1036_v61  ;;  %v644_v7 = vshrl.u32 %v609_v62, 16 }
  0x1d   : > { %7980 = vmatpush3.bf16.msra.mxu0 %v8657_v10  ;;  %8633 = vmatpush3.bf16.msra.mxu1 %v8657_v10  ;;  %v1142_v48 = vld [vmem:[#allocation2] sm:$0xf]  ;;  %1110 = vst [vmem:[#allocation3] sm:$0xf] %v1078_v47  ;;  %v1144_v53 = vld [vmem:[#allocation2 + $0x8] sm:$0x1]  ;;  %v828_v60 = vsel %vm9137_vm9, %v820_v44, %v827_v49 }
  0x1e   : > { %7981 = vmatprep.subr.bf16.mxu0 %v8658_v11  ;;  %8626 = vmatprep.subr.bf16.mxu1 %v8658_v11  ;;  %v1194_v54 = vshrl.u32 %v1142_v48, 16  ;;  %v1197_v55 = vshll.u32 %v1142_v48, 16  ;;  %v1213_v59 = vshll.u32 %v1144_v53, 16  ;;  %1039 = vst [vmem:[#allocation2 + $0x88] sm:$0xf] %v828_v60  ;;  %v647_v8 = vshll.u32 %v609_v62, 16 }
  0x1f   : > { %v1040_v3 = vld [vmem:[#allocation2 + $0x8c] sm:$0x1]  ;;  %1038 = vst [vmem:[#allocation2 + $0x84] sm:$0xf] %v1037_v2  ;;  %v652_v10 = vshrl.u32 %v610_v4, 16  ;;  %v655_v11 = vshll.u32 %v610_v4, 16 }
  0x20   : > { %v1196_v0 = vrot.slane %v1194_v54, 4  ;;  %v1199_v1 = vrot.slane %v1197_v55, 5  ;;  %v1215_v5 = vrot.slane %v1213_v59, 5  ;;  %v1041_v6 = vsel %vm9092_vm3, %v829_v50, %v1040_v3  ;;  %v535_v15 = vld [vmem:[#allocation2 + $0x90] sm:$0x1]  ;;  %v8689_v21 = vld [vmem:[%s10649_s1 + $0x178] sm:$0xff]  }
  0x21   : > { %7982 = vmatpush3.bf16.msra.mxu0 %v8659_v19  ;;  %8634 = vmatpush3.bf16.msra.mxu1 %v8659_v19  ;;  %1042 = vst [vmem:[#allocation2 + $0x8c] sm:$0x1] %v1041_v6  ;;  %v646_v14 = vrot.slane %v644_v7, 7  ;;  %v654_v18 = vrot.slane %v652_v10, 7  ;;  %v536_v19 = vsel %vm9092_vm3, 0, %v535_v15  ;;  %vm1738_vm13 = vcmask 1046532  }
  0x22   : > { %7983 = vmatprep.subr.bf16.mxu0 %v8660_v24  ;;  %8627 = vmatprep.subr.bf16.mxu1 %v8660_v24  ;;  %v1200_v9 = vor.u32 %v1199_v1, %v1196_v0  ;;  %v1216_v12 = vsel %vm9159_vm11, %v1211_v58, %v1215_v5  ;;  %v591_v20 = vld [vmem:[#allocation2 + $0x98] sm:$0x1]  ;;  %v966_v24 = vld [vmem:[#allocation2 + $0xc] sm:$0xf]  ;;  %537 = vst [vmem:[#allocation2 + $0x90] sm:$0x1] %v536_v19  ;;  %vm9399_vm14 = vmor %vm1737_vm12, %vm1738_vm13 }
  0x23   : > { %1610 = vst [vmem:[#allocation3 + $0x28] sm:$0xf] %v1216_v12  ;;  %v649_v22 = vor.u32 %v647_v8, %v646_v14  ;;  %v650_v23 = vrot.slane %v646_v14, 4  ;;  %v592_v25 = vsel %vm9106_vm4, 0, %v591_v20  ;;  %v631_v26 = vld [vmem:[%s9100_s25 + $0x58] sm:$0xf]  ;;  %v657_v29 = vor.u32 %v655_v11, %v654_v18 }
  0x24   : > { %v1201_v16 = vrot.slane %v1200_v9, 4  ;;  %v659_v30 = vrot.slane %v654_v18, 4  ;;  %v970_v31 = vld [vmem:[#allocation2 + $0x14] sm:$0x1]  ;;  %593 = vst [vmem:[#allocation2 + $0x98] sm:$0x1] %v592_v25 }
  0x25   : > { %7984 = vmatpush3.bf16.msra.mxu0 %v8661_v36  ;;  %8635 = vmatpush3.bf16.msra.mxu1 %v8661_v36  ;;  %v632_v32 = vld [vmem:[%s9100_s25 + $0x5c] sm:$0xf]  ;;  %v831_v33 = vshrl.u32 %v631_v26, 16  ;;  %v1101_v34 = vld [vmem:[#allocation2 + $0x88] sm:$0xf]  ;;  %v967_v36 = vsel %vm9143_vm10, %v649_v22, %v966_v24  ;;  %v834_v37 = vshll.u32 %v631_v26, 16  ;;  %v658_v43 = vsel %vm9137_vm9, %v650_v23, %v657_v29 }
  0x26   : > { %7985 = vmatprep.subr.bf16.mxu0 %v8662_v38  ;;  %8628 = vmatprep.subr.bf16.mxu1 %v8662_v38  ;;  %v1206_v27 = vsel %vm9159_vm11, %v1201_v16, %v9121_v28  ;;  %v1176_v35 = vld [vmem:[#allocation2 + $0x88] sm:$0xf]  ;;  %v839_v38 = vshrl.u32 %v632_v32, 16  ;;  %v1100_v39 = vld [vmem:[#allocation2 + $0x84] sm:$0xf]  ;;  %v971_v44 = vsel %vm9092_vm3, %v659_v30, %v970_v31  ;;  %v842_v54 = vshll.u32 %v632_v32, 16 }
  0x27   : > { %1609 = vst [vmem:[#allocation3 + $0x4] sm:$0xf] %v1206_v27  ;;  %1133 = vst [vmem:[#allocation3 + $0x33c] sm:$0xf] %v1101_v34  ;;  %v1175_v40 = vld [vmem:[#allocation2 + $0x84] sm:$0xf] }
  0x28   : > { %v1471_v28 = vshrl.u32 %v1176_v35, 16  ;;  %968 = vst [vmem:[#allocation2 + $0xc] sm:$0xf] %v967_v36  ;;  %1132 = vst [vmem:[#allocation3 + $0x318] sm:$0xf] %v1100_v39  ;;  %v1458_v46 = vshrl.u32 %v1175_v40, 16 }
  0x29   : > { %7986 = vmatpush3.bf16.msra.mxu0 %v8663_v41  ;;  %8636 = vmatpush3.bf16.msra.mxu1 %v8663_v41  ;;  %v1467_v41 = vshll.u32 %v1176_v35, 16  ;;  %v1177_v45 = vld [vmem:[#allocation2 + $0x8c] sm:$0x1]  ;;  %v1461_v47 = vshll.u32 %v1175_v40, 16  ;;  %969 = vst [vmem:[#allocation2 + $0x10] sm:$0xf] %v658_v43 }
  0x2a   : > { %8083 = vmatprep.subr.bf16.mxu1 %v8670_v56  ;;  %8195 = vmatprep.subr.bf16.mxu0 %v8689_v21  ;;  %972 = vst [vmem:[#allocation2 + $0x14] sm:$0x1] %v971_v44  ;;  %v833_v48 = vrot.slane %v831_v33, 7  ;;  %v841_v49 = vrot.slane %v839_v38, 7  ;;  %v1473_v52 = vrot.slane %v1471_v28, 4  ;;  %v1477_v53 = vshll.u32 %v1177_v45, 16 }
  0x2b   : > { %v1469_v50 = vrot.slane %v1467_v41, 5  ;;  %v1460_v55 = vrot.slane %v1458_v46, 4  ;;  %v1463_v56 = vrot.slane %v1461_v47, 5  ;;  %v1043_v0 = vld [vmem:[#allocation2 + $0x90] sm:$0xf]  ;;  %v8691_v25 = vld [vmem:[%s10649_s1 + $0x138] sm:$0xff]  }
  0x2c   : > { %v836_v57 = vor.u32 %v834_v37, %v833_v48  ;;  %v837_v58 = vrot.slane %v833_v48, 4  ;;  %v1479_v60 = vrot.slane %v1477_v53, 5  ;;  %v844_v61 = vor.u32 %v842_v54, %v841_v49  ;;  %v1047_v3 = vld [vmem:[#allocation2 + $0x98] sm:$0x1]  ;;  %v561_v24 = vld [vmem:[#allocation2 + $0x20] sm:$0x1] }
  0x2d   : > { %v1474_v59 = vor.u32 %v1473_v52, %v1469_v50  ;;  %v846_v62 = vrot.slane %v841_v49, 4  ;;  %v1464_v1 = vor.u32 %v1463_v56, %v1460_v55  ;;  %v505_v4 = vld [vmem:[#allocation2 + $0x18] sm:$0x1]  ;;  %v562_v29 = vsel %vm9106_vm4, 0, %v561_v24  ;;  %v611_v30 = vld [vmem:[%s9100_s25 + $0x8] sm:$0xf] }
  0x2e   : > { %v1044_v2 = vsel %vm9143_vm10, %v836_v57, %v1043_v0  ;;  %v8664_v5 = vld [vmem:[#allocation3] ss:$36 sps:$4 sm:$0xff]   ;;  %v845_v8 = vsel %vm9137_vm9, %v837_v58, %v844_v61  ;;  %v506_v14 = vsel %vm9092_vm3, 0, %v505_v4  ;;  %563 = vst [vmem:[#allocation2 + $0x20] sm:$0x1] %v562_v29  ;;  %v661_v35 = vshrl.u32 %v611_v30, 16 }
  0x2f   : > { %v8666_v6 = vld [vmem:[#allocation3 + $0x4] ss:$36 sps:$4 sm:$0xff]   ;;  %v1475_v7 = vrot.slane %v1474_v59, 4  ;;  %1045 = vst [vmem:[#allocation2 + $0x90] sm:$0xf] %v1044_v2  ;;  %v1048_v9 = vsel %vm9092_vm3, %v846_v62, %v1047_v3  ;;  %v1465_v10 = vrot.slane %v1464_v1, 4 }
  0x30   : > { %v1080_v11 = vld [vmem:[#allocation2 + $0xc] sm:$0xf]  ;;  %1046 = vst [vmem:[#allocation2 + $0x94] sm:$0xf] %v845_v8  ;;  %1049 = vst [vmem:[#allocation2 + $0x98] sm:$0x1] %v1048_v9  ;;  %5085 = vmatprep.mubr.bf16.mxu0 %v8666_v6 }
  0x31   : > { %v1145_v12 = vld [vmem:[#allocation2 + $0xc] sm:$0xf]  ;;  %v1480_v15 = vsel %vm9159_vm11, %v1475_v7, %v1479_v60  ;;  %v1081_v16 = vld [vmem:[#allocation2 + $0x10] sm:$0xf]  ;;  %1112 = vst [vmem:[#allocation3 + $0x48] sm:$0xf] %v1080_v11  ;;  %5086 = vmatmul.mubr.bf16.vlgmr.msra.gmra.mxu0 %v8664_v5  ;;  %v1470_v20 = vsel %vm9159_vm11, %v1465_v10, %v1469_v50 }
  0x32   : > { %v1146_v18 = vld [vmem:[#allocation2 + $0x10] sm:$0xf]  ;;  %v1147_v19 = vld [vmem:[#allocation2 + $0x14] sm:$0x1]  ;;  %507 = vst [vmem:[#allocation2 + $0x18] sm:$0x1] %v506_v14  ;;  %8196 = vmatpush3.bf16.msra.mxu0 %v8691_v25 }
  0x33   : > { %1632 = vst [vmem:[#allocation3 + $0x340] sm:$0xf] %v1480_v15  ;;  %1113 = vst [vmem:[#allocation3 + $0x6c] sm:$0xf] %v1081_v16  ;;  %v1218_v21 = vshrl.u32 %v1145_v12, 16  ;;  %v1221_v22 = vshll.u32 %v1145_v12, 16 }
  0x34   : > { %v1227_v23 = vshll.u32 %v1146_v18, 16  ;;  %1631 = vst [vmem:[#allocation3 + $0x31c] sm:$0xf] %v1470_v20  ;;  %v1231_v26 = vshrl.u32 %v1146_v18, 16  ;;  %v1237_v27 = vshll.u32 %v1147_v19, 16  ;;  %v664_v38 = vshll.u32 %v611_v30, 16 }
  0x35   : > { %v1220_v31 = vrot.slane %v1218_v21, 4  ;;  %v1223_v32 = vrot.slane %v1221_v22, 5  ;;  %v612_v34 = vld [vmem:[%s9100_s25 + $0xc] sm:$0xf]  ;;  %v663_v43 = vrot.slane %v661_v35, 7  ;;  %v8671_v49 = vld [vmem:[%s10649_s1 + $0xb8] sm:$0xff]  }
  0x36   : > { %v1229_v33 = vrot.slane %v1227_v23, 5  ;;  %v1233_v36 = vrot.slane %v1231_v26, 4  ;;  %v1239_v37 = vrot.slane %v1237_v27, 5  ;;  %v669_v39 = vshrl.u32 %v612_v34, 16  ;;  %v1102_v41 = vld [vmem:[#allocation2 + $0x90] sm:$0xf] }
  0x37   : > { %v1224_v40 = vor.u32 %v1223_v32, %v1220_v31  ;;  %v1178_v28 = vld [vmem:[#allocation2 + $0x90] sm:$0xf]  ;;  %v672_v44 = vshll.u32 %v612_v34, 16  ;;  %v1103_v46 = vld [vmem:[#allocation2 + $0x94] sm:$0xf]  ;;  %v666_v59 = vor.u32 %v664_v38, %v663_v43  ;;  %v667_v7 = vrot.slane %v663_v43, 4 }
  0x38   : > { %v1234_v45 = vor.u32 %v1233_v36, %v1229_v33  ;;  %1134 = vst [vmem:[#allocation3 + $0x360] sm:$0xf] %v1102_v41  ;;  %v1179_v47 = vld [vmem:[#allocation2 + $0x94] sm:$0xf]  ;;  %v1180_v48 = vld [vmem:[#allocation2 + $0x98] sm:$0x1] }
  0x39   : > { %v1225_v50 = vrot.slane %v1224_v40, 4  ;;  %1135 = vst [vmem:[#allocation3 + $0x384] sm:$0xf] %v1103_v46  ;;  %v1482_v52 = vshrl.u32 %v1178_v28, 16  ;;  %v1485_v53 = vshll.u32 %v1178_v28, 16  ;;  %v1491_v54 = vshll.u32 %v1179_v47, 16 }
  0x3a   : > { %v973_v55 = vld [vmem:[#allocation2 + $0x18] sm:$0xf]  ;;  %v1235_v56 = vrot.slane %v1234_v45, 4  ;;  %v1495_v57 = vshrl.u32 %v1179_v47, 16  ;;  %v1501_v58 = vshll.u32 %v1180_v48, 16  ;;  %v8675_v2 = vld [vmem:[%s10649_s1 + $0xf0] sm:$0xff]  }
  0x3b   : > { %v8667_v60 = vld [vmem:[#allocation3 + $0x318] ss:$36 sps:$4 sm:$0xff]   ;;  %v1230_v62 = vsel %vm9159_vm11, %v1225_v50, %v1229_v33  ;;  %v1484_v0 = vrot.slane %v1482_v52, 4  ;;  %v1487_v3 = vrot.slane %v1485_v53, 5  ;;  %v1493_v4 = vrot.slane %v1491_v54, 5  ;;  %v8680_v16 = vld [vmem:[%s10649_s1 + $0xe8] sm:$0xff]  }
  0x3c   : > { %v8669_v61 = vld [vmem:[#allocation3 + $0x31c] ss:$36 sps:$4 sm:$0xff]   ;;  %v1240_v1 = vsel %vm9159_vm11, %v1235_v56, %v1239_v37  ;;  %1611 = vst [vmem:[#allocation3 + $0x4c] sm:$0xf] %v1230_v62  ;;  %v1497_v5 = vrot.slane %v1495_v57, 4  ;;  %v671_v8 = vrot.slane %v669_v39, 7  ;;  %v974_v9 = vsel %vm9143_vm10, %v666_v59, %v973_v55 }
  0x3d   : > { %5173 = vmatprep.mubr.bf16.mxu1 %v8669_v61  ;;  %1612 = vst [vmem:[#allocation3 + $0x70] sm:$0xf] %v1240_v1  ;;  %v8676_v6 = vld [vmem:[%s10649_s1 + $0xb0] sm:$0xff]   ;;  %v977_v10 = vld [vmem:[#allocation2 + $0x20] sm:$0x1]  ;;  %v1488_v12 = vor.u32 %v1487_v3, %v1484_v0  ;;  %v1503_v15 = vrot.slane %v1501_v58, 5 }
  0x3e   : > { %v538_v11 = vld [vmem:[#allocation2 + $0x9c] sm:$0x1]  ;;  %5174 = vmatmul.mubr.bf16.vlgmr.msra.gmra.mxu1 %v8667_v60  ;;  %v1498_v14 = vor.u32 %v1497_v5, %v1493_v4  ;;  %975 = vst [vmem:[#allocation2 + $0x18] sm:$0xf] %v974_v9  ;;  %v594_v19 = vld [vmem:[#allocation2 + $0xa4] sm:$0x1]  ;;  %v674_v21 = vor.u32 %v672_v44, %v671_v8 }
  0x3f   : > { %v539_v18 = vsel %vm9092_vm3, 0, %v538_v11  ;;  %v633_v20 = vld [vmem:[%s9100_s25 + $0x60] sm:$0xf]  ;;  %8084 = vmatpush3.bf16.msra.mxu1 %v8671_v49  ;;  %v676_v22 = vrot.slane %v671_v8, 4  ;;  %v595_v23 = vsel %vm9106_vm4, 0, %v594_v19  ;;  %v8702_v26 = vld [vmem:[%s10649_s1 + $0x170] sm:$0xff]  }
  0x40   : > { %540 = vst [vmem:[#allocation2 + $0x9c] sm:$0x1] %v539_v18  ;;  %v634_v24 = vld [vmem:[%s9100_s25 + $0x64] sm:$0xf]  ;;  %v848_v25 = vshrl.u32 %v633_v20, 16  ;;  %8085 = vmatprep.subr.bf16.mxu1 %v8675_v2  ;;  %v1489_v27 = vrot.slane %v1488_v12, 4  ;;  %v675_v33 = vsel %vm9137_vm9, %v667_v7, %v674_v21  ;;  %8197 = vmatprep.subr.bf16.mxu0 %v8702_v26 }
  0x41   : > { %v1499_v29 = vrot.slane %v1498_v14, 4  ;;  %596 = vst [vmem:[#allocation2 + $0xa4] sm:$0x1] %v595_v23  ;;  %v851_v30 = vshll.u32 %v633_v20, 16  ;;  %v856_v31 = vshrl.u32 %v634_v24, 16  ;;  %v8681_v32 = vld [vmem:[%s10649_s1 + $0xa8] sm:$0xff]   ;;  %v978_v34 = vsel %vm9092_vm3, %v676_v22, %v977_v10 }
  0x42   : > { %v850_v35 = vrot.slane %v848_v25, 7  ;;  %v859_v36 = vshll.u32 %v634_v24, 16  ;;  %v1494_v37 = vsel %vm9159_vm11, %v1489_v27, %v1493_v4  ;;  %976 = vst [vmem:[#allocation2 + $0x1c] sm:$0xf] %v675_v33  ;;  %979 = vst [vmem:[#allocation2 + $0x20] sm:$0x1] %v978_v34 }
  0x43   : > { %v1504_v38 = vsel %vm9159_vm11, %v1499_v29, %v1503_v15  ;;  %v8685_v39 = vld [vmem:[%s10649_s1 + $0xe0] sm:$0xff]   ;;  %v858_v40 = vrot.slane %v856_v31, 7  ;;  %v8705_v41 = vld [vmem:[%s10649_s1 + $0x130] sm:$0xff]   ;;  %8086 = vmatpush3.bf16.msra.mxu1 %v8676_v6  ;;  %1633 = vst [vmem:[#allocation3 + $0x364] sm:$0xf] %v1494_v37  ;;  %v8694_v5 = vld [vmem:[%s10649_s1 + $0xd8] sm:$0xff]  }
  0x44   : > { %1634 = vst [vmem:[#allocation3 + $0x388] sm:$0xf] %v1504_v38  ;;  %v853_v28 = vor.u32 %v851_v30, %v850_v35  ;;  %v854_v43 = vrot.slane %v850_v35, 4  ;;  %v508_v44 = vld [vmem:[#allocation2 + $0x24] sm:$0x1]  ;;  %8087 = vmatprep.subr.bf16.mxu1 %v8680_v16  ;;  %8198 = vmatpush3.bf16.msra.mxu0 %v8705_v41  ;;  %v8696_v9 = vld [vmem:[%s10649_s1 + $0x98] sm:$0xff]  }
  0x45   : > { %v8672_v45 = vld [vmem:[#allocation3 + $0x4c] ss:$36 sps:$4 sm:$0xff]   ;;  %v861_v47 = vor.u32 %v859_v36, %v858_v40  ;;  %v863_v48 = vrot.slane %v858_v40, 4  ;;  %v1082_v49 = vld [vmem:[#allocation2 + $0x18] sm:$0xf]  ;;  %v509_v52 = vsel %vm9092_vm3, 0, %v508_v44 }
  0x46   : > { %v8674_v46 = vld [vmem:[#allocation3 + $0x48] ss:$36 sps:$4 sm:$0xff]   ;;  %v1148_v50 = vld [vmem:[#allocation2 + $0x18] sm:$0xf]  ;;  %5093 = vmatprep.mubr.bf16.mxu0 %v8672_v45  ;;  %1114 = vst [vmem:[#allocation3 + $0x90] sm:$0xf] %v1082_v49 }
  0x47   : > { %v1242_v53 = vshrl.u32 %v1148_v50, 16  ;;  %v1245_v54 = vshll.u32 %v1148_v50, 16  ;;  %v862_v55 = vsel %vm9137_vm9, %v854_v43, %v861_v47  ;;  %v1050_v56 = vld [vmem:[#allocation2 + $0x9c] sm:$0xf]  ;;  %510 = vst [vmem:[#allocation2 + $0x24] sm:$0x1] %v509_v52  ;;  %5094 = vmatmul.mubr.bf16.gmra.mxu0 %v8674_v46  ;;  %8088 = vmatpush3.bf16.msra.mxu1 %v8681_v32 }
  0x48   : > { %v564_v57 = vld [vmem:[#allocation2 + $0x2c] sm:$0x1]  ;;  %v1051_v58 = vsel %vm9143_vm10, %v853_v28, %v1050_v56  ;;  %1053 = vst [vmem:[#allocation2 + $0xa0] sm:$0xf] %v862_v55  ;;  %v1054_v59 = vld [vmem:[#allocation2 + $0xa4] sm:$0x1]  ;;  %8089 = vmatprep.subr.bf16.mxu1 %v8685_v39 }
  0x49   : > { %v8688_v60 = vld [vmem:[%s10649_s1 + $0xa0] sm:$0xff]   ;;  %v565_v61 = vsel %vm9106_vm4, 0, %v564_v57  ;;  %v613_v62 = vld [vmem:[%s9100_s25 + $0x10] sm:$0xf]  ;;  %v1244_v0 = vrot.slane %v1242_v53, 4  ;;  %v1247_v1 = vrot.slane %v1245_v54, 5  ;;  %v1055_v2 = vsel %vm9092_vm3, %v863_v48, %v1054_v59 }
  0x4a   : > { %1052 = vst [vmem:[#allocation2 + $0x9c] sm:$0xf] %v1051_v58  ;;  %566 = vst [vmem:[#allocation2 + $0x2c] sm:$0x1] %v565_v61  ;;  %v614_v3 = vld [vmem:[%s9100_s25 + $0x14] sm:$0xf] }
  0x4b   : > { %v678_v4 = vshrl.u32 %v613_v62, 16  ;;  %v1083_v6 = vld [vmem:[#allocation2 + $0x1c] sm:$0xf]  ;;  %v1150_v8 = vld [vmem:[#allocation2 + $0x20] sm:$0x1]  ;;  %v1248_v11 = vor.u32 %v1247_v1, %v1244_v0  ;;  %v8700_v15 = vld [vmem:[%s10649_s1 + $0xd0] sm:$0xff]   ;;  %8090 = vmatpush3.bf16.msra.mxu1 %v8688_v60 }
  0x4c   : > { %v1149_v7 = vld [vmem:[#allocation2 + $0x1c] sm:$0xf]  ;;  %1056 = vst [vmem:[#allocation2 + $0xa4] sm:$0x1] %v1055_v2  ;;  %1115 = vst [vmem:[#allocation3 + $0xb4] sm:$0xf] %v1083_v6  ;;  %8091 = vmatprep.subr.bf16.mxu1 %v8694_v5 }
  0x4d   : > { %v8677_v10 = vld [vmem:[#allocation3 + $0x364] ss:$36 sps:$4 sm:$0xff]   ;;  %v1251_v12 = vshll.u32 %v1149_v7, 16  ;;  %v1255_v14 = vshrl.u32 %v1149_v7, 16  ;;  %v1261_v18 = vshll.u32 %v1150_v8, 16  ;;  %v680_v19 = vrot.slane %v678_v4, 7 }
  0x4e   : > { %v8679_v16 = vld [vmem:[#allocation3 + $0x360] ss:$36 sps:$4 sm:$0xff]   ;;  %v681_v20 = vshll.u32 %v613_v62, 16  ;;  %v686_v21 = vshrl.u32 %v614_v3, 16  ;;  %5181 = vmatprep.mubr.bf16.mxu1 %v8677_v10  ;;  %v1249_v22 = vrot.slane %v1248_v11, 4  ;;  %v689_v25 = vshll.u32 %v614_v3, 16 }
  0x4f   : > { %v1253_v23 = vrot.slane %v1251_v12, 5  ;;  %v1257_v24 = vrot.slane %v1255_v14, 4  ;;  %5182 = vmatmul.mubr.bf16.gmra.mxu1 %v8679_v16  ;;  %v1263_v26 = vrot.slane %v1261_v18, 5  ;;  %v684_v29 = vrot.slane %v680_v19, 4  ;;  %v980_v31 = vld [vmem:[#allocation2 + $0x24] sm:$0xf] }
  0x50   : > { %v683_v27 = vor.u32 %v681_v20, %v680_v19  ;;  %v688_v30 = vrot.slane %v686_v21, 7  ;;  %v8701_v32 = vld [vmem:[%s10649_s1 + $0x90] sm:$0xff]   ;;  %v1105_v35 = vld [vmem:[#allocation2 + $0xa0] sm:$0xf]  ;;  %v8707_v37 = vld [vmem:[%s10649_s1 + $0xc8] sm:$0xff]   ;;  %8092 = vmatpush3.bf16.msra.mxu1 %v8696_v9  ;;  %vm8967_vm15 = vmmov 0  }
  0x51   : > { %v1254_v33 = vsel %vm9159_vm11, %v1249_v22, %v1253_v23  ;;  %v1258_v34 = vor.u32 %v1257_v24, %v1253_v23  ;;  %v1182_v36 = vld [vmem:[#allocation2 + $0xa0] sm:$0xf]  ;;  %v1104_v38 = vld [vmem:[#allocation2 + $0x9c] sm:$0xf]  ;;  %1137 = vst [vmem:[#allocation3 + $0x3cc] sm:$0xf] %v1105_v35  ;;  %8093 = vmatprep.subr.bf16.mxu1 %v8700_v15 }
  0x52   : > { %1613 = vst [vmem:[#allocation3 + $0x94] sm:$0xf] %v1254_v33  ;;  %v1181_v39 = vld [vmem:[#allocation2 + $0x9c] sm:$0xf]  ;;  %v1515_v40 = vshll.u32 %v1182_v36, 16  ;;  %v1519_v41 = vshrl.u32 %v1182_v36, 16  ;;  %v691_v28 = vor.u32 %v689_v25, %v688_v30  ;;  %v981_v43 = vsel %vm9143_vm10, %v683_v27, %v980_v31 }
  0x53   : > { %v1259_v44 = vrot.slane %v1258_v34, 4  ;;  %1136 = vst [vmem:[#allocation3 + $0x3a8] sm:$0xf] %v1104_v38  ;;  %v1183_v45 = vld [vmem:[#allocation2 + $0xa4] sm:$0x1]  ;;  %v1506_v46 = vshrl.u32 %v1181_v39, 16 }
  0x54   : > { %v1509_v47 = vshll.u32 %v1181_v39, 16  ;;  %v693_v48 = vrot.slane %v688_v30, 4  ;;  %982 = vst [vmem:[#allocation2 + $0x24] sm:$0xf] %v981_v43  ;;  %v1517_v49 = vrot.slane %v1515_v40, 5  ;;  %v1521_v50 = vrot.slane %v1519_v41, 4  ;;  %8094 = vmatpush3.bf16.msra.mxu1 %v8701_v32 }
  0x55   : > { %v1525_v52 = vshll.u32 %v1183_v45, 16  ;;  %v692_v53 = vsel %vm9137_vm9, %v684_v29, %v691_v28  ;;  %v984_v54 = vld [vmem:[#allocation2 + $0x2c] sm:$0x1]  ;;  %v1264_v57 = vsel %vm9159_vm11, %v1259_v44, %v1263_v26  ;;  %v1508_v58 = vrot.slane %v1506_v46, 4  ;;  %v8712_v61 = vld [vmem:[%s10649_s1 + $0xc0] sm:$0xff]   ;;  %8095 = vmatprep.subr.bf16.mxu1 %v8707_v37  ;;  %v8722_v18 = vld [vmem:[%s10649_s1 + $0x1f8] sm:$0xff]  }
  0x56   : > { %v8708_v55 = vld [vmem:[%s10649_s1 + $0x88] sm:$0xff]   ;;  %v1511_v59 = vrot.slane %v1509_v47, 5  ;;  %983 = vst [vmem:[#allocation2 + $0x28] sm:$0xf] %v692_v53  ;;  %v985_v60 = vsel %vm9092_vm3, %v693_v48, %v984_v54  ;;  %1614 = vst [vmem:[#allocation3 + $0xb8] sm:$0xf] %v1264_v57  ;;  %v1522_v62 = vor.u32 %v1521_v50, %v1517_v49 }
  0x57   : > { %v8717_v56 = vld [vmem:[%s10649_s1 + $0x168] sm:$0xff]   ;;  %v1527_v0 = vrot.slane %v1525_v52, 5  ;;  %986 = vst [vmem:[#allocation2 + $0x2c] sm:$0x1] %v985_v60  ;;  %v597_v2 = vld [vmem:[#allocation2 + $0xb0] sm:$0x1] }
  0x58   : > { %v541_v1 = vld [vmem:[#allocation2 + $0xa8] sm:$0x1]  ;;  %8199 = vmatprep.subr.bf16.mxu0 %v8717_v56  ;;  %v1512_v4 = vor.u32 %v1511_v59, %v1508_v58  ;;  %v598_v6 = vsel %vm9106_vm4, 0, %v597_v2  ;;  %v636_v8 = vld [vmem:[%s9100_s25 + $0x6c] sm:$0xf]  ;;  %v1523_v9 = vrot.slane %v1522_v62, 4  ;;  %8096 = vmatpush3.bf16.msra.mxu1 %v8708_v55 }
  0x59   : > { %v8718_v3 = vld [vmem:[%s10649_s1 + $0x128] sm:$0xff]   ;;  %v542_v5 = vsel %vm9092_vm3, 0, %v541_v1  ;;  %599 = vst [vmem:[#allocation2 + $0xb0] sm:$0x1] %v598_v6  ;;  %v873_v12 = vshrl.u32 %v636_v8, 16  ;;  %v8715_v14 = vld [vmem:[%s10649_s1 + $0x80] sm:$0xff]   ;;  %8097 = vmatprep.subr.bf16.mxu1 %v8712_v61 }
  0x5a   : > { %v635_v7 = vld [vmem:[%s9100_s25 + $0x68] sm:$0xf]  ;;  %543 = vst [vmem:[#allocation2 + $0xa8] sm:$0x1] %v542_v5  ;;  %8200 = vmatpush3.bf16.msra.mxu0 %v8718_v3  ;;  %v1513_v15 = vrot.slane %v1512_v4, 4  ;;  %v876_v16 = vshll.u32 %v636_v8, 16  ;;  %v1528_v19 = vsel %vm9159_vm11, %v1523_v9, %v1527_v0 }
  0x5b   : > { %v865_v10 = vshrl.u32 %v635_v7, 16  ;;  %v868_v11 = vshll.u32 %v635_v7, 16  ;;  %v1084_v20 = vld [vmem:[#allocation2 + $0x24] sm:$0xf]  ;;  %v875_v23 = vrot.slane %v873_v12, 7  ;;  %v8928_v13 = vld [vmem:[%s10652_s4 + $0x38] sm:$0xff]  }
  0x5c   : > { %v1151_v21 = vld [vmem:[#allocation2 + $0x24] sm:$0xf]  ;;  %v1518_v24 = vsel %vm9159_vm11, %v1513_v15, %v1517_v49  ;;  %1636 = vst [vmem:[#allocation3 + $0x3d0] sm:$0xf] %v1528_v19  ;;  %1116 = vst [vmem:[#allocation3 + $0xd8] sm:$0xf] %v1084_v20  ;;  %8098 = vmatpush3.bf16.msra.mxu1 %v8715_v14 }
  0x5d   : > { %v867_v22 = vrot.slane %v865_v10, 7  ;;  %v1266_v25 = vshrl.u32 %v1151_v21, 16  ;;  %v1269_v26 = vshll.u32 %v1151_v21, 16  ;;  %1635 = vst [vmem:[#allocation3 + $0x3ac] sm:$0xf] %v1518_v24  ;;  %v878_v32 = vor.u32 %v876_v16, %v875_v23  ;;  %8307 = vmatprep.subr.bf16.mxu1 %v8722_v18  ;;  %v8730_v45 = vld [vmem:[%s10649_s1 + $0x160] sm:$0xff]  }
  0x5e   : > { %v1085_v27 = vld [vmem:[#allocation2 + $0x28] sm:$0xf]  ;;  %v880_v33 = vrot.slane %v875_v23, 4  ;;  %v8682_v34 = vld [vmem:[#allocation3 + $0x94] ss:$36 sps:$4 sm:$0xff]   ;;  %8201 = vmatprep.subr.bf16.mxu0 %v8730_v45  ;;  %v8731_v55 = vld [vmem:[%s10649_s1 + $0x120] sm:$0xff]  }
  0x5f   : > { %v1152_v29 = vld [vmem:[#allocation2 + $0x28] sm:$0xf]  ;;  %v870_v30 = vor.u32 %v868_v11, %v867_v22  ;;  %v871_v31 = vrot.slane %v867_v22, 4  ;;  %1117 = vst [vmem:[#allocation3 + $0xfc] sm:$0xf] %v1085_v27  ;;  %v1268_v36 = vrot.slane %v1266_v25, 4  ;;  %5101 = vmatprep.mubr.bf16.mxu0 %v8682_v34  ;;  %8202 = vmatpush3.bf16.msra.mxu0 %v8731_v55 }
  0x60   : > { %v8684_v35 = vld [vmem:[#allocation3 + $0x90] ss:$36 sps:$4 sm:$0xff]   ;;  %v1271_v38 = vrot.slane %v1269_v26, 5  ;;  %v1275_v39 = vshll.u32 %v1152_v29, 16  ;;  %v1279_v40 = vshrl.u32 %v1152_v29, 16  ;;  %v8742_v20 = vld [vmem:[%s10649_s1 + $0x158] sm:$0xff]  }
  0x61   : > { %v1153_v37 = vld [vmem:[#allocation2 + $0x2c] sm:$0x1]  ;;  %v879_v41 = vsel %vm9137_vm9, %v871_v31, %v878_v32  ;;  %v1057_v43 = vld [vmem:[#allocation2 + $0xa8] sm:$0xf]  ;;  %v1061_v44 = vld [vmem:[#allocation2 + $0xb0] sm:$0x1]  ;;  %5102 = vmatmul.mubr.bf16.gmra.mxu0 %v8684_v35  ;;  %8203 = vmatprep.subr.bf16.mxu0 %v8742_v20 }
  0x62   : > { %v1285_v28 = vshll.u32 %v1153_v37, 16  ;;  %1060 = vst [vmem:[#allocation2 + $0xac] sm:$0xf] %v879_v41  ;;  %v1272_v46 = vor.u32 %v1271_v38, %v1268_v36  ;;  %v1277_v47 = vrot.slane %v1275_v39, 5  ;;  %v1281_v48 = vrot.slane %v1279_v40, 4 }
  0x63   : > { %v1058_v49 = vsel %vm9143_vm10, %v870_v30, %v1057_v43  ;;  %v1062_v52 = vsel %vm9092_vm3, %v880_v33, %v1061_v44  ;;  %v511_v53 = vld [vmem:[#allocation2 + $0x30] sm:$0x1]  ;;  %v567_v54 = vld [vmem:[#allocation2 + $0x38] sm:$0x1]  ;;  %v8690_v62 = vld [vmem:[#allocation3 + $0x3a8] ss:$36 sps:$4 sm:$0xff]  }
  0x64   : > { %v1287_v50 = vrot.slane %v1285_v28, 5  ;;  %1059 = vst [vmem:[#allocation2 + $0xa8] sm:$0xf] %v1058_v49  ;;  %v1273_v56 = vrot.slane %v1272_v46, 4  ;;  %v1282_v57 = vor.u32 %v1281_v48, %v1277_v47  ;;  %1063 = vst [vmem:[#allocation2 + $0xb0] sm:$0x1] %v1062_v52 }
  0x65   : > { %v512_v58 = vsel %vm9092_vm3, 0, %v511_v53  ;;  %v568_v59 = vsel %vm9106_vm4, 0, %v567_v54  ;;  %v615_v60 = vld [vmem:[%s9100_s25 + $0x18] sm:$0xf]  ;;  %v8686_v61 = vld [vmem:[#allocation3 + $0x3ac] ss:$36 sps:$4 sm:$0xff]  }
  0x66   : > { %513 = vst [vmem:[#allocation2 + $0x30] sm:$0x1] %v512_v58  ;;  %569 = vst [vmem:[#allocation2 + $0x38] sm:$0x1] %v568_v59  ;;  %v695_v0 = vshrl.u32 %v615_v60, 16  ;;  %v1278_v1 = vsel %vm9159_vm11, %v1273_v56, %v1277_v47  ;;  %v1283_v2 = vrot.slane %v1282_v57, 4  ;;  %5189 = vmatprep.mubr.bf16.mxu1 %v8686_v61 }
  0x67   : > { %v616_v3 = vld [vmem:[%s9100_s25 + $0x1c] sm:$0xf]  ;;  %v698_v4 = vshll.u32 %v615_v60, 16  ;;  %1615 = vst [vmem:[#allocation3 + $0xdc] sm:$0xf] %v1278_v1  ;;  %5190 = vmatmul.mubr.bf16.gmra.mxu1 %v8690_v62  ;;  %v8751_v58 = vld [vmem:[%s10649_s1 + $0x150] sm:$0xff]  }
  0x68   : > { %v697_v5 = vrot.slane %v695_v0, 7  ;;  %v703_v6 = vshrl.u32 %v616_v3, 16  ;;  %v706_v7 = vshll.u32 %v616_v3, 16  ;;  %v1288_v8 = vsel %vm9159_vm11, %v1283_v2, %v1287_v50  ;;  %v544_v39 = vld [vmem:[#allocation2 + $0xb4] sm:$0x1]  ;;  %v8744_v46 = vld [vmem:[%s10649_s1 + $0x118] sm:$0xff]  }
  0x69   : > { %v1107_v9 = vld [vmem:[#allocation2 + $0xac] sm:$0xf]  ;;  %1616 = vst [vmem:[#allocation3 + $0x100] sm:$0xf] %v1288_v8  ;;  %v600_v40 = vld [vmem:[#allocation2 + $0xbc] sm:$0x1]  ;;  %8204 = vmatpush3.bf16.msra.mxu0 %v8744_v46 }
  0x6a   : > { %v1185_v10 = vld [vmem:[#allocation2 + $0xac] sm:$0xf]  ;;  %1139 = vst [vmem:[#allocation3 + $0x414] sm:$0xf] %v1107_v9  ;;  %v700_v14 = vor.u32 %v698_v4, %v697_v5  ;;  %v701_v15 = vrot.slane %v697_v5, 4  ;;  %v705_v19 = vrot.slane %v703_v6, 7  ;;  %8205 = vmatprep.subr.bf16.mxu0 %v8751_v58 }
  0x6b   : > { %v1539_v11 = vshll.u32 %v1185_v10, 16  ;;  %v1543_v12 = vshrl.u32 %v1185_v10, 16  ;;  %v1106_v16 = vld [vmem:[#allocation2 + $0xa8] sm:$0xf]  ;;  %v1186_v21 = vld [vmem:[#allocation2 + $0xb0] sm:$0x1] }
  0x6c   : > { %v1184_v18 = vld [vmem:[#allocation2 + $0xa8] sm:$0xf]  ;;  %1138 = vst [vmem:[#allocation3 + $0x3f0] sm:$0xf] %v1106_v16  ;;  %v1549_v26 = vshll.u32 %v1186_v21, 16  ;;  %v708_v27 = vor.u32 %v706_v7, %v705_v19  ;;  %v710_v29 = vrot.slane %v705_v19, 4 }
  0x6d   : > { %v1530_v22 = vshrl.u32 %v1184_v18, 16  ;;  %v1533_v23 = vshll.u32 %v1184_v18, 16  ;;  %v1541_v24 = vrot.slane %v1539_v11, 5  ;;  %v1545_v25 = vrot.slane %v1543_v12, 4  ;;  %v987_v30 = vld [vmem:[#allocation2 + $0x30] sm:$0xf] }
  0x6e   : > { %v991_v31 = vld [vmem:[#allocation2 + $0x38] sm:$0x1]  ;;  %v988_v35 = vsel %vm9143_vm10, %v700_v14, %v987_v30  ;;  %v1551_v36 = vrot.slane %v1549_v26, 5  ;;  %v709_v37 = vsel %vm9137_vm9, %v701_v15, %v708_v27  ;;  %v545_v43 = vsel %vm9092_vm3, 0, %v544_v39  ;;  %v637_v45 = vld [vmem:[%s9100_s25 + $0x70] sm:$0xf] }
  0x6f   : > { %v1532_v32 = vrot.slane %v1530_v22, 4  ;;  %v1535_v33 = vrot.slane %v1533_v23, 5  ;;  %v1546_v34 = vor.u32 %v1545_v25, %v1541_v24  ;;  %989 = vst [vmem:[#allocation2 + $0x30] sm:$0xf] %v988_v35  ;;  %v992_v38 = vsel %vm9092_vm3, %v710_v29, %v991_v31  ;;  %990 = vst [vmem:[#allocation2 + $0x34] sm:$0xf] %v709_v37 }
  0x70   : > { %993 = vst [vmem:[#allocation2 + $0x38] sm:$0x1] %v992_v38  ;;  %v601_v44 = vsel %vm9106_vm4, 0, %v600_v40  ;;  %v8692_v47 = vld [vmem:[#allocation3 + $0xdc] ss:$36 sps:$4 sm:$0xff]   ;;  %v882_v49 = vshrl.u32 %v637_v45, 16 }
  0x71   : > { %v1536_v41 = vor.u32 %v1535_v33, %v1532_v32  ;;  %v1547_v28 = vrot.slane %v1546_v34, 4  ;;  %v8695_v48 = vld [vmem:[#allocation3 + $0xd8] ss:$36 sps:$4 sm:$0xff]   ;;  %546 = vst [vmem:[#allocation2 + $0xb4] sm:$0x1] %v545_v43  ;;  %v885_v54 = vshll.u32 %v637_v45, 16  ;;  %5109 = vmatprep.mubr.bf16.mxu0 %v8692_v47 }
  0x72   : > { %602 = vst [vmem:[#allocation2 + $0xbc] sm:$0x1] %v601_v44  ;;  %v638_v53 = vld [vmem:[%s9100_s25 + $0x74] sm:$0xf]  ;;  %v884_v55 = vrot.slane %v882_v49, 7  ;;  %5110 = vmatmul.mubr.bf16.gmra.mxu0 %v8695_v48  ;;  %v8761_v48 = vld [vmem:[%s10649_s1 + $0x148] sm:$0xff]  }
  0x73   : > { %v1537_v50 = vrot.slane %v1536_v41, 4  ;;  %v1552_v52 = vsel %vm9159_vm11, %v1547_v28, %v1551_v36  ;;  %v890_v56 = vshrl.u32 %v638_v53, 16  ;;  %v893_v57 = vshll.u32 %v638_v53, 16  ;;  %v514_v60 = vld [vmem:[#allocation2 + $0x3c] sm:$0x1]  ;;  %v8754_v4 = vld [vmem:[%s10649_s1 + $0x110] sm:$0xff]  }
  0x74   : > { %1638 = vst [vmem:[#allocation3 + $0x418] sm:$0xf] %v1552_v52  ;;  %v570_v61 = vld [vmem:[#allocation2 + $0x44] sm:$0x1]  ;;  %v617_v62 = vld [vmem:[%s9100_s25 + $0x20] sm:$0xf]  ;;  %v887_v0 = vor.u32 %v885_v54, %v884_v55  ;;  %8206 = vmatpush3.bf16.msra.mxu0 %v8754_v4 }
  0x75   : > { %v1542_v59 = vsel %vm9159_vm11, %v1537_v50, %v1541_v24  ;;  %v888_v1 = vrot.slane %v884_v55, 4  ;;  %v892_v2 = vrot.slane %v890_v56, 7  ;;  %v515_v3 = vsel %vm9092_vm3, 0, %v514_v60  ;;  %v618_v14 = vld [vmem:[%s9100_s25 + $0x24] sm:$0xf]  ;;  %8207 = vmatprep.subr.bf16.mxu0 %v8761_v48 }
  0x76   : > { %1637 = vst [vmem:[#allocation3 + $0x3f4] sm:$0xf] %v1542_v59  ;;  %v1086_v5 = vld [vmem:[#allocation2 + $0x30] sm:$0xf]  ;;  %516 = vst [vmem:[#allocation2 + $0x3c] sm:$0x1] %v515_v3 }
  0x77   : > { %v1154_v6 = vld [vmem:[#allocation2 + $0x30] sm:$0xf]  ;;  %v571_v7 = vsel %vm9106_vm4, 0, %v570_v61  ;;  %v712_v8 = vshrl.u32 %v617_v62, 16  ;;  %v1087_v9 = vld [vmem:[#allocation2 + $0x34] sm:$0xf]  ;;  %v895_v12 = vor.u32 %v893_v57, %v892_v2 }
  0x78   : > { %1118 = vst [vmem:[#allocation3 + $0x120] sm:$0xf] %v1086_v5  ;;  %v1155_v10 = vld [vmem:[#allocation2 + $0x34] sm:$0xf]  ;;  %v1156_v11 = vld [vmem:[#allocation2 + $0x38] sm:$0x1] }
  0x79   : > { %572 = vst [vmem:[#allocation2 + $0x44] sm:$0x1] %v571_v7  ;;  %1119 = vst [vmem:[#allocation3 + $0x144] sm:$0xf] %v1087_v9  ;;  %v1290_v15 = vshrl.u32 %v1154_v6, 16  ;;  %v1293_v16 = vshll.u32 %v1154_v6, 16  ;;  %v896_v22 = vsel %vm9137_vm9, %v888_v1, %v895_v12 }
  0x7a   : > { %v1299_v18 = vshll.u32 %v1155_v10, 16  ;;  %v1303_v19 = vshrl.u32 %v1155_v10, 16  ;;  %v1064_v20 = vld [vmem:[#allocation2 + $0xb4] sm:$0xf]  ;;  %v1309_v21 = vshll.u32 %v1156_v11, 16  ;;  %v897_v23 = vrot.slane %v892_v2, 4 }
  0x7b   : > { %v1065_v24 = vsel %vm9143_vm10, %v887_v0, %v1064_v20  ;;  %v1068_v25 = vld [vmem:[#allocation2 + $0xbc] sm:$0x1]  ;;  %v1292_v26 = vrot.slane %v1290_v15, 4  ;;  %v1295_v27 = vrot.slane %v1293_v16, 5  ;;  %1067 = vst [vmem:[#allocation2 + $0xb8] sm:$0xf] %v896_v22 }
  0x7c   : > { %v1301_v29 = vrot.slane %v1299_v18, 5  ;;  %v1305_v30 = vrot.slane %v1303_v19, 4  ;;  %1066 = vst [vmem:[#allocation2 + $0xb4] sm:$0xf] %v1065_v24  ;;  %v1311_v31 = vrot.slane %v1309_v21, 5  ;;  %v1069_v32 = vsel %vm9092_vm3, %v897_v23, %v1068_v25  ;;  %v8762_v57 = vld [vmem:[%s10649_s1 + $0x108] sm:$0xff]  }
  0x7d   : > { %v714_v33 = vrot.slane %v712_v8, 7  ;;  %v715_v34 = vshll.u32 %v617_v62, 16  ;;  %v8697_v35 = vld [vmem:[#allocation3 + $0x3f4] ss:$36 sps:$4 sm:$0xff]   ;;  %v1296_v37 = vor.u32 %v1295_v27, %v1292_v26  ;;  %1070 = vst [vmem:[#allocation2 + $0xbc] sm:$0x1] %v1069_v32  ;;  %8208 = vmatpush3.bf16.msra.mxu0 %v8762_v57 }
  0x7e   : > { %v8699_v36 = vld [vmem:[#allocation3 + $0x3f0] ss:$36 sps:$4 sm:$0xff]   ;;  %v1306_v38 = vor.u32 %v1305_v30, %v1301_v29  ;;  %v720_v39 = vshrl.u32 %v618_v14, 16  ;;  %v723_v28 = vshll.u32 %v618_v14, 16  ;;  %v994_v43 = vld [vmem:[#allocation2 + $0x3c] sm:$0xf]  ;;  %5197 = vmatprep.mubr.bf16.mxu1 %v8697_v35 }
  0x7f   : > { %v717_v40 = vor.u32 %v715_v34, %v714_v33  ;;  %v718_v41 = vrot.slane %v714_v33, 4  ;;  %v1297_v44 = vrot.slane %v1296_v37, 4  ;;  %5198 = vmatmul.mubr.bf16.gmra.mxu1 %v8699_v36  ;;  %v1641_v55 = vld [vmem:[#allocation2] sm:$0xe]  ;;  %v1642_v56 = vld [vmem:[#allocation2 + $0x4] sm:$0xf] }
  0x80   : > { %v1307_v45 = vrot.slane %v1306_v38, 4  ;;  %v722_v46 = vrot.slane %v720_v39, 7  ;;  %v998_v47 = vld [vmem:[#allocation2 + $0x44] sm:$0x1]  ;;  %v1643_v3 = vld [vmem:[#allocation2 + $0x8] sm:$0x1] }
  0x81   : > { %v995_v49 = vsel %vm9143_vm10, %v717_v40, %v994_v43  ;;  %v1302_v50 = vsel %vm9159_vm11, %v1297_v44, %v1301_v29  ;;  %v7255_v8 = vrot.slane %v1641_v55, 9  ;;  %v1742_v9 = vrot.slane %v1642_v56, 5  ;;  %v1916_v15 = vld [vmem:[#allocation2 + $0xc] sm:$0xf]  ;;  %v1917_v21 = vld [vmem:[#allocation2 + $0x10] sm:$0xf] }
  0x82   : > { %v1312_v52 = vsel %vm9159_vm11, %v1307_v45, %v1311_v31  ;;  %v725_v53 = vor.u32 %v723_v28, %v722_v46  ;;  %v727_v54 = vrot.slane %v722_v46, 4  ;;  %996 = vst [vmem:[#allocation2 + $0x3c] sm:$0xf] %v995_v49  ;;  %1617 = vst [vmem:[#allocation3 + $0x124] sm:$0xf] %v1302_v50  ;;  %v1745_v14 = vrot.slane %v1643_v3, 5 }
  0x83   : > { %1618 = vst [vmem:[#allocation3 + $0x148] sm:$0xf] %v1312_v52  ;;  %v1108_v58 = vld [vmem:[#allocation2 + $0xb4] sm:$0xf]  ;;  %v1109_v59 = vld [vmem:[#allocation2 + $0xb8] sm:$0xf]  ;;  %v1743_v19 = vsel %vm9399_vm14, %v7255_v8, %v1742_v9 }
  0x84   : > { %v1187_v60 = vld [vmem:[#allocation2 + $0xb4] sm:$0xf]  ;;  %1140 = vst [vmem:[#allocation3 + $0x438] sm:$0xf] %v1108_v58  ;;  %1141 = vst [vmem:[#allocation3 + $0x45c] sm:$0xf] %v1109_v59  ;;  %v726_v1 = vsel %vm9137_vm9, %v718_v41, %v725_v53  ;;  %v999_v2 = vsel %vm9092_vm3, %v727_v54, %v998_v47 }
  0x85   : > { %v1188_v61 = vld [vmem:[#allocation2 + $0xb8] sm:$0xf]  ;;  %v1554_v62 = vshrl.u32 %v1187_v60, 16  ;;  %v1557_v0 = vshll.u32 %v1187_v60, 16  ;;  %v1189_v5 = vld [vmem:[#allocation2 + $0xbc] sm:$0x1] }
  0x86   : > { %v1563_v6 = vshll.u32 %v1188_v61, 16  ;;  %v1567_v7 = vshrl.u32 %v1188_v61, 16  ;;  %997 = vst [vmem:[#allocation2 + $0x40] sm:$0xf] %v726_v1  ;;  %1000 = vst [vmem:[#allocation2 + $0x44] sm:$0x1] %v999_v2 }
  0x87   : > { %v1556_v10 = vrot.slane %v1554_v62, 4  ;;  %v1559_v11 = vrot.slane %v1557_v0, 5  ;;  %v1573_v12 = vshll.u32 %v1189_v5, 16  ;;  %v1744_v20 = vrot.slane %v1742_v9, 4  ;;  %1948 = vst [vmem:[#allocation3 + $0xc] sm:$0xf] %v1916_v15 }
  0x88   : > { %v1565_v16 = vrot.slane %v1563_v6, 5  ;;  %v1569_v18 = vrot.slane %v1567_v7, 4  ;;  %v8766_v22 = vld [vmem:[%s10649_s1 + $0x140] sm:$0xff]   ;;  %1884 = vst [vmem:[#allocation3 + $0x8] sm:$0xf] %v1743_v19  ;;  %v8788_v3 = vld [vmem:[%s10649_s1 + $0x238] sm:$0xff]  }
  0x89   : > { %v1560_v23 = vor.u32 %v1559_v11, %v1556_v10  ;;  %v1575_v24 = vrot.slane %v1573_v12, 5  ;;  %1949 = vst [vmem:[#allocation3 + $0x30] sm:$0xf] %v1917_v21  ;;  %v8767_v25 = vld [vmem:[%s10649_s1 + $0x100] sm:$0xff]   ;;  %v1088_v27 = vld [vmem:[#allocation2 + $0x3c] sm:$0xf]  ;;  %v1746_v30 = vsel %vm9399_vm14, %v1744_v20, %v1745_v14  ;;  %8209 = vmatprep.subr.bf16.mxu0 %v8766_v22 }
  0x8a   : > { %v1570_v26 = vor.u32 %v1569_v18, %v1565_v16  ;;  %v1157_v29 = vld [vmem:[#allocation2 + $0x3c] sm:$0xf]  ;;  %1120 = vst [vmem:[#allocation3 + $0x168] sm:$0xf] %v1088_v27  ;;  %1885 = vst [vmem:[#allocation3 + $0x2c] sm:$0xf] %v1746_v30  ;;  %8210 = vmatpush3.bf16.msra.mxu0 %v8767_v25 }
  0x8b   : > { %v8703_v31 = vld [vmem:[#allocation3 + $0x124] ss:$36 sps:$4 sm:$0xff]   ;;  %v1561_v32 = vrot.slane %v1560_v23, 4  ;;  %v1314_v33 = vshrl.u32 %v1157_v29, 16  ;;  %v1317_v36 = vshll.u32 %v1157_v29, 16  ;;  %8485 = vmatprep.subr.bf16.mxu0 %v8788_v3 }
  0x8c   : > { %v8706_v34 = vld [vmem:[#allocation3 + $0x120] ss:$36 sps:$4 sm:$0xff]   ;;  %v1571_v35 = vrot.slane %v1570_v26, 4  ;;  %5117 = vmatprep.mubr.bf16.mxu0 %v8703_v31  ;;  %v517_v45 = vld [vmem:[#allocation2 + $0x48] sm:$0x1] }
  0x8d   : > { %v1566_v37 = vsel %vm9159_vm11, %v1561_v32, %v1565_v16  ;;  %v1089_v38 = vld [vmem:[#allocation2 + $0x40] sm:$0xf]  ;;  %v1159_v40 = vld [vmem:[#allocation2 + $0x44] sm:$0x1]  ;;  %5118 = vmatmul.mubr.bf16.gmra.mxu0 %v8706_v34  ;;  %v1316_v28 = vrot.slane %v1314_v33, 4  ;;  %v1319_v43 = vrot.slane %v1317_v36, 5 }
  0x8e   : > { %v1158_v39 = vld [vmem:[#allocation2 + $0x40] sm:$0xf]  ;;  %v1576_v41 = vsel %vm9159_vm11, %v1571_v35, %v1575_v24  ;;  %1639 = vst [vmem:[#allocation3 + $0x43c] sm:$0xf] %v1566_v37  ;;  %1121 = vst [vmem:[#allocation3 + $0x18c] sm:$0xf] %v1089_v38 }
  0x8f   : > { %v1323_v44 = vshll.u32 %v1158_v39, 16  ;;  %1640 = vst [vmem:[#allocation3 + $0x460] sm:$0xf] %v1576_v41  ;;  %v1327_v46 = vshrl.u32 %v1158_v39, 16  ;;  %v1333_v47 = vshll.u32 %v1159_v40, 16  ;;  %v518_v48 = vsel %vm9092_vm3, 0, %v517_v45 }
  0x90   : > { %v573_v49 = vld [vmem:[#allocation2 + $0x50] sm:$0x1]  ;;  %v1320_v50 = vor.u32 %v1319_v43, %v1316_v28  ;;  %519 = vst [vmem:[#allocation2 + $0x48] sm:$0x1] %v518_v48  ;;  %v619_v54 = vld [vmem:[%s9100_s25 + $0x28] sm:$0xf] }
  0x91   : > { %v1325_v52 = vrot.slane %v1323_v44, 5  ;;  %v574_v53 = vsel %vm9106_vm4, 0, %v573_v49  ;;  %v1329_v55 = vrot.slane %v1327_v46, 4  ;;  %v620_v56 = vld [vmem:[%s9100_s25 + $0x2c] sm:$0xf]  ;;  %v729_v57 = vshrl.u32 %v619_v54, 16 }
  0x92   : > { %575 = vst [vmem:[#allocation2 + $0x50] sm:$0x1] %v574_v53  ;;  %v732_v58 = vshll.u32 %v619_v54, 16  ;;  %v1321_v59 = vrot.slane %v1320_v50, 4  ;;  %v1335_v60 = vrot.slane %v1333_v47, 5  ;;  %v737_v0 = vshrl.u32 %v620_v56, 16 }
  0x93   : > { %v1330_v61 = vor.u32 %v1329_v55, %v1325_v52  ;;  %v731_v62 = vrot.slane %v729_v57, 7  ;;  %v740_v1 = vshll.u32 %v620_v56, 16  ;;  %v1644_v2 = vld [vmem:[#allocation2 + $0xc] sm:$0xe]  ;;  %v8721_v6 = vld [vmem:[#allocation3 + $0xc] ss:$36 sps:$4 sm:$0xff]  }
  0x94   : > { %v1326_v5 = vsel %vm9159_vm11, %v1321_v59, %v1325_v52  ;;  %v1645_v7 = vld [vmem:[#allocation2 + $0x10] sm:$0xf]  ;;  %v1646_v8 = vld [vmem:[#allocation2 + $0x14] sm:$0x1]  ;;  %v7256_v9 = vrot.slane %v1644_v2, 9  ;;  %v739_v14 = vrot.slane %v737_v0, 7 }
  0x95   : > { %v1331_v10 = vrot.slane %v1330_v61, 4  ;;  %1619 = vst [vmem:[#allocation3 + $0x16c] sm:$0xf] %v1326_v5  ;;  %v734_v11 = vor.u32 %v732_v58, %v731_v62  ;;  %v735_v12 = vrot.slane %v731_v62, 4  ;;  %v1918_v15 = vld [vmem:[#allocation2 + $0x18] sm:$0xf] }
  0x96   : > { %v8709_v16 = vld [vmem:[#allocation3 + $0x43c] ss:$36 sps:$4 sm:$0xff]   ;;  %v1749_v19 = vrot.slane %v1645_v7, 5  ;;  %1950 = vst [vmem:[#allocation3 + $0x54] sm:$0xf] %v1918_v15  ;;  %v742_v21 = vor.u32 %v740_v1, %v739_v14  ;;  %v744_v22 = vrot.slane %v739_v14, 4 }
  0x97   : > { %v8711_v18 = vld [vmem:[#allocation3 + $0x438] ss:$36 sps:$4 sm:$0xff]   ;;  %v1336_v20 = vsel %vm9159_vm11, %v1331_v10, %v1335_v60  ;;  %v1001_v23 = vld [vmem:[#allocation2 + $0x48] sm:$0xf]  ;;  %v1752_v24 = vrot.slane %v1646_v8, 5  ;;  %5205 = vmatprep.mubr.bf16.mxu1 %v8709_v16  ;;  %v8723_v28 = vld [vmem:[%s10649_s1 + $0x1b8] sm:$0xff]  }
  0x98   : > { %v1919_v25 = vld [vmem:[#allocation2 + $0x1c] sm:$0xf]  ;;  %1620 = vst [vmem:[#allocation3 + $0x190] sm:$0xf] %v1336_v20  ;;  %v1002_v26 = vsel %vm9143_vm10, %v734_v11, %v1001_v23  ;;  %v1750_v29 = vsel %vm9399_vm14, %v7256_v9, %v1749_v19  ;;  %v1751_v30 = vrot.slane %v1749_v19, 4  ;;  %5206 = vmatmul.mubr.bf16.gmra.mxu1 %v8711_v18  ;;  %v743_v31 = vsel %vm9137_vm9, %v735_v12, %v742_v21  ;;  %v8737_v56 = vld [vmem:[%s10649_s1 + $0x1f0] sm:$0xff]  }
  0x99   : > { %v1005_v27 = vld [vmem:[#allocation2 + $0x50] sm:$0x1]  ;;  %1951 = vst [vmem:[#allocation3 + $0x78] sm:$0xf] %v1919_v25  ;;  %1003 = vst [vmem:[#allocation2 + $0x48] sm:$0xf] %v1002_v26  ;;  %5246 = vmatprep.mubr.bf16.mxu1 %v8721_v6 }
  0x9a   : > { %v1006_v32 = vsel %vm9092_vm3, %v744_v22, %v1005_v27  ;;  %1886 = vst [vmem:[#allocation3 + $0x50] sm:$0xf] %v1750_v29  ;;  %1004 = vst [vmem:[#allocation2 + $0x4c] sm:$0xf] %v743_v31  ;;  %v1753_v33 = vsel %vm9399_vm14, %v1751_v30, %v1752_v24  ;;  %v520_v34 = vld [vmem:[#allocation2 + $0x54] sm:$0x1] }
  0x9b   : > { %1007 = vst [vmem:[#allocation2 + $0x50] sm:$0x1] %v1006_v32  ;;  %v576_v35 = vld [vmem:[#allocation2 + $0x5c] sm:$0x1]  ;;  %v621_v36 = vld [vmem:[%s9100_s25 + $0x30] sm:$0xf] }
  0x9c   : > { %v8719_v37 = vld [vmem:[#allocation3 + $0x8] ss:$36 sps:$4 sm:$0xff]   ;;  %1887 = vst [vmem:[#allocation3 + $0x74] sm:$0xf] %v1753_v33  ;;  %v521_v38 = vsel %vm9092_vm3, 0, %v520_v34  ;;  %v577_v39 = vsel %vm9106_vm4, 0, %v576_v35 }
  0x9d   : > { %v622_v40 = vld [vmem:[%s9100_s25 + $0x34] sm:$0xf]  ;;  %v746_v41 = vshrl.u32 %v621_v36, 16  ;;  %522 = vst [vmem:[#allocation2 + $0x54] sm:$0x1] %v521_v38  ;;  %v749_v43 = vshll.u32 %v621_v36, 16 }
  0x9e   : > { %578 = vst [vmem:[#allocation2 + $0x5c] sm:$0x1] %v577_v39  ;;  %v754_v44 = vshrl.u32 %v622_v40, 16  ;;  %v757_v45 = vshll.u32 %v622_v40, 16  ;;  %v1647_v46 = vld [vmem:[#allocation2 + $0x18] sm:$0xe] }
  0x9f   : > { %v748_v47 = vrot.slane %v746_v41, 7  ;;  %v1648_v48 = vld [vmem:[#allocation2 + $0x1c] sm:$0xf]  ;;  %v1649_v49 = vld [vmem:[#allocation2 + $0x20] sm:$0x1]  ;;  %v7257_v50 = vrot.slane %v1647_v46, 9 }
  0xa0   : > { %v756_v52 = vrot.slane %v754_v44, 7  ;;  %v1756_v53 = vrot.slane %v1648_v48, 5  ;;  %v1759_v54 = vrot.slane %v1649_v49, 5  ;;  %v1920_v55 = vld [vmem:[#allocation2 + $0x24] sm:$0xf]  ;;  %v8739_v2 = vld [vmem:[%s10649_s1 + $0x1b0] sm:$0xff]   ;;  %5247 = vmatmul.mubr.bf16.vlgmr.msra.gmra.mxu1 %v8719_v37 }
  0xa1   : > { %v8713_v57 = vld [vmem:[#allocation3 + $0x16c] ss:$36 sps:$4 sm:$0xff]   ;;  %v752_v59 = vrot.slane %v748_v47, 4  ;;  %1952 = vst [vmem:[#allocation3 + $0x9c] sm:$0xf] %v1920_v55  ;;  %v751_v7 = vor.u32 %v749_v43, %v748_v47  ;;  %8308 = vmatpush3.bf16.msra.mxu1 %v8723_v28 }
  0xa2   : > { %v8716_v58 = vld [vmem:[#allocation3 + $0x168] ss:$36 sps:$4 sm:$0xff]   ;;  %v1090_v60 = vld [vmem:[#allocation2 + $0x48] sm:$0xf]  ;;  %v759_v62 = vor.u32 %v757_v45, %v756_v52  ;;  %v761_v0 = vrot.slane %v756_v52, 4  ;;  %v1757_v1 = vsel %vm9399_vm14, %v7257_v50, %v1756_v53  ;;  %5125 = vmatprep.mubr.bf16.mxu0 %v8713_v57  ;;  %v1758_v19 = vrot.slane %v1756_v53, 4  ;;  %8309 = vmatprep.subr.bf16.mxu1 %v8737_v56 }
  0xa3   : > { %v1160_v61 = vld [vmem:[#allocation2 + $0x48] sm:$0xf]  ;;  %v1091_v3 = vld [vmem:[#allocation2 + $0x4c] sm:$0xf]  ;;  %1122 = vst [vmem:[#allocation3 + $0x1b0] sm:$0xf] %v1090_v60  ;;  %5126 = vmatmul.mubr.bf16.gmra.mxu0 %v8716_v58 }
  0xa4   : > { %v1161_v5 = vld [vmem:[#allocation2 + $0x4c] sm:$0xf]  ;;  %v1162_v6 = vld [vmem:[#allocation2 + $0x50] sm:$0x1]  ;;  %1888 = vst [vmem:[#allocation3 + $0x98] sm:$0xf] %v1757_v1  ;;  %v760_v18 = vsel %vm9137_vm9, %v752_v59, %v759_v62  ;;  %v1760_v30 = vsel %vm9399_vm14, %v1758_v19, %v1759_v54 }
  0xa5   : > { %1123 = vst [vmem:[#allocation3 + $0x1d4] sm:$0xf] %v1091_v3  ;;  %v1338_v8 = vshrl.u32 %v1160_v61, 16  ;;  %v1341_v9 = vshll.u32 %v1160_v61, 16  ;;  %v1347_v10 = vshll.u32 %v1161_v5, 16  ;;  %v1351_v11 = vshrl.u32 %v1161_v5, 16  ;;  %8310 = vmatpush3.bf16.msra.mxu1 %v8739_v2 }
  0xa6   : > { %v8755_v12 = vld [vmem:[%s10649_s1 + $0x1e8] sm:$0xff]   ;;  %v1357_v14 = vshll.u32 %v1162_v6, 16  ;;  %v1008_v24 = vld [vmem:[#allocation2 + $0x54] sm:$0xf]  ;;  %1011 = vst [vmem:[#allocation2 + $0x58] sm:$0xf] %v760_v18 }
  0xa7   : > { %v8727_v15 = vld [vmem:[#allocation3 + $0x54] ss:$36 sps:$4 sm:$0xff]   ;;  %v1340_v20 = vrot.slane %v1338_v8, 4  ;;  %v1343_v21 = vrot.slane %v1341_v9, 5  ;;  %v1349_v22 = vrot.slane %v1347_v10, 5  ;;  %v1353_v23 = vrot.slane %v1351_v11, 4  ;;  %8311 = vmatprep.subr.bf16.mxu1 %v8755_v12 }
  0xa8   : > { %v8729_v16 = vld [vmem:[#allocation3 + $0x50] ss:$36 sps:$4 sm:$0xff]   ;;  %v1359_v26 = vrot.slane %v1357_v14, 5  ;;  %5254 = vmatprep.mubr.bf16.mxu1 %v8727_v15  ;;  %v1009_v27 = vsel %vm9143_vm10, %v751_v7, %v1008_v24  ;;  %v1012_v29 = vld [vmem:[#allocation2 + $0x5c] sm:$0x1]  ;;  %v8773_v32 = vld [vmem:[%s10649_s1 + $0x1e0] sm:$0xff]  }
  0xa9   : > { %v8757_v25 = vld [vmem:[%s10649_s1 + $0x1a8] sm:$0xff]   ;;  %v1344_v33 = vor.u32 %v1343_v21, %v1340_v20  ;;  %v1354_v34 = vor.u32 %v1353_v23, %v1349_v22  ;;  %1010 = vst [vmem:[#allocation2 + $0x54] sm:$0xf] %v1009_v27  ;;  %v1013_v35 = vsel %vm9092_vm3, %v761_v0, %v1012_v29  ;;  %1889 = vst [vmem:[#allocation3 + $0xbc] sm:$0xf] %v1760_v30  ;;  %v8775_v28 = vld [vmem:[%s10649_s1 + $0x1a0] sm:$0xff]   ;;  %5255 = vmatmul.mubr.bf16.gmra.mxu1 %v8729_v16 }
  0xaa   : > { %v1921_v31 = vld [vmem:[#allocation2 + $0x28] sm:$0xf]  ;;  %1014 = vst [vmem:[#allocation2 + $0x5c] sm:$0x1] %v1013_v35  ;;  %v523_v36 = vld [vmem:[#allocation2 + $0x60] sm:$0x1]  ;;  %8312 = vmatpush3.bf16.msra.mxu1 %v8757_v25 }
  0xab   : > { %1953 = vst [vmem:[#allocation3 + $0xc0] sm:$0xf] %v1921_v31  ;;  %v579_v37 = vld [vmem:[#allocation2 + $0x68] sm:$0x1]  ;;  %v1345_v38 = vrot.slane %v1344_v33, 4  ;;  %v1355_v39 = vrot.slane %v1354_v34, 4  ;;  %8313 = vmatprep.subr.bf16.mxu1 %v8773_v32 }
  0xac   : > { %v524_v40 = vsel %vm9092_vm3, 0, %v523_v36  ;;  %v580_v41 = vsel %vm9106_vm4, 0, %v579_v37  ;;  %v623_v43 = vld [vmem:[%s9100_s25 + $0x38] sm:$0xf]  ;;  %v624_v44 = vld [vmem:[%s9100_s25 + $0x3c] sm:$0xf] }
  0xad   : > { %525 = vst [vmem:[#allocation2 + $0x60] sm:$0x1] %v524_v40  ;;  %581 = vst [vmem:[#allocation2 + $0x68] sm:$0x1] %v580_v41  ;;  %v8787_v45 = vld [vmem:[%s10649_s1 + $0x1d8] sm:$0xff]   ;;  %v1350_v46 = vsel %vm9159_vm11, %v1345_v38, %v1349_v22  ;;  %v1360_v47 = vsel %vm9159_vm11, %v1355_v39, %v1359_v26  ;;  %v763_v48 = vshrl.u32 %v623_v43, 16 }
  0xae   : > { %v766_v49 = vshll.u32 %v623_v43, 16  ;;  %1621 = vst [vmem:[#allocation3 + $0x1b4] sm:$0xf] %v1350_v46  ;;  %1622 = vst [vmem:[#allocation3 + $0x1d8] sm:$0xf] %v1360_v47  ;;  %v771_v53 = vshrl.u32 %v624_v44, 16  ;;  %8314 = vmatpush3.bf16.msra.mxu1 %v8775_v28 }
  0xaf   : > { %v1093_v50 = vld [vmem:[#allocation2 + $0x58] sm:$0xf]  ;;  %v774_v54 = vshll.u32 %v624_v44, 16  ;;  %v765_v57 = vrot.slane %v763_v48, 7  ;;  %8315 = vmatprep.subr.bf16.mxu1 %v8787_v45  ;;  %v8802_v18 = vld [vmem:[%s10649_s1 + $0x1d0] sm:$0xff]   ;;  %v8817_v39 = vld [vmem:[%s10649_s1 + $0x1c8] sm:$0xff]  }
  0xb0   : > { %v1164_v52 = vld [vmem:[#allocation2 + $0x58] sm:$0xf]  ;;  %1125 = vst [vmem:[#allocation3 + $0x21c] sm:$0xf] %v1093_v50  ;;  %v1092_v58 = vld [vmem:[#allocation2 + $0x54] sm:$0xf] }
  0xb1   : > { %v1371_v55 = vshll.u32 %v1164_v52, 16  ;;  %v1375_v56 = vshrl.u32 %v1164_v52, 16  ;;  %v1163_v59 = vld [vmem:[#allocation2 + $0x54] sm:$0xf]  ;;  %v773_v60 = vrot.slane %v771_v53, 7  ;;  %v8790_v61 = vld [vmem:[%s10649_s1 + $0x198] sm:$0xff]   ;;  %v768_v8 = vor.u32 %v766_v49, %v765_v57 }
  0xb2   : > { %1124 = vst [vmem:[#allocation3 + $0x1f8] sm:$0xf] %v1092_v58  ;;  %v1165_v62 = vld [vmem:[#allocation2 + $0x5c] sm:$0x1]  ;;  %v1362_v0 = vshrl.u32 %v1163_v59, 16  ;;  %v1365_v1 = vshll.u32 %v1163_v59, 16  ;;  %8316 = vmatpush3.bf16.msra.mxu1 %v8790_v61 }
  0xb3   : > { %v1373_v2 = vrot.slane %v1371_v55, 5  ;;  %v1377_v3 = vrot.slane %v1375_v56, 4  ;;  %v1381_v5 = vshll.u32 %v1165_v62, 16  ;;  %v8735_v6 = vld [vmem:[#allocation3 + $0x9c] ss:$36 sps:$4 sm:$0xff]   ;;  %v769_v9 = vrot.slane %v765_v57, 4  ;;  %8317 = vmatprep.subr.bf16.mxu1 %v8802_v18 }
  0xb4   : > { %v8738_v7 = vld [vmem:[#allocation3 + $0x98] ss:$36 sps:$4 sm:$0xff]   ;;  %v776_v10 = vor.u32 %v774_v54, %v773_v60  ;;  %v1364_v11 = vrot.slane %v1362_v0, 4  ;;  %v1367_v12 = vrot.slane %v1365_v1, 5  ;;  %v778_v15 = vrot.slane %v773_v60, 4  ;;  %5262 = vmatprep.mubr.bf16.mxu1 %v8735_v6  ;;  %v8820_v52 = vld [vmem:[%s10649_s1 + $0x188] sm:$0xff]  }
  0xb5   : > { %v1378_v14 = vor.u32 %v1377_v3, %v1373_v2  ;;  %v1015_v16 = vld [vmem:[#allocation2 + $0x60] sm:$0xf]  ;;  %v1383_v19 = vrot.slane %v1381_v5, 5  ;;  %v1019_v22 = vld [vmem:[#allocation2 + $0x68] sm:$0x1]  ;;  %v8805_v24 = vld [vmem:[%s10649_s1 + $0x190] sm:$0xff]   ;;  %5263 = vmatmul.mubr.bf16.gmra.mxu1 %v8738_v7 }
  0xb6   : > { %v777_v20 = vsel %vm9137_vm9, %v769_v9, %v776_v10  ;;  %v1016_v21 = vsel %vm9143_vm10, %v768_v8, %v1015_v16  ;;  %v1650_v23 = vld [vmem:[#allocation2 + $0x24] sm:$0xe]  ;;  %v8724_v25 = vld [vmem:[#allocation3 + $0x1b4] ss:$36 sps:$4 sm:$0xff]   ;;  %v1368_v26 = vor.u32 %v1367_v12, %v1364_v11  ;;  %v1020_v29 = vsel %vm9092_vm3, %v778_v15, %v1019_v22  ;;  %v1651_v32 = vld [vmem:[#allocation2 + $0x28] sm:$0xf]  ;;  %8318 = vmatpush3.bf16.msra.mxu1 %v8805_v24 }
  0xb7   : > { %v1379_v27 = vrot.slane %v1378_v14, 4  ;;  %1017 = vst [vmem:[#allocation2 + $0x60] sm:$0xf] %v1016_v21  ;;  %1018 = vst [vmem:[#allocation2 + $0x64] sm:$0xf] %v777_v20  ;;  %v7258_v30 = vrot.slane %v1650_v23, 9  ;;  %5133 = vmatprep.mubr.bf16.mxu0 %v8724_v25  ;;  %8319 = vmatprep.subr.bf16.mxu1 %v8817_v39 }
  0xb8   : > { %v8726_v31 = vld [vmem:[#allocation3 + $0x1b0] ss:$36 sps:$4 sm:$0xff]   ;;  %1021 = vst [vmem:[#allocation2 + $0x68] sm:$0x1] %v1020_v29  ;;  %v1369_v34 = vrot.slane %v1368_v26, 4  ;;  %v1763_v36 = vrot.slane %v1651_v32, 5 }
  0xb9   : > { %v1652_v33 = vld [vmem:[#allocation2 + $0x2c] sm:$0x1]  ;;  %v1384_v35 = vsel %vm9159_vm11, %v1379_v27, %v1383_v19  ;;  %v1922_v38 = vld [vmem:[#allocation2 + $0x30] sm:$0xf]  ;;  %5134 = vmatmul.mubr.bf16.gmra.mxu0 %v8726_v31  ;;  %v1923_v40 = vld [vmem:[#allocation2 + $0x34] sm:$0xf] }
  0xba   : > { %v1766_v37 = vrot.slane %v1652_v33, 5  ;;  %1624 = vst [vmem:[#allocation3 + $0x220] sm:$0xf] %v1384_v35  ;;  %1954 = vst [vmem:[#allocation3 + $0xe4] sm:$0xf] %v1922_v38  ;;  %v1374_v43 = vsel %vm9159_vm11, %v1369_v34, %v1373_v2  ;;  %v1764_v44 = vsel %vm9399_vm14, %v7258_v30, %v1763_v36  ;;  %v1765_v45 = vrot.slane %v1763_v36, 4  ;;  %8320 = vmatpush3.bf16.msra.mxu1 %v8820_v52 }
  0xbb   : > { %v526_v41 = vld [vmem:[#allocation2 + $0x6c] sm:$0x1]  ;;  %v582_v28 = vld [vmem:[#allocation2 + $0x74] sm:$0x1]  ;;  %1955 = vst [vmem:[#allocation3 + $0x108] sm:$0xf] %v1923_v40 }
  0xbc   : > { %v527_v46 = vsel %vm9092_vm3, 0, %v526_v41  ;;  %v625_v47 = vld [vmem:[%s9100_s25 + $0x40] sm:$0xf]  ;;  %v626_v48 = vld [vmem:[%s9100_s25 + $0x44] sm:$0xf]  ;;  %v583_v49 = vsel %vm9106_vm4, 0, %v582_v28  ;;  %v1767_v53 = vsel %vm9399_vm14, %v1765_v45, %v1766_v37 }
  0xbd   : > { %1623 = vst [vmem:[#allocation3 + $0x1fc] sm:$0xf] %v1374_v43  ;;  %1890 = vst [vmem:[#allocation3 + $0xe0] sm:$0xf] %v1764_v44  ;;  %v780_v50 = vshrl.u32 %v625_v47, 16  ;;  %v783_v54 = vshll.u32 %v625_v47, 16 }
  0xbe   : > { %528 = vst [vmem:[#allocation2 + $0x6c] sm:$0x1] %v527_v46  ;;  %584 = vst [vmem:[#allocation2 + $0x74] sm:$0x1] %v583_v49  ;;  %v788_v55 = vshrl.u32 %v626_v48, 16  ;;  %v791_v56 = vshll.u32 %v626_v48, 16 }
  0xbf   : > { %v1094_v57 = vld [vmem:[#allocation2 + $0x60] sm:$0xf]  ;;  %v1095_v58 = vld [vmem:[#allocation2 + $0x64] sm:$0xf]  ;;  %1891 = vst [vmem:[#allocation3 + $0x104] sm:$0xf] %v1767_v53 }
  0xc0   : > { %v1166_v59 = vld [vmem:[#allocation2 + $0x60] sm:$0xf]  ;;  %1126 = vst [vmem:[#allocation3 + $0x240] sm:$0xf] %v1094_v57  ;;  %1127 = vst [vmem:[#allocation3 + $0x264] sm:$0xf] %v1095_v58 }
  0xc1   : > { %v1167_v60 = vld [vmem:[#allocation2 + $0x64] sm:$0xf]  ;;  %v1168_v61 = vld [vmem:[#allocation2 + $0x68] sm:$0x1]  ;;  %v1386_v62 = vshrl.u32 %v1166_v59, 16  ;;  %v1389_v0 = vshll.u32 %v1166_v59, 16 }
  0xc2   : > { %v1395_v1 = vshll.u32 %v1167_v60, 16  ;;  %v1399_v2 = vshrl.u32 %v1167_v60, 16  ;;  %v1405_v3 = vshll.u32 %v1168_v61, 16  ;;  %v782_v5 = vrot.slane %v780_v50, 7  ;;  %v1653_v9 = vld [vmem:[#allocation2 + $0x30] sm:$0xe] }
  0xc3   : > { %v1388_v6 = vrot.slane %v1386_v62, 4  ;;  %v1391_v7 = vrot.slane %v1389_v0, 5  ;;  %v790_v8 = vrot.slane %v788_v55, 7  ;;  %v1654_v10 = vld [vmem:[#allocation2 + $0x34] sm:$0xf]  ;;  %v7259_v36 = vrot.slane %v1653_v9, 9 }
  0xc4   : > { %v1397_v11 = vrot.slane %v1395_v1, 5  ;;  %v1401_v12 = vrot.slane %v1399_v2, 4  ;;  %v1407_v14 = vrot.slane %v1405_v3, 5  ;;  %v785_v15 = vor.u32 %v783_v54, %v782_v5  ;;  %v1655_v16 = vld [vmem:[#allocation2 + $0x38] sm:$0x1]  ;;  %v8832_v39 = vld [vmem:[%s10649_s1 + $0x1c0] sm:$0xff]  }
  0xc5   : > { %v1924_v18 = vld [vmem:[#allocation2 + $0x3c] sm:$0xf]  ;;  %v8732_v19 = vld [vmem:[#allocation3 + $0x1fc] ss:$36 sps:$4 sm:$0xff]   ;;  %v1392_v21 = vor.u32 %v1391_v7, %v1388_v6  ;;  %v786_v22 = vrot.slane %v782_v5, 4  ;;  %v793_v23 = vor.u32 %v791_v56, %v790_v8  ;;  %v795_v25 = vrot.slane %v790_v8, 4  ;;  %8321 = vmatprep.subr.bf16.mxu1 %v8832_v39 }
  0xc6   : > { %v8734_v20 = vld [vmem:[#allocation3 + $0x1f8] ss:$36 sps:$4 sm:$0xff]   ;;  %1956 = vst [vmem:[#allocation3 + $0x12c] sm:$0xf] %v1924_v18  ;;  %v1402_v24 = vor.u32 %v1401_v12, %v1397_v11  ;;  %v1022_v26 = vld [vmem:[#allocation2 + $0x6c] sm:$0xf]  ;;  %5141 = vmatprep.mubr.bf16.mxu0 %v8732_v19 }
  0xc7   : > { %v1026_v27 = vld [vmem:[#allocation2 + $0x74] sm:$0x1]  ;;  %v1393_v29 = vrot.slane %v1392_v21, 4  ;;  %v8745_v30 = vld [vmem:[#allocation3 + $0xe4] ss:$36 sps:$4 sm:$0xff]   ;;  %v794_v32 = vsel %vm9137_vm9, %v786_v22, %v793_v23  ;;  %v1023_v33 = vsel %vm9143_vm10, %v785_v15, %v1022_v26  ;;  %5142 = vmatmul.mubr.bf16.gmra.mxu0 %v8734_v20  ;;  %v1770_v37 = vrot.slane %v1654_v10, 5 }
  0xc8   : > { %v8747_v31 = vld [vmem:[#allocation3 + $0xe0] ss:$36 sps:$4 sm:$0xff]   ;;  %v1403_v34 = vrot.slane %v1402_v24, 4  ;;  %1024 = vst [vmem:[#allocation2 + $0x6c] sm:$0xf] %v1023_v33  ;;  %v1027_v35 = vsel %vm9092_vm3, %v795_v25, %v1026_v27  ;;  %5270 = vmatprep.mubr.bf16.mxu1 %v8745_v30  ;;  %v1773_v41 = vrot.slane %v1655_v16, 5 }
  0xc9   : > { %1025 = vst [vmem:[#allocation2 + $0x70] sm:$0xf] %v794_v32  ;;  %v1925_v38 = vld [vmem:[#allocation2 + $0x40] sm:$0xf]  ;;  %v1398_v40 = vsel %vm9159_vm11, %v1393_v29, %v1397_v11  ;;  %1028 = vst [vmem:[#allocation2 + $0x74] sm:$0x1] %v1027_v35  ;;  %5271 = vmatmul.mubr.bf16.gmra.mxu1 %v8747_v31  ;;  %v1771_v43 = vsel %vm9399_vm14, %v7259_v36, %v1770_v37 }
  0xca   : > { %1957 = vst [vmem:[#allocation3 + $0x150] sm:$0xf] %v1925_v38  ;;  %v1408_v28 = vsel %vm9159_vm11, %v1403_v34, %v1407_v14  ;;  %1625 = vst [vmem:[#allocation3 + $0x244] sm:$0xf] %v1398_v40  ;;  %v1772_v44 = vrot.slane %v1770_v37, 4  ;;  %v8835_v45 = vld [vmem:[%s10649_s1 + $0x180] sm:$0xff]  }
  0xcb   : > { %1626 = vst [vmem:[#allocation3 + $0x268] sm:$0xf] %v1408_v28  ;;  %1892 = vst [vmem:[#allocation3 + $0x128] sm:$0xf] %v1771_v43  ;;  %v529_v46 = vld [vmem:[#allocation2 + $0x78] sm:$0x1]  ;;  %8322 = vmatpush3.bf16.msra.mxu1 %v8835_v45 }
  0xcc   : > { %v1774_v47 = vsel %vm9399_vm14, %v1772_v44, %v1773_v41  ;;  %v530_v48 = vsel %vm9092_vm3, 0, %v529_v46  ;;  %v585_v49 = vld [vmem:[#allocation2 + $0x80] sm:$0x1]  ;;  %v627_v50 = vld [vmem:[%s9100_s25 + $0x48] sm:$0xf] }
  0xcd   : > { %1893 = vst [vmem:[#allocation3 + $0x14c] sm:$0xf] %v1774_v47  ;;  %531 = vst [vmem:[#allocation2 + $0x78] sm:$0x1] %v530_v48  ;;  %v586_v52 = vsel %vm9106_vm4, 0, %v585_v49  ;;  %v797_v54 = vshrl.u32 %v627_v50, 16 }
  0xce   : > { %v628_v53 = vld [vmem:[%s9100_s25 + $0x4c] sm:$0xf]  ;;  %587 = vst [vmem:[#allocation2 + $0x80] sm:$0x1] %v586_v52  ;;  %v800_v55 = vshll.u32 %v627_v50, 16 }
  0xcf   : > { %v805_v56 = vshrl.u32 %v628_v53, 16  ;;  %v1096_v57 = vld [vmem:[#allocation2 + $0x6c] sm:$0xf]  ;;  %v799_v5 = vrot.slane %v797_v54, 7  ;;  %v8743_v7 = vld [vmem:[#allocation3 + $0x240] ss:$36 sps:$4 sm:$0xff]  }
  0xd0   : > { %v1097_v58 = vld [vmem:[#allocation2 + $0x70] sm:$0xf]  ;;  %v1169_v59 = vld [vmem:[#allocation2 + $0x6c] sm:$0xf]  ;;  %1128 = vst [vmem:[#allocation3 + $0x288] sm:$0xf] %v1096_v57 }
  0xd1   : > { %1129 = vst [vmem:[#allocation3 + $0x2ac] sm:$0xf] %v1097_v58  ;;  %v1170_v60 = vld [vmem:[#allocation2 + $0x70] sm:$0xf]  ;;  %v1171_v61 = vld [vmem:[#allocation2 + $0x74] sm:$0x1]  ;;  %v802_v18 = vor.u32 %v800_v55, %v799_v5 }
  0xd2   : > { %v1410_v62 = vshrl.u32 %v1169_v59, 16  ;;  %v1413_v0 = vshll.u32 %v1169_v59, 16  ;;  %v1419_v1 = vshll.u32 %v1170_v60, 16  ;;  %v1423_v2 = vshrl.u32 %v1170_v60, 16  ;;  %v8740_v6 = vld [vmem:[#allocation3 + $0x244] ss:$36 sps:$4 sm:$0xff]  }
  0xd3   : > { %v1429_v3 = vshll.u32 %v1171_v61, 16  ;;  %v808_v12 = vshll.u32 %v628_v53, 16  ;;  %5149 = vmatprep.mubr.bf16.mxu0 %v8740_v6  ;;  %v8752_v15 = vld [vmem:[#allocation3 + $0x12c] ss:$36 sps:$4 sm:$0xff]   ;;  %v803_v21 = vrot.slane %v799_v5, 4  ;;  %v807_v22 = vrot.slane %v805_v56, 7 }
  0xd4   : > { %v1412_v8 = vrot.slane %v1410_v62, 4  ;;  %v1415_v9 = vrot.slane %v1413_v0, 5  ;;  %v1421_v10 = vrot.slane %v1419_v1, 5  ;;  %v1425_v11 = vrot.slane %v1423_v2, 4  ;;  %v8756_v16 = vld [vmem:[#allocation3 + $0x128] ss:$36 sps:$4 sm:$0xff]   ;;  %5150 = vmatmul.mubr.bf16.gmra.mxu0 %v8743_v7  ;;  %5278 = vmatprep.mubr.bf16.mxu1 %v8752_v15 }
  0xd5   : > { %v1431_v14 = vrot.slane %v1429_v3, 5  ;;  %v1029_v23 = vld [vmem:[#allocation2 + $0x78] sm:$0xf]  ;;  %v1033_v24 = vld [vmem:[#allocation2 + $0x80] sm:$0x1]  ;;  %5279 = vmatmul.mubr.bf16.gmra.mxu1 %v8756_v16  ;;  %v810_v30 = vor.u32 %v808_v12, %v807_v22  ;;  %v812_v31 = vrot.slane %v807_v22, 4 }
  0xd6   : > { %v1416_v19 = vor.u32 %v1415_v9, %v1412_v8  ;;  %v1426_v20 = vor.u32 %v1425_v11, %v1421_v10  ;;  %v1030_v25 = vsel %vm9143_vm10, %v802_v18, %v1029_v23  ;;  %v1656_v26 = vld [vmem:[#allocation2 + $0x3c] sm:$0xe]  ;;  %v1657_v32 = vld [vmem:[#allocation2 + $0x40] sm:$0xf]  ;;  %v1658_v33 = vld [vmem:[#allocation2 + $0x44] sm:$0x1] }
  0xd7   : > { %1031 = vst [vmem:[#allocation2 + $0x78] sm:$0xf] %v1030_v25  ;;  %v7260_v34 = vrot.slane %v1656_v26, 9  ;;  %v1777_v35 = vrot.slane %v1657_v32, 5  ;;  %v1926_v36 = vld [vmem:[#allocation2 + $0x48] sm:$0xf]  ;;  %v811_v39 = vsel %vm9137_vm9, %v803_v21, %v810_v30  ;;  %v1034_v40 = vsel %vm9092_vm3, %v812_v31, %v1033_v24 }
  0xd8   : > { %v1417_v27 = vrot.slane %v1416_v19, 4  ;;  %v1427_v29 = vrot.slane %v1426_v20, 4  ;;  %v1927_v41 = vld [vmem:[#allocation2 + $0x4c] sm:$0xf]  ;;  %1958 = vst [vmem:[#allocation3 + $0x174] sm:$0xf] %v1926_v36 }
  0xd9   : > { %1032 = vst [vmem:[#allocation2 + $0x7c] sm:$0xf] %v811_v39  ;;  %1035 = vst [vmem:[#allocation2 + $0x80] sm:$0x1] %v1034_v40  ;;  %v1778_v28 = vsel %vm9399_vm14, %v7260_v34, %v1777_v35  ;;  %v1779_v43 = vrot.slane %v1777_v35, 4  ;;  %v1780_v44 = vrot.slane %v1658_v33, 5 }
  0xda   : > { %v1422_v37 = vsel %vm9159_vm11, %v1417_v27, %v1421_v10  ;;  %v1432_v38 = vsel %vm9159_vm11, %v1427_v29, %v1431_v14  ;;  %1959 = vst [vmem:[#allocation3 + $0x198] sm:$0xf] %v1927_v41  ;;  %1894 = vst [vmem:[#allocation3 + $0x170] sm:$0xf] %v1778_v28  ;;  %v1980_v45 = vld [vmem:[#allocation2 + $0xc] sm:$0xf] }
  0xdb   : > { %1627 = vst [vmem:[#allocation3 + $0x28c] sm:$0xf] %v1422_v37  ;;  %1628 = vst [vmem:[#allocation3 + $0x2b0] sm:$0xf] %v1432_v38  ;;  %v1981_v46 = vld [vmem:[#allocation2 + $0x10] sm:$0xf]  ;;  %v1781_v48 = vsel %vm9399_vm14, %v1779_v43, %v1780_v44 }
  0xdc   : > { %v1982_v47 = vld [vmem:[#allocation2 + $0x14] sm:$0x1]  ;;  %v2029_v49 = vshrl.u32 %v1980_v45, 16  ;;  %v2032_v50 = vshll.u32 %v1980_v45, 16  ;;  %v2038_v52 = vshll.u32 %v1981_v46, 16  ;;  %v2042_v53 = vshrl.u32 %v1981_v46, 16 }
  0xdd   : > { %1895 = vst [vmem:[#allocation3 + $0x194] sm:$0xf] %v1781_v48  ;;  %v2048_v54 = vshll.u32 %v1982_v47, 16  ;;  %v2476_v55 = vld [vmem:[#allocation2 + $0xc] sm:$0xe] }
  0xde   : > { %v2477_v56 = vld [vmem:[#allocation2 + $0x10] sm:$0xf]  ;;  %v1098_v57 = vld [vmem:[#allocation2 + $0x78] sm:$0xf]  ;;  %v2031_v59 = vrot.slane %v2029_v49, 4  ;;  %v2034_v60 = vrot.slane %v2032_v50, 5 }
  0xdf   : > { %v1172_v58 = vld [vmem:[#allocation2 + $0x78] sm:$0xf]  ;;  %1130 = vst [vmem:[#allocation3 + $0x2d0] sm:$0xf] %v1098_v57  ;;  %v2040_v0 = vrot.slane %v2038_v52, 5  ;;  %v2044_v1 = vrot.slane %v2042_v53, 4 }
  0xe0   : > { %v1434_v61 = vshrl.u32 %v1172_v58, 16  ;;  %v1437_v62 = vshll.u32 %v1172_v58, 16  ;;  %v2035_v2 = vor.u32 %v2034_v60, %v2031_v59  ;;  %v2050_v3 = vrot.slane %v2048_v54, 5  ;;  %v2478_v10 = vld [vmem:[#allocation2 + $0x14] sm:$0x1] }
  0xe1   : > { %v7271_v5 = vrot.slane %v2476_v55, 9  ;;  %v2574_v6 = vrot.slane %v2477_v56, 5  ;;  %v8750_v11 = vld [vmem:[#allocation3 + $0x288] ss:$36 sps:$4 sm:$0xff]   ;;  %v1099_v12 = vld [vmem:[#allocation2 + $0x7c] sm:$0xf]  ;;  %v2045_v15 = vor.u32 %v2044_v1, %v2040_v0 }
  0xe2   : > { %v8748_v7 = vld [vmem:[#allocation3 + $0x28c] ss:$36 sps:$4 sm:$0xff]   ;;  %v1436_v8 = vrot.slane %v1434_v61, 4  ;;  %v1439_v9 = vrot.slane %v1437_v62, 5  ;;  %v1173_v14 = vld [vmem:[#allocation2 + $0x7c] sm:$0xf] }
  0xe3   : > { %v2575_v16 = vsel %vm9399_vm14, %v7271_v5, %v2574_v6  ;;  %v1659_v18 = vld [vmem:[#allocation2 + $0x48] sm:$0xe]  ;;  %v1660_v19 = vld [vmem:[#allocation2 + $0x4c] sm:$0xf]  ;;  %5157 = vmatprep.mubr.bf16.mxu0 %v8748_v7  ;;  %1131 = vst [vmem:[#allocation3 + $0x2f4] sm:$0xf] %v1099_v12 }
  0xe4   : > { %v1174_v20 = vld [vmem:[#allocation2 + $0x80] sm:$0x1]  ;;  %v1440_v21 = vor.u32 %v1439_v9, %v1436_v8  ;;  %v1443_v22 = vshll.u32 %v1173_v14, 16  ;;  %v1447_v23 = vshrl.u32 %v1173_v14, 16  ;;  %v2036_v24 = vrot.slane %v2035_v2, 4  ;;  %5158 = vmatmul.mubr.bf16.gmra.mxu0 %v8750_v11 }
  0xe5   : > { %2716 = vst [vmem:[#allocation3 + $0x14] sm:$0xf] %v2575_v16  ;;  %v1453_v25 = vshll.u32 %v1174_v20, 16  ;;  %v8763_v26 = vld [vmem:[#allocation3 + $0x174] ss:$36 sps:$4 sm:$0xff]   ;;  %v2046_v35 = vrot.slane %v2045_v15, 4 }
  0xe6   : > { %v8765_v27 = vld [vmem:[#allocation3 + $0x170] ss:$36 sps:$4 sm:$0xff]   ;;  %v1441_v29 = vrot.slane %v1440_v21, 4  ;;  %v1445_v30 = vrot.slane %v1443_v22, 5  ;;  %v1449_v31 = vrot.slane %v1447_v23, 4  ;;  %v2041_v32 = vsel %vm9159_vm11, %v2036_v24, %v2040_v0  ;;  %5286 = vmatprep.mubr.bf16.mxu1 %v8763_v26 }
  0xe7   : > { %v1661_v33 = vld [vmem:[#allocation2 + $0x50] sm:$0x1]  ;;  %v1455_v34 = vrot.slane %v1453_v25, 5  ;;  %2444 = vst [vmem:[#allocation3 + $0x10] sm:$0xf] %v2041_v32  ;;  %v2576_v36 = vrot.slane %v2574_v6, 4  ;;  %5287 = vmatmul.mubr.bf16.gmra.mxu1 %v8765_v27  ;;  %v2051_v44 = vsel %vm9159_vm11, %v2046_v35, %v2050_v3 }
  0xe8   : > { %v2577_v37 = vrot.slane %v2478_v10, 5  ;;  %v1928_v38 = vld [vmem:[#allocation2 + $0x54] sm:$0xf]  ;;  %v1446_v39 = vsel %vm9159_vm11, %v1441_v29, %v1445_v30  ;;  %v1450_v40 = vor.u32 %v1449_v31, %v1445_v30  ;;  %v7261_v41 = vrot.slane %v1659_v18, 9  ;;  %v1929_v43 = vld [vmem:[#allocation2 + $0x58] sm:$0xf] }
  0xe9   : > { %v1784_v28 = vrot.slane %v1660_v19, 5  ;;  %1960 = vst [vmem:[#allocation3 + $0x1bc] sm:$0xf] %v1928_v38  ;;  %1629 = vst [vmem:[#allocation3 + $0x2d4] sm:$0xf] %v1446_v39  ;;  %v1787_v46 = vrot.slane %v1661_v33, 5 }
  0xea   : > { %v2578_v45 = vsel %vm9399_vm14, %v2576_v36, %v2577_v37  ;;  %1961 = vst [vmem:[#allocation3 + $0x1e0] sm:$0xf] %v1929_v43  ;;  %v1451_v47 = vrot.slane %v1450_v40, 4  ;;  %2445 = vst [vmem:[#allocation3 + $0x34] sm:$0xf] %v2051_v44 }
  0xeb   : > { %2717 = vst [vmem:[#allocation3 + $0x38] sm:$0xf] %v2578_v45  ;;  %v1785_v48 = vsel %vm9399_vm14, %v7261_v41, %v1784_v28  ;;  %v1786_v49 = vrot.slane %v1784_v28, 4  ;;  %v1983_v50 = vld [vmem:[#allocation2 + $0x18] sm:$0xf] }
  0xec   : > { %1896 = vst [vmem:[#allocation3 + $0x1b8] sm:$0xf] %v1785_v48  ;;  %v1984_v52 = vld [vmem:[#allocation2 + $0x1c] sm:$0xf]  ;;  %v1985_v53 = vld [vmem:[#allocation2 + $0x20] sm:$0x1]  ;;  %v1456_v56 = vsel %vm9159_vm11, %v1451_v47, %v1455_v34 }
  0xed   : > { %v2053_v54 = vshrl.u32 %v1983_v50, 16  ;;  %v2056_v55 = vshll.u32 %v1983_v50, 16  ;;  %v1788_v57 = vsel %vm9399_vm14, %v1786_v49, %v1787_v46  ;;  %v2062_v58 = vshll.u32 %v1984_v52, 16  ;;  %v2479_v60 = vld [vmem:[#allocation2 + $0x18] sm:$0xe] }
  0xee   : > { %v2066_v59 = vshrl.u32 %v1984_v52, 16  ;;  %v2480_v61 = vld [vmem:[#allocation2 + $0x1c] sm:$0xf]  ;;  %1630 = vst [vmem:[#allocation3 + $0x2f8] sm:$0xf] %v1456_v56  ;;  %v2072_v1 = vshll.u32 %v1985_v53, 16 }
  0xef   : > { %1897 = vst [vmem:[#allocation3 + $0x1dc] sm:$0xf] %v1788_v57  ;;  %v2055_v62 = vrot.slane %v2053_v54, 4  ;;  %v2058_v0 = vrot.slane %v2056_v55, 5  ;;  %v2481_v2 = vld [vmem:[#allocation2 + $0x20] sm:$0x1] }
  0xf0   : > { %v7272_v3 = vrot.slane %v2479_v60, 9  ;;  %v2064_v5 = vrot.slane %v2062_v58, 5  ;;  %v2068_v6 = vrot.slane %v2066_v59, 4  ;;  %v2581_v7 = vrot.slane %v2480_v61, 5  ;;  %v1662_v11 = vld [vmem:[#allocation2 + $0x54] sm:$0xe] }
  0xf1   : > { %v2584_v8 = vrot.slane %v2481_v2, 5  ;;  %v2059_v9 = vor.u32 %v2058_v0, %v2055_v62  ;;  %v2074_v10 = vrot.slane %v2072_v1, 5  ;;  %v1663_v12 = vld [vmem:[#allocation2 + $0x58] sm:$0xf]  ;;  %v1664_v18 = vld [vmem:[#allocation2 + $0x5c] sm:$0x1] }
  0xf2   : > { %v2069_v14 = vor.u32 %v2068_v6, %v2064_v5  ;;  %v2582_v15 = vsel %vm9399_vm14, %v7272_v3, %v2581_v7  ;;  %v2583_v16 = vrot.slane %v2581_v7, 4  ;;  %v7262_v19 = vrot.slane %v1662_v11, 9  ;;  %v8770_v21 = vld [vmem:[#allocation3 + $0x14] ss:$36 sps:$4 sm:$0xff]   ;;  %v1930_v26 = vld [vmem:[#allocation2 + $0x60] sm:$0xf] }
  0xf3   : > { %v2060_v20 = vrot.slane %v2059_v9, 4  ;;  %2718 = vst [vmem:[#allocation3 + $0x5c] sm:$0xf] %v2582_v15  ;;  %v1791_v24 = vrot.slane %v1663_v12, 5  ;;  %v1794_v25 = vrot.slane %v1664_v18, 5 }
  0xf4   : > { %v2070_v22 = vrot.slane %v2069_v14, 4  ;;  %v2585_v23 = vsel %vm9399_vm14, %v2583_v16, %v2584_v8  ;;  %v1931_v29 = vld [vmem:[#allocation2 + $0x64] sm:$0xf]  ;;  %1962 = vst [vmem:[#allocation3 + $0x204] sm:$0xf] %v1930_v26  ;;  %v8803_v16 = vld [vmem:[%s10649_s1 + $0x230] sm:$0xff]  }
  0xf5   : > { %v2065_v27 = vsel %vm9159_vm11, %v2060_v20, %v2064_v5  ;;  %2719 = vst [vmem:[#allocation3 + $0x80] sm:$0xf] %v2585_v23  ;;  %v1986_v30 = vld [vmem:[#allocation2 + $0x24] sm:$0xf]  ;;  %v1987_v31 = vld [vmem:[#allocation2 + $0x28] sm:$0xf]  ;;  %v1792_v35 = vsel %vm9399_vm14, %v7262_v19, %v1791_v24 }
  0xf6   : > { %v8758_v32 = vld [vmem:[#allocation3 + $0x2d4] ss:$36 sps:$4 sm:$0xff]   ;;  %v2075_v34 = vsel %vm9159_vm11, %v2070_v22, %v2074_v10  ;;  %2446 = vst [vmem:[#allocation3 + $0x58] sm:$0xf] %v2065_v27  ;;  %v1793_v36 = vrot.slane %v1791_v24, 4  ;;  %v2077_v39 = vshrl.u32 %v1986_v30, 16 }
  0xf7   : > { %v8760_v33 = vld [vmem:[#allocation3 + $0x2d0] ss:$36 sps:$4 sm:$0xff]   ;;  %1963 = vst [vmem:[#allocation3 + $0x228] sm:$0xf] %v1931_v29  ;;  %v8771_v37 = vld [vmem:[#allocation3 + $0x1bc] ss:$36 sps:$4 sm:$0xff]   ;;  %5165 = vmatprep.mubr.bf16.mxu0 %v8758_v32 }
  0xf8   : > { %v8774_v38 = vld [vmem:[#allocation3 + $0x1b8] ss:$36 sps:$4 sm:$0xff]   ;;  %2447 = vst [vmem:[#allocation3 + $0x7c] sm:$0xf] %v2075_v34  ;;  %1898 = vst [vmem:[#allocation3 + $0x200] sm:$0xf] %v1792_v35  ;;  %v1795_v40 = vsel %vm9399_vm14, %v1793_v36, %v1794_v25  ;;  %5166 = vmatmul.mubr.bf16.gmra.mxu0 %v8760_v33  ;;  %5294 = vmatprep.mubr.bf16.mxu1 %v8771_v37 }
  0xf9   : > { %v1988_v41 = vld [vmem:[#allocation2 + $0x2c] sm:$0x1]  ;;  %v2080_v28 = vshll.u32 %v1986_v30, 16  ;;  %v2086_v43 = vshll.u32 %v1987_v31, 16  ;;  %v2090_v44 = vshrl.u32 %v1987_v31, 16  ;;  %v2079_v45 = vrot.slane %v2077_v39, 4  ;;  %5407 = vmatprep.mubr.bf16.mxu0 %v8770_v21  ;;  %5295 = vmatmul.mubr.bf16.gmra.mxu1 %v8774_v38 }
  0xfa   : > { %1899 = vst [vmem:[#allocation3 + $0x224] sm:$0xf] %v1795_v40  ;;  %v2096_v46 = vshll.u32 %v1988_v41, 16  ;;  %v2482_v47 = vld [vmem:[#allocation2 + $0x24] sm:$0xe]  ;;  %v8818_v23 = vld [vmem:[%s10649_s1 + $0x228] sm:$0xff]  }
  0xfb   : > { %v2483_v48 = vld [vmem:[#allocation2 + $0x28] sm:$0xf]  ;;  %v2082_v49 = vrot.slane %v2080_v28, 5  ;;  %v2088_v50 = vrot.slane %v2086_v43, 5  ;;  %v2092_v52 = vrot.slane %v2090_v44, 4  ;;  %v7273_v54 = vrot.slane %v2482_v47, 9  ;;  %v7987_v44 = vpop.f32.mrf.mxu0 }
  0xfc   : > { %v2484_v53 = vld [vmem:[#allocation2 + $0x2c] sm:$0x1]  ;;  %v2588_v56 = vrot.slane %v2483_v48, 5  ;;  %v1665_v58 = vld [vmem:[#allocation2 + $0x60] sm:$0xe]  ;;  %v2098_v61 = vrot.slane %v2096_v46, 5 }
  0xfd   : > { %v8768_v55 = vld [vmem:[#allocation3 + $0x10] ss:$36 sps:$4 sm:$0xff]   ;;  %v2591_v57 = vrot.slane %v2484_v53, 5  ;;  %v2083_v59 = vor.u32 %v2082_v49, %v2079_v45  ;;  %v2093_v60 = vor.u32 %v2092_v52, %v2088_v50  ;;  %v1666_v62 = vld [vmem:[#allocation2 + $0x64] sm:$0xf]  ;;  %v7263_v1 = vrot.slane %v1665_v58, 9 }
  0xfe   : > { %v1667_v0 = vld [vmem:[#allocation2 + $0x68] sm:$0x1]  ;;  %v2589_v2 = vsel %vm9399_vm14, %v7273_v54, %v2588_v56  ;;  %v2590_v3 = vrot.slane %v2588_v56, 4  ;;  %v1798_v5 = vrot.slane %v1666_v62, 5  ;;  %v1932_v7 = vld [vmem:[#allocation2 + $0x6c] sm:$0xf] }
  0xff   : > { %v1801_v6 = vrot.slane %v1667_v0, 5  ;;  %v8776_v8 = vld [vmem:[#allocation3 + $0x5c] ss:$36 sps:$4 sm:$0xff]   ;;  %v2084_v9 = vrot.slane %v2083_v59, 4  ;;  %2720 = vst [vmem:[#allocation3 + $0xa4] sm:$0xf] %v2589_v2 }
 0x100   : > { %1964 = vst [vmem:[#allocation3 + $0x24c] sm:$0xf] %v1932_v7  ;;  %v2094_v10 = vrot.slane %v2093_v60, 4  ;;  %v2592_v11 = vsel %vm9399_vm14, %v2590_v3, %v2591_v57  ;;  %v1799_v12 = vsel %vm9399_vm14, %v7263_v1, %v1798_v5  ;;  %v1800_v14 = vrot.slane %v1798_v5, 4  ;;  %v1933_v15 = vld [vmem:[#allocation2 + $0x70] sm:$0xf]  ;;  %5408 = vmatmul.mubr.bf16.vlgmr.msra.gmra.mxu0 %v8768_v55  ;;  %v7988_v55 = vpop.f32.mrf.mxu0 }
 0x101   : > { %v8779_v18 = vld [vmem:[#allocation3 + $0x204] ss:$36 sps:$4 sm:$0xff]   ;;  %v2089_v20 = vsel %vm9159_vm11, %v2084_v9, %v2088_v50  ;;  %2721 = vst [vmem:[#allocation3 + $0xc8] sm:$0xf] %v2592_v11  ;;  %1900 = vst [vmem:[#allocation3 + $0x248] sm:$0xf] %v1799_v12  ;;  %5415 = vmatprep.mubr.bf16.mxu0 %v8776_v8  ;;  %v9619_v60 = vadd.f32 %v7988_v55, %v7987_v44  ;;  %v8053_v44 = vpop.f32.mrf.mxu1 }
 0x102   : > { %v8781_v19 = vld [vmem:[#allocation3 + $0x200] ss:$36 sps:$4 sm:$0xff]   ;;  %1965 = vst [vmem:[#allocation3 + $0x270] sm:$0xf] %v1933_v15  ;;  %v2099_v21 = vsel %vm9159_vm11, %v2094_v10, %v2098_v61  ;;  %2448 = vst [vmem:[#allocation3 + $0xa0] sm:$0xf] %v2089_v20  ;;  %v1802_v22 = vsel %vm9399_vm14, %v1800_v14, %v1801_v6  ;;  %5302 = vmatprep.mubr.bf16.mxu1 %v8779_v18 }
 0x103   : > { %2449 = vst [vmem:[#allocation3 + $0xc4] sm:$0xf] %v2099_v21  ;;  %1901 = vst [vmem:[#allocation3 + $0x26c] sm:$0xf] %v1802_v22  ;;  %v8778_v24 = vld [vmem:[#allocation3 + $0x58] ss:$36 sps:$4 sm:$0xff]   ;;  %5303 = vmatmul.mubr.bf16.gmra.mxu1 %v8781_v19 }
 0x104   : > { %v8956_v25 = vld [vmem:[%s10649_s1 + $0x238] sm:$0xff]   ;;  %v1989_v26 = vld [vmem:[#allocation2 + $0x30] sm:$0xf]  ;;  %v1990_v27 = vld [vmem:[#allocation2 + $0x34] sm:$0xf] }
 0x105   : > { %8486 = vmatpush3.bf16.msra.mxu0 %v8956_v25  ;;  %v1991_v29 = vld [vmem:[#allocation2 + $0x38] sm:$0x1]  ;;  %v2101_v30 = vshrl.u32 %v1989_v26, 16  ;;  %v2104_v31 = vshll.u32 %v1989_v26, 16  ;;  %v2110_v32 = vshll.u32 %v1990_v27, 16  ;;  %v2114_v33 = vshrl.u32 %v1990_v27, 16 }
 0x106   : > { %v2485_v34 = vld [vmem:[#allocation2 + $0x30] sm:$0xe]  ;;  %8487 = vmatprep.subr.bf16.mxu0 %v8803_v16  ;;  %v2120_v35 = vshll.u32 %v1991_v29, 16  ;;  %v2486_v36 = vld [vmem:[#allocation2 + $0x34] sm:$0xf]  ;;  %v8833_v54 = vld [vmem:[%s10649_s1 + $0x220] sm:$0xff]  }
 0x107   : > { %v2487_v37 = vld [vmem:[#allocation2 + $0x38] sm:$0x1]  ;;  %v7274_v38 = vrot.slane %v2485_v34, 9  ;;  %v2103_v39 = vrot.slane %v2101_v30, 4  ;;  %v2106_v40 = vrot.slane %v2104_v31, 5  ;;  %v2112_v41 = vrot.slane %v2110_v32, 5 }
 0x108   : > { %v2116_v28 = vrot.slane %v2114_v33, 4  ;;  %v1668_v43 = vld [vmem:[#allocation2 + $0x6c] sm:$0xe]  ;;  %v2595_v45 = vrot.slane %v2486_v36, 5  ;;  %v2598_v46 = vrot.slane %v2487_v37, 5  ;;  %5416 = vmatmul.mubr.bf16.gmra.mxu0 %v8778_v24  ;;  %v2122_v57 = vrot.slane %v2120_v35, 5 }
 0x109   : > { %v1669_v47 = vld [vmem:[#allocation2 + $0x70] sm:$0xf]  ;;  %8488 = vmatpush3.bf16.msra.mxu0 %v8803_v16  ;;  %v2107_v48 = vor.u32 %v2106_v40, %v2103_v39  ;;  %v1670_v50 = vld [vmem:[#allocation2 + $0x74] sm:$0x1]  ;;  %v7264_v52 = vrot.slane %v1668_v43, 9  ;;  %v8848_v9 = vld [vmem:[%s10649_s1 + $0x218] sm:$0xff]  }
 0x10a   : > { %v2117_v49 = vor.u32 %v2116_v28, %v2112_v41  ;;  %v1805_v53 = vrot.slane %v1669_v47, 5  ;;  %8489 = vmatprep.subr.bf16.mxu0 %v8818_v23  ;;  %v8782_v56 = vld [vmem:[#allocation3 + $0xa4] ss:$36 sps:$4 sm:$0xff]   ;;  %v2596_v58 = vsel %vm9399_vm14, %v7274_v38, %v2595_v45  ;;  %v2597_v59 = vrot.slane %v2595_v45, 4  ;;  %v8785_v61 = vld [vmem:[#allocation3 + $0x24c] ss:$36 sps:$4 sm:$0xff]  }
 0x10b   : > { %v8789_v62 = vld [vmem:[#allocation3 + $0x248] ss:$36 sps:$4 sm:$0xff]   ;;  %v2108_v0 = vrot.slane %v2107_v48, 4  ;;  %2722 = vst [vmem:[#allocation3 + $0xec] sm:$0xf] %v2596_v58  ;;  %5423 = vmatprep.mubr.bf16.mxu0 %v8782_v56  ;;  %v1808_v7 = vrot.slane %v1670_v50, 5  ;;  %5310 = vmatprep.mubr.bf16.mxu1 %v8785_v61  ;;  %v9639_v50 = vpop.f32.mrf.mxu0 }
 0x10c   : > { %v1806_v1 = vsel %vm9399_vm14, %v7264_v52, %v1805_v53  ;;  %v8784_v2 = vld [vmem:[#allocation3 + $0xa0] ss:$36 sps:$4 sm:$0xff]   ;;  %v2118_v3 = vrot.slane %v2117_v49, 4  ;;  %v2599_v5 = vsel %vm9399_vm14, %v2597_v59, %v2598_v46  ;;  %v1807_v6 = vrot.slane %v1805_v53, 4  ;;  %v1993_v14 = vld [vmem:[#allocation2 + $0x40] sm:$0xf]  ;;  %5311 = vmatmul.mubr.bf16.gmra.mxu1 %v8789_v62 }
 0x10d   : > { %1902 = vst [vmem:[#allocation3 + $0x290] sm:$0xf] %v1806_v1  ;;  %v1934_v8 = vld [vmem:[#allocation2 + $0x78] sm:$0xf]  ;;  %8490 = vmatpush3.bf16.msra.mxu0 %v8818_v23  ;;  %v2113_v10 = vsel %vm9159_vm11, %v2108_v0, %v2112_v41  ;;  %2723 = vst [vmem:[#allocation3 + $0x110] sm:$0xf] %v2599_v5  ;;  %v9653_v5 = vpop.f32.mrf.mxu0 }
 0x10e   : > { %v1935_v11 = vld [vmem:[#allocation2 + $0x7c] sm:$0xf]  ;;  %1966 = vst [vmem:[#allocation3 + $0x294] sm:$0xf] %v1934_v8  ;;  %8491 = vmatprep.subr.bf16.mxu0 %v8833_v54  ;;  %v2123_v15 = vsel %vm9159_vm11, %v2118_v3, %v2122_v57  ;;  %2450 = vst [vmem:[#allocation3 + $0xe8] sm:$0xf] %v2113_v10  ;;  %v1809_v16 = vsel %vm9399_vm14, %v1807_v6, %v1808_v7 }
 0x10f   : > { %v1992_v12 = vld [vmem:[#allocation2 + $0x3c] sm:$0xf]  ;;  %1967 = vst [vmem:[#allocation3 + $0x2b8] sm:$0xf] %v1935_v11  ;;  %v1994_v18 = vld [vmem:[#allocation2 + $0x44] sm:$0x1] }
 0x110   : > { %v2125_v19 = vshrl.u32 %v1992_v12, 16  ;;  %v2128_v20 = vshll.u32 %v1992_v12, 16  ;;  %v2488_v21 = vld [vmem:[#allocation2 + $0x3c] sm:$0xe]  ;;  %2451 = vst [vmem:[#allocation3 + $0x10c] sm:$0xf] %v2123_v15  ;;  %5424 = vmatmul.mubr.bf16.gmra.mxu0 %v8784_v2 }
 0x111   : > { %1903 = vst [vmem:[#allocation3 + $0x2b4] sm:$0xf] %v1809_v16  ;;  %v2134_v22 = vshll.u32 %v1993_v14, 16  ;;  %v2138_v23 = vshrl.u32 %v1993_v14, 16  ;;  %v2144_v24 = vshll.u32 %v1994_v18, 16  ;;  %v7275_v26 = vrot.slane %v2488_v21, 9  ;;  %8492 = vmatpush3.bf16.msra.mxu0 %v8833_v54  ;;  %v8054_v54 = vpop.f32.mrf.mxu1  ;;  %v7993_v21 = vpop.f32.mrf.mxu0 }
 0x112   : > { %v2489_v25 = vld [vmem:[#allocation2 + $0x40] sm:$0xf]  ;;  %v2127_v27 = vrot.slane %v2125_v19, 4  ;;  %v2130_v29 = vrot.slane %v2128_v20, 5  ;;  %v2490_v30 = vld [vmem:[#allocation2 + $0x44] sm:$0x1]  ;;  %8493 = vmatprep.subr.bf16.mxu0 %v8848_v9  ;;  %v9645_v58 = vadd.f32 %v8054_v54, %v8053_v44 }
 0x113   : > { %v2602_v31 = vrot.slane %v2489_v25, 5  ;;  %v8860_v32 = vld [vmem:[%s10649_s1 + $0x210] sm:$0xff]   ;;  %v2136_v33 = vrot.slane %v2134_v22, 5  ;;  %v2140_v34 = vrot.slane %v2138_v23, 4  ;;  %v2146_v35 = vrot.slane %v2144_v24, 5 }
 0x114   : > { %v2605_v36 = vrot.slane %v2490_v30, 5  ;;  %v1671_v37 = vld [vmem:[#allocation2 + $0x78] sm:$0xe]  ;;  %v2131_v38 = vor.u32 %v2130_v29, %v2127_v27  ;;  %v1672_v41 = vld [vmem:[#allocation2 + $0x7c] sm:$0xf] }
 0x115   : > { %v2603_v39 = vsel %vm9399_vm14, %v7275_v26, %v2602_v31  ;;  %v2604_v40 = vrot.slane %v2602_v31, 4  ;;  %v1673_v28 = vld [vmem:[#allocation2 + $0x80] sm:$0x1]  ;;  %v7265_v43 = vrot.slane %v1671_v37, 9  ;;  %v2141_v45 = vor.u32 %v2140_v34, %v2136_v33  ;;  %v1936_v48 = vld [vmem:[#allocation2 + $0x84] sm:$0xf]  ;;  %8494 = vmatpush3.bf16.msra.mxu0 %v8848_v9  ;;  %v9655_v9 = vpop.f32.mrf.mxu1 }
 0x116   : > { %2724 = vst [vmem:[#allocation3 + $0x134] sm:$0xf] %v2603_v39  ;;  %v1812_v46 = vrot.slane %v1672_v41, 5  ;;  %v1815_v47 = vrot.slane %v1673_v28, 5  ;;  %v1937_v49 = vld [vmem:[#allocation2 + $0x88] sm:$0xf]  ;;  %8495 = vmatprep.subr.bf16.mxu0 %v8860_v32 }
 0x117   : > { %v2132_v52 = vrot.slane %v2131_v38, 4  ;;  %v2606_v53 = vsel %vm9399_vm14, %v2604_v40, %v2605_v36  ;;  %1968 = vst [vmem:[#allocation3 + $0x2dc] sm:$0xf] %v1936_v48  ;;  %1969 = vst [vmem:[#allocation3 + $0x300] sm:$0xf] %v1937_v49  ;;  %v2142_v55 = vrot.slane %v2141_v45, 4  ;;  %v7994_v38 = vpop.f32.mrf.mxu0 }
 0x118   : > { %2725 = vst [vmem:[#allocation3 + $0x158] sm:$0xf] %v2606_v53  ;;  %v1813_v56 = vsel %vm9399_vm14, %v7265_v43, %v1812_v46  ;;  %v1814_v57 = vrot.slane %v1812_v46, 4  ;;  %v8791_v59 = vld [vmem:[#allocation3 + $0xec] ss:$36 sps:$4 sm:$0xff]   ;;  %v9664_v44 = vadd.f32 %v7994_v38, %v7993_v21 }
 0x119   : > { %v8793_v61 = vld [vmem:[#allocation3 + $0xe8] ss:$36 sps:$4 sm:$0xff]   ;;  %v2137_v62 = vsel %vm9159_vm11, %v2132_v52, %v2136_v33  ;;  %1904 = vst [vmem:[#allocation3 + $0x2d8] sm:$0xf] %v1813_v56  ;;  %v8794_v0 = vld [vmem:[#allocation3 + $0x294] ss:$36 sps:$4 sm:$0xff]   ;;  %v2147_v2 = vsel %vm9159_vm11, %v2142_v55, %v2146_v35  ;;  %5431 = vmatprep.mubr.bf16.mxu0 %v8791_v59  ;;  %8496 = vmatpush3.bf16.msra.mxu0 %v8860_v32  ;;  %v9657_v32 = vpop.f32.mrf.mxu1 }
 0x11a   : > { %v8796_v1 = vld [vmem:[#allocation3 + $0x290] ss:$36 sps:$4 sm:$0xff]   ;;  %2452 = vst [vmem:[#allocation3 + $0x130] sm:$0xf] %v2137_v62  ;;  %v1816_v3 = vsel %vm9399_vm14, %v1814_v57, %v1815_v47  ;;  %2453 = vst [vmem:[#allocation3 + $0x154] sm:$0xf] %v2147_v2  ;;  %5318 = vmatprep.mubr.bf16.mxu1 %v8794_v0  ;;  %5432 = vmatmul.mubr.bf16.gmra.mxu0 %v8793_v61 }
 0x11b   : > { %1905 = vst [vmem:[#allocation3 + $0x2fc] sm:$0xf] %v1816_v3  ;;  %v1995_v6 = vld [vmem:[#allocation2 + $0x48] sm:$0xf]  ;;  %v1996_v7 = vld [vmem:[#allocation2 + $0x4c] sm:$0xf]  ;;  %5319 = vmatmul.mubr.bf16.gmra.mxu1 %v8796_v1  ;;  %v8059_v56 = vpop.f32.mrf.mxu1 }
 0x11c   : > { %v1997_v8 = vld [vmem:[#allocation2 + $0x50] sm:$0x1]  ;;  %v2149_v10 = vshrl.u32 %v1995_v6, 16  ;;  %v2152_v11 = vshll.u32 %v1995_v6, 16  ;;  %v2158_v12 = vshll.u32 %v1996_v7, 16  ;;  %v2162_v14 = vshrl.u32 %v1996_v7, 16 }
 0x11d   : > { %v2491_v15 = vld [vmem:[#allocation2 + $0x48] sm:$0xe]  ;;  %v2168_v16 = vshll.u32 %v1997_v8, 16  ;;  %v2492_v18 = vld [vmem:[#allocation2 + $0x4c] sm:$0xf]  ;;  %v8060_v8 = vpop.f32.mrf.mxu1 }
 0x11e   : > { %v2493_v19 = vld [vmem:[#allocation2 + $0x50] sm:$0x1]  ;;  %v7276_v20 = vrot.slane %v2491_v15, 9  ;;  %v2151_v22 = vrot.slane %v2149_v10, 4  ;;  %v2154_v23 = vrot.slane %v2152_v11, 5  ;;  %v2160_v24 = vrot.slane %v2158_v12, 5 }
 0x11f   : > { %v2164_v25 = vrot.slane %v2162_v14, 4  ;;  %v1674_v26 = vld [vmem:[#allocation2 + $0x84] sm:$0xe]  ;;  %v2170_v27 = vrot.slane %v2168_v16, 5  ;;  %v2609_v29 = vrot.slane %v2492_v18, 5  ;;  %v2612_v30 = vrot.slane %v2493_v19, 5 }
 0x120   : > { %v1675_v31 = vld [vmem:[#allocation2 + $0x88] sm:$0xf]  ;;  %v2155_v33 = vor.u32 %v2154_v23, %v2151_v22  ;;  %v1676_v35 = vld [vmem:[#allocation2 + $0x8c] sm:$0x1]  ;;  %v7266_v36 = vrot.slane %v1674_v26, 9  ;;  %v9676_v21 = vadd.f32 %v8060_v8, %v8059_v56 }
 0x121   : > { %v2165_v34 = vor.u32 %v2164_v25, %v2160_v24  ;;  %v1819_v37 = vrot.slane %v1675_v31, 5  ;;  %v8873_v39 = vld [vmem:[%s10649_s1 + $0x208] sm:$0xff]   ;;  %v2610_v28 = vsel %vm9399_vm14, %v7276_v20, %v2609_v29  ;;  %v2611_v43 = vrot.slane %v2609_v29, 4  ;;  %v8800_v45 = vld [vmem:[#allocation3 + $0x2dc] ss:$36 sps:$4 sm:$0xff]  }
 0x122   : > { %v8797_v40 = vld [vmem:[#allocation3 + $0x134] ss:$36 sps:$4 sm:$0xff]   ;;  %v2156_v47 = vrot.slane %v2155_v33, 4  ;;  %2726 = vst [vmem:[#allocation3 + $0x17c] sm:$0xf] %v2610_v28  ;;  %8497 = vmatprep.subr.bf16.mxu0 %v8873_v39  ;;  %v1822_v54 = vrot.slane %v1676_v35, 5  ;;  %5326 = vmatprep.mubr.bf16.mxu1 %v8800_v45  ;;  %v9682_v28 = vpop.f32.mrf.mxu0 }
 0x123   : > { %v8799_v41 = vld [vmem:[#allocation3 + $0x130] ss:$36 sps:$4 sm:$0xff]   ;;  %v8804_v46 = vld [vmem:[#allocation3 + $0x2d8] ss:$36 sps:$4 sm:$0xff]   ;;  %v1820_v48 = vsel %vm9399_vm14, %v7266_v36, %v1819_v37  ;;  %5439 = vmatprep.mubr.bf16.mxu0 %v8797_v40  ;;  %v2166_v49 = vrot.slane %v2165_v34, 4  ;;  %v2613_v52 = vsel %vm9399_vm14, %v2611_v43, %v2612_v30  ;;  %v1821_v53 = vrot.slane %v1819_v37, 4  ;;  %8498 = vmatpush3.bf16.msra.mxu0 %v8873_v39 }
 0x124   : > { %1906 = vst [vmem:[#allocation3 + $0x320] sm:$0xf] %v1820_v48  ;;  %v1938_v55 = vld [vmem:[#allocation2 + $0x90] sm:$0xf]  ;;  %5440 = vmatmul.mubr.bf16.gmra.mxu0 %v8799_v41  ;;  %v2161_v57 = vsel %vm9159_vm11, %v2156_v47, %v2160_v24  ;;  %2727 = vst [vmem:[#allocation3 + $0x1a0] sm:$0xf] %v2613_v52  ;;  %5327 = vmatmul.mubr.bf16.gmra.mxu1 %v8804_v46 }
 0x125   : > { %v1939_v59 = vld [vmem:[#allocation2 + $0x94] sm:$0xf]  ;;  %1970 = vst [vmem:[#allocation3 + $0x324] sm:$0xf] %v1938_v55  ;;  %v1999_v62 = vld [vmem:[#allocation2 + $0x58] sm:$0xf]  ;;  %v2171_v0 = vsel %vm9159_vm11, %v2166_v49, %v2170_v27  ;;  %v1823_v1 = vsel %vm9399_vm14, %v1821_v53, %v1822_v54 }
 0x126   : > { %v1998_v61 = vld [vmem:[#allocation2 + $0x54] sm:$0xf]  ;;  %2454 = vst [vmem:[#allocation3 + $0x178] sm:$0xf] %v2161_v57  ;;  %1971 = vst [vmem:[#allocation3 + $0x348] sm:$0xf] %v1939_v59  ;;  %v9695_v57 = vpop.f32.mrf.mxu0 }
 0x127   : > { %v2000_v2 = vld [vmem:[#allocation2 + $0x5c] sm:$0x1]  ;;  %v2173_v3 = vshrl.u32 %v1998_v61, 16  ;;  %v2176_v6 = vshll.u32 %v1998_v61, 16  ;;  %v2494_v7 = vld [vmem:[#allocation2 + $0x54] sm:$0xe] }
 0x128   : > { %2455 = vst [vmem:[#allocation3 + $0x19c] sm:$0xf] %v2171_v0  ;;  %1907 = vst [vmem:[#allocation3 + $0x344] sm:$0xf] %v1823_v1  ;;  %v2182_v10 = vshll.u32 %v1999_v62, 16  ;;  %v2186_v11 = vshrl.u32 %v1999_v62, 16 }
 0x129   : > { %v2192_v12 = vshll.u32 %v2000_v2, 16  ;;  %v2495_v14 = vld [vmem:[#allocation2 + $0x58] sm:$0xf]  ;;  %v7277_v15 = vrot.slane %v2494_v7, 9  ;;  %v2175_v16 = vrot.slane %v2173_v3, 4  ;;  %v2178_v18 = vrot.slane %v2176_v6, 5  ;;  %v9697_v7 = vpop.f32.mrf.mxu1 }
 0x12a   : > { %v2496_v19 = vld [vmem:[#allocation2 + $0x5c] sm:$0x1]  ;;  %v2616_v20 = vrot.slane %v2495_v14, 5  ;;  %10675 = vst [vmem:[#allocation5_spill] sm:$0xff] %v9676_v21  ;;  %v2184_v22 = vrot.slane %v2182_v10, 5  ;;  %v2188_v23 = vrot.slane %v2186_v11, 4 }
 0x12b   : > { %v2194_v24 = vrot.slane %v2192_v12, 5  ;;  %v2619_v25 = vrot.slane %v2496_v19, 5  ;;  %v1677_v26 = vld [vmem:[#allocation2 + $0x90] sm:$0xe]  ;;  %v2179_v27 = vor.u32 %v2178_v18, %v2175_v16  ;;  %v1678_v31 = vld [vmem:[#allocation2 + $0x94] sm:$0xf] }
 0x12c   : > { %v2617_v29 = vsel %vm9399_vm14, %v7277_v15, %v2616_v20  ;;  %v2618_v30 = vrot.slane %v2616_v20, 4  ;;  %v1679_v33 = vld [vmem:[#allocation2 + $0x98] sm:$0x1]  ;;  %v7267_v34 = vrot.slane %v1677_v26, 9  ;;  %v2189_v35 = vor.u32 %v2188_v23, %v2184_v22  ;;  %v1940_v38 = vld [vmem:[#allocation2 + $0x9c] sm:$0xf]  ;;  %v7999_v20 = vpop.f32.mrf.mxu0 }
 0x12d   : > { %2728 = vst [vmem:[#allocation3 + $0x1c4] sm:$0xf] %v2617_v29  ;;  %v1826_v36 = vrot.slane %v1678_v31, 5  ;;  %v1829_v37 = vrot.slane %v1679_v33, 5  ;;  %v1941_v39 = vld [vmem:[#allocation2 + $0xa0] sm:$0xf] }
 0x12e   : > { %v2180_v40 = vrot.slane %v2179_v27, 4  ;;  %v2620_v41 = vsel %vm9399_vm14, %v2618_v30, %v2619_v25  ;;  %1972 = vst [vmem:[#allocation3 + $0x36c] sm:$0xf] %v1940_v38  ;;  %1973 = vst [vmem:[#allocation3 + $0x390] sm:$0xf] %v1941_v39  ;;  %v2190_v43 = vrot.slane %v2189_v35, 4  ;;  %v8000_v33 = vpop.f32.mrf.mxu0 }
 0x12f   : > { %2729 = vst [vmem:[#allocation3 + $0x1e8] sm:$0xf] %v2620_v41  ;;  %v1827_v45 = vsel %vm9399_vm14, %v7267_v34, %v1826_v36  ;;  %v1828_v46 = vrot.slane %v1826_v36, 4  ;;  %v8881_v47 = vld [vmem:[%s10649_s1 + $0x200] sm:$0xff]   ;;  %v8806_v48 = vld [vmem:[#allocation3 + $0x17c] ss:$36 sps:$4 sm:$0xff]   ;;  %v9699_v34 = vpop.f32.mrf.mxu1  ;;  %v9703_v39 = vadd.f32 %v8000_v33, %v7999_v20 }
 0x130   : > { %v8808_v49 = vld [vmem:[#allocation3 + $0x178] ss:$36 sps:$4 sm:$0xff]   ;;  %v2185_v52 = vsel %vm9159_vm11, %v2180_v40, %v2184_v22  ;;  %1908 = vst [vmem:[#allocation3 + $0x368] sm:$0xf] %v1827_v45  ;;  %v8809_v53 = vld [vmem:[#allocation3 + $0x324] ss:$36 sps:$4 sm:$0xff]   ;;  %v2195_v55 = vsel %vm9159_vm11, %v2190_v43, %v2194_v24  ;;  %8499 = vmatprep.subr.bf16.mxu0 %v8881_v47  ;;  %5447 = vmatprep.mubr.bf16.mxu0 %v8806_v48 }
 0x131   : > { %v8811_v54 = vld [vmem:[#allocation3 + $0x320] ss:$36 sps:$4 sm:$0xff]   ;;  %2456 = vst [vmem:[#allocation3 + $0x1c0] sm:$0xf] %v2185_v52  ;;  %v1830_v56 = vsel %vm9399_vm14, %v1828_v46, %v1829_v37  ;;  %2457 = vst [vmem:[#allocation3 + $0x1e4] sm:$0xf] %v2195_v55  ;;  %8500 = vmatpush3.bf16.msra.mxu0 %v8881_v47  ;;  %5334 = vmatprep.mubr.bf16.mxu1 %v8809_v53 }
 0x132   : > { %1909 = vst [vmem:[#allocation3 + $0x38c] sm:$0xf] %v1830_v56  ;;  %5448 = vmatmul.mubr.bf16.gmra.mxu0 %v8808_v49  ;;  %v2001_v59 = vld [vmem:[#allocation2 + $0x60] sm:$0xf]  ;;  %v2002_v61 = vld [vmem:[#allocation2 + $0x64] sm:$0xf]  ;;  %5335 = vmatmul.mubr.bf16.gmra.mxu1 %v8811_v54 }
 0x133   : > { %v2003_v62 = vld [vmem:[#allocation2 + $0x68] sm:$0x1]  ;;  %v2197_v0 = vshrl.u32 %v2001_v59, 16  ;;  %v2200_v1 = vshll.u32 %v2001_v59, 16  ;;  %v2206_v2 = vshll.u32 %v2002_v61, 16  ;;  %v2210_v3 = vshrl.u32 %v2002_v61, 16  ;;  %v8065_v59 = vpop.f32.mrf.mxu1 }
 0x134   : > { %v2497_v6 = vld [vmem:[#allocation2 + $0x60] sm:$0xe]  ;;  %10676 = vst [vmem:[#allocation6_spill] sm:$0xff] %v9697_v7  ;;  %v2216_v8 = vshll.u32 %v2003_v62, 16  ;;  %v2498_v10 = vld [vmem:[#allocation2 + $0x64] sm:$0xf] }
 0x135   : > { %v2499_v11 = vld [vmem:[#allocation2 + $0x68] sm:$0x1]  ;;  %v7278_v12 = vrot.slane %v2497_v6, 9  ;;  %v2199_v14 = vrot.slane %v2197_v0, 4  ;;  %v2202_v15 = vrot.slane %v2200_v1, 5  ;;  %v2208_v16 = vrot.slane %v2206_v2, 5  ;;  %v8066_v20 = vpop.f32.mrf.mxu1 }
 0x136   : > { %v2212_v18 = vrot.slane %v2210_v3, 4  ;;  %v1680_v19 = vld [vmem:[#allocation2 + $0x9c] sm:$0xe]  ;;  %v2218_v22 = vrot.slane %v2216_v8, 5  ;;  %v2623_v23 = vrot.slane %v2498_v10, 5  ;;  %v2626_v24 = vrot.slane %v2499_v11, 5 }
 0x137   : > { %v1681_v25 = vld [vmem:[#allocation2 + $0xa0] sm:$0xf]  ;;  %v2203_v26 = vor.u32 %v2202_v15, %v2199_v14  ;;  %v1682_v29 = vld [vmem:[#allocation2 + $0xa4] sm:$0x1]  ;;  %v7268_v30 = vrot.slane %v1680_v19, 9  ;;  %10677 = vst [vmem:[#allocation7_spill] sm:$0xff] %v9699_v34  ;;  %v9715_v19 = vpop.f32.mrf.mxu0 }
 0x138   : > { %v2213_v27 = vor.u32 %v2212_v18, %v2208_v16  ;;  %v1833_v31 = vrot.slane %v1681_v25, 5  ;;  %v8812_v35 = vld [vmem:[#allocation3 + $0x1c4] ss:$36 sps:$4 sm:$0xff]   ;;  %v2624_v37 = vsel %vm9399_vm14, %v7278_v12, %v2623_v23  ;;  %v2625_v38 = vrot.slane %v2623_v23, 4  ;;  %v8815_v40 = vld [vmem:[#allocation3 + $0x36c] ss:$36 sps:$4 sm:$0xff]  }
 0x139   : > { %v8814_v36 = vld [vmem:[#allocation3 + $0x1c0] ss:$36 sps:$4 sm:$0xff]   ;;  %v8819_v41 = vld [vmem:[#allocation3 + $0x368] ss:$36 sps:$4 sm:$0xff]   ;;  %v2204_v43 = vrot.slane %v2203_v26, 4  ;;  %5455 = vmatprep.mubr.bf16.mxu0 %v8812_v35  ;;  %v1836_v49 = vrot.slane %v1682_v29, 5  ;;  %5342 = vmatprep.mubr.bf16.mxu1 %v8815_v40 }
 0x13a   : > { %2730 = vst [vmem:[#allocation3 + $0x20c] sm:$0xf] %v2624_v37  ;;  %v1834_v45 = vsel %vm9399_vm14, %v7268_v30, %v1833_v31  ;;  %v2214_v46 = vrot.slane %v2213_v27, 4  ;;  %v2627_v47 = vsel %vm9399_vm14, %v2625_v38, %v2626_v24  ;;  %v1835_v48 = vrot.slane %v1833_v31, 4  ;;  %v1942_v52 = vld [vmem:[#allocation2 + $0xa8] sm:$0xf]  ;;  %5456 = vmatmul.mubr.bf16.gmra.mxu0 %v8814_v36  ;;  %5343 = vmatmul.mubr.bf16.gmra.mxu1 %v8819_v41 }
 0x13b   : > { %1910 = vst [vmem:[#allocation3 + $0x3b0] sm:$0xf] %v1834_v45  ;;  %v2209_v53 = vsel %vm9159_vm11, %v2204_v43, %v2208_v16  ;;  %2731 = vst [vmem:[#allocation3 + $0x230] sm:$0xf] %v2627_v47  ;;  %v1943_v54 = vld [vmem:[#allocation2 + $0xac] sm:$0xf]  ;;  %v9719_v43 = vadd.f32 %v8066_v20, %v8065_v59  ;;  %v9723_v47 = vpop.f32.mrf.mxu0 }
 0x13c   : > { %1974 = vst [vmem:[#allocation3 + $0x3b4] sm:$0xf] %v1942_v52  ;;  %v2004_v55 = vld [vmem:[#allocation2 + $0x6c] sm:$0xf]  ;;  %v2005_v56 = vld [vmem:[#allocation2 + $0x70] sm:$0xf]  ;;  %v2219_v61 = vsel %vm9159_vm11, %v2214_v46, %v2218_v22  ;;  %v1837_v62 = vsel %vm9399_vm14, %v1835_v48, %v1836_v49 }
 0x13d   : > { %2458 = vst [vmem:[#allocation3 + $0x208] sm:$0xf] %v2209_v53  ;;  %1975 = vst [vmem:[#allocation3 + $0x3d8] sm:$0xf] %v1943_v54  ;;  %v2006_v0 = vld [vmem:[#allocation2 + $0x74] sm:$0x1] }
 0x13e   : > { %v2221_v1 = vshrl.u32 %v2004_v55, 16  ;;  %v2224_v2 = vshll.u32 %v2004_v55, 16  ;;  %v2500_v3 = vld [vmem:[#allocation2 + $0x6c] sm:$0xe]  ;;  %2459 = vst [vmem:[#allocation3 + $0x22c] sm:$0xf] %v2219_v61 }
 0x13f   : > { %1911 = vst [vmem:[#allocation3 + $0x3d4] sm:$0xf] %v1837_v62  ;;  %v2230_v6 = vshll.u32 %v2005_v56, 16  ;;  %v2234_v8 = vshrl.u32 %v2005_v56, 16  ;;  %v2240_v10 = vshll.u32 %v2006_v0, 16  ;;  %v7279_v12 = vrot.slane %v2500_v3, 9  ;;  %v8005_v0 = vpop.f32.mrf.mxu0 }
 0x140   : > { %v2501_v11 = vld [vmem:[#allocation2 + $0x70] sm:$0xf]  ;;  %v2223_v14 = vrot.slane %v2221_v1, 4  ;;  %v2226_v15 = vrot.slane %v2224_v2, 5  ;;  %v2502_v16 = vld [vmem:[#allocation2 + $0x74] sm:$0x1] }
 0x141   : > { %v2630_v18 = vrot.slane %v2501_v11, 5  ;;  %v2232_v22 = vrot.slane %v2230_v6, 5  ;;  %v2236_v23 = vrot.slane %v2234_v8, 4  ;;  %v2242_v24 = vrot.slane %v2240_v10, 5  ;;  %v1683_v26 = vld [vmem:[#allocation2 + $0xa8] sm:$0xe] }
 0x142   : > { %v2633_v25 = vrot.slane %v2502_v16, 5  ;;  %v2227_v27 = vor.u32 %v2226_v15, %v2223_v14  ;;  %v1684_v31 = vld [vmem:[#allocation2 + $0xac] sm:$0xf]  ;;  %v1685_v33 = vld [vmem:[#allocation2 + $0xb0] sm:$0x1]  ;;  %v7269_v35 = vrot.slane %v1683_v26, 9  ;;  %v8006_v14 = vpop.f32.mrf.mxu0 }
 0x143   : > { %v2631_v29 = vsel %vm9399_vm14, %v7279_v12, %v2630_v18  ;;  %v2632_v30 = vrot.slane %v2630_v18, 4  ;;  %v2237_v36 = vor.u32 %v2236_v23, %v2232_v22  ;;  %v1840_v37 = vrot.slane %v1684_v31, 5  ;;  %v1944_v40 = vld [vmem:[#allocation2 + $0xb4] sm:$0xf]  ;;  %v1945_v41 = vld [vmem:[#allocation2 + $0xb8] sm:$0xf] }
 0x144   : > { %2732 = vst [vmem:[#allocation3 + $0x254] sm:$0xf] %v2631_v29  ;;  %v1843_v38 = vrot.slane %v1685_v33, 5  ;;  %10678 = vst [vmem:[#allocation8_spill] sm:$0xff] %v9719_v43  ;;  %v2228_v45 = vrot.slane %v2227_v27, 4  ;;  %v9735_v29 = vpop.f32.mrf.mxu1 }
 0x145   : > { %v2634_v46 = vsel %vm9399_vm14, %v2632_v30, %v2633_v25  ;;  %1976 = vst [vmem:[#allocation3 + $0x3fc] sm:$0xf] %v1944_v40  ;;  %1977 = vst [vmem:[#allocation3 + $0x420] sm:$0xf] %v1945_v41  ;;  %v2238_v48 = vrot.slane %v2237_v36, 4  ;;  %v1841_v49 = vsel %vm9399_vm14, %v7269_v35, %v1840_v37  ;;  %v1842_v52 = vrot.slane %v1840_v37, 4 }
 0x146   : > { %2733 = vst [vmem:[#allocation3 + $0x278] sm:$0xf] %v2634_v46  ;;  %v8821_v53 = vld [vmem:[#allocation3 + $0x20c] ss:$36 sps:$4 sm:$0xff]   ;;  %v2233_v55 = vsel %vm9159_vm11, %v2228_v45, %v2232_v22  ;;  %1912 = vst [vmem:[#allocation3 + $0x3f8] sm:$0xf] %v1841_v49  ;;  %v9733_v22 = vadd.f32 %v8006_v14, %v8005_v0 }
 0x147   : > { %v8823_v54 = vld [vmem:[#allocation3 + $0x208] ss:$36 sps:$4 sm:$0xff]   ;;  %v8824_v56 = vld [vmem:[#allocation3 + $0x3b4] ss:$36 sps:$4 sm:$0xff]   ;;  %v2243_v61 = vsel %vm9159_vm11, %v2238_v48, %v2242_v24  ;;  %2460 = vst [vmem:[#allocation3 + $0x250] sm:$0xf] %v2233_v55  ;;  %v1844_v62 = vsel %vm9399_vm14, %v1842_v52, %v1843_v38  ;;  %5463 = vmatprep.mubr.bf16.mxu0 %v8821_v53 }
 0x148   : > { %v8826_v59 = vld [vmem:[#allocation3 + $0x3b0] ss:$36 sps:$4 sm:$0xff]   ;;  %2461 = vst [vmem:[#allocation3 + $0x274] sm:$0xf] %v2243_v61  ;;  %1913 = vst [vmem:[#allocation3 + $0x41c] sm:$0xf] %v1844_v62  ;;  %5464 = vmatmul.mubr.bf16.gmra.mxu0 %v8823_v54  ;;  %5350 = vmatprep.mubr.bf16.mxu1 %v8824_v56  ;;  %v9743_v54 = vpop.f32.mrf.mxu1 }
 0x149   : > { %v2007_v1 = vld [vmem:[#allocation2 + $0x78] sm:$0xf]  ;;  %v2008_v2 = vld [vmem:[#allocation2 + $0x7c] sm:$0xf]  ;;  %v2009_v3 = vld [vmem:[#allocation2 + $0x80] sm:$0x1]  ;;  %5351 = vmatmul.mubr.bf16.gmra.mxu1 %v8826_v59 }
 0x14a   : > { %v2245_v6 = vshrl.u32 %v2007_v1, 16  ;;  %v2248_v8 = vshll.u32 %v2007_v1, 16  ;;  %v2254_v10 = vshll.u32 %v2008_v2, 16  ;;  %v2258_v11 = vshrl.u32 %v2008_v2, 16  ;;  %v2503_v12 = vld [vmem:[#allocation2 + $0x78] sm:$0xe] }
 0x14b   : > { %v2264_v15 = vshll.u32 %v2009_v3, 16  ;;  %v2504_v16 = vld [vmem:[#allocation2 + $0x7c] sm:$0xf]  ;;  %v2505_v18 = vld [vmem:[#allocation2 + $0x80] sm:$0x1]  ;;  %v7280_v20 = vrot.slane %v2503_v12, 9 }
 0x14c   : > { %v2247_v23 = vrot.slane %v2245_v6, 4  ;;  %v2250_v24 = vrot.slane %v2248_v8, 5  ;;  %v2256_v25 = vrot.slane %v2254_v10, 5  ;;  %v2260_v26 = vrot.slane %v2258_v11, 4  ;;  %v547_v27 = vld [vmem:[#allocation2 + $0xc0] sm:$0x1] }
 0x14d   : > { %10679 = vst [vmem:[#allocation9_spill] sm:$0xff] %v9735_v29  ;;  %v2637_v30 = vrot.slane %v2504_v16, 5  ;;  %v2640_v31 = vrot.slane %v2505_v18, 5  ;;  %v548_v33 = vsel %vm9092_vm3, 0, %v547_v27  ;;  %v2266_v37 = vrot.slane %v2264_v15, 5  ;;  %10680 = vst [vmem:[#allocation10_spill] sm:$0xff] %v9743_v54 }
 0x14e   : > { %v2251_v35 = vor.u32 %v2250_v24, %v2247_v23  ;;  %v2261_v36 = vor.u32 %v2260_v26, %v2256_v25  ;;  %549 = vst [vmem:[#allocation2 + $0xc0] sm:$0x1] %v548_v33  ;;  %v639_v38 = vld [vmem:[%s9100_s25 + $0x78] sm:$0xf]  ;;  %v640_v40 = vld [vmem:[%s9100_s25 + $0x7c] sm:$0xf] }
 0x14f   : > { %v8827_v41 = vld [vmem:[#allocation3 + $0x254] ss:$36 sps:$4 sm:$0xff]   ;;  %v2638_v46 = vsel %vm9399_vm14, %v7280_v20, %v2637_v30  ;;  %v2639_v48 = vrot.slane %v2637_v30, 4  ;;  %v8830_v49 = vld [vmem:[#allocation3 + $0x3fc] ss:$36 sps:$4 sm:$0xff]   ;;  %v899_v59 = vshrl.u32 %v639_v38, 16  ;;  %v8071_v20 = vpop.f32.mrf.mxu1 }
 0x150   : > { %v8829_v45 = vld [vmem:[#allocation3 + $0x250] ss:$36 sps:$4 sm:$0xff]   ;;  %v8834_v52 = vld [vmem:[#allocation3 + $0x3f8] ss:$36 sps:$4 sm:$0xff]   ;;  %v2252_v53 = vrot.slane %v2251_v35, 4  ;;  %5471 = vmatprep.mubr.bf16.mxu0 %v8827_v41  ;;  %v2262_v55 = vrot.slane %v2261_v36, 4  ;;  %5358 = vmatprep.mubr.bf16.mxu1 %v8830_v49 }
 0x151   : > { %2734 = vst [vmem:[#allocation3 + $0x29c] sm:$0xf] %v2638_v46  ;;  %v2641_v56 = vsel %vm9399_vm14, %v2639_v48, %v2640_v31  ;;  %v902_v61 = vshll.u32 %v639_v38, 16  ;;  %v1686_v62 = vld [vmem:[#allocation2 + $0xb4] sm:$0xe]  ;;  %5472 = vmatmul.mubr.bf16.gmra.mxu0 %v8829_v45  ;;  %v907_v1 = vshrl.u32 %v640_v40, 16  ;;  %5359 = vmatmul.mubr.bf16.gmra.mxu1 %v8834_v52  ;;  %v8072_v51 = vpop.f32.mrf.mxu1 }
 0x152   : > { %v2257_v0 = vsel %vm9159_vm11, %v2252_v53, %v2256_v25  ;;  %2735 = vst [vmem:[#allocation3 + $0x2c0] sm:$0xf] %v2641_v56  ;;  %v910_v2 = vshll.u32 %v640_v40, 16  ;;  %v1687_v3 = vld [vmem:[#allocation2 + $0xb8] sm:$0xf]  ;;  %v2267_v8 = vsel %vm9159_vm11, %v2262_v55, %v2266_v37  ;;  %v901_v10 = vrot.slane %v899_v59, 7  ;;  %v9762_v59 = vpop.f32.mrf.mxu0 }
 0x153   : > { %v1688_v6 = vld [vmem:[#allocation2 + $0xbc] sm:$0x1]  ;;  %2462 = vst [vmem:[#allocation3 + $0x298] sm:$0xf] %v2257_v0  ;;  %v7270_v11 = vrot.slane %v1686_v62, 9  ;;  %v1847_v12 = vrot.slane %v1687_v3, 5 }
 0x154   : > { %v2010_v14 = vld [vmem:[#allocation2 + $0x84] sm:$0xf]  ;;  %2463 = vst [vmem:[#allocation3 + $0x2bc] sm:$0xf] %v2267_v8  ;;  %v9751_v15 = vrot.slane %v907_v1, 7  ;;  %v1850_v16 = vrot.slane %v1688_v6, 5  ;;  %v904_v23 = vor.u32 %v902_v61, %v901_v10 }
 0x155   : > { %v2011_v18 = vld [vmem:[#allocation2 + $0x88] sm:$0xf]  ;;  %v905_v24 = vrot.slane %v901_v10, 4  ;;  %v1071_v25 = vld [vmem:[#allocation2 + $0xc0] sm:$0xf]  ;;  %v1848_v26 = vsel %vm9399_vm14, %v7270_v11, %v1847_v12  ;;  %v1849_v27 = vrot.slane %v1847_v12, 4 }
 0x156   : > { %v2012_v30 = vld [vmem:[#allocation2 + $0x8c] sm:$0x1]  ;;  %v912_v31 = vor.u32 %v910_v2, %v9751_v15  ;;  %1914 = vst [vmem:[#allocation3 + $0x440] sm:$0xf] %v1848_v26  ;;  %v2269_v33 = vshrl.u32 %v2010_v14, 16  ;;  %v2272_v35 = vshll.u32 %v2010_v14, 16  ;;  %v1072_v38 = vsel %vm9143_vm10, %v904_v23, %v1071_v25 }
 0x157   : > { %v2506_v36 = vld [vmem:[#allocation2 + $0x84] sm:$0xe]  ;;  %v2507_v37 = vld [vmem:[#allocation2 + $0x88] sm:$0xf]  ;;  %v1851_v40 = vsel %vm9399_vm14, %v1849_v27, %v1850_v16  ;;  %v2278_v41 = vshll.u32 %v2011_v18, 16  ;;  %v2282_v45 = vshrl.u32 %v2011_v18, 16  ;;  %v9766_v23 = vadd.f32 %v8072_v51, %v8071_v20 }
 0x158   : > { %v2508_v46 = vld [vmem:[#allocation2 + $0x8c] sm:$0x1]  ;;  %v2749_v48 = vld [vmem:[#allocation2 + $0x18] sm:$0xf]  ;;  %v913_v49 = vsel %vm9137_vm9, %v905_v24, %v912_v31  ;;  %1073 = vst [vmem:[#allocation2 + $0xc0] sm:$0xf] %v1072_v38  ;;  %v9768_v31 = vpop.f32.mrf.mxu0 }
 0x159   : > { %1915 = vst [vmem:[#allocation3 + $0x464] sm:$0xf] %v1851_v40  ;;  %v2271_v52 = vrot.slane %v2269_v33, 4  ;;  %v2274_v53 = vrot.slane %v2272_v35, 5  ;;  %v2288_v55 = vshll.u32 %v2012_v30, 16  ;;  %v2280_v61 = vrot.slane %v2278_v41, 5 }
 0x15a   : > { %v2750_v56 = vld [vmem:[#allocation2 + $0x1c] sm:$0xf]  ;;  %2781 = vst [vmem:[#allocation3 + $0x18] sm:$0xf] %v2749_v48  ;;  %1074 = vst [vmem:[#allocation2 + $0xc4] sm:$0xf] %v913_v49 }
 0x15b   : > { %v2284_v62 = vrot.slane %v2282_v45, 4  ;;  %v7281_v0 = vrot.slane %v2506_v36, 9  ;;  %v2644_v1 = vrot.slane %v2507_v37, 5  ;;  %2782 = vst [vmem:[#allocation3 + $0x3c] sm:$0xf] %v2750_v56  ;;  %v2275_v3 = vor.u32 %v2274_v53, %v2271_v52  ;;  %10681 = vst [vmem:[#allocation11_spill] sm:$0xff] %v9766_v23 }
 0x15c   : > { %v2813_v2 = vld [vmem:[#allocation2 + $0x18] sm:$0xf]  ;;  %v2290_v42 = vrot.slane %v2288_v55, 5  ;;  %v2647_v6 = vrot.slane %v2508_v46, 5  ;;  %v2814_v8 = vld [vmem:[#allocation2 + $0x1c] sm:$0xf] }
 0x15d   : > { %v2862_v10 = vshrl.u32 %v2813_v2, 16  ;;  %v8836_v11 = vld [vmem:[#allocation3 + $0x29c] ss:$36 sps:$4 sm:$0xff]   ;;  %v2285_v14 = vor.u32 %v2284_v62, %v2280_v61  ;;  %v2645_v16 = vsel %vm9399_vm14, %v7281_v0, %v2644_v1  ;;  %v2646_v18 = vrot.slane %v2644_v1, 4  ;;  %v2815_v25 = vld [vmem:[#allocation2 + $0x20] sm:$0x1] }
 0x15e   : > { %v8838_v12 = vld [vmem:[#allocation3 + $0x298] ss:$36 sps:$4 sm:$0xff]   ;;  %v2276_v24 = vrot.slane %v2275_v3, 4  ;;  %2736 = vst [vmem:[#allocation3 + $0x2e4] sm:$0xf] %v2645_v16  ;;  %v2865_v27 = vshll.u32 %v2813_v2, 16  ;;  %5479 = vmatprep.mubr.bf16.mxu0 %v8836_v11 }
 0x15f   : > { %v2864_v26 = vrot.slane %v2862_v10, 4  ;;  %v2871_v30 = vshll.u32 %v2814_v8, 16  ;;  %v2286_v33 = vrot.slane %v2285_v14, 4  ;;  %v2648_v35 = vsel %vm9399_vm14, %v2646_v18, %v2647_v6  ;;  %5480 = vmatmul.mubr.bf16.gmra.mxu0 %v8838_v12  ;;  %v2013_v41 = vld [vmem:[#allocation2 + $0x90] sm:$0xf]  ;;  %v9776_v14 = vpop.f32.mrf.mxu1 }
 0x160   : > { %v2875_v36 = vshrl.u32 %v2814_v8, 16  ;;  %v2881_v37 = vshll.u32 %v2815_v25, 16  ;;  %v2281_v20 = vsel %vm9159_vm11, %v2276_v24, %v2280_v61  ;;  %2737 = vst [vmem:[#allocation3 + $0x308] sm:$0xf] %v2648_v35  ;;  %v2867_v38 = vrot.slane %v2865_v27, 5  ;;  %v8011_v61 = vpop.f32.mrf.mxu0  ;;  %10682 = vst [vmem:[#allocation12_spill] sm:$0xff] %v9776_v14 }
 0x161   : > { %v2873_v40 = vrot.slane %v2871_v30, 5  ;;  %v1946_v45 = vld [vmem:[#allocation2 + $0xc0] sm:$0xf]  ;;  %v2291_v46 = vsel %vm9159_vm11, %v2286_v33, %v2290_v42  ;;  %2464 = vst [vmem:[#allocation3 + $0x2e0] sm:$0xf] %v2281_v20  ;;  %v2293_v51 = vshrl.u32 %v2013_v41, 16 }
 0x162   : > { %v2877_v48 = vrot.slane %v2875_v36, 4  ;;  %v2883_v49 = vrot.slane %v2881_v37, 5  ;;  %v2014_v52 = vld [vmem:[#allocation2 + $0x94] sm:$0xf]  ;;  %v1947_v53 = vld [vmem:[#allocation2 + $0xc4] sm:$0xf]  ;;  %v2868_v55 = vor.u32 %v2867_v38, %v2864_v26  ;;  %v8012_v20 = vpop.f32.mrf.mxu0 }
 0x163   : > { %1978 = vst [vmem:[#allocation3 + $0x444] sm:$0xf] %v1946_v45  ;;  %2465 = vst [vmem:[#allocation3 + $0x304] sm:$0xf] %v2291_v46  ;;  %v2015_v56 = vld [vmem:[#allocation2 + $0x98] sm:$0x1] }
 0x164   : > { %v2296_v62 = vshll.u32 %v2013_v41, 16  ;;  %1979 = vst [vmem:[#allocation3 + $0x468] sm:$0xf] %v1947_v53  ;;  %v2878_v0 = vor.u32 %v2877_v48, %v2873_v40  ;;  %v2302_v1 = vshll.u32 %v2014_v52, 16  ;;  %v2306_v2 = vshrl.u32 %v2014_v52, 16 }
 0x165   : > { %v2312_v3 = vshll.u32 %v2015_v56, 16  ;;  %v2509_v6 = vld [vmem:[#allocation2 + $0x90] sm:$0xe]  ;;  %v2869_v8 = vrot.slane %v2868_v55, 4  ;;  %v2295_v42 = vrot.slane %v2293_v51, 4  ;;  %v9782_v52 = vadd.f32 %v8012_v20, %v8011_v61 }
 0x166   : > { %v2298_v10 = vrot.slane %v2296_v62, 5  ;;  %v2510_v11 = vld [vmem:[#allocation2 + $0x94] sm:$0xf]  ;;  %v7282_v12 = vrot.slane %v2509_v6, 9  ;;  %v2879_v16 = vrot.slane %v2878_v0, 4  ;;  %v2304_v18 = vrot.slane %v2302_v1, 5  ;;  %v9786_v62 = vpop.f32.mrf.mxu1 }
 0x167   : > { %v2308_v24 = vrot.slane %v2306_v2, 4  ;;  %v2314_v25 = vrot.slane %v2312_v3, 5  ;;  %v2511_v26 = vld [vmem:[#allocation2 + $0x98] sm:$0x1]  ;;  %v2874_v27 = vsel %vm9159_vm11, %v2869_v8, %v2873_v40  ;;  %v2651_v33 = vrot.slane %v2510_v11, 5  ;;  %10683 = vst [vmem:[#allocation13_spill] sm:$0xff] %v9786_v62 }
 0x168   : > { %v2299_v30 = vor.u32 %v2298_v10, %v2295_v42  ;;  %v2654_v35 = vrot.slane %v2511_v26, 5  ;;  %v2751_v36 = vld [vmem:[#allocation2 + $0x24] sm:$0xf]  ;;  %v2752_v37 = vld [vmem:[#allocation2 + $0x28] sm:$0xf]  ;;  %v2884_v38 = vsel %vm9159_vm11, %v2879_v16, %v2883_v49 }
 0x169   : > { %3277 = vst [vmem:[#allocation3 + $0x1c] sm:$0xf] %v2874_v27  ;;  %v2309_v41 = vor.u32 %v2308_v24, %v2304_v18  ;;  %2783 = vst [vmem:[#allocation3 + $0x60] sm:$0xf] %v2751_v36  ;;  %v2816_v45 = vld [vmem:[#allocation2 + $0x24] sm:$0xf]  ;;  %v2652_v53 = vsel %vm9399_vm14, %v7282_v12, %v2651_v33 }
 0x16a   : > { %2784 = vst [vmem:[#allocation3 + $0x84] sm:$0xf] %v2752_v37  ;;  %v2817_v46 = vld [vmem:[#allocation2 + $0x28] sm:$0xf]  ;;  %v2818_v48 = vld [vmem:[#allocation2 + $0x2c] sm:$0x1] }
 0x16b   : > { %3278 = vst [vmem:[#allocation3 + $0x40] sm:$0xf] %v2884_v38  ;;  %v2300_v40 = vrot.slane %v2299_v30, 4  ;;  %v2653_v55 = vrot.slane %v2651_v33, 4  ;;  %v2886_v56 = vshrl.u32 %v2816_v45, 16  ;;  %v2310_v0 = vrot.slane %v2309_v41, 4  ;;  %v8077_v30 = vpop.f32.mrf.mxu1 }
 0x16c   : > { %v2016_v51 = vld [vmem:[#allocation2 + $0x9c] sm:$0xf]  ;;  %2738 = vst [vmem:[#allocation3 + $0x32c] sm:$0xf] %v2652_v53  ;;  %v2889_v1 = vshll.u32 %v2816_v45, 16  ;;  %v2895_v12 = vshll.u32 %v2817_v46, 16 }
 0x16d   : > { %v8842_v49 = vld [vmem:[#allocation3 + $0x2e4] ss:$36 sps:$4 sm:$0xff]   ;;  %v2305_v61 = vsel %vm9159_vm11, %v2300_v40, %v2304_v18  ;;  %v2655_v6 = vsel %vm9399_vm14, %v2653_v55, %v2654_v35  ;;  %v2888_v8 = vrot.slane %v2886_v56, 4  ;;  %v2315_v10 = vsel %vm9159_vm11, %v2310_v0, %v2314_v25  ;;  %v2018_v27 = vld [vmem:[#allocation2 + $0xa4] sm:$0x1]  ;;  %v9794_v25 = vpop.f32.mrf.mxu0  ;;  %v8078_v40 = vpop.f32.mrf.mxu1 }
 0x16e   : > { %v8839_v2 = vld [vmem:[#allocation3 + $0x444] ss:$36 sps:$4 sm:$0xff]   ;;  %5487 = vmatprep.mubr.bf16.mxu0 %v8842_v49  ;;  %2466 = vst [vmem:[#allocation3 + $0x328] sm:$0xf] %v2305_v61  ;;  %2739 = vst [vmem:[#allocation3 + $0x350] sm:$0xf] %v2655_v6  ;;  %v9796_v49 = vadd.f32 %v8078_v40, %v8077_v30 }
 0x16f   : > { %v8841_v3 = vld [vmem:[#allocation3 + $0x440] ss:$36 sps:$4 sm:$0xff]   ;;  %v2891_v11 = vrot.slane %v2889_v1, 5  ;;  %v2899_v16 = vshrl.u32 %v2817_v46, 16  ;;  %5366 = vmatprep.mubr.bf16.mxu1 %v8839_v2  ;;  %2467 = vst [vmem:[#allocation3 + $0x34c] sm:$0xf] %v2315_v10 }
 0x170   : > { %v8844_v42 = vld [vmem:[#allocation3 + $0x2e0] ss:$36 sps:$4 sm:$0xff]   ;;  %v2905_v24 = vshll.u32 %v2818_v48, 16  ;;  %v2017_v26 = vld [vmem:[#allocation2 + $0xa0] sm:$0xf]  ;;  %v2317_v18 = vshrl.u32 %v2016_v51, 16  ;;  %5367 = vmatmul.mubr.bf16.gmra.mxu1 %v8841_v3 }
 0x171   : > { %5488 = vmatmul.mubr.bf16.gmra.mxu0 %v8844_v42  ;;  %v2892_v33 = vor.u32 %v2891_v11, %v2888_v8  ;;  %v2897_v35 = vrot.slane %v2895_v12, 5  ;;  %v2901_v36 = vrot.slane %v2899_v16, 4  ;;  %v2320_v37 = vshll.u32 %v2016_v51, 16  ;;  %v2512_v20 = vld [vmem:[#allocation2 + $0x9c] sm:$0xe]  ;;  %10684 = vst [vmem:[#allocation14_spill] sm:$0xff] %v9796_v49  ;;  %v9798_v51 = vpop.f32.mrf.mxu1  ;;  %v9802_v12 = vpop.f32.mrf.mxu0 }
 0x172   : > { %v2907_v38 = vrot.slane %v2905_v24, 5  ;;  %v2319_v41 = vrot.slane %v2317_v18, 4  ;;  %v2326_v45 = vshll.u32 %v2017_v26, 16  ;;  %v2330_v46 = vshrl.u32 %v2017_v26, 16  ;;  %v8845_v53 = vld [vmem:[#allocation3 + $0x18] ss:$36 sps:$4 sm:$0xff]  }
 0x173   : > { %v8847_v48 = vld [vmem:[#allocation3 + $0x1c] ss:$36 sps:$4 sm:$0xff]   ;;  %v2893_v55 = vrot.slane %v2892_v33, 4  ;;  %v2902_v56 = vor.u32 %v2901_v36, %v2897_v35  ;;  %v2322_v0 = vrot.slane %v2320_v37, 5  ;;  %v2336_v3 = vshll.u32 %v2018_v27, 16  ;;  %10685 = vst [vmem:[#allocation15_spill] sm:$0xff] %v9798_v51  ;;  %v9804_v27 = vpop.f32.mrf.mxu1 }
 0x174   : > { %v2328_v1 = vrot.slane %v2326_v45, 5  ;;  %v2332_v2 = vrot.slane %v2330_v46, 4  ;;  %v2513_v61 = vld [vmem:[#allocation2 + $0xa0] sm:$0xf]  ;;  %5568 = vmatprep.mubr.bf16.mxu1 %v8847_v48  ;;  %v2514_v42 = vld [vmem:[#allocation2 + $0xa4] sm:$0x1] }
 0x175   : > { %v2898_v6 = vsel %vm9159_vm11, %v2893_v55, %v2897_v35  ;;  %v2903_v8 = vrot.slane %v2902_v56, 4  ;;  %v7283_v10 = vrot.slane %v2512_v20, 9  ;;  %v2658_v11 = vrot.slane %v2513_v61, 5  ;;  %v2753_v30 = vld [vmem:[#allocation2 + $0x30] sm:$0xf]  ;;  %10686 = vst [vmem:[#allocation16_spill] sm:$0xff] %v9804_v27  ;;  %v8099_v48 = vpop.f32.mrf.mxu1 }
 0x176   : > { %3279 = vst [vmem:[#allocation3 + $0x64] sm:$0xf] %v2898_v6  ;;  %v2323_v16 = vor.u32 %v2322_v0, %v2319_v41  ;;  %v2333_v24 = vor.u32 %v2332_v2, %v2328_v1  ;;  %v2338_v26 = vrot.slane %v2336_v3, 5  ;;  %v2661_v18 = vrot.slane %v2514_v42, 5  ;;  %v8849_v33 = vld [vmem:[#allocation3 + $0x32c] ss:$36 sps:$4 sm:$0xff]   ;;  %v8017_v3 = vpop.f32.mrf.mxu0 }
 0x177   : > { %v8851_v36 = vld [vmem:[#allocation3 + $0x328] ss:$36 sps:$4 sm:$0xff]   ;;  %v2908_v37 = vsel %vm9159_vm11, %v2903_v8, %v2907_v38  ;;  %v2659_v35 = vsel %vm9399_vm14, %v7283_v10, %v2658_v11  ;;  %v2660_v20 = vrot.slane %v2658_v11, 4  ;;  %2785 = vst [vmem:[#allocation3 + $0xa8] sm:$0xf] %v2753_v30  ;;  %5495 = vmatprep.mubr.bf16.mxu0 %v8849_v33  ;;  %v8100_v42 = vpop.f32.mrf.mxu1 }
 0x178   : > { %3280 = vst [vmem:[#allocation3 + $0x88] sm:$0xf] %v2908_v37  ;;  %v2324_v45 = vrot.slane %v2323_v16, 4  ;;  %v2334_v46 = vrot.slane %v2333_v24, 4  ;;  %2740 = vst [vmem:[#allocation3 + $0x374] sm:$0xf] %v2659_v35  ;;  %5569 = vmatmul.mubr.bf16.vlgmr.msra.gmra.mxu1 %v8845_v53  ;;  %v8101_v30 = vadd.f32 %v8100_v42, %v8099_v48 }
 0x179   : > { %v2754_v41 = vld [vmem:[#allocation2 + $0x34] sm:$0xf]  ;;  %v2819_v40 = vld [vmem:[#allocation2 + $0x30] sm:$0xf]  ;;  %v2662_v55 = vsel %vm9399_vm14, %v2660_v20, %v2661_v18  ;;  %v2821_v38 = vld [vmem:[#allocation2 + $0x38] sm:$0x1]  ;;  %5496 = vmatmul.mubr.bf16.gmra.mxu0 %v8851_v36  ;;  %v8018_v18 = vpop.f32.mrf.mxu0  ;;  %v8102_v20 = vpop.f32.mrf.mxu1 }
 0x17a   : > { %2786 = vst [vmem:[#allocation3 + $0xcc] sm:$0xf] %v2754_v41  ;;  %v2820_v56 = vld [vmem:[#allocation2 + $0x34] sm:$0xf]  ;;  %v2910_v0 = vshrl.u32 %v2819_v40, 16  ;;  %v2913_v2 = vshll.u32 %v2819_v40, 16  ;;  %v2329_v61 = vsel %vm9159_vm11, %v2324_v45, %v2328_v1  ;;  %v2339_v6 = vsel %vm9159_vm11, %v2334_v46, %v2338_v26 }
 0x17b   : > { %2741 = vst [vmem:[#allocation3 + $0x398] sm:$0xf] %v2662_v55  ;;  %v2919_v8 = vshll.u32 %v2820_v56, 16  ;;  %v2923_v53 = vshrl.u32 %v2820_v56, 16  ;;  %2468 = vst [vmem:[#allocation3 + $0x370] sm:$0xf] %v2329_v61  ;;  %v9816_v1 = vadd.f32 %v8018_v18, %v8017_v3  ;;  %v8103_v61 = vpop.f32.mrf.mxu1  ;;  %v9821_v3 = vadd.f32 %v8101_v30, %v9619_v60 }
 0x17c   : > { %2469 = vst [vmem:[#allocation3 + $0x394] sm:$0xf] %v2339_v6  ;;  %v2912_v10 = vrot.slane %v2910_v0, 4  ;;  %v2915_v11 = vrot.slane %v2913_v2, 5  ;;  %v2929_v16 = vshll.u32 %v2821_v38, 16  ;;  %v8104_v42 = vadd.f32 %v8103_v61, %v8102_v20 }
 0x17d   : > { %v2019_v24 = vld [vmem:[#allocation2 + $0xa8] sm:$0xf]  ;;  %v2921_v33 = vrot.slane %v2919_v8, 5  ;;  %v2925_v36 = vrot.slane %v2923_v53, 4  ;;  %v2020_v37 = vld [vmem:[#allocation2 + $0xac] sm:$0xf]  ;;  %v7992_v53 = vadd.f32 %v9653_v5, %v9639_v50 }
 0x17e   : > { %v2021_v35 = vld [vmem:[#allocation2 + $0xb0] sm:$0x1]  ;;  %v2916_v26 = vor.u32 %v2915_v11, %v2912_v10  ;;  %v2931_v45 = vrot.slane %v2929_v16, 5  ;;  %v2341_v46 = vshrl.u32 %v2019_v24, 16  ;;  %v2344_v41 = vshll.u32 %v2019_v24, 16 }
 0x17f   : > { %v2515_v40 = vld [vmem:[#allocation2 + $0xa8] sm:$0xe]  ;;  %v2926_v55 = vor.u32 %v2925_v36, %v2921_v33  ;;  %v2350_v56 = vshll.u32 %v2020_v37, 16  ;;  %v2354_v0 = vshrl.u32 %v2020_v37, 16  ;;  %v2360_v2 = vshll.u32 %v2021_v35, 16  ;;  %v8105_v36 = vpop.f32.mrf.mxu1 }
 0x180   : > { %v2516_v38 = vld [vmem:[#allocation2 + $0xac] sm:$0xf]  ;;  %v8852_v6 = vld [vmem:[#allocation3 + $0x64] ss:$36 sps:$4 sm:$0xff]   ;;  %v2917_v8 = vrot.slane %v2916_v26, 4  ;;  %v2343_v11 = vrot.slane %v2341_v46, 4 }
 0x181   : > { %v8854_v48 = vld [vmem:[#allocation3 + $0x60] ss:$36 sps:$4 sm:$0xff]   ;;  %v2927_v10 = vrot.slane %v2926_v55, 4  ;;  %v2346_v16 = vrot.slane %v2344_v41, 5  ;;  %v2352_v24 = vrot.slane %v2350_v56, 5  ;;  %5576 = vmatprep.mubr.bf16.mxu1 %v8852_v6  ;;  %v2356_v35 = vrot.slane %v2354_v0, 4  ;;  %v8106_v46 = vpop.f32.mrf.mxu1 }
 0x182   : > { %v2517_v18 = vld [vmem:[#allocation2 + $0xb0] sm:$0x1]  ;;  %v2922_v37 = vsel %vm9159_vm11, %v2917_v8, %v2921_v33  ;;  %v2362_v27 = vrot.slane %v2360_v2, 5  ;;  %v7284_v26 = vrot.slane %v2515_v40, 9  ;;  %v2755_v51 = vld [vmem:[#allocation2 + $0x3c] sm:$0xf]  ;;  %5577 = vmatmul.mubr.bf16.gmra.mxu1 %v8854_v48  ;;  %v9829_v40 = vadd.f32 %v9695_v57, %v9682_v28  ;;  %v9839_v8 = vpop.f32.mrf.mxu0 }
 0x183   : > { %v8855_v50 = vld [vmem:[#allocation3 + $0x374] ss:$36 sps:$4 sm:$0xff]   ;;  %v2932_v60 = vsel %vm9159_vm11, %v2927_v10, %v2931_v45  ;;  %3281 = vst [vmem:[#allocation3 + $0xac] sm:$0xf] %v2922_v37  ;;  %v2347_v5 = vor.u32 %v2346_v16, %v2343_v11  ;;  %v2665_v30 = vrot.slane %v2516_v38, 5  ;;  %v2668_v20 = vrot.slane %v2517_v18, 5  ;;  %v8108_v28 = vpop.f32.mrf.mxu1 }
 0x184   : > { %2787 = vst [vmem:[#allocation3 + $0xf0] sm:$0xf] %v2755_v51  ;;  %v8857_v41 = vld [vmem:[#allocation3 + $0x370] ss:$36 sps:$4 sm:$0xff]   ;;  %3282 = vst [vmem:[#allocation3 + $0xd0] sm:$0xf] %v2932_v60  ;;  %v2357_v55 = vor.u32 %v2356_v35, %v2352_v24  ;;  %v9831_v0 = vadd.f32 %v8104_v42, %v7992_v53  ;;  %v8107_v2 = vadd.f32 %v8106_v46, %v8105_v36  ;;  %5503 = vmatprep.mubr.bf16.mxu0 %v8855_v50 }
 0x185   : > { %v2756_v56 = vld [vmem:[#allocation2 + $0x40] sm:$0xf]  ;;  %v2822_v33 = vld [vmem:[#allocation2 + $0x3c] sm:$0xf]  ;;  %v2348_v45 = vrot.slane %v2347_v5, 4  ;;  %v2666_v38 = vsel %vm9399_vm14, %v7284_v26, %v2665_v30  ;;  %v2667_v61 = vrot.slane %v2665_v30, 4  ;;  %v9837_v48 = vadd.f32 %v9723_v47, %v9715_v19  ;;  %5504 = vmatmul.mubr.bf16.gmra.mxu0 %v8857_v41  ;;  %v8109_v35 = vpop.f32.mrf.mxu1 }
 0x186   : > { %2788 = vst [vmem:[#allocation3 + $0x114] sm:$0xf] %v2756_v56  ;;  %v2823_v51 = vld [vmem:[#allocation2 + $0x40] sm:$0xf]  ;;  %v2824_v6 = vld [vmem:[#allocation2 + $0x44] sm:$0x1]  ;;  %v9847_v56 = vpop.f32.mrf.mxu0 }
 0x187   : > { %v2358_v57 = vrot.slane %v2357_v55, 4  ;;  %2742 = vst [vmem:[#allocation3 + $0x3bc] sm:$0xf] %v2666_v38  ;;  %v2934_v53 = vshrl.u32 %v2822_v33, 16  ;;  %v2937_v42 = vshll.u32 %v2822_v33, 16  ;;  %v2943_v10 = vshll.u32 %v2823_v51, 16 }
 0x188   : > { %v2022_v11 = vld [vmem:[#allocation2 + $0xb4] sm:$0xf]  ;;  %v2353_v16 = vsel %vm9159_vm11, %v2348_v45, %v2352_v24  ;;  %v2669_v18 = vsel %vm9399_vm14, %v2667_v61, %v2668_v20  ;;  %v2947_v36 = vshrl.u32 %v2823_v51, 16  ;;  %v2953_v37 = vshll.u32 %v2824_v6, 16  ;;  %v2023_v19 = vld [vmem:[#allocation2 + $0xb8] sm:$0xf]  ;;  %v8023_v14 = vpop.f32.mrf.mxu0 }
 0x189   : > { %v2024_v47 = vld [vmem:[#allocation2 + $0xbc] sm:$0x1]  ;;  %v2363_v26 = vsel %vm9159_vm11, %v2358_v57, %v2362_v27  ;;  %2470 = vst [vmem:[#allocation3 + $0x3b8] sm:$0xf] %v2353_v16  ;;  %2743 = vst [vmem:[#allocation3 + $0x3e0] sm:$0xf] %v2669_v18  ;;  %v8111_v27 = vpop.f32.mrf.mxu1  ;;  %v8110_v16 = vadd.f32 %v8109_v35, %v8108_v28 }
 0x18a   : > { %v2936_v50 = vrot.slane %v2934_v53, 4  ;;  %v2939_v60 = vrot.slane %v2937_v42, 5  ;;  %v2945_v5 = vrot.slane %v2943_v10, 5  ;;  %v2518_v30 = vld [vmem:[#allocation2 + $0xb4] sm:$0xe]  ;;  %v2949_v46 = vrot.slane %v2947_v36, 4 }
 0x18b   : > { %2471 = vst [vmem:[#allocation3 + $0x3dc] sm:$0xf] %v2363_v26  ;;  %v2955_v24 = vrot.slane %v2953_v37, 5  ;;  %v2365_v41 = vshrl.u32 %v2022_v11, 16  ;;  %v2368_v55 = vshll.u32 %v2022_v11, 16  ;;  %v2374_v45 = vshll.u32 %v2023_v19, 16  ;;  %v8112_v49 = vpop.f32.mrf.mxu1 }
 0x18c   : > { %v2519_v20 = vld [vmem:[#allocation2 + $0xb8] sm:$0xf]  ;;  %v2940_v33 = vor.u32 %v2939_v60, %v2936_v50  ;;  %v2378_v38 = vshrl.u32 %v2023_v19, 16  ;;  %v2384_v61 = vshll.u32 %v2024_v47, 16  ;;  %v2520_v51 = vld [vmem:[#allocation2 + $0xbc] sm:$0x1]  ;;  %v2950_v53 = vor.u32 %v2949_v46, %v2945_v5 }
 0x18d   : > { %v8858_v6 = vld [vmem:[#allocation3 + $0xac] ss:$36 sps:$4 sm:$0xff]   ;;  %v2367_v42 = vrot.slane %v2365_v41, 4  ;;  %v9850_v10 = vadd.f32 %v8107_v2, %v9664_v44  ;;  %v2370_v36 = vrot.slane %v2368_v55, 5  ;;  %v2376_v11 = vrot.slane %v2374_v45, 5  ;;  %v8114_v55 = vpop.f32.mrf.mxu1 }
 0x18e   : > { %v8861_v57 = vld [vmem:[#allocation3 + $0xa8] ss:$36 sps:$4 sm:$0xff]   ;;  %v2941_v18 = vrot.slane %v2940_v33, 4  ;;  %v2380_v37 = vrot.slane %v2378_v38, 4  ;;  %v2757_v26 = vld [vmem:[#allocation2 + $0x48] sm:$0xf]  ;;  %5584 = vmatprep.mubr.bf16.mxu1 %v8858_v6 }
 0x18f   : > { %v2951_v50 = vrot.slane %v2950_v53, 4  ;;  %v2386_v19 = vrot.slane %v2384_v61, 5  ;;  %v7285_v47 = vrot.slane %v2518_v30, 9  ;;  %v2672_v60 = vrot.slane %v2519_v20, 5  ;;  %v2758_v62 = vld [vmem:[#allocation2 + $0x4c] sm:$0xf]  ;;  %5585 = vmatmul.mubr.bf16.gmra.mxu1 %v8861_v57  ;;  %v8024_v61 = vpop.f32.mrf.mxu0 }
 0x190   : > { %2789 = vst [vmem:[#allocation3 + $0x138] sm:$0xf] %v2757_v26  ;;  %v2946_v44 = vsel %vm9159_vm11, %v2941_v18, %v2945_v5  ;;  %v2371_v2 = vor.u32 %v2370_v36, %v2367_v42  ;;  %v2381_v28 = vor.u32 %v2380_v37, %v2376_v11  ;;  %v2675_v35 = vrot.slane %v2520_v51, 5  ;;  %2790 = vst [vmem:[#allocation3 + $0x15c] sm:$0xf] %v2758_v62 }
 0x191   : > { %v2825_v46 = vld [vmem:[#allocation2 + $0x48] sm:$0xf]  ;;  %v2826_v41 = vld [vmem:[#allocation2 + $0x4c] sm:$0xf]  ;;  %v2956_v33 = vsel %vm9159_vm11, %v2951_v50, %v2955_v24  ;;  %3283 = vst [vmem:[#allocation3 + $0xf4] sm:$0xf] %v2946_v44  ;;  %v2673_v30 = vsel %vm9399_vm14, %v7285_v47, %v2672_v60  ;;  %v9858_v62 = vadd.f32 %v8024_v61, %v8023_v14  ;;  %v9861_v51 = vadd.f32 %v8110_v16, %v9829_v40  ;;  %v8115_v24 = vpop.f32.mrf.mxu1  ;;  %v9865_v26 = vpop.f32.mrf.mxu0 }
 0x192   : > { %v2674_v20 = vrot.slane %v2672_v60, 4  ;;  %v2827_v45 = vld [vmem:[#allocation2 + $0x50] sm:$0x1]  ;;  %v2958_v38 = vshrl.u32 %v2825_v46, 16  ;;  %v8862_v6 = vld [vmem:[#allocation3 + $0x3bc] ss:$36 sps:$4 sm:$0xff]   ;;  %v8113_v53 = vadd.f32 %v8112_v49, %v8111_v27 }
 0x193   : > { %v8864_v5 = vld [vmem:[#allocation3 + $0x3b8] ss:$36 sps:$4 sm:$0xff]   ;;  %3284 = vst [vmem:[#allocation3 + $0x118] sm:$0xf] %v2956_v33  ;;  %v2372_v57 = vrot.slane %v2371_v2, 4  ;;  %v2382_v42 = vrot.slane %v2381_v28, 4  ;;  %5511 = vmatprep.mubr.bf16.mxu0 %v8862_v6  ;;  %v8116_v2 = vadd.f32 %v8115_v24, %v8114_v55 }
 0x194   : > { %2744 = vst [vmem:[#allocation3 + $0x404] sm:$0xf] %v2673_v30  ;;  %v2676_v18 = vsel %vm9399_vm14, %v2674_v20, %v2675_v35  ;;  %v2960_v36 = vrot.slane %v2958_v38, 4  ;;  %v2961_v37 = vshll.u32 %v2825_v46, 16  ;;  %v2967_v14 = vshll.u32 %v2826_v41, 16  ;;  %5512 = vmatmul.mubr.bf16.gmra.mxu0 %v8864_v5  ;;  %v9877_v38 = vpop.f32.mrf.mxu0 }
 0x195   : > { %v2377_v50 = vsel %vm9159_vm11, %v2372_v57, %v2376_v11  ;;  %2745 = vst [vmem:[#allocation3 + $0x428] sm:$0xf] %v2676_v18  ;;  %v2971_v47 = vshrl.u32 %v2826_v41, 16  ;;  %v2977_v60 = vshll.u32 %v2827_v45, 16  ;;  %v2387_v49 = vsel %vm9159_vm11, %v2382_v42, %v2386_v19  ;;  %v603_v27 = vld [vmem:[#allocation2 + $0xc8] sm:$0x1] }
 0x196   : > { %2472 = vst [vmem:[#allocation3 + $0x400] sm:$0xf] %v2377_v50  ;;  %v2963_v40 = vrot.slane %v2961_v37, 5  ;;  %v2025_v16 = vld [vmem:[#allocation2 + $0xc0] sm:$0xf]  ;;  %v9872_v44 = vadd.f32 %v8113_v53, %v9703_v39  ;;  %v914_v28 = vrot.slane %v9751_v15, 4  ;;  %v9880_v24 = vadd.f32 %v8116_v2, %v9837_v48 }
 0x197   : > { %2473 = vst [vmem:[#allocation3 + $0x424] sm:$0xf] %v2387_v49  ;;  %v2969_v11 = vrot.slane %v2967_v14, 5  ;;  %v2973_v35 = vrot.slane %v2971_v47, 4  ;;  %v604_v46 = vsel %vm9106_vm4, 0, %v603_v27  ;;  %v2389_v19 = vshrl.u32 %v2025_v16, 16  ;;  %v8029_v27 = vpop.f32.mrf.mxu0 }
 0x198   : > { %v2026_v41 = vld [vmem:[#allocation2 + $0xc4] sm:$0xf]  ;;  %v2964_v33 = vor.u32 %v2963_v40, %v2960_v36  ;;  %605 = vst [vmem:[#allocation2 + $0xc8] sm:$0x1] %v604_v46  ;;  %v2392_v30 = vshll.u32 %v2025_v16, 16  ;;  %v2979_v61 = vrot.slane %v2977_v60, 5 }
 0x199   : > { %v2398_v20 = vshll.u32 %v2026_v41, 16  ;;  %v2521_v45 = vld [vmem:[#allocation2 + $0xc0] sm:$0xe]  ;;  %v2974_v39 = vor.u32 %v2973_v35, %v2969_v11  ;;  %v2402_v55 = vshrl.u32 %v2026_v41, 16  ;;  %v2522_v6 = vld [vmem:[#allocation2 + $0xc4] sm:$0xf] }
 0x19a   : > { %v7286_v15 = vrot.slane %v2521_v45, 9  ;;  %v8865_v5 = vld [vmem:[#allocation3 + $0xf4] ss:$36 sps:$4 sm:$0xff]   ;;  %v2965_v53 = vrot.slane %v2964_v33, 4  ;;  %v2391_v18 = vrot.slane %v2389_v19, 4  ;;  %v2394_v36 = vrot.slane %v2392_v30, 5  ;;  %v8117_v45 = vpop.f32.mrf.mxu1 }
 0x19b   : > { %v8867_v57 = vld [vmem:[#allocation3 + $0xf0] ss:$36 sps:$4 sm:$0xff]   ;;  %v2975_v42 = vrot.slane %v2974_v39, 4  ;;  %v2400_v37 = vrot.slane %v2398_v20, 5  ;;  %v2759_v50 = vld [vmem:[#allocation2 + $0x54] sm:$0xf]  ;;  %5592 = vmatprep.mubr.bf16.mxu1 %v8865_v5  ;;  %v8030_v20 = vpop.f32.mrf.mxu0 }
 0x19c   : > { %v2970_v14 = vsel %vm9159_vm11, %v2965_v53, %v2969_v11  ;;  %v2404_v47 = vrot.slane %v2402_v55, 4  ;;  %v2679_v60 = vrot.slane %v2522_v6, 5  ;;  %v2760_v49 = vld [vmem:[#allocation2 + $0x58] sm:$0xf]  ;;  %2791 = vst [vmem:[#allocation3 + $0x180] sm:$0xf] %v2759_v50  ;;  %5593 = vmatmul.mubr.bf16.gmra.mxu1 %v8867_v57  ;;  %v2395_v16 = vor.u32 %v2394_v36, %v2391_v18  ;;  %v8118_v36 = vpop.f32.mrf.mxu1 }
 0x19d   : > { %v2828_v40 = vld [vmem:[#allocation2 + $0x54] sm:$0xf]  ;;  %v2980_v48 = vsel %vm9159_vm11, %v2975_v42, %v2979_v61  ;;  %3285 = vst [vmem:[#allocation3 + $0x13c] sm:$0xf] %v2970_v14  ;;  %2792 = vst [vmem:[#allocation3 + $0x1a4] sm:$0xf] %v2760_v49  ;;  %v9898_v49 = vpop.f32.mrf.mxu0 }
 0x19e   : > { %v2829_v2 = vld [vmem:[#allocation2 + $0x58] sm:$0xf]  ;;  %v2830_v35 = vld [vmem:[#allocation2 + $0x5c] sm:$0x1]  ;;  %v2982_v46 = vshrl.u32 %v2828_v40, 16  ;;  %v2405_v11 = vor.u32 %v2404_v47, %v2400_v37  ;;  %v2680_v19 = vsel %vm9399_vm14, %v7286_v15, %v2679_v60  ;;  %v9888_v30 = vrot.slane %v2679_v60, 4 }
 0x19f   : > { %v8868_v41 = vld [vmem:[#allocation3 + $0x404] ss:$36 sps:$4 sm:$0xff]   ;;  %3286 = vst [vmem:[#allocation3 + $0x160] sm:$0xf] %v2980_v48  ;;  %v1075_v39 = vld [vmem:[#allocation2 + $0xc8] sm:$0x1]  ;;  %v9896_v60 = vadd.f32 %v8030_v20, %v8029_v27 }
 0x1a0   : > { %v8870_v33 = vld [vmem:[#allocation3 + $0x400] ss:$36 sps:$4 sm:$0xff]   ;;  %v2396_v55 = vrot.slane %v2395_v16, 4  ;;  %2746 = vst [vmem:[#allocation3 + $0x44c] sm:$0xf] %v2680_v19  ;;  %v2984_v61 = vrot.slane %v2982_v46, 4  ;;  %5519 = vmatprep.mubr.bf16.mxu0 %v8868_v41  ;;  %v1076_v57 = vsel %vm9092_vm3, %v914_v28, %v1075_v39 }
 0x1a1   : > { %v2985_v6 = vshll.u32 %v2828_v40, 16  ;;  %v2991_v5 = vshll.u32 %v2829_v2, 16  ;;  %v9892_v53 = vrot.slane %v2405_v11, 4  ;;  %v2995_v42 = vshrl.u32 %v2829_v2, 16  ;;  %5520 = vmatmul.mubr.bf16.gmra.mxu0 %v8870_v33  ;;  %1077 = vst [vmem:[#allocation2 + $0xc8] sm:$0x1] %v1076_v57 }
 0x1a2   : > { %v3001_v18 = vshll.u32 %v2830_v35, 16  ;;  %v2401_v15 = vsel %vm9159_vm11, %v2396_v55, %v2400_v37  ;;  %v3309_v47 = vld [vmem:[#allocation2 + $0x18] sm:$0xe]  ;;  %v3310_v48 = vld [vmem:[#allocation2 + $0x1c] sm:$0xf]  ;;  %v8119_v2 = vadd.f32 %v8118_v36, %v8117_v45  ;;  %v8120_v35 = vpop.f32.mrf.mxu1 }
 0x1a3   : > { %v2987_v50 = vrot.slane %v2985_v6, 5  ;;  %v2993_v14 = vrot.slane %v2991_v5, 5  ;;  %2474 = vst [vmem:[#allocation3 + $0x448] sm:$0xf] %v2401_v15  ;;  %v2997_v40 = vrot.slane %v2995_v42, 4  ;;  %v7287_v41 = vrot.slane %v3309_v47, 9 }
 0x1a4   : > { %v3003_v28 = vrot.slane %v3001_v18, 5  ;;  %v3311_v16 = vld [vmem:[#allocation2 + $0x20] sm:$0x1]  ;;  %v3407_v33 = vrot.slane %v3310_v48, 5  ;;  %v3312_v19 = vld [vmem:[#allocation2 + $0x24] sm:$0xe]  ;;  %v9901_v27 = vadd.f32 %v8119_v2, %v9733_v22  ;;  %v8121_v20 = vpop.f32.mrf.mxu1  ;;  %v9907_v18 = vpop.f32.mrf.mxu0 }
 0x1a5   : > { %v2988_v46 = vor.u32 %v2987_v50, %v2984_v61  ;;  %v3410_v11 = vrot.slane %v3311_v16, 5  ;;  %v2998_v37 = vor.u32 %v2997_v40, %v2993_v14  ;;  %v3313_v39 = vld [vmem:[#allocation2 + $0x28] sm:$0xf]  ;;  %v3314_v55 = vld [vmem:[#allocation2 + $0x2c] sm:$0x1]  ;;  %v7288_v6 = vrot.slane %v3312_v19, 9 }
 0x1a6   : > { %v8871_v5 = vld [vmem:[#allocation3 + $0x13c] ss:$36 sps:$4 sm:$0xff]   ;;  %v3408_v45 = vsel %vm9399_vm14, %v7287_v41, %v3407_v33  ;;  %v8010_v61 = vadd.f32 %v9768_v31, %v9762_v59  ;;  %v8122_v36 = vadd.f32 %v8121_v20, %v8120_v35  ;;  %v3409_v50 = vrot.slane %v3407_v33, 4  ;;  %v2761_v22 = vld [vmem:[#allocation2 + $0x60] sm:$0xf] }
 0x1a7   : > { %v8874_v57 = vld [vmem:[#allocation3 + $0x138] ss:$36 sps:$4 sm:$0xff]   ;;  %v2989_v42 = vrot.slane %v2988_v46, 4  ;;  %v2999_v15 = vrot.slane %v2998_v37, 4  ;;  %3549 = vst [vmem:[#allocation3 + $0x20] sm:$0xf] %v3408_v45  ;;  %5600 = vmatprep.mubr.bf16.mxu1 %v8871_v5  ;;  %v8035_v5 = vpop.f32.mrf.mxu0 }
 0x1a8   : > { %v3414_v47 = vrot.slane %v3313_v39, 5  ;;  %v3417_v40 = vrot.slane %v3314_v55, 5  ;;  %v2762_v16 = vld [vmem:[#allocation2 + $0x64] sm:$0xf]  ;;  %2793 = vst [vmem:[#allocation3 + $0x1c8] sm:$0xf] %v2761_v22  ;;  %v9911_v41 = vadd.f32 %v8122_v36, %v8010_v61  ;;  %5601 = vmatmul.mubr.bf16.gmra.mxu1 %v8874_v57  ;;  %v3411_v33 = vsel %vm9399_vm14, %v3409_v50, %v3410_v11 }
 0x1a9   : > { %v2994_v48 = vsel %vm9159_vm11, %v2989_v42, %v2993_v14  ;;  %v2831_v2 = vld [vmem:[#allocation2 + $0x60] sm:$0xf]  ;;  %v2832_v46 = vld [vmem:[#allocation2 + $0x64] sm:$0xf]  ;;  %v2027_v59 = vld [vmem:[#allocation2 + $0xc8] sm:$0x1]  ;;  %v3004_v35 = vsel %vm9159_vm11, %v2999_v15, %v3003_v28 }
 0x1aa   : > { %v2523_v31 = vld [vmem:[#allocation2 + $0xc8] sm:$0x1]  ;;  %3287 = vst [vmem:[#allocation3 + $0x184] sm:$0xf] %v2994_v48  ;;  %v3415_v19 = vsel %vm9399_vm14, %v7288_v6, %v3414_v47  ;;  %v3416_v14 = vrot.slane %v3414_v47, 4  ;;  %v2408_v37 = vshll.u32 %v2027_v59, 16  ;;  %v8123_v47 = vpop.f32.mrf.mxu1 }
 0x1ab   : > { %2794 = vst [vmem:[#allocation3 + $0x1ec] sm:$0xf] %v2762_v16  ;;  %v2682_v39 = vrot.slane %v2523_v31, 5  ;;  %3288 = vst [vmem:[#allocation3 + $0x1a8] sm:$0xf] %v3004_v35  ;;  %v3006_v20 = vshrl.u32 %v2831_v2, 16 }
 0x1ac   : > { %3550 = vst [vmem:[#allocation3 + $0x44] sm:$0xf] %v3411_v33  ;;  %3551 = vst [vmem:[#allocation3 + $0x68] sm:$0xf] %v3415_v19  ;;  %v2833_v55 = vld [vmem:[#allocation2 + $0x68] sm:$0x1]  ;;  %v3418_v28 = vsel %vm9399_vm14, %v3416_v14, %v3417_v40 }
 0x1ad   : > { %v3009_v57 = vshll.u32 %v2831_v2, 16  ;;  %v3015_v42 = vshll.u32 %v2832_v46, 16  ;;  %v3019_v45 = vshrl.u32 %v2832_v46, 16  ;;  %v3315_v11 = vld [vmem:[#allocation2 + $0x30] sm:$0xe]  ;;  %v2410_v61 = vrot.slane %v2408_v37, 5  ;;  %v8036_v2 = vpop.f32.mrf.mxu0 }
 0x1ae   : > { %v2683_v6 = vsel %vm9399_vm14, %v9888_v30, %v2682_v39  ;;  %3552 = vst [vmem:[#allocation3 + $0x8c] sm:$0xf] %v3418_v28  ;;  %v3008_v36 = vrot.slane %v3006_v20, 4  ;;  %v3025_v15 = vshll.u32 %v2833_v55, 16  ;;  %v3316_v50 = vld [vmem:[#allocation2 + $0x34] sm:$0xf]  ;;  %v8124_v30 = vpop.f32.mrf.mxu1  ;;  %v9927_v20 = vadd.f32 %v8036_v2, %v8035_v5 }
 0x1af   : > { %2747 = vst [vmem:[#allocation3 + $0x470] sm:$0xf] %v2683_v6  ;;  %v3011_v22 = vrot.slane %v3009_v57, 5  ;;  %v3017_v48 = vrot.slane %v3015_v42, 5  ;;  %v3021_v16 = vrot.slane %v3019_v45, 4  ;;  %v7289_v40 = vrot.slane %v3315_v11, 9 }
 0x1b0   : > { %v3317_v59 = vld [vmem:[#allocation2 + $0x38] sm:$0x1]  ;;  %v2411_v46 = vsel %vm9159_vm11, %v9892_v53, %v2410_v61  ;;  %v3027_v31 = vrot.slane %v3025_v15, 5  ;;  %v3421_v35 = vrot.slane %v3316_v50, 5  ;;  %v3318_v37 = vld [vmem:[#allocation2 + $0x3c] sm:$0xe]  ;;  %v8125_v28 = vadd.f32 %v8124_v30, %v8123_v47  ;;  %v8126_v61 = vpop.f32.mrf.mxu1 }
 0x1b1   : > { %v3424_v33 = vrot.slane %v3317_v59, 5  ;;  %2475 = vst [vmem:[#allocation3 + $0x46c] sm:$0xf] %v2411_v46  ;;  %v3012_v19 = vor.u32 %v3011_v22, %v3008_v36  ;;  %v3022_v14 = vor.u32 %v3021_v16, %v3017_v48  ;;  %v3319_v39 = vld [vmem:[#allocation2 + $0x40] sm:$0xf]  ;;  %v7290_v45 = vrot.slane %v3318_v37, 9  ;;  %v9931_v36 = vpop.f32.mrf.mxu0 }
 0x1b2   : > { %v3320_v55 = vld [vmem:[#allocation2 + $0x44] sm:$0x1]  ;;  %v3422_v57 = vsel %vm9399_vm14, %v7289_v40, %v3421_v35  ;;  %v3423_v42 = vrot.slane %v3421_v35, 4  ;;  %v3428_v11 = vrot.slane %v3319_v39, 5  ;;  %v2763_v53 = vld [vmem:[#allocation2 + $0x6c] sm:$0xf]  ;;  %v9934_v22 = vadd.f32 %v8125_v28, %v9782_v52  ;;  %v8127_v59 = vpop.f32.mrf.mxu1 }
 0x1b3   : > { %v8878_v6 = vld [vmem:[#allocation3 + $0x184] ss:$36 sps:$4 sm:$0xff]   ;;  %v3013_v50 = vrot.slane %v3012_v19, 4  ;;  %3553 = vst [vmem:[#allocation3 + $0xb0] sm:$0xf] %v3422_v57  ;;  %v8016_v16 = vadd.f32 %v9802_v12, %v9794_v25  ;;  %v3023_v2 = vrot.slane %v3022_v14, 4  ;;  %v8128_v52 = vadd.f32 %v8127_v59, %v8126_v61 }
 0x1b4   : > { %v8880_v15 = vld [vmem:[#allocation3 + $0x180] ss:$36 sps:$4 sm:$0xff]   ;;  %2795 = vst [vmem:[#allocation3 + $0x210] sm:$0xf] %v2763_v53  ;;  %v3425_v5 = vsel %vm9399_vm14, %v3423_v42, %v3424_v33  ;;  %v3429_v47 = vsel %vm9399_vm14, %v7290_v45, %v3428_v11  ;;  %5608 = vmatprep.mubr.bf16.mxu1 %v8878_v6  ;;  %v3430_v46 = vrot.slane %v3428_v11, 4  ;;  %v3431_v33 = vrot.slane %v3320_v55, 5 }
 0x1b5   : > { %v3018_v40 = vsel %vm9159_vm11, %v3013_v50, %v3017_v48  ;;  %3554 = vst [vmem:[#allocation3 + $0xd4] sm:$0xf] %v3425_v5  ;;  %3555 = vst [vmem:[#allocation3 + $0xf8] sm:$0xf] %v3429_v47  ;;  %5609 = vmatmul.mubr.bf16.gmra.mxu1 %v8880_v15  ;;  %v8882_v35 = vld [vmem:[#allocation3 + $0x20] ss:$36 sps:$4 sm:$0xff]   ;;  %v3028_v37 = vsel %vm9159_vm11, %v3023_v2, %v3027_v31  ;;  %v9946_v48 = vpop.f32.mrf.mxu0  ;;  %v9948_v14 = vadd.f32 %v8128_v52, %v8016_v16 }
 0x1b6   : > { %3289 = vst [vmem:[#allocation3 + $0x1cc] sm:$0xf] %v3018_v40  ;;  %v2764_v30 = vld [vmem:[#allocation2 + $0x70] sm:$0xf]  ;;  %v2834_v19 = vld [vmem:[#allocation2 + $0x6c] sm:$0xf]  ;;  %v3432_v55 = vsel %vm9399_vm14, %v3430_v46, %v3431_v33 }
 0x1b7   : > { %2796 = vst [vmem:[#allocation3 + $0x234] sm:$0xf] %v2764_v30  ;;  %v2835_v25 = vld [vmem:[#allocation2 + $0x70] sm:$0xf]  ;;  %v2836_v12 = vld [vmem:[#allocation2 + $0x74] sm:$0x1]  ;;  %v8041_v2 = vpop.f32.mrf.mxu0 }
 0x1b8   : > { %v3030_v39 = vshrl.u32 %v2834_v19, 16  ;;  %v3033_v28 = vshll.u32 %v2834_v19, 16  ;;  %v8875_v57 = vld [vmem:[#allocation3 + $0x44c] ss:$36 sps:$4 sm:$0xff]   ;;  %3290 = vst [vmem:[#allocation3 + $0x1f0] sm:$0xf] %v3028_v37 }
 0x1b9   : > { %v8877_v42 = vld [vmem:[#allocation3 + $0x448] ss:$36 sps:$4 sm:$0xff]   ;;  %v3039_v45 = vshll.u32 %v2835_v25, 16  ;;  %3556 = vst [vmem:[#allocation3 + $0x11c] sm:$0xf] %v3432_v55  ;;  %v3043_v31 = vshrl.u32 %v2835_v25, 16  ;;  %5527 = vmatprep.mubr.bf16.mxu0 %v8875_v57 }
 0x1ba   : > { %v3032_v11 = vrot.slane %v3030_v39, 4  ;;  %v3035_v53 = vrot.slane %v3033_v28, 5  ;;  %v3049_v61 = vshll.u32 %v2836_v12, 16  ;;  %v3321_v6 = vld [vmem:[#allocation2 + $0x48] sm:$0xe]  ;;  %5528 = vmatmul.mubr.bf16.gmra.mxu0 %v8877_v42  ;;  %v8042_v12 = vpop.f32.mrf.mxu0 }
 0x1bb   : > { %v3041_v15 = vrot.slane %v3039_v45, 5  ;;  %v3322_v50 = vld [vmem:[#allocation2 + $0x4c] sm:$0xf]  ;;  %v7291_v5 = vrot.slane %v3321_v6, 9  ;;  %v3045_v16 = vrot.slane %v3043_v31, 4  ;;  %8501 = vmatprep.mubr.bf16.mxu0 %v8882_v35  ;;  %v9954_v55 = vadd.f32 %v8042_v12, %v8041_v2  ;;  %v8129_v45 = vpop.f32.mrf.mxu1 }
 0x1bc   : > { %v3036_v47 = vor.u32 %v3035_v53, %v3032_v11  ;;  %v3323_v59 = vld [vmem:[#allocation2 + $0x50] sm:$0x1]  ;;  %v3435_v40 = vrot.slane %v3322_v50, 5  ;;  %v3051_v52 = vrot.slane %v3049_v61, 5  ;;  %v8883_v46 = vld [vmem:[#allocation3 + $0x68] ss:$36 sps:$4 sm:$0xff]  }
 0x1bd   : > { %v3046_v30 = vor.u32 %v3045_v16, %v3041_v15  ;;  %v3324_v25 = vld [vmem:[#allocation2 + $0x54] sm:$0xe]  ;;  %v3438_v39 = vrot.slane %v3323_v59, 5  ;;  %v3325_v28 = vld [vmem:[#allocation2 + $0x58] sm:$0xf] }
 0x1be   : > { %v3037_v33 = vrot.slane %v3036_v47, 4  ;;  %v3436_v19 = vsel %vm9399_vm14, %v7291_v5, %v3435_v40  ;;  %v3437_v37 = vrot.slane %v3435_v40, 4  ;;  %v3326_v57 = vld [vmem:[#allocation2 + $0x5c] sm:$0x1]  ;;  %v7292_v42 = vrot.slane %v3324_v25, 9  ;;  %v8130_v47 = vpop.f32.mrf.mxu1 }
 0x1bf   : > { %3557 = vst [vmem:[#allocation3 + $0x140] sm:$0xf] %v3436_v19  ;;  %v8884_v11 = vld [vmem:[#allocation3 + $0x1cc] ss:$36 sps:$4 sm:$0xff]   ;;  %v3047_v31 = vrot.slane %v3046_v30, 4  ;;  %v3442_v50 = vrot.slane %v3325_v28, 5  ;;  %v8131_v19 = vadd.f32 %v8130_v47, %v8129_v45 }
 0x1c0   : > { %v8886_v35 = vld [vmem:[#allocation3 + $0x1c8] ss:$36 sps:$4 sm:$0xff]   ;;  %v3042_v53 = vsel %vm9159_vm11, %v3037_v33, %v3041_v15  ;;  %v8887_v61 = vld [vmem:[#allocation3 + $0xb0] ss:$36 sps:$4 sm:$0xff]   ;;  %v3439_v6 = vsel %vm9399_vm14, %v3437_v37, %v3438_v39  ;;  %v3445_v5 = vrot.slane %v3326_v57, 5  ;;  %5616 = vmatprep.mubr.bf16.mxu1 %v8884_v11  ;;  %v8132_v12 = vpop.f32.mrf.mxu1 }
 0x1c1   : > { %3291 = vst [vmem:[#allocation3 + $0x214] sm:$0xf] %v3042_v53  ;;  %v3052_v16 = vsel %vm9159_vm11, %v3047_v31, %v3051_v52  ;;  %3558 = vst [vmem:[#allocation3 + $0x164] sm:$0xf] %v3439_v6  ;;  %v2765_v59 = vld [vmem:[#allocation2 + $0x78] sm:$0xf]  ;;  %5617 = vmatmul.mubr.bf16.gmra.mxu1 %v8886_v35  ;;  %v3443_v15 = vsel %vm9399_vm14, %v7292_v42, %v3442_v50  ;;  %v9967_v6 = vadd.f32 %v8131_v19, %v9816_v1 }
 0x1c2   : > { %v2766_v40 = vld [vmem:[#allocation2 + $0x7c] sm:$0xf]  ;;  %v2837_v2 = vld [vmem:[#allocation2 + $0x78] sm:$0xf]  ;;  %3292 = vst [vmem:[#allocation3 + $0x238] sm:$0xf] %v3052_v16  ;;  %8502 = vmatmul.mubr.bf16.vlgmr.msra.gmra.mxu0 %v8883_v46 }
 0x1c3   : > { %v3444_v33 = vrot.slane %v3442_v50, 4  ;;  %2797 = vst [vmem:[#allocation3 + $0x258] sm:$0xf] %v2765_v59  ;;  %2798 = vst [vmem:[#allocation3 + $0x27c] sm:$0xf] %v2766_v40  ;;  %v3054_v25 = vshrl.u32 %v2837_v2, 16  ;;  %8505 = vmatprep.mubr.bf16.mxu0 %v8887_v61  ;;  %v8133_v50 = vpop.f32.mrf.mxu1  ;;  %v8022_v61 = vadd.f32 %v9847_v56, %v9839_v8 }
 0x1c4   : > { %v2838_v30 = vld [vmem:[#allocation2 + $0x7c] sm:$0xf]  ;;  %v2839_v37 = vld [vmem:[#allocation2 + $0x80] sm:$0x1]  ;;  %3559 = vst [vmem:[#allocation3 + $0x188] sm:$0xf] %v3443_v15 }
 0x1c5   : > { %v3057_v52 = vshll.u32 %v2837_v2, 16  ;;  %v3063_v39 = vshll.u32 %v2838_v30, 16  ;;  %v3067_v28 = vshrl.u32 %v2838_v30, 16  ;;  %v3073_v57 = vshll.u32 %v2839_v37, 16  ;;  %v3327_v11 = vld [vmem:[#allocation2 + $0x60] sm:$0xe]  ;;  %v9969_v2 = vpop.f32.mrf.mxu0 }
 0x1c6   : > { %v3446_v45 = vsel %vm9399_vm14, %v3444_v33, %v3445_v5  ;;  %v3056_v35 = vrot.slane %v3054_v25, 4  ;;  %v3328_v42 = vld [vmem:[#allocation2 + $0x64] sm:$0xf]  ;;  %v3329_v53 = vld [vmem:[#allocation2 + $0x68] sm:$0x1]  ;;  %v7293_v31 = vrot.slane %v3327_v11, 9  ;;  %v8134_v37 = vadd.f32 %v8133_v50, %v8132_v12 }
 0x1c7   : > { %v8888_v47 = vld [vmem:[#allocation3 + $0xf8] ss:$36 sps:$4 sm:$0xff]   ;;  %3560 = vst [vmem:[#allocation3 + $0x1ac] sm:$0xf] %v3446_v45  ;;  %v3059_v46 = vrot.slane %v3057_v52, 5  ;;  %v3065_v16 = vrot.slane %v3063_v39, 5 }
 0x1c8   : > { %v3069_v59 = vrot.slane %v3067_v28, 4  ;;  %v3075_v40 = vrot.slane %v3073_v57, 5  ;;  %v3449_v5 = vrot.slane %v3328_v42, 5  ;;  %v3452_v15 = vrot.slane %v3329_v53, 5  ;;  %v3330_v33 = vld [vmem:[#allocation2 + $0x6c] sm:$0xe] }
 0x1c9   : > { %v3331_v30 = vld [vmem:[#allocation2 + $0x70] sm:$0xf]  ;;  %v3060_v25 = vor.u32 %v3059_v46, %v3056_v35  ;;  %v3332_v19 = vld [vmem:[#allocation2 + $0x74] sm:$0x1]  ;;  %v7294_v11 = vrot.slane %v3330_v33, 9  ;;  %v9975_v57 = vadd.f32 %v8134_v37, %v8022_v61  ;;  %v9979_v35 = vpop.f32.mrf.mxu0 }
 0x1ca   : > { %v3070_v1 = vor.u32 %v3069_v59, %v3065_v16  ;;  %v3456_v23 = vrot.slane %v3331_v30, 5  ;;  %v8892_v45 = vld [vmem:[#allocation3 + $0x140] ss:$36 sps:$4 sm:$0xff]   ;;  %v3450_v52 = vsel %vm9399_vm14, %v7293_v31, %v3449_v5  ;;  %v3451_v39 = vrot.slane %v3449_v5, 4  ;;  %v8889_v54 = vld [vmem:[#allocation3 + $0x210] ss:$36 sps:$4 sm:$0xff]   ;;  %8506 = vmatmul.mubr.bf16.gmra.mxu0 %v8888_v47 }
 0x1cb   : > { %v3459_v28 = vrot.slane %v3332_v19, 5  ;;  %v8891_v8 = vld [vmem:[#allocation3 + $0x214] ss:$36 sps:$4 sm:$0xff]   ;;  %v3061_v56 = vrot.slane %v3060_v25, 4  ;;  %3561 = vst [vmem:[#allocation3 + $0x1d0] sm:$0xf] %v3450_v52  ;;  %8509 = vmatprep.mubr.bf16.mxu0 %v8892_v45  ;;  %v8047_v19 = vpop.f32.mrf.mxu0 }
 0x1cc   : > { %v3457_v12 = vsel %vm9399_vm14, %v7294_v11, %v3456_v23  ;;  %v3071_v42 = vrot.slane %v3070_v1, 4  ;;  %v3453_v53 = vsel %vm9399_vm14, %v3451_v39, %v3452_v15  ;;  %v3458_v50 = vrot.slane %v3456_v23, 4  ;;  %v2767_v31 = vld [vmem:[#allocation2 + $0x84] sm:$0xf]  ;;  %5624 = vmatprep.mubr.bf16.mxu1 %v8891_v8  ;;  %v2768_v59 = vld [vmem:[#allocation2 + $0x88] sm:$0xf] }
 0x1cd   : > { %3563 = vst [vmem:[#allocation3 + $0x218] sm:$0xf] %v3457_v12  ;;  %v3066_v46 = vsel %vm9159_vm11, %v3061_v56, %v3065_v16  ;;  %3562 = vst [vmem:[#allocation3 + $0x1f4] sm:$0xf] %v3453_v53  ;;  %v2840_v61 = vld [vmem:[#allocation2 + $0x84] sm:$0xf]  ;;  %5625 = vmatmul.mubr.bf16.gmra.mxu1 %v8889_v54 }
 0x1ce   : > { %2799 = vst [vmem:[#allocation3 + $0x2a0] sm:$0xf] %v2767_v31  ;;  %v2841_v5 = vld [vmem:[#allocation2 + $0x88] sm:$0xf]  ;;  %v3076_v33 = vsel %vm9159_vm11, %v3071_v42, %v3075_v40  ;;  %3293 = vst [vmem:[#allocation3 + $0x25c] sm:$0xf] %v3066_v46  ;;  %v3460_v23 = vsel %vm9399_vm14, %v3458_v50, %v3459_v28  ;;  %v8135_v40 = vpop.f32.mrf.mxu1  ;;  %v8048_v42 = vpop.f32.mrf.mxu0 }
 0x1cf   : > { %2800 = vst [vmem:[#allocation3 + $0x2c4] sm:$0xf] %v2768_v59  ;;  %v2842_v47 = vld [vmem:[#allocation2 + $0x8c] sm:$0x1]  ;;  %v8893_v15 = vld [vmem:[#allocation3 + $0x188] ss:$36 sps:$4 sm:$0xff]  }
 0x1d0   : > { %3294 = vst [vmem:[#allocation3 + $0x280] sm:$0xf] %v3076_v33  ;;  %3564 = vst [vmem:[#allocation3 + $0x23c] sm:$0xf] %v3460_v23  ;;  %v3078_v16 = vshrl.u32 %v2840_v61, 16  ;;  %v3081_v30 = vshll.u32 %v2840_v61, 16  ;;  %v8136_v59 = vpop.f32.mrf.mxu1  ;;  %v9991_v29 = vpop.f32.mrf.mxu0 }
 0x1d1   : > { %v3087_v37 = vshll.u32 %v2841_v5, 16  ;;  %v3091_v25 = vshrl.u32 %v2841_v5, 16  ;;  %v3333_v1 = vld [vmem:[#allocation2 + $0x78] sm:$0xe]  ;;  %v3097_v54 = vshll.u32 %v2842_v47, 16  ;;  %v9989_v47 = vadd.f32 %v8048_v42, %v8047_v19 }
 0x1d2   : > { %v3334_v11 = vld [vmem:[#allocation2 + $0x7c] sm:$0xf]  ;;  %v3335_v45 = vld [vmem:[#allocation2 + $0x80] sm:$0x1]  ;;  %v7295_v52 = vrot.slane %v3333_v1, 9  ;;  %v3080_v39 = vrot.slane %v3078_v16, 4  ;;  %v8137_v1 = vadd.f32 %v8136_v59, %v8135_v40  ;;  %8510 = vmatmul.mubr.bf16.gmra.mxu0 %v8893_v15 }
 0x1d3   : > { %v3083_v8 = vrot.slane %v3081_v30, 5  ;;  %v3089_v56 = vrot.slane %v3087_v37, 5  ;;  %v3093_v28 = vrot.slane %v3091_v25, 4  ;;  %v3336_v12 = vld [vmem:[#allocation2 + $0x84] sm:$0xe]  ;;  %v3099_v53 = vrot.slane %v3097_v54, 5  ;;  %v8138_v54 = vpop.f32.mrf.mxu1 }
 0x1d4   : > { %v3463_v50 = vrot.slane %v3334_v11, 5  ;;  %v3466_v31 = vrot.slane %v3335_v45, 5  ;;  %v7296_v46 = vrot.slane %v3336_v12, 9  ;;  %v3337_v33 = vld [vmem:[#allocation2 + $0x88] sm:$0xf]  ;;  %v9998_v19 = vadd.f32 %v8137_v1, %v9858_v62 }
 0x1d5   : > { %v3084_v61 = vor.u32 %v3083_v8, %v3080_v39  ;;  %v3094_v5 = vor.u32 %v3093_v28, %v3089_v56  ;;  %v3338_v23 = vld [vmem:[#allocation2 + $0x8c] sm:$0x1]  ;;  %v3470_v25 = vrot.slane %v3337_v33, 5  ;;  %v2769_v8 = vld [vmem:[#allocation2 + $0x90] sm:$0xf]  ;;  %v9995_v28 = vpop.f32.mrf.mxu0 }
 0x1d6   : > { %v8897_v16 = vld [vmem:[#allocation3 + $0x1d0] ss:$36 sps:$4 sm:$0xff]   ;;  %v3464_v30 = vsel %vm9399_vm14, %v7295_v52, %v3463_v50  ;;  %v3465_v37 = vrot.slane %v3463_v50, 4  ;;  %v3473_v39 = vrot.slane %v3338_v23, 5  ;;  %v8894_v12 = vld [vmem:[#allocation3 + $0x258] ss:$36 sps:$4 sm:$0xff]   ;;  %v8139_v50 = vpop.f32.mrf.mxu1 }
 0x1d7   : > { %v3085_v11 = vrot.slane %v3084_v61, 4  ;;  %v3095_v45 = vrot.slane %v3094_v5, 4  ;;  %3565 = vst [vmem:[#allocation3 + $0x260] sm:$0xf] %v3464_v30  ;;  %v8896_v40 = vld [vmem:[#allocation3 + $0x25c] ss:$36 sps:$4 sm:$0xff]   ;;  %8513 = vmatprep.mubr.bf16.mxu0 %v8897_v16  ;;  %v3471_v42 = vsel %vm9399_vm14, %v7296_v46, %v3470_v25  ;;  %v8211_v33 = vpop.f32.mrf.mxu0  ;;  %v8140_v23 = vadd.f32 %v8139_v50, %v8138_v54 }
 0x1d8   : > { %v3467_v52 = vsel %vm9399_vm14, %v3465_v37, %v3466_v31  ;;  %v3472_v15 = vrot.slane %v3470_v25, 4  ;;  %2801 = vst [vmem:[#allocation3 + $0x2e8] sm:$0xf] %v2769_v8  ;;  %v8898_v59 = vld [vmem:[#allocation3 + $0x218] ss:$36 sps:$4 sm:$0xff]   ;;  %5632 = vmatprep.mubr.bf16.mxu1 %v8896_v40  ;;  %v8028_v31 = vadd.f32 %v9877_v38, %v9865_v26 }
 0x1d9   : > { %v3090_v61 = vsel %vm9159_vm11, %v3085_v11, %v3089_v56  ;;  %v3100_v62 = vsel %vm9159_vm11, %v3095_v45, %v3099_v53  ;;  %3566 = vst [vmem:[#allocation3 + $0x284] sm:$0xf] %v3467_v52  ;;  %3567 = vst [vmem:[#allocation3 + $0x2a8] sm:$0xf] %v3471_v42  ;;  %v2770_v5 = vld [vmem:[#allocation2 + $0x94] sm:$0xf]  ;;  %5633 = vmatmul.mubr.bf16.gmra.mxu1 %v8894_v12  ;;  %v8212_v11 = vpop.f32.mrf.mxu0  ;;  %v8141_v45 = vpop.f32.mrf.mxu1 }
 0x1da   : > { %3295 = vst [vmem:[#allocation3 + $0x2a4] sm:$0xf] %v3090_v61  ;;  %3296 = vst [vmem:[#allocation3 + $0x2c8] sm:$0xf] %v3100_v62  ;;  %v3474_v46 = vsel %vm9399_vm14, %v3472_v15, %v3473_v39  ;;  %v2843_v1 = vld [vmem:[#allocation2 + $0x90] sm:$0xf]  ;;  %v8213_v38 = vadd.f32 %v8212_v11, %v8211_v33  ;;  %v10012_v42 = vadd.f32 %v8140_v23, %v8028_v31  ;;  %8514 = vmatmul.mubr.bf16.gmra.mxu0 %v8898_v59 }
 0x1db   : > { %2802 = vst [vmem:[#allocation3 + $0x30c] sm:$0xf] %v2770_v5  ;;  %v2844_v56 = vld [vmem:[#allocation2 + $0x94] sm:$0xf]  ;;  %v2845_v16 = vld [vmem:[#allocation2 + $0x98] sm:$0x1]  ;;  %v8214_v62 = vpop.f32.mrf.mxu0  ;;  %v8142_v5 = vpop.f32.mrf.mxu1 }
 0x1dc   : > { %3568 = vst [vmem:[#allocation3 + $0x2cc] sm:$0xf] %v3474_v46  ;;  %v3102_v53 = vshrl.u32 %v2843_v1, 16  ;;  %v3105_v30 = vshll.u32 %v2843_v1, 16  ;;  %v3111_v37 = vshll.u32 %v2844_v56, 16  ;;  %v3115_v25 = vshrl.u32 %v2844_v56, 16 }
 0x1dd   : > { %v3339_v54 = vld [vmem:[#allocation2 + $0x90] sm:$0xe]  ;;  %v3121_v8 = vshll.u32 %v2845_v16, 16  ;;  %v3340_v40 = vld [vmem:[#allocation2 + $0x94] sm:$0xf]  ;;  %v10015_v33 = vadd.f32 %v8213_v38, %v9821_v3  ;;  %v8215_v23 = vpop.f32.mrf.mxu0  ;;  %v8143_v31 = vadd.f32 %v8142_v5, %v8141_v45  ;;  %v8034_v45 = vadd.f32 %v9907_v18, %v9898_v49 }
 0x1de   : > { %v3341_v52 = vld [vmem:[#allocation2 + $0x98] sm:$0x1]  ;;  %v7297_v26 = vrot.slane %v3339_v54, 9  ;;  %v3104_v39 = vrot.slane %v3102_v53, 4  ;;  %v3107_v15 = vrot.slane %v3105_v30, 5  ;;  %v3113_v50 = vrot.slane %v3111_v37, 5  ;;  %v8144_v53 = vpop.f32.mrf.mxu1 }
 0x1df   : > { %v3117_v61 = vrot.slane %v3115_v25, 4  ;;  %v3342_v12 = vld [vmem:[#allocation2 + $0x9c] sm:$0xe]  ;;  %v3123_v46 = vrot.slane %v3121_v8, 5  ;;  %v3477_v1 = vrot.slane %v3340_v40, 5  ;;  %v3480_v56 = vrot.slane %v3341_v52, 5  ;;  %v8217_v40 = vpop.f32.mrf.mxu0 }
 0x1e0   : > { %v7298_v43 = vrot.slane %v3342_v12, 9  ;;  %v3108_v34 = vor.u32 %v3107_v15, %v3104_v39  ;;  %v3343_v7 = vld [vmem:[#allocation2 + $0xa0] sm:$0xf]  ;;  %v3344_v21 = vld [vmem:[#allocation2 + $0xa4] sm:$0x1]  ;;  %v8216_v25 = vadd.f32 %v8215_v23, %v8214_v62  ;;  %v10020_v52 = vadd.f32 %v8143_v31, %v9896_v60  ;;  %v8145_v39 = vpop.f32.mrf.mxu1 }
 0x1e1   : > { %v3118_v16 = vor.u32 %v3117_v61, %v3113_v50  ;;  %v2771_v54 = vld [vmem:[#allocation2 + $0x9c] sm:$0xf]  ;;  %v3478_v37 = vsel %vm9399_vm14, %v7297_v26, %v3477_v1  ;;  %v8146_v26 = vadd.f32 %v8145_v39, %v8144_v53  ;;  %v3479_v12 = vrot.slane %v3477_v1, 4  ;;  %v2772_v62 = vld [vmem:[#allocation2 + $0xa0] sm:$0xf] }
 0x1e2   : > { %v8902_v30 = vld [vmem:[#allocation3 + $0x260] ss:$36 sps:$4 sm:$0xff]   ;;  %2803 = vst [vmem:[#allocation3 + $0x330] sm:$0xf] %v2771_v54  ;;  %v3109_v8 = vrot.slane %v3108_v34, 4  ;;  %v10025_v15 = vadd.f32 %v8216_v25, %v9831_v0  ;;  %v3484_v60 = vrot.slane %v3343_v7, 5 }
 0x1e3   : > { %v8899_v11 = vld [vmem:[#allocation3 + $0x2a0] ss:$36 sps:$4 sm:$0xff]   ;;  %v3119_v59 = vrot.slane %v3118_v16, 4  ;;  %3569 = vst [vmem:[#allocation3 + $0x2f0] sm:$0xf] %v3478_v37  ;;  %8517 = vmatprep.mubr.bf16.mxu0 %v8902_v30  ;;  %v8218_v16 = vpop.f32.mrf.mxu0  ;;  %v3487_v54 = vrot.slane %v3344_v21, 5  ;;  %v10031_v31 = vadd.f32 %v8146_v26, %v8034_v45  ;;  %v8147_v21 = vpop.f32.mrf.mxu1 }
 0x1e4   : > { %v8901_v3 = vld [vmem:[#allocation3 + $0x2a4] ss:$36 sps:$4 sm:$0xff]   ;;  %10687 = vst [vmem:[#allocation17_spill] sm:$0xff] %v10025_v15  ;;  %v3114_v34 = vsel %vm9159_vm11, %v3109_v8, %v3113_v50  ;;  %2804 = vst [vmem:[#allocation3 + $0x354] sm:$0xf] %v2772_v62  ;;  %v8219_v23 = vadd.f32 %v8218_v16, %v8217_v40  ;;  %v3481_v50 = vsel %vm9399_vm14, %v3479_v12, %v3480_v56 }
 0x1e5   : > { %v8903_v38 = vld [vmem:[#allocation3 + $0x2a8] ss:$36 sps:$4 sm:$0xff]   ;;  %v3124_v61 = vsel %vm9159_vm11, %v3119_v59, %v3123_v46  ;;  %v2846_v5 = vld [vmem:[#allocation2 + $0x9c] sm:$0xf]  ;;  %5640 = vmatprep.mubr.bf16.mxu1 %v8901_v3  ;;  %3297 = vst [vmem:[#allocation3 + $0x2ec] sm:$0xf] %v3114_v34  ;;  %v3485_v7 = vsel %vm9399_vm14, %v7298_v43, %v3484_v60  ;;  %v8220_v37 = vpop.f32.mrf.mxu0 }
 0x1e6   : > { %3298 = vst [vmem:[#allocation3 + $0x310] sm:$0xf] %v3124_v61  ;;  %v2847_v49 = vld [vmem:[#allocation2 + $0xa0] sm:$0xf]  ;;  %v2848_v0 = vld [vmem:[#allocation2 + $0xa4] sm:$0x1]  ;;  %5641 = vmatmul.mubr.bf16.gmra.mxu1 %v8899_v11  ;;  %8518 = vmatmul.mubr.bf16.gmra.mxu0 %v8903_v38  ;;  %v10040_v26 = vadd.f32 %v8219_v23, %v9850_v10  ;;  %v8148_v61 = vpop.f32.mrf.mxu1 }
 0x1e7   : > { %v3126_v18 = vshrl.u32 %v2846_v5, 16  ;;  %v3486_v46 = vrot.slane %v3484_v60, 4  ;;  %v3129_v1 = vshll.u32 %v2846_v5, 16  ;;  %v2773_v53 = vld [vmem:[#allocation2 + $0xa8] sm:$0xf]  ;;  %v3135_v8 = vshll.u32 %v2847_v49, 16  ;;  %v8221_v34 = vpop.f32.mrf.mxu0 }
 0x1e8   : > { %v2774_v30 = vld [vmem:[#allocation2 + $0xac] sm:$0xf]  ;;  %3570 = vst [vmem:[#allocation3 + $0x314] sm:$0xf] %v3481_v50  ;;  %3571 = vst [vmem:[#allocation3 + $0x338] sm:$0xf] %v3485_v7  ;;  %v8150_v50 = vpop.f32.mrf.mxu1  ;;  %v8222_v23 = vadd.f32 %v8221_v34, %v8220_v37 }
 0x1e9   : > { %v3128_v25 = vrot.slane %v3126_v18, 4  ;;  %v3139_v59 = vshrl.u32 %v2847_v49, 16  ;;  %v3145_v40 = vshll.u32 %v2848_v0, 16  ;;  %2805 = vst [vmem:[#allocation3 + $0x378] sm:$0xf] %v2773_v53  ;;  %v3488_v56 = vsel %vm9399_vm14, %v3486_v46, %v3487_v54  ;;  %v8223_v54 = vpop.f32.mrf.mxu0 }
 0x1ea   : > { %2806 = vst [vmem:[#allocation3 + $0x39c] sm:$0xf] %v2774_v30  ;;  %v2849_v11 = vld [vmem:[#allocation2 + $0xa8] sm:$0xf]  ;;  %v3131_v43 = vrot.slane %v3129_v1, 5  ;;  %v3137_v12 = vrot.slane %v3135_v8, 5  ;;  %v8040_v8 = vadd.f32 %v9946_v48, %v9931_v36  ;;  %v10049_v37 = vadd.f32 %v8222_v23, %v9861_v51 }
 0x1eb   : > { %v2850_v39 = vld [vmem:[#allocation2 + $0xac] sm:$0xf]  ;;  %v2851_v3 = vld [vmem:[#allocation2 + $0xb0] sm:$0x1]  ;;  %v3150_v45 = vshrl.u32 %v2849_v11, 16  ;;  %v3141_v60 = vrot.slane %v3139_v59, 4 }
 0x1ec   : > { %3572 = vst [vmem:[#allocation3 + $0x35c] sm:$0xf] %v3488_v56  ;;  %v3147_v62 = vrot.slane %v3145_v40, 5  ;;  %v3153_v5 = vshll.u32 %v2849_v11, 16  ;;  %v3132_v16 = vor.u32 %v3131_v43, %v3128_v25  ;;  %v3159_v38 = vshll.u32 %v2850_v39, 16  ;;  %v8224_v25 = vpop.f32.mrf.mxu0 }
 0x1ed   : > { %v3152_v49 = vrot.slane %v3150_v45, 4  ;;  %v3163_v0 = vshrl.u32 %v2850_v39, 16  ;;  %v3345_v18 = vld [vmem:[#allocation2 + $0xa8] sm:$0xe]  ;;  %v3142_v7 = vor.u32 %v3141_v60, %v3137_v12  ;;  %v3169_v1 = vshll.u32 %v2851_v3, 16  ;;  %v8151_v60 = vpop.f32.mrf.mxu1 }
 0x1ee   : > { %v3155_v46 = vrot.slane %v3153_v5, 5  ;;  %v3346_v53 = vld [vmem:[#allocation2 + $0xac] sm:$0xf]  ;;  %v10042_v10 = vld [vmem:[#allocation2 + $0xb0] sm:$0x1]  ;;  %v3133_v56 = vrot.slane %v3132_v16, 4  ;;  %v8149_v40 = vadd.f32 %v8148_v61, %v8147_v21  ;;  %v8225_v34 = vadd.f32 %v8224_v25, %v8223_v54  ;;  %v8226_v16 = vpop.f32.mrf.mxu0 }
 0x1ef   : > { %v8904_v30 = vld [vmem:[#allocation3 + $0x2e8] ss:$36 sps:$4 sm:$0xff]   ;;  %v3161_v59 = vrot.slane %v3159_v38, 5  ;;  %v3143_v43 = vrot.slane %v3142_v7, 4  ;;  %v3165_v45 = vrot.slane %v3163_v0, 4  ;;  %v3171_v15 = vrot.slane %v3169_v1, 5 }
 0x1f0   : > { %v8906_v11 = vld [vmem:[#allocation3 + $0x2ec] ss:$36 sps:$4 sm:$0xff]   ;;  %v3156_v39 = vor.u32 %v3155_v46, %v3152_v49  ;;  %v3138_v3 = vsel %vm9159_vm11, %v3133_v56, %v3137_v12  ;;  %v10052_v36 = vadd.f32 %v8149_v40, %v9927_v20  ;;  %v7299_v49 = vrot.slane %v3345_v18, 9  ;;  %v3348_v38 = vld [vmem:[#allocation2 + $0xb4] sm:$0xe]  ;;  %v8227_v7 = vpop.f32.mrf.mxu0 }
 0x1f1   : > { %v8907_v5 = vld [vmem:[#allocation3 + $0x2f0] ss:$36 sps:$4 sm:$0xff]   ;;  %5648 = vmatprep.mubr.bf16.mxu1 %v8906_v11  ;;  %v3148_v48 = vsel %vm9159_vm11, %v3143_v43, %v3147_v62  ;;  %3299 = vst [vmem:[#allocation3 + $0x334] sm:$0xf] %v3138_v3  ;;  %v3166_v61 = vor.u32 %v3165_v45, %v3161_v59  ;;  %v3349_v0 = vld [vmem:[#allocation2 + $0xb8] sm:$0xf]  ;;  %v10058_v20 = vadd.f32 %v8225_v34, %v9872_v44  ;;  %v8153_v43 = vpop.f32.mrf.mxu1 }
 0x1f2   : > { %v3157_v21 = vrot.slane %v3156_v39, 4  ;;  %5649 = vmatmul.mubr.bf16.gmra.mxu1 %v8904_v30  ;;  %8521 = vmatprep.mubr.bf16.mxu0 %v8907_v5  ;;  %3300 = vst [vmem:[#allocation3 + $0x358] sm:$0xf] %v3148_v48  ;;  %v3491_v51 = vrot.slane %v3346_v53, 5  ;;  %v3494_v54 = vrot.slane %v10042_v10, 5  ;;  %v8152_v46 = vadd.f32 %v8151_v60, %v8150_v50  ;;  %v8229_v11 = vpop.f32.mrf.mxu0 }
 0x1f3   : > { %v8908_v12 = vld [vmem:[#allocation3 + $0x338] ss:$36 sps:$4 sm:$0xff]   ;;  %v3167_v1 = vrot.slane %v3166_v61, 4  ;;  %v3350_v23 = vld [vmem:[#allocation2 + $0xbc] sm:$0x1]  ;;  %v7300_v18 = vrot.slane %v3348_v38, 9  ;;  %v8228_v44 = vadd.f32 %v8227_v7, %v8226_v16  ;;  %v8154_v61 = vpop.f32.mrf.mxu1 }
 0x1f4   : > { %v3162_v62 = vsel %vm9159_vm11, %v3157_v21, %v3161_v59  ;;  %v3498_v56 = vrot.slane %v3349_v0, 5  ;;  %8522 = vmatmul.mubr.bf16.gmra.mxu0 %v8908_v12  ;;  %v3492_v30 = vsel %vm9399_vm14, %v7299_v49, %v3491_v51  ;;  %v3493_v53 = vrot.slane %v3491_v51, 4  ;;  %v2775_v10 = vld [vmem:[#allocation2 + $0xb4] sm:$0xf]  ;;  %v2776_v40 = vld [vmem:[#allocation2 + $0xb8] sm:$0xf]  ;;  %v8230_v21 = vpop.f32.mrf.mxu0 }
 0x1f5   : > { %3301 = vst [vmem:[#allocation3 + $0x37c] sm:$0xf] %v3162_v62  ;;  %v3501_v25 = vrot.slane %v3350_v23, 5  ;;  %v3172_v50 = vsel %vm9159_vm11, %v3167_v1, %v3171_v15  ;;  %3573 = vst [vmem:[#allocation3 + $0x380] sm:$0xf] %v3492_v30  ;;  %v10068_v5 = vadd.f32 %v8152_v46, %v8040_v8  ;;  %v10075_v51 = vadd.f32 %v8228_v44, %v9880_v24 }
 0x1f6   : > { %v3499_v59 = vsel %vm9399_vm14, %v7300_v18, %v3498_v56  ;;  %v3500_v39 = vrot.slane %v3498_v56, 4  ;;  %2807 = vst [vmem:[#allocation3 + $0x3c0] sm:$0xf] %v2775_v10  ;;  %2808 = vst [vmem:[#allocation3 + $0x3e4] sm:$0xf] %v2776_v40  ;;  %v3495_v3 = vsel %vm9399_vm14, %v3493_v53, %v3494_v54  ;;  %v8231_v1 = vadd.f32 %v8230_v21, %v8229_v11  ;;  %v8232_v23 = vpop.f32.mrf.mxu0  ;;  %v8156_v18 = vpop.f32.mrf.mxu1 }
 0x1f7   : > { %v2852_v45 = vld [vmem:[#allocation2 + $0xb4] sm:$0xf]  ;;  %v2853_v60 = vld [vmem:[#allocation2 + $0xb8] sm:$0xf]  ;;  %3302 = vst [vmem:[#allocation3 + $0x3a0] sm:$0xf] %v3172_v50 }
 0x1f8   : > { %3575 = vst [vmem:[#allocation3 + $0x3c8] sm:$0xf] %v3499_v59  ;;  %v2854_v34 = vld [vmem:[#allocation2 + $0xbc] sm:$0x1]  ;;  %v3174_v16 = vshrl.u32 %v2852_v45, 16  ;;  %v3177_v48 = vshll.u32 %v2852_v45, 16  ;;  %v3502_v49 = vsel %vm9399_vm14, %v3500_v39, %v3501_v25  ;;  %v8155_v25 = vadd.f32 %v8154_v61, %v8153_v43  ;;  %v8233_v39 = vpop.f32.mrf.mxu0  ;;  %v8157_v45 = vpop.f32.mrf.mxu1 }
 0x1f9   : > { %v3183_v15 = vshll.u32 %v2853_v60, 16  ;;  %3574 = vst [vmem:[#allocation3 + $0x3a4] sm:$0xf] %v3495_v3  ;;  %v3187_v38 = vshrl.u32 %v2853_v60, 16  ;;  %v3193_v0 = vshll.u32 %v2854_v34, 16  ;;  %v10078_v44 = vadd.f32 %v8231_v1, %v9901_v27 }
 0x1fa   : > { %v2777_v12 = vld [vmem:[#allocation2 + $0xc0] sm:$0xf]  ;;  %v2778_v8 = vld [vmem:[#allocation2 + $0xc4] sm:$0xf]  ;;  %3576 = vst [vmem:[#allocation3 + $0x3ec] sm:$0xf] %v3502_v49  ;;  %v8235_v61 = vpop.f32.mrf.mxu0  ;;  %v8234_v27 = vadd.f32 %v8233_v39, %v8232_v23 }
 0x1fb   : > { %v3176_v54 = vrot.slane %v3174_v16, 4  ;;  %v3179_v7 = vrot.slane %v3177_v48, 5  ;;  %v3185_v46 = vrot.slane %v3183_v15, 5  ;;  %2809 = vst [vmem:[#allocation3 + $0x408] sm:$0xf] %v2777_v12  ;;  %v3189_v53 = vrot.slane %v3187_v38, 4 }
 0x1fc   : > { %2810 = vst [vmem:[#allocation3 + $0x42c] sm:$0xf] %v2778_v8  ;;  %v2855_v62 = vld [vmem:[#allocation2 + $0xc0] sm:$0xf]  ;;  %v8909_v56 = vld [vmem:[#allocation3 + $0x330] ss:$36 sps:$4 sm:$0xff]   ;;  %v8158_v12 = vadd.f32 %v8157_v45, %v8156_v18  ;;  %v8159_v8 = vpop.f32.mrf.mxu1  ;;  %v10090_v23 = vadd.f32 %v8234_v27, %v9911_v41 }
 0x1fd   : > { %v8911_v30 = vld [vmem:[#allocation3 + $0x334] ss:$36 sps:$4 sm:$0xff]   ;;  %v3180_v10 = vor.u32 %v3179_v7, %v3176_v54  ;;  %v3195_v40 = vrot.slane %v3193_v0, 5  ;;  %v2856_v50 = vld [vmem:[#allocation2 + $0xc4] sm:$0xf]  ;;  %v3198_v24 = vshrl.u32 %v2855_v62, 16  ;;  %v3190_v60 = vor.u32 %v3189_v53, %v3185_v46 }
 0x1fe   : > { %v2857_v59 = vld [vmem:[#allocation2 + $0xc8] sm:$0x1]  ;;  %5656 = vmatprep.mubr.bf16.mxu1 %v8911_v30  ;;  %v3201_v3 = vshll.u32 %v2855_v62, 16  ;;  %v3207_v11 = vshll.u32 %v2856_v50, 16  ;;  %v3211_v34 = vshrl.u32 %v2856_v50, 16  ;;  %v10081_v0 = vadd.f32 %v8155_v25, %v9954_v55  ;;  %v8160_v18 = vpop.f32.mrf.mxu1 }
 0x1ff   : > { %v3351_v16 = vld [vmem:[#allocation2 + $0xc0] sm:$0xe]  ;;  %5657 = vmatmul.mubr.bf16.gmra.mxu1 %v8909_v56  ;;  %v3181_v48 = vrot.slane %v3180_v10, 4  ;;  %v3200_v15 = vrot.slane %v3198_v24, 4  ;;  %v3217_v43 = vshll.u32 %v2857_v59, 16  ;;  %v3191_v38 = vrot.slane %v3190_v60, 4  ;;  %v8236_v56 = vpop.f32.mrf.mxu0 }
 0x200   : > { %v7301_v21 = vrot.slane %v3351_v16, 9  ;;  %v8914_v49 = vld [vmem:[#allocation3 + $0x37c] ss:$36 sps:$4 sm:$0xff]   ;;  %v8046_v7 = vadd.f32 %v9979_v35, %v9969_v2  ;;  %v3203_v55 = vrot.slane %v3201_v3, 5  ;;  %v3209_v25 = vrot.slane %v3207_v11, 5  ;;  %v8162_v41 = vpop.f32.mrf.mxu1 }
 0x201   : > { %v8912_v54 = vld [vmem:[#allocation3 + $0x378] ss:$36 sps:$4 sm:$0xff]   ;;  %v8915_v62 = vld [vmem:[#allocation3 + $0x380] ss:$36 sps:$4 sm:$0xff]   ;;  %v3186_v1 = vsel %vm9159_vm11, %v3181_v48, %v3185_v46  ;;  %5664 = vmatprep.mubr.bf16.mxu1 %v8914_v49  ;;  %v8916_v30 = vld [vmem:[#allocation3 + $0x3c8] ss:$36 sps:$4 sm:$0xff]   ;;  %v3196_v53 = vsel %vm9159_vm11, %v3191_v38, %v3195_v40  ;;  %v8237_v59 = vadd.f32 %v8236_v56, %v8235_v61  ;;  %v8238_v24 = vpop.f32.mrf.mxu0  ;;  %v8161_v11 = vadd.f32 %v8160_v18, %v8159_v8 }
 0x202   : > { %3303 = vst [vmem:[#allocation3 + $0x3c4] sm:$0xf] %v3186_v1  ;;  %8525 = vmatprep.mubr.bf16.mxu0 %v8915_v62  ;;  %3304 = vst [vmem:[#allocation3 + $0x3e8] sm:$0xf] %v3196_v53  ;;  %v3213_v2 = vrot.slane %v3211_v34, 4  ;;  %v3219_v35 = vrot.slane %v3217_v43, 5  ;;  %v10092_v46 = vadd.f32 %v8158_v12, %v8046_v7  ;;  %v3204_v39 = vor.u32 %v3203_v55, %v3200_v15 }
 0x203   : > { %v3352_v10 = vld [vmem:[#allocation2 + $0xc4] sm:$0xf]  ;;  %v3353_v50 = vld [vmem:[#allocation2 + $0xc8] sm:$0x1]  ;;  %8526 = vmatmul.mubr.bf16.gmra.mxu0 %v8916_v30  ;;  %v606_v60 = vld [vmem:[#allocation2 + $0xd4] sm:$0x1]  ;;  %v10097_v38 = vadd.f32 %v8237_v59, %v9934_v22  ;;  %v8239_v61 = vpop.f32.mrf.mxu0  ;;  %v10104_v22 = vadd.f32 %v8161_v11, %v9989_v47  ;;  %v8163_v30 = vpop.f32.mrf.mxu1  ;;  %v8052_v59 = vadd.f32 %v9995_v28, %v9991_v29 }
 0x204   : > { %v3505_v40 = vrot.slane %v3352_v10, 5  ;;  %v3508_v45 = vrot.slane %v3353_v50, 5  ;;  %v3354_v3 = vld [vmem:[#allocation2 + $0xcc] sm:$0xe]  ;;  %v3214_v16 = vor.u32 %v3213_v2, %v3209_v25  ;;  %v607_v48 = vsel %vm9106_vm4, 0, %v606_v60 }
 0x205   : > { %v3355_v34 = vld [vmem:[#allocation2 + $0xd0] sm:$0xf]  ;;  %v7302_v43 = vrot.slane %v3354_v3, 9  ;;  %v550_v49 = vld [vmem:[#allocation2 + $0xcc] sm:$0x1]  ;;  %v3205_v27 = vrot.slane %v3204_v39, 4  ;;  %v8240_v56 = vadd.f32 %v8239_v61, %v8238_v24  ;;  %v8164_v24 = vadd.f32 %v8163_v30, %v8162_v41  ;;  %v8165_v3 = vpop.f32.mrf.mxu1 }
 0x206   : > { %v3506_v15 = vsel %vm9399_vm14, %v7301_v21, %v3505_v40  ;;  %v3507_v12 = vrot.slane %v3505_v40, 4  ;;  %608 = vst [vmem:[#allocation2 + $0xd4] sm:$0x1] %v607_v48  ;;  %v3512_v7 = vrot.slane %v3355_v34, 5  ;;  %v2780_v8 = vld [vmem:[#allocation2 + $0xd0] sm:$0xf] }
 0x207   : > { %5665 = vmatmul.mubr.bf16.gmra.mxu1 %v8912_v54  ;;  %v3215_v62 = vrot.slane %v3214_v16, 4  ;;  %3577 = vst [vmem:[#allocation3 + $0x410] sm:$0xf] %v3506_v15  ;;  %v551_v17 = vsel %vm9092_vm3, 0, %v550_v49  ;;  %2812 = vst [vmem:[#allocation3 + $0x474] sm:$0xf] %v2780_v8  ;;  %v3210_v21 = vsel %vm9159_vm11, %v3205_v27, %v3209_v25  ;;  %v10118_v2 = vadd.f32 %v8240_v56, %v9948_v14  ;;  %v8166_v34 = vpop.f32.mrf.mxu1 }
 0x208   : > { %v2859_v1 = vld [vmem:[#allocation2 + $0xd0] sm:$0xf]  ;;  %v3509_v53 = vsel %vm9399_vm14, %v3507_v12, %v3508_v45  ;;  %v3513_v54 = vsel %vm9399_vm14, %v7302_v43, %v3512_v7  ;;  %v3514_v55 = vrot.slane %v3512_v7, 4  ;;  %552 = vst [vmem:[#allocation2 + $0xcc] sm:$0x1] %v551_v17  ;;  %v8241_v45 = vpop.f32.mrf.mxu0  ;;  %v10125_v60 = vadd.f32 %v8164_v24, %v8052_v59 }
 0x209   : > { %v3220_v47 = vsel %vm9159_vm11, %v3215_v62, %v3219_v35  ;;  %3305 = vst [vmem:[#allocation3 + $0x40c] sm:$0xf] %v3210_v21  ;;  %3578 = vst [vmem:[#allocation3 + $0x434] sm:$0xf] %v3509_v53  ;;  %v3231_v18 = vshll.u32 %v2859_v1, 16  ;;  %v3235_v25 = vshrl.u32 %v2859_v1, 16  ;;  %v8167_v15 = vadd.f32 %v8166_v34, %v8165_v3  ;;  %v8168_v17 = vpop.f32.mrf.mxu1 }
 0x20a   : > { %3579 = vst [vmem:[#allocation3 + $0x458] sm:$0xf] %v3513_v54  ;;  %v8917_v10 = vld [vmem:[#allocation3 + $0x3c0] ss:$36 sps:$4 sm:$0xff]   ;;  %3306 = vst [vmem:[#allocation3 + $0x430] sm:$0xf] %v3220_v47  ;;  %v8242_v48 = vpop.f32.mrf.mxu0 }
 0x20b   : > { %v8919_v50 = vld [vmem:[#allocation3 + $0x3c4] ss:$36 sps:$4 sm:$0xff]   ;;  %v10122_v39 = vrot.slane %v3231_v18, 5  ;;  %v3237_v40 = vrot.slane %v3235_v25, 4  ;;  %v8966_v35 = vmov 0.0   ;;  %v8243_v41 = vadd.f32 %v8242_v48, %v8241_v45  ;;  %v8169_v4 = vpop.f32.mrf.mxu1 }
 0x20c   : > { %8533 = vmatprep.subr.bf16.mxu1 %v8966_v35  ;;  %5672 = vmatprep.mubr.bf16.mxu1 %v8919_v50  ;;  %v8244_v27 = vpop.f32.mrf.mxu0  ;;  %v10135_v30 = vadd.f32 %v8167_v15, %v9645_v58  ;;  %v8920_v53 = vld [vmem:[#allocation3 + $0x408] ss:$36 sps:$4 sm:$0xff]   ;;  %v8170_v18 = vadd.f32 %v8169_v4, %v8168_v17  ;;  %v8929_v50 = vld [vmem:[%s10652_s4 + $0x30] sm:$0xff]  }
 0x20d   : > { %8534 = vmatpush3.bf16.msra.mxu1 %v8928_v13  ;;  %v3356_v14 = vld [vmem:[#allocation2 + $0xd4] sm:$0x1]  ;;  %v3238_v16 = vor.u32 %v3237_v40, %v10122_v39  ;;  %v10132_v62 = vadd.f32 %v8243_v41, %v9967_v6  ;;  %v8171_v40 = vpop.f32.mrf.mxu1 }
 0x20e   : > { %v2860_v11 = vld [vmem:[#allocation2 + $0xd4] sm:$0x1]  ;;  %8535 = vmatprep.subr.bf16.mxu1 %v8966_v35  ;;  %v3515_v29 = vrot.slane %v3356_v14, 5  ;;  %v8245_v21 = vpop.f32.mrf.mxu0 }
 0x20f   : > { %v3241_v28 = vshll.u32 %v2860_v11, 16  ;;  %5673 = vmatmul.mubr.bf16.gmra.mxu1 %v8917_v10  ;;  %v2779_v43 = vld [vmem:[#allocation2 + $0xcc] sm:$0xf]  ;;  %v3239_v61 = vrot.slane %v3238_v16, 4  ;;  %v8246_v47 = vadd.f32 %v8245_v21, %v8244_v27  ;;  %v8172_v3 = vpop.f32.mrf.mxu1  ;;  %v10691_v4 = vld [vmem:[#allocation8_spill] sm:$0xff] }
 0x210   : > { %v2858_v49 = vld [vmem:[#allocation2 + $0xcc] sm:$0xf]  ;;  %v3516_v7 = vsel %vm9399_vm14, %v3514_v55, %v3515_v29  ;;  %2811 = vst [vmem:[#allocation3 + $0x450] sm:$0xf] %v2779_v43  ;;  %v8058_v55 = vadd.f32 %v9657_v32, %v9655_v9  ;;  %v8247_v58 = vpop.f32.mrf.mxu0  ;;  %v8173_v11 = vadd.f32 %v8172_v3, %v8171_v40 }
 0x211   : > { %v8923_v12 = vld [vmem:[#allocation3 + $0x410] ss:$36 sps:$4 sm:$0xff]   ;;  %v3222_v8 = vshrl.u32 %v2858_v49, 16  ;;  %3580 = vst [vmem:[#allocation3 + $0x47c] sm:$0xf] %v3516_v7  ;;  %v3225_v56 = vshll.u32 %v2858_v49, 16  ;;  %v10142_v10 = vadd.f32 %v8246_v47, %v9975_v57  ;;  %8536 = vmatpush3.bf16.msra.mxu1 %v8929_v50  ;;  %v8174_v29 = vpop.f32.mrf.mxu1 }
 0x212   : > { %v8922_v1 = vld [vmem:[#allocation3 + $0x40c] ss:$36 sps:$4 sm:$0xff]   ;;  %8529 = vmatprep.mubr.bf16.mxu0 %v8923_v12  ;;  %v3243_v13 = vrot.slane %v3241_v28, 5  ;;  %v10147_v24 = vadd.f32 %v8170_v18, %v8058_v55  ;;  %v8248_v9 = vpop.f32.mrf.mxu0  ;;  %8537 = vmatprep.subr.bf16.mxu1 %v8966_v35  ;;  %v10688_v28 = vld [vmem:[#allocation5_spill] sm:$0xff] }
 0x213   : > { %v3224_v54 = vrot.slane %v3222_v8, 4  ;;  %5680 = vmatprep.mubr.bf16.mxu1 %v8922_v1  ;;  %v3227_v6 = vrot.slane %v3225_v56, 5  ;;  %v8249_v45 = vadd.f32 %v8248_v9, %v8247_v58  ;;  %v10157_v41 = vadd.f32 %v8173_v11, %v10688_v28  ;;  %v8175_v49 = vpop.f32.mrf.mxu1  ;;  %v10690_v27 = vld [vmem:[#allocation7_spill] sm:$0xff]  ;;  %v10692_v58 = vld [vmem:[#allocation9_spill] sm:$0xff]  ;;  %v10693_v50 = vld [vmem:[#allocation10_spill] sm:$0xff] }
 0x214   : > { %v3244_v25 = vsel %vm9159_vm11, %v3239_v61, %v3243_v13  ;;  %v8250_v14 = vpop.f32.mrf.mxu0  ;;  %v10689_v61 = vld [vmem:[#allocation6_spill] sm:$0xff]  ;;  %v8176_v12 = vadd.f32 %v8175_v49, %v8174_v29 }
 0x215   : > { %v3228_v59 = vor.u32 %v3227_v6, %v3224_v54  ;;  %3308 = vst [vmem:[#allocation3 + $0x478] sm:$0xf] %v3244_v25  ;;  %v10154_v48 = vadd.f32 %v8249_v45, %v9998_v19  ;;  %v8064_v15 = vadd.f32 %v10690_v27, %v10689_v61  ;;  %v8177_v17 = vpop.f32.mrf.mxu1  ;;  %v8930_v25 = vld [vmem:[%s10652_s4 + $0x28] sm:$0xff]   ;;  %v10695_v27 = vld [vmem:[#allocation12_spill] sm:$0xff] }
 0x216   : > { %v8251_v34 = vpop.f32.mrf.mxu0  ;;  %8538 = vmatpush3.bf16.msra.mxu1 %v8930_v25 }
 0x217   : > { %5681 = vmatmul.mubr.bf16.gmra.mxu1 %v8920_v53  ;;  %v3229_v32 = vrot.slane %v3228_v59, 4  ;;  %v8252_v43 = vadd.f32 %v8251_v34, %v8250_v14  ;;  %v10164_v63 = vadd.f32 %v8176_v12, %v8064_v15  ;;  %v8178_v21 = vpop.f32.mrf.mxu1  ;;  %v8070_v59 = vadd.f32 %v10693_v50, %v10692_v58  ;;  %8539 = vmatprep.subr.bf16.mxu1 %v8966_v35  ;;  %v10694_v34 = vld [vmem:[#allocation11_spill] sm:$0xff]  ;;  %v10696_v15 = vld [vmem:[#allocation13_spill] sm:$0xff] }
 0x218   : > { %v8924_v57 = vld [vmem:[#allocation3 + $0x458] ss:$36 sps:$4 sm:$0xff]   ;;  %v8253_v19 = vpop.f32.mrf.mxu0  ;;  %v8179_v54 = vadd.f32 %v8178_v21, %v8177_v17  ;;  %v8076_v12 = vadd.f32 %v10696_v15, %v10695_v27 }
 0x219   : > { %v3234_v16 = vsel %vm9159_vm11, %v3229_v32, %v10122_v39  ;;  %8530 = vmatmul.mubr.bf16.gmra.mxu0 %v8924_v57  ;;  %v10162_v7 = vadd.f32 %v8252_v43, %v10012_v42  ;;  %v8925_v39 = vld [vmem:[#allocation3 + $0x450] ss:$36 sps:$4 sm:$0xff]   ;;  %v8180_v47 = vpop.f32.mrf.mxu1 }
 0x21a   : > { %3307 = vst [vmem:[#allocation3 + $0x454] sm:$0xf] %v3234_v16  ;;  %v8254_v1 = vpop.f32.mrf.mxu0  ;;  %v10170_v42 = vadd.f32 %v8179_v54, %v10691_v4 }
 0x21b   : > { %v8255_v56 = vadd.f32 %v8254_v1, %v8253_v19  ;;  %v8181_v18 = vpop.f32.mrf.mxu1 }
 0x21c   : > { %v8256_v53 = vpop.f32.mrf.mxu0  ;;  %v8182_v40 = vadd.f32 %v8181_v18, %v8180_v47 }
 0x21d   : > { %v10167_v13 = vadd.f32 %v8255_v56, %v10020_v52  ;;  %v8183_v45 = vpop.f32.mrf.mxu1  ;;  %v8931_v56 = vld [vmem:[%s10652_s4 + $0x20] sm:$0xff]  }
 0x21e   : > { %v8257_v55 = vpop.f32.mrf.mxu0  ;;  %v10180_v32 = vadd.f32 %v8182_v40, %v8070_v59  ;;  %8540 = vmatpush3.bf16.msra.mxu1 %v8931_v56  ;;  %v10697_v40 = vld [vmem:[#allocation14_spill] sm:$0xff] }
 0x21f   : > { %v8258_v6 = vadd.f32 %v8257_v55, %v8256_v53  ;;  %v8184_v14 = vpop.f32.mrf.mxu1  ;;  %8541 = vmatprep.subr.bf16.mxu1 %v8966_v35 }
 0x220   : > { %v8259_v52 = vpop.f32.mrf.mxu0  ;;  %v8185_v16 = vadd.f32 %v8184_v14, %v8183_v45  ;;  %v10699_v14 = vld [vmem:[#allocation16_spill] sm:$0xff] }
 0x221   : > { %v8927_v8 = vld [vmem:[#allocation3 + $0x454] ss:$36 sps:$4 sm:$0xff]   ;;  %v10178_v9 = vadd.f32 %v8258_v6, %v10031_v31  ;;  %v8186_v28 = vpop.f32.mrf.mxu1 }
 0x222   : > { %5688 = vmatprep.mubr.bf16.mxu1 %v8927_v8  ;;  %v8260_v3 = vpop.f32.mrf.mxu0  ;;  %v10187_v43 = vadd.f32 %v8185_v16, %v10694_v34 }
 0x223   : > { %5689 = vmatmul.mubr.bf16.gmra.mxu1 %v8925_v39  ;;  %v8261_v57 = vadd.f32 %v8260_v3, %v8259_v52  ;;  %v8187_v61 = vpop.f32.mrf.mxu1 }
 0x224   : > { %v8262_v11 = vpop.f32.mrf.mxu0  ;;  %v8188_v19 = vadd.f32 %v8187_v61, %v8186_v28  ;;  %8549 = vmatprep.mubr.msk.bf16.mxu1 %vm8967_vm15, %v8966_v35 }
 0x225   : > { %v10184_v29 = vadd.f32 %v8261_v57, %v10052_v36  ;;  %v10698_v57 = vld [vmem:[#allocation15_spill] sm:$0xff] }
 0x226   : > { %v8263_v31 = vpop.f32.mrf.mxu0  ;;  %v10194_v8 = vadd.f32 %v8188_v19, %v8076_v12  ;;  %v8932_v12 = vld [vmem:[%s10652_s4 + $0x18] sm:$0xff]  }
 0x227   : > { %v8264_v49 = vadd.f32 %v8263_v31, %v8262_v11  ;;  %8542 = vmatpush3.bf16.msra.mxu1 %v8932_v12 }
 0x228   : > { %v8265_v17 = vpop.f32.mrf.mxu0  ;;  %8543 = vmatprep.subr.bf16.mxu1 %v8966_v35 }
 0x229   : > { %v10192_v39 = vadd.f32 %v8264_v49, %v10068_v5 }
 0x22a   : > { %v8266_v1 = vpop.f32.mrf.mxu0 }
 0x22b   : > { %v8267_v36 = vadd.f32 %v8266_v1, %v8265_v17 }
 0x22c   : > { %v8268_v21 = vpop.f32.mrf.mxu0 }
 0x22d   : > { %v10200_v53 = vadd.f32 %v8267_v36, %v10081_v0 }
 0x22e   : > { %v8269_v54 = vpop.f32.mrf.mxu0 }
 0x22f   : > { %v8270_v47 = vadd.f32 %v8269_v54, %v8268_v21 }
 0x230   : > { %v8189_v4 = vpop.f32.mrf.mxu1 }
 0x231   : > { %v10204_v5 = vadd.f32 %v8270_v47, %v10092_v46  ;;  %v8271_v55 = vpop.f32.mrf.mxu0  ;;  %v8082_v46 = vadd.f32 %v10699_v14, %v10698_v57 }
 0x232   : > { %v8190_v6 = vpop.f32.mrf.mxu1 }
 0x233   : > { %v8272_v18 = vpop.f32.mrf.mxu0  ;;  %v8191_v25 = vadd.f32 %v8190_v6, %v8189_v4 }
 0x234   : > { %v8273_v58 = vadd.f32 %v8272_v18, %v8271_v55  ;;  %v8192_v50 = vpop.f32.mrf.mxu1 }
 0x235   : > { %v8274_v59 = vpop.f32.mrf.mxu0  ;;  %v10207_v52 = vadd.f32 %v8191_v25, %v10697_v40  ;;  %v8933_v40 = vld [vmem:[%s10652_s4 + $0x10] sm:$0xff]  }
 0x236   : > { %v10210_v0 = vadd.f32 %v8273_v58, %v10104_v22  ;;  %v8193_v45 = vpop.f32.mrf.mxu1  ;;  %8544 = vmatpush3.bf16.msra.mxu1 %v8933_v40 }
 0x237   : > { %v8275_v3 = vpop.f32.mrf.mxu0  ;;  %v8194_v11 = vadd.f32 %v8193_v45, %v8192_v50  ;;  %8545 = vmatprep.subr.bf16.mxu1 %v8966_v35 }
 0x238   : > { %v8276_v16 = vadd.f32 %v8275_v3, %v8274_v59  ;;  %v10214_v28 = vpop.f32.mrf.mxu1 }
 0x239   : > { %v10216_v34 = vadd.f32 %v8194_v11, %v8082_v46  ;;  %v8277_v49 = vpop.f32.mrf.mxu0 }
 0x23a   : > { %v10219_v31 = vadd.f32 %v8276_v16, %v10125_v60  ;;  %v10221_v61 = vpop.f32.mrf.mxu1 }
 0x23b   : > { %v8278_v27 = vpop.f32.mrf.mxu0 }
 0x23c   : > { %v10223_v22 = vpop.f32.mrf.mxu1  ;;  %v8279_v15 = vadd.f32 %v8278_v27, %v8277_v49 }
 0x23d   : > { %v8280_v19 = vpop.f32.mrf.mxu0 }
 0x23e   : > { %v10229_v17 = vadd.f32 %v8279_v15, %v10135_v30  ;;  %v10231_v1 = vpop.f32.mrf.mxu1 }
 0x23f   : > { %v8281_v60 = vpop.f32.mrf.mxu0 }
 0x240   : > { %v8282_v36 = vadd.f32 %v8281_v60, %v8280_v19 }
 0x242   : > { %v8329_v56 = vpop.f32.mrf.mxu1  ;;  %v10235_v21 = vadd.f32 %v8282_v36, %v10147_v24 }
 0x244   : > { %v8330_v54 = vpop.f32.mrf.mxu1 }
 0x245   : > { %v8283_v47 = vpop.f32.mrf.mxu0 }
 0x246   : > { %v8332_v4 = vpop.f32.mrf.mxu1 }
 0x247   : > { %v8284_v55 = vpop.f32.mrf.mxu0 }
 0x248   : > { %v8285_v6 = vadd.f32 %v8284_v55, %v8283_v47  ;;  %v8333_v18 = vpop.f32.mrf.mxu1 }
 0x249   : > { %v8286_v25 = vpop.f32.mrf.mxu0 }
 0x24a   : > { %v10238_v30 = vadd.f32 %v8285_v6, %v10157_v41 }
 0x24b   : > { %v8287_v58 = vpop.f32.mrf.mxu0 }
 0x24c   : > { %v8288_v50 = vadd.f32 %v8287_v58, %v8286_v25 }
 0x24e   : > { %v10246_v24 = vadd.f32 %v8288_v50, %v10164_v63 }
 0x24f   : > { %v10240_v59 = vpop.f32.mrf.mxu1 }
 0x250   : > { %10700 = vst [vmem:[#allocation5_spill] sm:$0xff] %v10246_v24 }
 0x251   : > { %v10248_v45 = vpop.f32.mrf.mxu1 }
 0x253   : > { %v10251_v3 = vpop.f32.mrf.mxu1 }
 0x254   : > { %v8289_v41 = vpop.f32.mrf.mxu0 }
 0x255   : > { %v10253_v46 = vpop.f32.mrf.mxu1 }
 0x256   : > { %v8290_v57 = vpop.f32.mrf.mxu0 }
 0x257   : > { %v8291_v14 = vadd.f32 %v8290_v57, %v8289_v41 }
 0x258   : > { %v8292_v11 = vpop.f32.mrf.mxu0 }
 0x259   : > { %v10256_v16 = vadd.f32 %v8291_v14, %v10170_v42  ;;  %v8934_v42 = vld [vmem:[%s10652_s4 + $0x8] sm:$0xff]  }
 0x25a   : > { %v8293_v49 = vpop.f32.mrf.mxu0  ;;  %8546 = vmatpush3.bf16.msra.mxu1 %v8934_v42 }
 0x25b   : > { %10701 = vst [vmem:[#allocation6_spill] sm:$0xff] %v10256_v16  ;;  %v8294_v63 = vadd.f32 %v8293_v49, %v8292_v11  ;;  %8547 = vmatprep.subr.bf16.mxu1 %v8966_v35 }
 0x25c   : > { %v8341_v27 = vpop.f32.mrf.mxu1 }
 0x25d   : > { %v10259_v15 = vadd.f32 %v8294_v63, %v10180_v32  ;;  %v8935_v63 = vld [vmem:[%s10652_s4] sm:$0xff]  }
 0x25e   : > { %v8342_v12 = vpop.f32.mrf.mxu1  ;;  %8548 = vmatpush3.bf16.msra.mxu1 %v8935_v63 }
 0x25f   : > { %10702 = vst [vmem:[#allocation7_spill] sm:$0xff] %v10259_v15  ;;  %8553 = vmatprep.subr.bf16.mxu1 %v8966_v35 }
 0x260   : > { %v8344_v60 = vpop.f32.mrf.mxu1 }
 0x261   : > { %v8295_v19 = vpop.f32.mrf.mxu0 }
 0x262   : > { %v8345_v55 = vpop.f32.mrf.mxu1 }
 0x263   : > { %v8296_v36 = vpop.f32.mrf.mxu0 }
 0x264   : > { %v8297_v47 = vadd.f32 %v8296_v36, %v8295_v19  ;;  %v8331_v36 = vadd.f32 %v8330_v54, %v8329_v56  ;;  %v10298_v56 = vld [vmem:[%s10650_s2] ss:$0 sm:$0xff]  ;;  %v8328_v54 = vadd.f32 %v10231_v1, %v10223_v22  ;;  %v8337_v22 = vadd.f32 %v10248_v45, %v10240_v59 }
 0x265   : > { %v8298_v6 = vpop.f32.mrf.mxu0  ;;  %v8346_v45 = vadd.f32 %v8345_v55, %v8344_v60 }
 0x266   : > { %v10262_v25 = vadd.f32 %v8297_v47, %v10187_v43  ;;  %v5579_v15 = vadd.f32 %v8331_v36, %v10040_v26 }
 0x267   : > { %v8299_v58 = vpop.f32.mrf.mxu0 }
 0x268   : > { %10703 = vst [vmem:[#allocation8_spill] sm:$0xff] %v10262_v25  ;;  %v10267_v50 = vpop.f32.mrf.mxu1  ;;  %v8300_v40 = vadd.f32 %v8299_v58, %v8298_v6  ;;  %v8325_v58 = vadd.f32 %v10221_v61, %v10214_v28  ;;  %v8334_v25 = vadd.f32 %v8333_v18, %v8332_v4  ;;  %v8343_v18 = vadd.f32 %v8342_v12, %v8341_v27  ;;  %v10705_v27 = vld [vmem:[#allocation17_spill] sm:$0xff] }
 0x26a   : > { %v10271_v32 = vadd.f32 %v8300_v40, %v10194_v8  ;;  %v10273_v41 = vpop.f32.mrf.mxu1  ;;  %v5571_v61 = vadd.f32 %v8325_v58, %v10015_v33  ;;  %v5595_v59 = vadd.f32 %v8343_v18, %v10078_v44 }
 0x26c   : > { %10704 = vst [vmem:[#allocation9_spill] sm:$0xff] %v10271_v32  ;;  %v10275_v57 = vpop.f32.mrf.mxu1 }
 0x26e   : > { %v10277_v43 = vpop.f32.mrf.mxu1 }
 0x275   : > { %v8353_v14 = vpop.f32.mrf.mxu1 }
 0x277   : > { %v8354_v11 = vpop.f32.mrf.mxu1 }
 0x279   : > { %v10279_v49 = vpop.f32.mrf.mxu1 }
 0x27a   : > { %v8301_v19 = vpop.f32.mrf.mxu0 }
 0x27b   : > { %v8357_v6 = vpop.f32.mrf.mxu1 }
 0x27c   : > { %v8302_v8 = vpop.f32.mrf.mxu0 }
 0x27d   : > { %v8303_v47 = vadd.f32 %v8302_v8, %v8301_v19  ;;  %v5582_v8 = vadd.f32 %v8334_v25, %v10049_v37 }
 0x27e   : > { %v8304_v42 = vpop.f32.mrf.mxu0 }
 0x27f   : > { %v10290_v40 = vadd.f32 %v8303_v47, %v10207_v52 }
 0x280   : > { %v8305_v32 = vpop.f32.mrf.mxu0 }
 0x281   : > { %v8306_v63 = vadd.f32 %v8305_v32, %v8304_v42  ;;  %v10293_v16 = vpop.f32.mrf.mxu1 }
 0x282   : > { %v8503_v24 = vpop.f32.mrf.mxu0 }
 0x283   : > { %v10303_v28 = vadd.f32 %v8306_v63, %v10216_v34  ;;  %v5740_v52 = vadd.f32 %v8503_v24, %v5579_v15  ;;  %v10306_v4 = vpop.f32.mrf.mxu1  ;;  %v10317_v34 = vld [vmem:[%s10651_s3] ss:$0 sm:$0xff]  ;;  %v5574_v15 = vadd.f32 %v8328_v54, %v10705_v27  ;;  %v5587_v63 = vadd.f32 %v8337_v22, %v10058_v20 }
 0x284   : > { %v5731_v26 = vpop.f32.mrf.mxu0  ;;  %v8349_v20 = vadd.f32 %v10273_v41, %v10267_v50  ;;  %v5598_v22 = vadd.f32 %v8346_v45, %v10090_v23 }
 0x285   : > { %v5867_v32 = vmul.f32 %v10298_v56, %v5740_v52  ;;  %v5732_v19 = vadd.f32 %v5731_v26, %v5571_v61  ;;  %v10310_v36 = vpop.f32.mrf.mxu1 }
 0x286   : > { %v8504_v33 = vpop.f32.mrf.mxu0 }
 0x287   : > { %v5865_v1 = vmul.f32 %v10298_v56, %v5732_v19  ;;  %v5743_v24 = vadd.f32 %v8504_v33, %v5582_v8  ;;  %v10321_v12 = vpop.f32.mrf.mxu1  ;;  %v5906_v37 = vadd.f32 %v10317_v34, %v5867_v32  ;;  %v8340_v32 = vadd.f32 %v10253_v46, %v10251_v3 }
 0x288   : > { %v5734_v47 = vpop.f32.mrf.mxu0  ;;  %v8355_v8 = vadd.f32 %v8354_v11, %v8353_v14  ;;  %v8358_v14 = vadd.f32 %v8357_v6, %v10279_v49  ;;  %v8352_v49 = vadd.f32 %v10277_v43, %v10275_v57 }
 0x289   : > { %v5868_v25 = vmul.f32 %v10298_v56, %v5743_v24  ;;  %v5735_v42 = vadd.f32 %v5734_v47, %v5574_v15  ;;  %v5904_v52 = vadd.f32 %v10317_v34, %v5865_v1  ;;  %v5938_v24 = vmax.f32 %v5906_v37, 0.0 }
 0x28a   : > { %v8507_v58 = vpop.f32.mrf.mxu0  ;;  %v5590_v37 = vadd.f32 %v8340_v32, %v10075_v51  ;;  %v5611_v23 = vadd.f32 %v8355_v8, %v10132_v62 }
 0x28b   : > { %v5907_v61 = vadd.f32 %v10317_v34, %v5868_v25  ;;  %v5866_v54 = vmul.f32 %v10298_v56, %v5735_v42  ;;  %v5756_v26 = vadd.f32 %v8507_v58, %v5595_v59  ;;  %v5936_v15 = vmax.f32 %v5904_v52, 0.0 }
 0x28c   : > { %v5747_v33 = vpop.f32.mrf.mxu0 }
 0x28d   : > { %v8365_v19 = vpop.f32.mrf.mxu1  ;;  %v5939_v27 = vmax.f32 %v5907_v61, 0.0  ;;  %v5905_v44 = vadd.f32 %v10317_v34, %v5866_v54  ;;  %v5748_v60 = vadd.f32 %v5747_v33, %v5587_v63  ;;  %v5871_v18 = vmul.f32 %v10298_v56, %v5756_v26 }
 0x28e   : > { %v8508_v1 = vpop.f32.mrf.mxu0  ;;  %v5603_v54 = vadd.f32 %v8349_v20, %v10097_v38  ;;  %v5614_v33 = vadd.f32 %v8358_v14, %v10142_v10  ;;  %v8361_v38 = vadd.f32 %v10306_v4, %v10293_v16 }
 0x28f   : > { %v8366_v55 = vpop.f32.mrf.mxu1  ;;  %v7710_v47 = vpack.c.bf16 %v5939_v27, %v5938_v24  ;;  %v5937_v25 = vmax.f32 %v5905_v44, 0.0  ;;  %v5869_v3 = vmul.f32 %v10298_v56, %v5748_v60  ;;  %v5759_v11 = vadd.f32 %v8508_v1, %v5598_v22 }
 0x290   : > { %v5750_v42 = vpop.f32.mrf.mxu0  ;;  %v5910_v45 = vadd.f32 %v10317_v34, %v5871_v18  ;;  %v8367_v32 = vadd.f32 %v8366_v55, %v8365_v19 }
 0x291   : > { %v8368_v46 = vpop.f32.mrf.mxu1  ;;  %7926 = vst [vmem:[#allocation4 + $0x8] sm:$0xff] %v7710_v47   ;;  %v5968_v59 = vadd.f32 %v5937_v25, %v5936_v15  ;;  %v7705_v50 = vpack.c.bf16 %v5937_v25, %v5936_v15  ;;  %v5908_v41 = vadd.f32 %v10317_v34, %v5869_v3  ;;  %v5872_v58 = vmul.f32 %v10298_v56, %v5759_v11 }
 0x292   : > { %v5751_v63 = vadd.f32 %v5750_v42, %v5590_v37  ;;  %v8511_v52 = vpop.f32.mrf.mxu0  ;;  %v5942_v1 = vmax.f32 %v5910_v45, 0.0  ;;  %v5606_v3 = vadd.f32 %v8352_v49, %v10118_v2  ;;  %v8364_v11 = vadd.f32 %v10321_v12, %v10310_v36 }
 0x293   : > { %v8369_v61 = vpop.f32.mrf.mxu1  ;;  %v5969_v6 = vadd.f32 %v5968_v59, %v5938_v24  ;;  %7706 = vst [vmem:[#allocation4] sm:$0xff] %v7705_v50   ;;  %v5772_v51 = vadd.f32 %v8511_v52, %v5611_v23  ;;  %v5911_v26 = vadd.f32 %v10317_v34, %v5872_v58  ;;  %v5940_v44 = vmax.f32 %v5908_v41, 0.0 }
 0x294   : > { %v5870_v62 = vmul.f32 %v10298_v56, %v5751_v63  ;;  %v5763_v8 = vpop.f32.mrf.mxu0  ;;  %v8370_v25 = vadd.f32 %v8369_v61, %v8368_v46  ;;  %v5627_v16 = vadd.f32 %v8367_v32, %v10167_v13  ;;  %v5619_v58 = vadd.f32 %v8361_v38, %v10154_v48 }
 0x295   : > { %v5970_v60 = vadd.f32 %v5969_v6, %v5939_v27  ;;  %v5875_v18 = vmul.f32 %v10298_v56, %v5772_v51  ;;  %v5764_v22 = vadd.f32 %v5763_v8, %v5603_v54  ;;  %v5943_v57 = vmax.f32 %v5911_v26, 0.0 }
 0x296   : > { %v5909_v43 = vadd.f32 %v10317_v34, %v5870_v62  ;;  %v8512_v15 = vpop.f32.mrf.mxu0  ;;  %v5630_v13 = vadd.f32 %v8370_v25, %v10178_v9  ;;  %v5622_v48 = vadd.f32 %v8364_v11, %v10162_v7 }
 0x297   : > { %v5971_v19 = vadd.f32 %v5970_v60, %v5940_v44  ;;  %v5873_v55 = vmul.f32 %v10298_v56, %v5764_v22  ;;  %v5775_v20 = vadd.f32 %v8512_v15, %v5614_v33  ;;  %v7720_v47 = vpack.c.bf16 %v5943_v57, %v5942_v1 }
 0x298   : > { %v5941_v10 = vmax.f32 %v5909_v43, 0.0  ;;  %v5766_v14 = vpop.f32.mrf.mxu0  ;;  %v5914_v37 = vadd.f32 %v10317_v34, %v5875_v18 }
 0x299   : > { %v8371_v24 = vpop.f32.mrf.mxu1  ;;  %v5876_v42 = vmul.f32 %v10298_v56, %v5775_v20  ;;  %7928 = vst [vmem:[#allocation4 + $0x18] sm:$0xff] %v7720_v47   ;;  %v5912_v50 = vadd.f32 %v10317_v34, %v5873_v55  ;;  %v5767_v41 = vadd.f32 %v5766_v14, %v5606_v3 }
 0x29a   : > { %v5972_v4 = vadd.f32 %v5971_v19, %v5941_v10  ;;  %v7715_v59 = vpack.c.bf16 %v5941_v10, %v5940_v44  ;;  %v8515_v23 = vpop.f32.mrf.mxu0  ;;  %v5946_v61 = vmax.f32 %v5914_v37, 0.0 }
 0x29b   : > { %v8372_v27 = vpop.f32.mrf.mxu1  ;;  %v5915_v2 = vadd.f32 %v10317_v34, %v5876_v42  ;;  %v5788_v45 = vadd.f32 %v8515_v23, %v5627_v16  ;;  %v5874_v12 = vmul.f32 %v10298_v56, %v5767_v41  ;;  %v5944_v54 = vmax.f32 %v5912_v50, 0.0 }
 0x29c   : > { %v5973_v36 = vadd.f32 %v5972_v4, %v5942_v1  ;;  %7927 = vst [vmem:[#allocation4 + $0x10] sm:$0xff] %v7715_v59   ;;  %v5779_v52 = vpop.f32.mrf.mxu0  ;;  %v8373_v33 = vadd.f32 %v8372_v27, %v8371_v24 }
 0x29d   : > { %v8374_v46 = vpop.f32.mrf.mxu1  ;;  %v5947_v49 = vmax.f32 %v5915_v2, 0.0  ;;  %v5879_v6 = vmul.f32 %v10298_v56, %v5788_v45  ;;  %v5780_v51 = vadd.f32 %v5779_v52, %v5619_v58  ;;  %v5913_v32 = vadd.f32 %v10317_v34, %v5874_v12 }
 0x29e   : > { %v5974_v26 = vadd.f32 %v5973_v36, %v5943_v57  ;;  %v8516_v62 = vpop.f32.mrf.mxu0  ;;  %v5635_v27 = vadd.f32 %v8373_v33, %v10184_v29 }
 0x29f   : > { %v8375_v63 = vpop.f32.mrf.mxu1  ;;  %v7730_v8 = vpack.c.bf16 %v5947_v49, %v5946_v61  ;;  %v5877_v44 = vmul.f32 %v10298_v56, %v5780_v51  ;;  %v5791_v60 = vadd.f32 %v8516_v62, %v5630_v13  ;;  %v5945_v22 = vmax.f32 %v5913_v32, 0.0 }
 0x2a0   : > { %v5975_v18 = vadd.f32 %v5974_v26, %v5944_v54  ;;  %v5918_v9 = vadd.f32 %v10317_v34, %v5879_v6  ;;  %v5782_v43 = vpop.f32.mrf.mxu0  ;;  %v8376_v55 = vadd.f32 %v8375_v63, %v8374_v46 }
 0x2a1   : > { %7930 = vst [vmem:[#allocation4 + $0x28] sm:$0xff] %v7730_v8   ;;  %v5880_v15 = vmul.f32 %v10298_v56, %v5791_v60  ;;  %v5783_v57 = vadd.f32 %v5782_v43, %v5622_v48  ;;  %v7725_v19 = vpack.c.bf16 %v5945_v22, %v5944_v54  ;;  %v5916_v7 = vadd.f32 %v10317_v34, %v5877_v44 }
 0x2a2   : > { %v5976_v38 = vadd.f32 %v5975_v18, %v5945_v22  ;;  %v5950_v14 = vmax.f32 %v5918_v9, 0.0  ;;  %v5638_v2 = vadd.f32 %v8376_v55, %v10192_v39 }
 0x2a3   : > { %v5919_v47 = vadd.f32 %v10317_v34, %v5880_v15  ;;  %v5878_v25 = vmul.f32 %v10298_v56, %v5783_v57  ;;  %7929 = vst [vmem:[#allocation4 + $0x20] sm:$0xff] %v7725_v19   ;;  %v5948_v50 = vmax.f32 %v5916_v7, 0.0 }
 0x2a4   : > { %v5977_v3 = vadd.f32 %v5976_v38, %v5946_v61 }
 0x2a5   : > { %v5951_v42 = vmax.f32 %v5919_v47, 0.0  ;;  %v5917_v16 = vadd.f32 %v10317_v34, %v5878_v25 }
 0x2a6   : > { %v8377_v1 = vpop.f32.mrf.mxu1  ;;  %v8519_v24 = vpop.f32.mrf.mxu0  ;;  %v5978_v41 = vadd.f32 %v5977_v3, %v5947_v49 }
 0x2a7   : > { %v7740_v45 = vpack.c.bf16 %v5951_v42, %v5950_v14  ;;  %v5949_v58 = vmax.f32 %v5917_v16, 0.0 }
 0x2a8   : > { %v8378_v20 = vpop.f32.mrf.mxu1  ;;  %v5795_v37 = vpop.f32.mrf.mxu0  ;;  %v5979_v12 = vadd.f32 %v5978_v41, %v5948_v50 }
 0x2a9   : > { %v8379_v10 = vadd.f32 %v8378_v20, %v8377_v1  ;;  %v5796_v59 = vadd.f32 %v5795_v37, %v5635_v27  ;;  %7932 = vst [vmem:[#allocation4 + $0x38] sm:$0xff] %v7740_v45   ;;  %v7735_v13 = vpack.c.bf16 %v5949_v58, %v5948_v50 }
 0x2aa   : > { %v8380_v11 = vpop.f32.mrf.mxu1  ;;  %v8520_v23 = vpop.f32.mrf.mxu0  ;;  %v5980_v49 = vadd.f32 %v5979_v12, %v5949_v58 }
 0x2ab   : > { %v5643_v4 = vadd.f32 %v8379_v10, %v10200_v53  ;;  %v5881_v63 = vmul.f32 %v10298_v56, %v5796_v59  ;;  %7931 = vst [vmem:[#allocation4 + $0x30] sm:$0xff] %v7735_v13  }
 0x2ac   : > { %v8381_v46 = vpop.f32.mrf.mxu1  ;;  %v5798_v52 = vpop.f32.mrf.mxu0  ;;  %v5981_v32 = vadd.f32 %v5980_v49, %v5950_v14 }
 0x2ad   : > { %v5804_v29 = vadd.f32 %v8519_v24, %v5643_v4  ;;  %v8382_v36 = vadd.f32 %v8381_v46, %v8380_v11  ;;  %v5799_v6 = vadd.f32 %v5798_v52, %v5638_v2  ;;  %v5920_v51 = vadd.f32 %v10317_v34, %v5881_v63 }
 0x2ae   : > { %v5982_v18 = vadd.f32 %v5981_v32, %v5951_v42 }
 0x2af   : > { %v5883_v61 = vmul.f32 %v10298_v56, %v5804_v29  ;;  %v5646_v53 = vadd.f32 %v8382_v36, %v10204_v5  ;;  %v5882_v26 = vmul.f32 %v10298_v56, %v5799_v6  ;;  %v5952_v5 = vmax.f32 %v5920_v51, 0.0 }
 0x2b1   : > { %v5807_v39 = vadd.f32 %v8520_v23, %v5646_v53  ;;  %v5922_v62 = vadd.f32 %v10317_v34, %v5883_v61  ;;  %v5921_v60 = vadd.f32 %v10317_v34, %v5882_v26  ;;  %v5983_v38 = vadd.f32 %v5982_v18, %v5952_v5 }
 0x2b2   : > { %v8383_v54 = vpop.f32.mrf.mxu1 }
 0x2b3   : > { %v5884_v33 = vmul.f32 %v10298_v56, %v5807_v39  ;;  %v5953_v43 = vmax.f32 %v5921_v60, 0.0  ;;  %v5954_v57 = vmax.f32 %v5922_v62, 0.0 }
 0x2b4   : > { %v8384_v48 = vpop.f32.mrf.mxu1  ;;  %v8523_v8 = vpop.f32.mrf.mxu0 }
 0x2b5   : > { %v8385_v44 = vadd.f32 %v8384_v48, %v8383_v54  ;;  %v5923_v1 = vadd.f32 %v10317_v34, %v5884_v33  ;;  %v7745_v20 = vpack.c.bf16 %v5953_v43, %v5952_v5  ;;  %v5984_v10 = vadd.f32 %v5983_v38, %v5953_v43 }
 0x2b6   : > { %v8386_v22 = vpop.f32.mrf.mxu1  ;;  %v5811_v9 = vpop.f32.mrf.mxu0 }
 0x2b7   : > { %v5651_v15 = vadd.f32 %v8385_v44, %v10210_v0  ;;  %v5955_v7 = vmax.f32 %v5923_v1, 0.0  ;;  %7933 = vst [vmem:[#allocation4 + $0x40] sm:$0xff] %v7745_v20   ;;  %v5985_v11 = vadd.f32 %v5984_v10, %v5954_v57 }
 0x2b8   : > { %v8387_v19 = vpop.f32.mrf.mxu1  ;;  %v8524_v55 = vpop.f32.mrf.mxu0 }
 0x2b9   : > { %v8388_v24 = vadd.f32 %v8387_v19, %v8386_v22  ;;  %v5812_v47 = vadd.f32 %v5811_v9, %v5651_v15  ;;  %v7750_v27 = vpack.c.bf16 %v5955_v7, %v5954_v57  ;;  %v5986_v16 = vadd.f32 %v5985_v11, %v5955_v7  ;;  %v10706_v9 = vld [vmem:[#allocation5_spill] sm:$0xff] }
 0x2ba   : > { %v5814_v25 = vpop.f32.mrf.mxu0 }
 0x2bb   : > { %v5885_v3 = vmul.f32 %v10298_v56, %v5812_v47  ;;  %v5654_v14 = vadd.f32 %v8388_v24, %v10219_v31  ;;  %7934 = vst [vmem:[#allocation4 + $0x48] sm:$0xff] %v7750_v27   ;;  %v10707_v24 = vld [vmem:[#allocation6_spill] sm:$0xff] }
 0x2bd   : > { %v5924_v0 = vadd.f32 %v10317_v34, %v5885_v3  ;;  %v5815_v42 = vadd.f32 %v5814_v25, %v5654_v14 }
 0x2bf   : > { %v8389_v37 = vpop.f32.mrf.mxu1  ;;  %v5956_v59 = vmax.f32 %v5924_v0, 0.0  ;;  %v5886_v41 = vmul.f32 %v10298_v56, %v5815_v42  ;;  %v10708_v42 = vld [vmem:[#allocation7_spill] sm:$0xff] }
 0x2c1   : > { %v8390_v4 = vpop.f32.mrf.mxu1  ;;  %v5987_v23 = vadd.f32 %v5986_v16, %v5956_v59  ;;  %v5925_v45 = vadd.f32 %v10317_v34, %v5886_v41 }
 0x2c2   : > { %v8391_v50 = vadd.f32 %v8390_v4, %v8389_v37 }
 0x2c3   : > { %v8392_v46 = vpop.f32.mrf.mxu1  ;;  %v8527_v58 = vpop.f32.mrf.mxu0  ;;  %v5957_v36 = vmax.f32 %v5925_v45, 0.0 }
 0x2c4   : > { %v5659_v2 = vadd.f32 %v8391_v50, %v10229_v17 }
 0x2c5   : > { %v8393_v31 = vpop.f32.mrf.mxu1  ;;  %v5988_v13 = vadd.f32 %v5987_v23, %v5957_v36  ;;  %v7755_v61 = vpack.c.bf16 %v5957_v36, %v5956_v59  ;;  %v5827_v6 = vpop.f32.mrf.mxu0  ;;  %v10709_v36 = vld [vmem:[#allocation8_spill] sm:$0xff] }
 0x2c6   : > { %v5820_v29 = vadd.f32 %v8523_v8, %v5659_v2  ;;  %v8394_v12 = vadd.f32 %v8393_v31, %v8392_v46 }
 0x2c7   : > { %v8395_v63 = vpop.f32.mrf.mxu1  ;;  %7935 = vst [vmem:[#allocation4 + $0x50] sm:$0xff] %v7755_v61   ;;  %v8528_v48 = vpop.f32.mrf.mxu0 }
 0x2c8   : > { %v5887_v52 = vmul.f32 %v10298_v56, %v5820_v29  ;;  %v5662_v53 = vadd.f32 %v8394_v12, %v10235_v21 }
 0x2c9   : > { %v8396_v49 = vpop.f32.mrf.mxu1  ;;  %v5830_v43 = vpop.f32.mrf.mxu0 }
 0x2ca   : > { %v5926_v51 = vadd.f32 %v10317_v34, %v5887_v52  ;;  %v5823_v17 = vadd.f32 %v8524_v55, %v5662_v53  ;;  %v8397_v54 = vadd.f32 %v8396_v49, %v8395_v63 }
 0x2cb   : > { %v8398_v39 = vpop.f32.mrf.mxu1 }
 0x2cc   : > { %v5958_v26 = vmax.f32 %v5926_v51, 0.0  ;;  %v5888_v32 = vmul.f32 %v10298_v56, %v5823_v17  ;;  %v5667_v62 = vadd.f32 %v8397_v54, %v10238_v30  ;;  %v10710_v54 = vld [vmem:[#allocation9_spill] sm:$0xff] }
 0x2cd   : > { %v8399_v8 = vpop.f32.mrf.mxu1 }
 0x2ce   : > { %v5989_v33 = vadd.f32 %v5988_v13, %v5958_v26  ;;  %v5927_v44 = vadd.f32 %v10317_v34, %v5888_v32  ;;  %v8400_v60 = vadd.f32 %v8399_v8, %v8398_v39  ;;  %v5828_v21 = vadd.f32 %v5827_v6, %v5667_v62 }
 0x2cf   : > { %v8401_v5 = vpop.f32.mrf.mxu1 }
 0x2d0   : > { %v5959_v18 = vmax.f32 %v5927_v44, 0.0  ;;  %v5889_v22 = vmul.f32 %v10298_v56, %v5828_v21  ;;  %v5670_v1 = vadd.f32 %v8400_v60, %v10706_v9 }
 0x2d1   : > { %v8402_v15 = vpop.f32.mrf.mxu1 }
 0x2d2   : > { %v7760_v57 = vpack.c.bf16 %v5959_v18, %v5958_v26  ;;  %v5928_v38 = vadd.f32 %v10317_v34, %v5889_v22  ;;  %v5990_v19 = vadd.f32 %v5989_v33, %v5959_v18  ;;  %v8403_v30 = vadd.f32 %v8402_v15, %v8401_v5 }
 0x2d3   : > { %v5831_v55 = vadd.f32 %v5830_v43, %v5670_v1  ;;  %v8404_v7 = vpop.f32.mrf.mxu1 }
 0x2d4   : > { %7936 = vst [vmem:[#allocation4 + $0x58] sm:$0xff] %v7760_v57   ;;  %v5960_v20 = vmax.f32 %v5928_v38, 0.0  ;;  %v5675_v47 = vadd.f32 %v8403_v30, %v10707_v24 }
 0x2d5   : > { %v5890_v10 = vmul.f32 %v10298_v56, %v5831_v55  ;;  %v8405_v25 = vpop.f32.mrf.mxu1 }
 0x2d6   : > { %v5991_v27 = vadd.f32 %v5990_v19, %v5960_v20  ;;  %v5836_v3 = vadd.f32 %v8527_v58, %v5675_v47  ;;  %v8406_v14 = vadd.f32 %v8405_v25, %v8404_v7 }
 0x2d7   : > { %v5929_v11 = vadd.f32 %v10317_v34, %v5890_v10  ;;  %v8407_v37 = vpop.f32.mrf.mxu1 }
 0x2d8   : > { %v5891_v0 = vmul.f32 %v10298_v56, %v5836_v3  ;;  %v5678_v16 = vadd.f32 %v8406_v14, %v10708_v42 }
 0x2d9   : > { %v5961_v4 = vmax.f32 %v5929_v11, 0.0  ;;  %v8408_v59 = vpop.f32.mrf.mxu1  ;;  %v8531_v23 = vpop.f32.mrf.mxu0 }
 0x2da   : > { %v5930_v50 = vadd.f32 %v10317_v34, %v5891_v0  ;;  %v5839_v41 = vadd.f32 %v8528_v48, %v5678_v16  ;;  %v8409_v46 = vadd.f32 %v8408_v59, %v8407_v37  ;;  %v8936_v59 = vld [vmem:[%s10656_s8 + $0x38] sm:$0xff]  }
 0x2db   : > { %v5992_v2 = vadd.f32 %v5991_v27, %v5961_v4  ;;  %v7765_v45 = vpack.c.bf16 %v5961_v4, %v5960_v20  ;;  %v8410_v31 = vpop.f32.mrf.mxu1  ;;  %v5843_v63 = vpop.f32.mrf.mxu0 }
 0x2dc   : > { %v5962_v29 = vmax.f32 %v5930_v50, 0.0  ;;  %v5892_v58 = vmul.f32 %v10298_v56, %v5839_v41  ;;  %v5683_v12 = vadd.f32 %v8409_v46, %v10709_v36  ;;  %v8939_v41 = vld [vmem:[%s10656_s8 + $0x20] sm:$0xff]   ;;  %v8940_v46 = vld [vmem:[%s10656_s8 + $0x18] sm:$0xff]  }
 0x2dd   : > { %7937 = vst [vmem:[#allocation4 + $0x60] sm:$0xff] %v7765_v45   ;;  %v8411_v52 = vpop.f32.mrf.mxu1  ;;  %v8532_v49 = vpop.f32.mrf.mxu0  ;;  %v8943_v45 = vld [vmem:[%s10656_s8] sm:$0xff]  }
 0x2de   : > { %v5993_v13 = vadd.f32 %v5992_v2, %v5962_v29  ;;  %v5931_v61 = vadd.f32 %v10317_v34, %v5892_v58  ;;  %v5844_v53 = vadd.f32 %v5843_v63, %v5683_v12  ;;  %v8412_v6 = vadd.f32 %v8411_v52, %v8410_v31  ;;  %v8942_v2 = vld [vmem:[%s10656_s8 + $0x8] sm:$0xff]   ;;  %v8944_v31 = vld [vmem:[%s10658_s10 + $0x38] sm:$0xff]   ;;  %v7553_v58 = vld [vmem:[%s10653_s5] ss:$0 sm:$0xff] }
 0x2df   : > { %v5846_v26 = vpop.f32.mrf.mxu0  ;;  %8573 = vmatprep.subr.bf16.mxu0 %v8944_v31  ;;  %v7562_v12 = vld [vmem:[%s10654_s6] ss:$0 sm:$0xff] }
 0x2e0   : > { %v5963_v51 = vmax.f32 %v5931_v61, 0.0  ;;  %v5893_v17 = vmul.f32 %v10298_v56, %v5844_v53  ;;  %v5686_v39 = vadd.f32 %v8412_v6, %v10710_v54  ;;  %8574 = vmatpush3.bf16.msra.mxu0 %v8944_v31  ;;  %v7563_v52 = vld [vmem:[%s10655_s7] ss:$0 sm:$0xff] }
 0x2e1   : > { %v8947_v54 = vld [vmem:[%s10658_s10 + $0x20] sm:$0xff]  }
 0x2e2   : > { %v7770_v32 = vpack.c.bf16 %v5963_v51, %v5962_v29  ;;  %v5932_v62 = vadd.f32 %v10317_v34, %v5893_v17  ;;  %v5994_v48 = vadd.f32 %v5993_v13, %v5963_v51  ;;  %v5847_v8 = vadd.f32 %v5846_v26, %v5686_v39  ;;  %v8945_v29 = vld [vmem:[%s10658_s10 + $0x30] sm:$0xff]   ;;  %v8948_v39 = vld [vmem:[%s10658_s10 + $0x18] sm:$0xff]  }
 0x2e3   : > { %v8413_v44 = vpop.f32.mrf.mxu1  ;;  %8575 = vmatprep.subr.bf16.mxu0 %v8945_v29  ;;  %v8949_v26 = vld [vmem:[%s10658_s10 + $0x10] sm:$0xff]  }
 0x2e4   : > { %7938 = vst [vmem:[#allocation4 + $0x68] sm:$0xff] %v7770_v32   ;;  %v5964_v33 = vmax.f32 %v5932_v62, 0.0  ;;  %v5894_v60 = vmul.f32 %v10298_v56, %v5847_v8  ;;  %8576 = vmatpush3.bf16.msra.mxu0 %v8945_v29  ;;  %v8950_v32 = vld [vmem:[%s10658_s10 + $0x8] sm:$0xff]   ;;  %v8951_v62 = vld [vmem:[%s10658_s10] sm:$0xff]  }
 0x2e5   : > { %v8414_v18 = vpop.f32.mrf.mxu1 }
 0x2e6   : > { %v5995_v21 = vadd.f32 %v5994_v48, %v5964_v33  ;;  %v5933_v5 = vadd.f32 %v10317_v34, %v5894_v60  ;;  %v8415_v22 = vadd.f32 %v8414_v18, %v8413_v44  ;;  %v7564_v48 = vld [vmem:[%s10657_s9] ss:$0 sm:$0xff] }
 0x2e7   : > { %v8416_v1 = vpop.f32.mrf.mxu1 }
 0x2e8   : > { %v5965_v9 = vmax.f32 %v5933_v5, 0.0  ;;  %v5691_v43 = vadd.f32 %v8415_v22, %v10290_v40 }
 0x2e9   : > { %v8417_v38 = vpop.f32.mrf.mxu1 }
 0x2ea   : > { %v5996_v15 = vadd.f32 %v5995_v21, %v5965_v9  ;;  %v7775_v57 = vpack.c.bf16 %v5965_v9, %v5964_v33  ;;  %v5852_v19 = vadd.f32 %v8531_v23, %v5691_v43  ;;  %v8418_v30 = vadd.f32 %v8417_v38, %v8416_v1  ;;  %v8941_v23 = vld [vmem:[%s10656_s8 + $0x10] sm:$0xff]  }
 0x2eb   : > { %v6450_v9 = vlaneseq }
 0x2ec   : > { %7939 = vst [vmem:[#allocation4 + $0x70] sm:$0xff] %v7775_v57   ;;  %v5895_v55 = vmul.f32 %v10298_v56, %v5852_v19  ;;  %v5694_v7 = vadd.f32 %v8418_v30, %v10303_v28 }
 0x2ed   : > { %v6451_v1 = vshrl.u32 %v6450_v9, 7  ;;  %v6438_v9 = vld [vmem:[#allocation4 + $0x5c] sm:$0xf] }
 0x2ee   : > { %v5934_v20 = vadd.f32 %v10317_v34, %v5895_v55  ;;  %v5855_v24 = vadd.f32 %v8532_v49, %v5694_v7  ;;  %v6417_v55 = vld [vmem:[#allocation4 + $0x8] sm:$0xf]  ;;  %v6415_v7 = vld [vmem:[#allocation4] sm:$0xf] }
 0x2ef   : > { %v6452_v57 = vsub.s32 0, %v6451_v1 }
 0x2f0   : > { %v5966_v47 = vmax.f32 %v5934_v20, 0.0  ;;  %v5896_v10 = vmul.f32 %v10298_v56, %v5855_v24  ;;  %v8937_v56 = vld [vmem:[%s10656_s8 + $0x30] sm:$0xff]   ;;  %v6416_v20 = vld [vmem:[#allocation4 + $0x4] sm:$0xf]  ;;  %v6418_v24 = vld [vmem:[#allocation4 + $0xc] sm:$0xf] }
 0x2f2   : > { %v5997_v25 = vadd.f32 %v5996_v15, %v5966_v47  ;;  %v5935_v27 = vadd.f32 %v10317_v34, %v5896_v10  ;;  %v8938_v34 = vld [vmem:[%s10656_s8 + $0x28] sm:$0xff]  }
 0x2f4   : > { %v5967_v40 = vmax.f32 %v5935_v27, 0.0 }
 0x2f6   : > { %v5998_v3 = vadd.f32 %v5997_v25, %v5967_v40  ;;  %v7780_v14 = vpack.c.bf16 %v5967_v40, %v5966_v47  ;;  %v6419_v40 = vld [vmem:[#allocation4 + $0x10] sm:$0xf] }
 0x2f8   : > { %v5999_v11 = vrot.slane %v5998_v3, 4  ;;  %7940 = vst [vmem:[#allocation4 + $0x78] sm:$0xff] %v7780_v14  }
 0x2fa   : > { %v6000_v37 = vadd.f32 %v5999_v11, %v5998_v3  ;;  %v6420_v3 = vld [vmem:[#allocation4 + $0x14] sm:$0xf] }
 0x2fc   : > { %v6001_v0 = vrot.slane %v6000_v37, 2 }
 0x2fe   : > { %v6002_v42 = vadd.f32 %v6001_v0, %v6000_v37 }
 0x300   : > { %v6003_v16 = vrot.slane %v6002_v42, 1 }
 0x302   : > { %v6004_v4 = vadd.f32 %v6003_v16, %v6002_v42  ;;  %v6421_v16 = vld [vmem:[#allocation4 + $0x18] sm:$0xf] }
 0x304   : > { %v6006_v28 = vmul.f32 0.00390625, %v6004_v4  ;;  %v6422_v4 = vld [vmem:[#allocation4 + $0x1c] sm:$0xf] }
 0x306   : > { %v6167_v50 = vpack.c.bf16 %v6006_v28, %v6006_v28 }
 0x308   : > { %8550 = vmatmul.mubr.bf16.vlgmr.msra.gmra.mxu1 %v6167_v50  ;;  %v6423_v50 = vld [vmem:[#allocation4 + $0x20] sm:$0xf] }
 0x309   : > { %8554 = vmatpush3.bf16.msra.mxu1 %v8936_v59  ;;  %8569 = vmatprep.mubr.msk.bf16.mxu1 %vm8967_vm15, %v8966_v35 }
 0x30a   : > { %8555 = vmatprep.subr.bf16.mxu1 %v8966_v35 }
 0x30d   : > { %8556 = vmatpush3.bf16.msra.mxu1 %v8937_v56  ;;  %v6424_v56 = vld [vmem:[#allocation4 + $0x24] sm:$0xf] }
 0x30e   : > { %8557 = vmatprep.subr.bf16.mxu1 %v8966_v35 }
 0x311   : > { %8558 = vmatpush3.bf16.msra.mxu1 %v8938_v34 }
 0x312   : > { %8559 = vmatprep.subr.bf16.mxu1 %v8966_v35 }
 0x315   : > { %8560 = vmatpush3.bf16.msra.mxu1 %v8939_v41 }
 0x316   : > { %8561 = vmatprep.subr.bf16.mxu1 %v8966_v35 }
 0x319   : > { %8562 = vmatpush3.bf16.msra.mxu1 %v8940_v46 }
 0x31a   : > { %8563 = vmatprep.subr.bf16.mxu1 %v8966_v35 }
 0x31d   : > { %8564 = vmatpush3.bf16.msra.mxu1 %v8941_v23 }
 0x31e   : > { %8565 = vmatprep.subr.bf16.mxu1 %v8966_v35 }
 0x321   : > { %8566 = vmatpush3.bf16.msra.mxu1 %v8942_v2  ;;  %v6425_v2 = vld [vmem:[#allocation4 + $0x28] sm:$0xf] }
 0x322   : > { %8567 = vmatprep.subr.bf16.mxu1 %v8966_v35  ;;  %v8946_v35 = vld [vmem:[%s10658_s10 + $0x28] sm:$0xff]  }
 0x323   : > { %8577 = vmatprep.subr.bf16.mxu0 %v8946_v35 }
 0x324   : > { %8578 = vmatpush3.bf16.msra.mxu0 %v8946_v35  ;;  %v6427_v35 = vld [vmem:[#allocation4 + $0x30] sm:$0xf] }
 0x325   : > { %8568 = vmatpush3.bf16.msra.mxu1 %v8943_v45  ;;  %8579 = vmatprep.subr.bf16.mxu0 %v8947_v54  ;;  %v6426_v45 = vld [vmem:[#allocation4 + $0x2c] sm:$0xf] }
 0x328   : > { %8580 = vmatpush3.bf16.msra.mxu0 %v8947_v54 }
 0x329   : > { %8581 = vmatprep.subr.bf16.mxu0 %v8948_v39 }
 0x32c   : > { %8582 = vmatpush3.bf16.msra.mxu0 %v8948_v39 }
 0x32d   : > { %8583 = vmatprep.subr.bf16.mxu0 %v8949_v26 }
 0x330   : > { %8584 = vmatpush3.bf16.msra.mxu0 %v8949_v26 }
 0x331   : > { %8585 = vmatprep.subr.bf16.mxu0 %v8950_v32 }
 0x334   : > { %8586 = vmatpush3.bf16.msra.mxu0 %v8950_v32  ;;  %v6433_v32 = vld [vmem:[#allocation4 + $0x48] sm:$0xf] }
 0x335   : > { %8587 = vmatprep.subr.bf16.mxu0 %v8951_v62 }
 0x338   : > { %8588 = vmatpush3.bf16.msra.mxu0 %v8951_v62  ;;  %v6434_v62 = vld [vmem:[#allocation4 + $0x4c] sm:$0xf] }
 0x3c8   : > { %v6273_v36 = vpop.f32.mrf.mxu1 }
 0x3c9   : > { %v6274_v63 = vadd.f32 %v7553_v58, %v6273_v36  ;;  %v6428_v58 = vld [vmem:[#allocation4 + $0x34] sm:$0xf] }
 0x3ca   : > { %v8551_v13 = vpop.f32.mrf.mxu1 }
 0x3cb   : > { %v6286_v61 = vmul.f32 %v7562_v12, %v6274_v63  ;;  %v6429_v13 = vld [vmem:[#allocation4 + $0x38] sm:$0xf] }
 0x3cc   : > { %v6276_v53 = vpop.f32.mrf.mxu1 }
 0x3cd   : > { %v6294_v6 = vadd.f32 %v7563_v52, %v6286_v61  ;;  %v6430_v61 = vld [vmem:[#allocation4 + $0x3c] sm:$0xf] }
 0x3ce   : > { %v8552_v49 = vpop.f32.mrf.mxu1 }
 0x3cf   : > { %v6295_v51 = vmax.f32 %v6294_v6, 0.0  ;;  %v6431_v49 = vld [vmem:[#allocation4 + $0x40] sm:$0xf] }
 0x3d1   : > { %v6296_v17 = vpack.c.bf16 %v6295_v51, %v6295_v51  ;;  %v6432_v51 = vld [vmem:[#allocation4 + $0x44] sm:$0xf] }
 0x3d3   : > { %8570 = vmatmul.mubr.bf16.vlgmr.msra.gmra.mxu1 %v6296_v17 }
 0x493   : > { %v6402_v8 = vpop.f32.mrf.mxu1 }
 0x494   : > { %v6403_v33 = vadd.f32 %v7564_v48, %v6402_v8 }
 0x495   : > { %v8571_v44 = vpop.f32.mrf.mxu1 }
 0x496   : > { %v7573_v60 = vmul.f32 -1.442695, %v6403_v33  ;;  %v6435_v33 = vld [vmem:[#allocation4 + $0x50] sm:$0xf]  ;;  %v6436_v44 = vld [vmem:[#allocation4 + $0x54] sm:$0xf] }
 0x497   : > { %v6405_v21 = vpop.f32.mrf.mxu1 }
 0x498   : > { %8952 = vpow2.f32 %v7573_v60 }
 0x499   : > { %v8572_v5 = vpop.f32.mrf.mxu1 }
 0x4a5   : > { %v8953_v18 = vpop.eup %8952 }
 0x4a6   : > { %v6411_v22 = vadd.f32 1.0, %v8953_v18 }
 0x4a8   : > { %8954 = vrcp.f32 %v6411_v22  ;;  %v6437_v22 = vld [vmem:[#allocation4 + $0x58] sm:$0xf] }
 0x4b5   : > { %v8955_v43 = vpop.eup %8954 }
 0x4b6   : > { %v6414_v15 = vpack.c.bf16 %v8955_v43, %v8955_v43 }
 0x4b8   : > { %v6448_v38 = vpack.i.b16 %v6414_v15, %v6414_v15  ;;  %v6439_v15 = vld [vmem:[#allocation4 + $0x60] sm:$0xf] }
 0x4ba   : > { %v6453_v19 = vrot.slane %v6448_v38, %v6452_v57  ;;  %v6440_v57 = vld [vmem:[#allocation4 + $0x64] sm:$0xf] }
 0x4bc   : > { %v10493_v30 = vcombine.low %v6453_v19, %v6453_v19 }
 0x4be   : > { %v6458_v47 = vmul.bf16 %v10493_v30, %v6415_v7  ;;  %v6459_v10 = vmul.bf16 %v10493_v30, %v6416_v20  ;;  %v6460_v25 = vmul.bf16 %v10493_v30, %v6417_v55  ;;  %v6461_v27 = vmul.bf16 %v10493_v30, %v6418_v24  ;;  %v6441_v20 = vld [vmem:[#allocation4 + $0x68] sm:$0xf]  ;;  %v6442_v24 = vld [vmem:[#allocation4 + $0x6c] sm:$0xf] }
 0x4bf   : > { %v6462_v14 = vmul.bf16 %v10493_v30, %v6419_v40  ;;  %v6463_v11 = vmul.bf16 %v10493_v30, %v6420_v3  ;;  %v6464_v28 = vmul.bf16 %v10493_v30, %v6421_v16  ;;  %v6465_v59 = vmul.bf16 %v10493_v30, %v6422_v4 }
 0x4c0   : > { %v7575_v37 = vcombine.low %v6458_v47, %v6459_v10  ;;  %v7576_v0 = vcombine.low %v6460_v25, %v6461_v27  ;;  %v6466_v34 = vmul.bf16 %v10493_v30, %v6423_v50  ;;  %v6467_v41 = vmul.bf16 %v10493_v30, %v6424_v56  ;;  %v6443_v25 = vld [vmem:[#allocation4 + $0x70] sm:$0xf]  ;;  %v6444_v27 = vld [vmem:[#allocation4 + $0x74] sm:$0xf]  ;;  %v10541_v50 = vld [vmem:[%s10660_s12] ss:$0 sm:$0xff] }
 0x4c1   : > { %v7577_v42 = vcombine.low %v6462_v14, %v6463_v11  ;;  %v7578_v46 = vcombine.low %v6464_v28, %v6465_v59  ;;  %v6468_v31 = vmul.bf16 %v10493_v30, %v6425_v2  ;;  %v6469_v29 = vmul.bf16 %v10493_v30, %v6426_v45  ;;  %v10536_v28 = vld [vmem:[%s10659_s11] ss:$0 sm:$0xff] }
 0x4c2   : > { %8589 = vmatprep.mubr.bf16.mxu0 %v7575_v37  ;;  %v7579_v23 = vcombine.low %v6466_v34, %v6467_v41  ;;  %v6470_v36 = vmul.bf16 %v10493_v30, %v6427_v35  ;;  %v6471_v12 = vmul.bf16 %v10493_v30, %v6428_v58  ;;  %v6472_v53 = vmul.bf16 %v10493_v30, %v6429_v13  ;;  %v6445_v37 = vld [vmem:[#allocation4 + $0x78] sm:$0xf]  ;;  %v7783_v41 = vld [vmem:[%s10531_s24] sm:$0xff]  }
 0x4c3   : > { %8590 = vmatmul.mubr.bf16.vlgmr.msra.gmra.mxu0 %v7576_v0  ;;  %v7580_v63 = vcombine.low %v6468_v31, %v6469_v29  ;;  %v6473_v6 = vmul.bf16 %v10493_v30, %v6430_v61  ;;  %v6474_v17 = vmul.bf16 %v10493_v30, %v6431_v49  ;;  %v6475_v54 = vmul.bf16 %v10493_v30, %v6432_v51  ;;  %v6446_v0 = vld [vmem:[#allocation4 + $0x7c] sm:$0xf] }
 0x4c4   : > { %8593 = vmatprep.mubr.bf16.mxu0 %v7577_v42  ;;  %v7581_v52 = vcombine.low %v6470_v36, %v6471_v12  ;;  %v6476_v48 = vmul.bf16 %v10493_v30, %v6433_v32  ;;  %v6477_v8 = vmul.bf16 %v10493_v30, %v6434_v62  ;;  %v6478_v60 = vmul.bf16 %v10493_v30, %v6435_v33 }
 0x4c5   : > { %v7582_v39 = vcombine.low %v6472_v53, %v6473_v6  ;;  %v7583_v26 = vcombine.low %v6474_v17, %v6475_v54  ;;  %v6479_v21 = vmul.bf16 %v10493_v30, %v6436_v44  ;;  %v6480_v1 = vmul.bf16 %v10493_v30, %v6437_v22  ;;  %v7943_v17 = vld [vmem:[%s10531_s24 + $0x18] sm:$0xff]   ;;  %v7942_v54 = vld [vmem:[%s10531_s24 + $0x10] sm:$0xff]  }
 0x4c6   : > { %v7584_v5 = vcombine.low %v6476_v48, %v6477_v8  ;;  %v6481_v43 = vmul.bf16 %v10493_v30, %v6438_v9  ;;  %v6482_v38 = vmul.bf16 %v10493_v30, %v6439_v15  ;;  %v6483_v19 = vmul.bf16 %v10493_v30, %v6440_v57 }
 0x4c7   : > { %v7585_v18 = vcombine.low %v6478_v60, %v6479_v21  ;;  %v6484_v47 = vmul.bf16 %v10493_v30, %v6441_v20  ;;  %v6485_v10 = vmul.bf16 %v10493_v30, %v6442_v24  ;;  %v6486_v40 = vmul.bf16 %v10493_v30, %v6443_v25  ;;  %v7945_v20 = vld [vmem:[%s10531_s24 + $0x28] sm:$0xff]  }
 0x4c8   : > { %v7586_v55 = vcombine.low %v6480_v1, %v6481_v43  ;;  %v7587_v7 = vcombine.low %v6482_v38, %v6483_v19  ;;  %v6487_v3 = vmul.bf16 %v10493_v30, %v6444_v27  ;;  %v6488_v42 = vmul.bf16 %v10493_v30, %v6445_v37  ;;  %v7944_v37 = vld [vmem:[%s10531_s24 + $0x20] sm:$0xff]  }
 0x4c9   : > { %v7588_v14 = vcombine.low %v6484_v47, %v6485_v10  ;;  %v6489_v16 = vmul.bf16 %v10493_v30, %v6446_v0  ;;  %v7941_v30 = vld [vmem:[%s10531_s24 + $0x8] sm:$0xff]   ;;  %v7784_v29 = vunpack.c.l.bf16 %v7783_v41  ;;  %v7785_v13 = vunpack.c.h.bf16 %v7783_v41 }
 0x4ca   : > { %v7589_v11 = vcombine.low %v6486_v40, %v6487_v3  ;;  %v7789_v58 = vunpack.c.h.bf16 %v7941_v30  ;;  %v7796_v33 = vunpack.c.l.bf16 %v7943_v17  ;;  %v7792_v44 = vunpack.c.l.bf16 %v7942_v54 }
 0x4cb   : > { %8594 = vmatmul.mubr.bf16.gmra.mxu0 %v7578_v46  ;;  %v7590_v4 = vcombine.low %v6488_v42, %v6489_v16  ;;  %v7797_v1 = vunpack.c.h.bf16 %v7943_v17  ;;  %v7793_v38 = vunpack.c.h.bf16 %v7942_v54 }
 0x4cc   : > { %8597 = vmatprep.mubr.bf16.mxu0 %v7579_v23  ;;  %v7788_v23 = vunpack.c.l.bf16 %v7941_v30 }
 0x4d3   : > { %8598 = vmatmul.mubr.bf16.gmra.mxu0 %v7580_v63 }
 0x4d4   : > { %8601 = vmatprep.mubr.bf16.mxu0 %v7581_v52 }
 0x4db   : > { %8602 = vmatmul.mubr.bf16.gmra.mxu0 %v7582_v39 }
 0x4dc   : > { %8605 = vmatprep.mubr.bf16.mxu0 %v7583_v26 }
 0x4e3   : > { %8606 = vmatmul.mubr.bf16.gmra.mxu0 %v7584_v5 }
 0x4e4   : > { %8609 = vmatprep.mubr.bf16.mxu0 %v7585_v18 }
 0x4eb   : > { %8610 = vmatmul.mubr.bf16.gmra.mxu0 %v7586_v55 }
 0x4ec   : > { %8613 = vmatprep.mubr.bf16.mxu0 %v7587_v7 }
 0x4f3   : > { %8614 = vmatmul.mubr.bf16.gmra.mxu0 %v7588_v14  ;;  %v7804_v14 = vunpack.c.l.bf16 %v7945_v20 }
 0x4f4   : > { %8617 = vmatprep.mubr.bf16.mxu0 %v7589_v11 }
 0x4fb   : > { %8618 = vmatmul.mubr.bf16.gmra.mxu0 %v7590_v4 }
 0x583   : > { %v8591_v59 = vpop.f32.mrf.mxu0 }
 0x584   : > { %v6820_v56 = vmul.f32 %v8591_v59, %v10536_v28 }
 0x585   : > { %v6684_v34 = vpop.f32.mrf.mxu0 }
 0x586   : > { %v6859_v46 = vadd.f32 %v10541_v50, %v6820_v56  ;;  %v6818_v2 = vmul.f32 %v10536_v28, %v6684_v34  ;;  %v7805_v56 = vunpack.c.h.bf16 %v7945_v20 }
 0x587   : > { %v8592_v45 = vpop.f32.mrf.mxu0 }
 0x588   : > { %v6857_v31 = vadd.f32 %v10541_v50, %v6818_v2  ;;  %v6821_v35 = vmul.f32 %v8592_v45, %v10536_v28  ;;  %v6955_v12 = vadd.f32 %v7788_v23, %v6859_v46  ;;  %v7800_v46 = vunpack.c.l.bf16 %v7944_v37 }
 0x589   : > { %v6687_v36 = vpop.f32.mrf.mxu0 }
 0x58a   : > { %v6860_v63 = vadd.f32 %v10541_v50, %v6821_v35  ;;  %v6819_v52 = vmul.f32 %v10536_v28, %v6687_v36  ;;  %v6953_v53 = vadd.f32 %v7784_v29, %v6857_v31  ;;  %v6987_v26 = vmax.f32 %v6955_v12, 0.0  ;;  %v7947_v29 = vld [vmem:[%s10531_s24 + $0x38] sm:$0xff]  }
 0x58b   : > { %v8595_v61 = vpop.f32.mrf.mxu0 }
 0x58c   : > { %v6956_v6 = vadd.f32 %v7789_v58, %v6860_v63  ;;  %v6858_v49 = vadd.f32 %v10541_v50, %v6819_v52  ;;  %v6824_v51 = vmul.f32 %v8595_v61, %v10536_v28  ;;  %v6985_v21 = vmax.f32 %v6953_v53, 0.0  ;;  %v7946_v52 = vld [vmem:[%s10531_s24 + $0x30] sm:$0xff]  }
 0x58d   : > { %v6700_v39 = vpop.f32.mrf.mxu0  ;;  %v7801_v58 = vunpack.c.h.bf16 %v7944_v37  ;;  %v7812_v53 = vunpack.c.l.bf16 %v7947_v29 }
 0x58e   : > { %v6988_v32 = vmax.f32 %v6956_v6, 0.0  ;;  %v6954_v62 = vadd.f32 %v7785_v13, %v6858_v49  ;;  %v6822_v48 = vmul.f32 %v10536_v28, %v6700_v39  ;;  %v6863_v8 = vadd.f32 %v10541_v50, %v6824_v51 }
 0x58f   : > { %v8596_v60 = vpop.f32.mrf.mxu0 }
 0x590   : > { %v7854_v5 = vpack.c.bf16 %v6988_v32, %v6987_v26  ;;  %v6986_v18 = vmax.f32 %v6954_v62, 0.0  ;;  %v6861_v22 = vadd.f32 %v10541_v50, %v6822_v48  ;;  %v6825_v9 = vmul.f32 %v8596_v60, %v10536_v28 }
 0x591   : > { %v6703_v43 = vpop.f32.mrf.mxu0  ;;  %v6959_v19 = vadd.f32 %v7796_v33, %v6863_v8  ;;  %v7808_v26 = vunpack.c.l.bf16 %v7946_v52  ;;  %v7813_v33 = vunpack.c.h.bf16 %v7947_v29 }
 0x592   : > { %7956 = vst [vmem:[%s10561_s18 + $0x8] sm:$0xff] %v7854_v5   ;;  %v7849_v15 = vpack.c.bf16 %v6986_v18, %v6985_v21  ;;  %v6823_v57 = vmul.f32 %v10536_v28, %v6703_v43  ;;  %v6864_v55 = vadd.f32 %v10541_v50, %v6825_v9  ;;  %v6957_v24 = vadd.f32 %v7792_v44, %v6861_v22 }
 0x593   : > { %v8599_v7 = vpop.f32.mrf.mxu0  ;;  %v6991_v0 = vmax.f32 %v6959_v19, 0.0  ;;  %v7809_v9 = vunpack.c.h.bf16 %v7946_v52 }
 0x594   : > { %7850 = vst [vmem:[%s10561_s18] sm:$0xff] %v7849_v15   ;;  %v6862_v47 = vadd.f32 %v10541_v50, %v6823_v57  ;;  %v6828_v10 = vmul.f32 %v8599_v7, %v10536_v28  ;;  %v6960_v25 = vadd.f32 %v7797_v1, %v6864_v55  ;;  %v6989_v4 = vmax.f32 %v6957_v24, 0.0  ;;  %v7949_v55 = vld [vmem:[%s10531_s24 + $0x48] sm:$0xff]   ;;  %v7948_v7 = vld [vmem:[%s10531_s24 + $0x40] sm:$0xff]  }
 0x595   : > { %v6716_v27 = vpop.f32.mrf.mxu0 }
 0x596   : > { %v6958_v40 = vadd.f32 %v7793_v38, %v6862_v47  ;;  %v6867_v3 = vadd.f32 %v10541_v50, %v6828_v10  ;;  %v6826_v11 = vmul.f32 %v10536_v28, %v6716_v27  ;;  %v6992_v42 = vmax.f32 %v6960_v25, 0.0 }
 0x597   : > { %v8600_v16 = vpop.f32.mrf.mxu0 }
 0x598   : > { %v6990_v59 = vmax.f32 %v6958_v40, 0.0  ;;  %v6829_v30 = vmul.f32 %v8600_v16, %v10536_v28  ;;  %v7864_v34 = vpack.c.bf16 %v6992_v42, %v6991_v0  ;;  %v6865_v41 = vadd.f32 %v10541_v50, %v6826_v11 }
 0x599   : > { %v6719_v23 = vpop.f32.mrf.mxu0  ;;  %v6963_v45 = vadd.f32 %v7804_v14, %v6867_v3  ;;  %v7820_v40 = vunpack.c.l.bf16 %v7949_v55  ;;  %v7816_v3 = vunpack.c.l.bf16 %v7948_v7 }
 0x59a   : > { %v7859_v2 = vpack.c.bf16 %v6990_v59, %v6989_v4  ;;  %v6868_v31 = vadd.f32 %v10541_v50, %v6829_v30  ;;  %7958 = vst [vmem:[%s10561_s18 + $0x18] sm:$0xff] %v7864_v34   ;;  %v6827_v35 = vmul.f32 %v10536_v28, %v6719_v23  ;;  %v6961_v13 = vadd.f32 %v7800_v46, %v6865_v41 }
 0x59b   : > { %v8603_v36 = vpop.f32.mrf.mxu0  ;;  %v6995_v49 = vmax.f32 %v6963_v45, 0.0  ;;  %v7821_v4 = vunpack.c.h.bf16 %v7949_v55  ;;  %v7817_v34 = vunpack.c.h.bf16 %v7948_v7 }
 0x59c   : > { %7957 = vst [vmem:[%s10561_s18 + $0x10] sm:$0xff] %v7859_v2   ;;  %v6964_v12 = vadd.f32 %v7805_v56, %v6868_v31  ;;  %v6832_v63 = vmul.f32 %v8603_v36, %v10536_v28  ;;  %v6866_v61 = vadd.f32 %v10541_v50, %v6827_v35  ;;  %v6993_v44 = vmax.f32 %v6961_v13, 0.0  ;;  %v7951_v2 = vld [vmem:[%s10531_s24 + $0x58] sm:$0xff]   ;;  %v7950_v13 = vld [vmem:[%s10531_s24 + $0x50] sm:$0xff]  }
 0x59d   : > { %v6732_v6 = vpop.f32.mrf.mxu0 }
 0x59e   : > { %v6996_v51 = vmax.f32 %v6964_v12, 0.0  ;;  %v6871_v17 = vadd.f32 %v10541_v50, %v6832_v63  ;;  %v6830_v54 = vmul.f32 %v10536_v28, %v6732_v6  ;;  %v6962_v39 = vadd.f32 %v7801_v58, %v6866_v61 }
 0x59f   : > { %v8604_v32 = vpop.f32.mrf.mxu0  ;;  %v7828_v63 = vunpack.c.l.bf16 %v7951_v2 }
 0x5a0   : > { %v7874_v62 = vpack.c.bf16 %v6996_v51, %v6995_v49  ;;  %v6869_v48 = vadd.f32 %v10541_v50, %v6830_v54  ;;  %v6833_v8 = vmul.f32 %v8604_v32, %v10536_v28  ;;  %v6994_v60 = vmax.f32 %v6962_v39, 0.0 }
 0x5a1   : > { %v6735_v21 = vpop.f32.mrf.mxu0  ;;  %v6967_v5 = vadd.f32 %v7812_v53, %v6871_v17  ;;  %v7829_v54 = vunpack.c.h.bf16 %v7951_v2  ;;  %v7824_v32 = vunpack.c.l.bf16 %v7950_v13 }
 0x5a2   : > { %7960 = vst [vmem:[%s10561_s18 + $0x28] sm:$0xff] %v7874_v62   ;;  %v6872_v18 = vadd.f32 %v10541_v50, %v6833_v8  ;;  %v6831_v22 = vmul.f32 %v10536_v28, %v6735_v21  ;;  %v7869_v1 = vpack.c.bf16 %v6994_v60, %v6993_v44  ;;  %v6965_v15 = vadd.f32 %v7808_v26, %v6869_v48  ;;  %v7953_v44 = vld [vmem:[%s10531_s24 + $0x68] sm:$0xff]  }
 0x5a3   : > { %v8607_v43 = vpop.f32.mrf.mxu0  ;;  %v6999_v24 = vmax.f32 %v6967_v5, 0.0  ;;  %v7825_v21 = vunpack.c.h.bf16 %v7950_v13 }
 0x5a4   : > { %v6968_v57 = vadd.f32 %v7813_v33, %v6872_v18  ;;  %v6870_v38 = vadd.f32 %v10541_v50, %v6831_v22  ;;  %v6836_v19 = vmul.f32 %v8607_v43, %v10536_v28  ;;  %7959 = vst [vmem:[%s10561_s18 + $0x20] sm:$0xff] %v7869_v1   ;;  %v6997_v11 = vmax.f32 %v6965_v15, 0.0 }
 0x5a5   : > { %v6748_v20 = vpop.f32.mrf.mxu0  ;;  %v7836_v15 = vunpack.c.l.bf16 %v7953_v44 }
 0x5a6   : > { %v7000_v47 = vmax.f32 %v6968_v57, 0.0  ;;  %v6966_v10 = vadd.f32 %v7809_v9, %v6870_v38  ;;  %v6834_v25 = vmul.f32 %v10536_v28, %v6748_v20  ;;  %v6875_v27 = vadd.f32 %v10541_v50, %v6836_v19  ;;  %v7952_v9 = vld [vmem:[%s10531_s24 + $0x60] sm:$0xff]  }
 0x5a7   : > { %v8608_v14 = vpop.f32.mrf.mxu0 }
 0x5a8   : > { %v7884_v37 = vpack.c.bf16 %v7000_v47, %v6999_v24  ;;  %v6998_v0 = vmax.f32 %v6966_v10, 0.0  ;;  %v6873_v42 = vadd.f32 %v10541_v50, %v6834_v25  ;;  %v6837_v16 = vmul.f32 %v8608_v14, %v10536_v28 }
 0x5a9   : > { %v6751_v59 = vpop.f32.mrf.mxu0  ;;  %v6971_v41 = vadd.f32 %v7820_v40, %v6875_v27  ;;  %v7832_v24 = vunpack.c.l.bf16 %v7952_v9  ;;  %v7837_v40 = vunpack.c.h.bf16 %v7953_v44 }
 0x5aa   : > { %7962 = vst [vmem:[%s10561_s18 + $0x38] sm:$0xff] %v7884_v37   ;;  %v7879_v30 = vpack.c.bf16 %v6998_v0, %v6997_v11  ;;  %v6835_v56 = vmul.f32 %v10536_v28, %v6751_v59  ;;  %v6876_v46 = vadd.f32 %v10541_v50, %v6837_v16  ;;  %v6969_v45 = vadd.f32 %v7816_v3, %v6873_v42 }
 0x5ab   : > { %v8611_v23 = vpop.f32.mrf.mxu0  ;;  %v7003_v61 = vmax.f32 %v6971_v41, 0.0  ;;  %v7833_v16 = vunpack.c.h.bf16 %v7952_v9 }
 0x5ac   : > { %7961 = vst [vmem:[%s10561_s18 + $0x30] sm:$0xff] %v7879_v30   ;;  %v6874_v31 = vadd.f32 %v10541_v50, %v6835_v56  ;;  %v6840_v29 = vmul.f32 %v8611_v23, %v10536_v28  ;;  %v6972_v35 = vadd.f32 %v7821_v4, %v6876_v46  ;;  %v7001_v49 = vmax.f32 %v6969_v45, 0.0  ;;  %v7955_v46 = vld [vmem:[%s10531_s24 + $0x78] sm:$0xff]   ;;  %v7954_v23 = vld [vmem:[%s10531_s24 + $0x70] sm:$0xff]  }
 0x5ad   : > { %v6764_v58 = vpop.f32.mrf.mxu0 }
 0x5ae   : > { %v6970_v36 = vadd.f32 %v7817_v34, %v6874_v31  ;;  %v6879_v12 = vadd.f32 %v10541_v50, %v6840_v29  ;;  %v6838_v52 = vmul.f32 %v10536_v28, %v6764_v58  ;;  %v7004_v53 = vmax.f32 %v6972_v35, 0.0 }
 0x5af   : > { %v8612_v6 = vpop.f32.mrf.mxu0 }
 0x5b0   : > { %v7002_v51 = vmax.f32 %v6970_v36, 0.0  ;;  %v6841_v17 = vmul.f32 %v8612_v6, %v10536_v28  ;;  %v7894_v39 = vpack.c.bf16 %v7004_v53, %v7003_v61  ;;  %v6877_v26 = vadd.f32 %v10541_v50, %v6838_v52 }
 0x5b1   : > { %v6767_v62 = vpop.f32.mrf.mxu0  ;;  %v6975_v8 = vadd.f32 %v7828_v63, %v6879_v12  ;;  %v7844_v36 = vunpack.c.l.bf16 %v7955_v46  ;;  %v7840_v12 = vunpack.c.l.bf16 %v7954_v23 }
 0x5b2   : > { %v7889_v48 = vpack.c.bf16 %v7002_v51, %v7001_v49  ;;  %v6880_v33 = vadd.f32 %v10541_v50, %v6841_v17  ;;  %7964 = vst [vmem:[%s10561_s18 + $0x48] sm:$0xff] %v7894_v39   ;;  %v6839_v60 = vmul.f32 %v10536_v28, %v6767_v62  ;;  %v6973_v1 = vadd.f32 %v7824_v32, %v6877_v26 }
 0x5b3   : > { %v8615_v5 = vpop.f32.mrf.mxu0  ;;  %v7007_v38 = vmax.f32 %v6975_v8, 0.0  ;;  %v7845_v49 = vunpack.c.h.bf16 %v7955_v46  ;;  %v7841_v39 = vunpack.c.h.bf16 %v7954_v23 }
 0x5b4   : > { %7963 = vst [vmem:[%s10561_s18 + $0x40] sm:$0xff] %v7889_v48   ;;  %v6976_v18 = vadd.f32 %v7829_v54, %v6880_v33  ;;  %v6844_v22 = vmul.f32 %v8615_v5, %v10536_v28  ;;  %v6878_v43 = vadd.f32 %v10541_v50, %v6839_v60  ;;  %v7005_v3 = vmax.f32 %v6973_v1, 0.0 }
 0x5b5   : > { %v6780_v57 = vpop.f32.mrf.mxu0 }
 0x5b6   : > { %v7008_v19 = vmax.f32 %v6976_v18, 0.0  ;;  %v6883_v55 = vadd.f32 %v10541_v50, %v6844_v22  ;;  %v6842_v7 = vmul.f32 %v10536_v28, %v6780_v57  ;;  %v6974_v20 = vadd.f32 %v7825_v21, %v6878_v43 }
 0x5b7   : > { %v8616_v47 = vpop.f32.mrf.mxu0 }
 0x5b8   : > { %v7904_v10 = vpack.c.bf16 %v7008_v19, %v7007_v38  ;;  %v6881_v25 = vadd.f32 %v10541_v50, %v6842_v7  ;;  %v6845_v27 = vmul.f32 %v8616_v47, %v10536_v28  ;;  %v7006_v14 = vmax.f32 %v6974_v20, 0.0 }
 0x5b9   : > { %v6783_v11 = vpop.f32.mrf.mxu0  ;;  %v6979_v37 = vadd.f32 %v7836_v15, %v6883_v55 }
 0x5ba   : > { %7966 = vst [vmem:[%s10561_s18 + $0x58] sm:$0xff] %v7904_v10   ;;  %v6884_v0 = vadd.f32 %v10541_v50, %v6845_v27  ;;  %v6843_v42 = vmul.f32 %v10536_v28, %v6783_v11  ;;  %v7899_v4 = vpack.c.bf16 %v7006_v14, %v7005_v3  ;;  %v6977_v30 = vadd.f32 %v7832_v24, %v6881_v25 }
 0x5bb   : > { %v8619_v59 = vpop.f32.mrf.mxu0  ;;  %v7011_v45 = vmax.f32 %v6979_v37, 0.0 }
 0x5bc   : > { %v6980_v56 = vadd.f32 %v7837_v40, %v6884_v0  ;;  %v6882_v34 = vadd.f32 %v10541_v50, %v6843_v42  ;;  %v6848_v41 = vmul.f32 %v8619_v59, %v10536_v28  ;;  %7965 = vst [vmem:[%s10561_s18 + $0x50] sm:$0xff] %v7899_v4   ;;  %v7009_v52 = vmax.f32 %v6977_v30, 0.0 }
 0x5bd   : > { %v6796_v2 = vpop.f32.mrf.mxu0 }
 0x5be   : > { %v7012_v31 = vmax.f32 %v6980_v56, 0.0  ;;  %v6978_v29 = vadd.f32 %v7833_v16, %v6882_v34  ;;  %v6846_v35 = vmul.f32 %v10536_v28, %v6796_v2  ;;  %v6887_v58 = vadd.f32 %v10541_v50, %v6848_v41 }
 0x5bf   : > { %v8620_v63 = vpop.f32.mrf.mxu0 }
 0x5c0   : > { %v7914_v13 = vpack.c.bf16 %v7012_v31, %v7011_v45  ;;  %v7010_v61 = vmax.f32 %v6978_v29, 0.0  ;;  %v6885_v53 = vadd.f32 %v10541_v50, %v6846_v35  ;;  %v6849_v6 = vmul.f32 %v8620_v63, %v10536_v28 }
 0x5c1   : > { %v6799_v51 = vpop.f32.mrf.mxu0  ;;  %v6983_v26 = vadd.f32 %v7844_v36, %v6887_v58 }
 0x5c2   : > { %7968 = vst [vmem:[%s10561_s18 + $0x68] sm:$0xff] %v7914_v13   ;;  %v7909_v17 = vpack.c.bf16 %v7010_v61, %v7009_v52  ;;  %v6847_v54 = vmul.f32 %v10536_v28, %v6799_v51  ;;  %v6888_v32 = vadd.f32 %v10541_v50, %v6849_v6  ;;  %v6981_v62 = vadd.f32 %v7840_v12, %v6885_v53 }
 0x5c3   : > { %v7015_v44 = vmax.f32 %v6983_v26, 0.0 }
 0x5c4   : > { %7967 = vst [vmem:[%s10561_s18 + $0x60] sm:$0xff] %v7909_v17   ;;  %v6886_v48 = vadd.f32 %v10541_v50, %v6847_v54  ;;  %v6984_v8 = vadd.f32 %v7845_v49, %v6888_v32  ;;  %v7013_v21 = vmax.f32 %v6981_v62, 0.0 }
 0x5c6   : > { %v6982_v33 = vadd.f32 %v7841_v39, %v6886_v48  ;;  %v7016_v60 = vmax.f32 %v6984_v8, 0.0 }
 0x5c8   : > { %v7014_v5 = vmax.f32 %v6982_v33, 0.0  ;;  %v7924_v18 = vpack.c.bf16 %v7016_v60, %v7015_v44 }
 0x5ca   : > { %v7919_v22 = vpack.c.bf16 %v7014_v5, %v7013_v21  ;;  %7970 = vst [vmem:[%s10561_s18 + $0x78] sm:$0xff] %v7924_v18  }
 0x5cc   : > { %7969 = vst [vmem:[%s10561_s18 + $0x70] sm:$0xff] %v7919_v22  }
 0x5cd PF: > { %s24_s29 = sadd.s32 1, %s8963_s29  }
 0x5ce   : > { %p21_p4 = scmp.ge.s32.totalorder %s24_s29, 4  }
 0x5d0   :  { %23 = sbr.rel (!%p21_p4) target bundleno = 1 (0x1), region = 112 }

</bundles_post_ra>
